<compile_context>
chip_gen: v7x
topology: tpu7x:2x2x1
jax: 0.10.0
libtpu: 0.0.40
codegen_flags: <defaults>
</compile_context>

<pallas_src>
import functools
import math

import jax
import jax.numpy as jnp
from jax import lax
from jax.experimental import pallas as pl
from jax.experimental.pallas import tpu as pltpu

_NEG = -1e30  # Python float (NOT a jax array -> no captured-constant trace error)


def _circle_loss_kernel(xr_ref, xc_ref, tr_ref, tc_ref, o_ref,
                        m_p, s_p, m_n, s_n,
                        *, m, gamma, n_valid, n_pad, row_tile, col_tile, precision):
    i = pl.program_id(0)          # row-tile index   ("parallel")
    j = pl.program_id(1)          # col-tile index   ("arbitrary" reduction axis, innermost)

    @pl.when(j == 0)
    def _():
        m_p[...] = jnp.full_like(m_p, _NEG)
        s_p[...] = jnp.zeros_like(s_p)
        m_n[...] = jnp.full_like(m_n, _NEG)
        s_n[...] = jnp.zeros_like(s_n)

    # Similarity tile on the MXU: (TR, D) . (TC, D)^T -> (TR, TC), f32 accumulation.
    # Operands are fed in their native dtype (bf16 stays bf16 on the MXU).
    sim = lax.dot_general(
        xr_ref[...], xc_ref[...],
        dimension_numbers=(((1,), (1,)), ((), ())),
        precision=precision,
        preferred_element_type=jnp.float32)

    label_eq = tr_ref[...] == tc_ref[...]            # (TR,1) == (1,TC) -> (TR,TC)
    neg = jnp.logical_not(label_eq)

    ap = jnp.maximum(1.0 + m - sim, 0.0)
    an = jnp.maximum(sim + m, 0.0)
    # Masked entries = 0, exactly as in the torch reference (they contribute exp(0)=1).
    lp = jnp.where(label_eq, (-gamma) * ap * (sim - (1.0 - m)), 0.0)
    ln = jnp.where(neg, gamma * an * (sim - m), 0.0)

    row_start = i * row_tile
    col_start = j * col_tile

    # Diagonal exclusion: only needed on tiles whose row range intersects the column range.
    def _mask_diag(v):
        rid = row_start + lax.broadcasted_iota(jnp.int32, (row_tile, col_tile), 0)
        cid = col_start + lax.broadcasted_iota(jnp.int32, (row_tile, col_tile), 1)
        return jnp.where(rid == cid, 0.0, v)

    diag_overlap = jnp.logical_and(row_start < col_start + col_tile,
                                   col_start < row_start + row_tile)
    lp = lax.cond(diag_overlap, _mask_diag, lambda v: v, lp)

    # Padded-column exclusion: only needed on column tiles that contain padding, and only
    # when there is padding at all (static condition).
    if n_pad > n_valid:
        def _mask_pad(ops):
            lpv, lnv = ops
            cid = col_start + lax.broadcasted_iota(jnp.int32, (row_tile, col_tile), 1)
            valid = cid < n_valid
            return jnp.where(valid, lpv, _NEG), jnp.where(valid, lnv, _NEG)

        lp, ln = lax.cond(col_start + col_tile > n_valid,
                          _mask_pad, lambda ops: ops, (lp, ln))

    # Online (streaming) logsumexp over the column axis.
    def _update(m_ref, s_ref, logits):
        m_old = m_ref[...]
        m_new = jnp.maximum(m_old, jnp.max(logits, axis=-1, keepdims=True))
        s_ref[...] = (s_ref[...] * jnp.exp(m_old - m_new)
                      + jnp.sum(jnp.exp(logits - m_new), axis=-1, keepdims=True))
        m_ref[...] = m_new

    _update(m_p, s_p, lp)
    _update(m_n, s_n, ln)

    @pl.when(j == pl.num_programs(1) - 1)
    def _():
        z = (m_p[...] + jnp.log(s_p[...])) + (m_n[...] + jnp.log(s_n[...]))
        # Numerically stable softplus: max(z,0) + log(1 + exp(-|z|))
        o_ref[...] = jnp.maximum(z, 0.0) + jnp.log(1.0 + jnp.exp(-jnp.abs(z)))


def circle_loss(x, target, m=0.2, gamma=256, row_tile=256, col_tile=256):
    """Pallas TPU CircleLoss. x: (N, D) embeddings, target: (N,) integer labels."""
    n, d = x.shape
    assert target.shape == (n,)
    t = math.lcm(row_tile, col_tile)
    n_pad = ((n + t - 1) // t) * t

    x_pad = jnp.pad(x, ((0, n_pad - n), (0, 0)))
    tgt = jnp.pad(target.astype(jnp.int32), (0, n_pad - n), constant_values=-1)
    t_row = tgt.reshape(n_pad, 1)
    t_col = tgt.reshape(1, n_pad)

    grid = (n_pad // row_tile, n_pad // col_tile)

    # f32 inputs: true-f32 matmul (matches torch / the reference exactly).
    # bf16 inputs: native single-pass bf16 MXU path.
    precision = (lax.Precision.HIGHEST if x.dtype == jnp.float32
                 else lax.Precision.DEFAULT)

    kernel = functools.partial(
        _circle_loss_kernel, m=float(m), gamma=float(gamma),
        n_valid=n, n_pad=n_pad, row_tile=row_tile, col_tile=col_tile,
        precision=precision)

    bpe = x.dtype.itemsize
    cost = pl.CostEstimate(
        flops=int(2 * n_pad * n_pad * d + 20 * n_pad * n_pad),
        transcendentals=int(2 * n_pad * n_pad + 4 * n_pad),
        bytes_accessed=int(n_pad * d * bpe                 # row tiles: VMEM-resident across j
                           + grid[0] * n_pad * d * bpe     # column tiles: re-read per row tile
                           + 2 * n_pad * 4                 # labels
                           + n_pad * 4),                   # per-row output
    )

    per_row = pl.pallas_call(
        kernel,
        out_shape=jax.ShapeDtypeStruct((n_pad, 1), jnp.float32),
        grid_spec=pltpu.PrefetchScalarGridSpec(
            num_scalar_prefetch=0,
            grid=grid,
            in_specs=[
                pl.BlockSpec((row_tile, d), lambda i, j: (i, 0)),   # x row tile
                pl.BlockSpec((col_tile, d), lambda i, j: (j, 0)),   # x column tile (NT dot)
                pl.BlockSpec((row_tile, 1), lambda i, j: (i, 0)),   # row labels
                pl.BlockSpec((1, col_tile), lambda i, j: (0, j)),   # col labels
            ],
            out_specs=pl.BlockSpec((row_tile, 1), lambda i, j: (i, 0)),
            scratch_shapes=[
                pltpu.VMEM((row_tile, 1), jnp.float32),   # running max (positives)
                pltpu.VMEM((row_tile, 1), jnp.float32),   # running sum (positives)
                pltpu.VMEM((row_tile, 1), jnp.float32),   # running max (negatives)
                pltpu.VMEM((row_tile, 1), jnp.float32),   # running sum (negatives)
            ],
        ),
        compiler_params=pltpu.CompilerParams(
            dimension_semantics=("parallel", "arbitrary"),
        ),
        cost_estimate=cost,
    )(x_pad, x_pad, t_row, t_col)

    return jnp.mean(per_row[:n, 0])


def _reference(x, target, m=0.2, gamma=256):
    n = x.shape[0]
    sim = jnp.matmul(x, x.T, precision=jax.lax.Precision.HIGHEST)
    label = target[:, None] == target[None, :]
    neg = jnp.logical_not(label)
    pos = jnp.logical_and(label, jnp.logical_not(jnp.eye(n, dtype=bool)))
    sp = jnp.where(pos, sim, 0.0)
    sn = jnp.where(neg, sim, 0.0)
    ap = jnp.maximum(1.0 + m - sp, 0.0)
    an = jnp.maximum(sn + m, 0.0)
    logit_p = jnp.where(pos, -gamma * ap * (sp - (1.0 - m)), 0.0)
    logit_n = jnp.where(neg, gamma * an * (sn - m), 0.0)
    lse_p = jax.scipy.special.logsumexp(logit_p, axis=1)
    lse_n = jax.scipy.special.logsumexp(logit_n, axis=1)
    return jnp.mean(jax.nn.softplus(lse_p + lse_n))


if __name__ == "__main__":
    key = jax.random.PRNGKey(0)
    kx, kt = jax.random.split(key)
    batch, feat_dim, num_classes = 16, 32, 4

    x = jax.random.normal(kx, (batch, feat_dim), dtype=jnp.float32)
    x = x / jnp.linalg.norm(x, axis=1, keepdims=True)   # CircleLoss expects normalized embeddings
    target = jax.random.randint(kt, (batch,), 0, num_classes, dtype=jnp.int32)

    loss = circle_loss(x, target, m=0.2, gamma=256)
    loss = jax.block_until_ready(loss)

    ref = _reference(x, target, m=0.2, gamma=256)
    assert jnp.allclose(loss, ref, rtol=5e-3, atol=5e-3), (loss, ref)

    print("KERNEL_OK")
</pallas_src>

<mosaic_0001>
module attributes {stable_mosaic.version = 11 : i64} {
  func.func @_circle_loss_kernel(%arg0: i32, %arg1: i32, %arg2: memref<256x32xf32, #tpu.memory_space<vmem>>, %arg3: memref<256x32xf32, #tpu.memory_space<vmem>>, %arg4: memref<256x1xi32, #tpu.memory_space<vmem>>, %arg5: memref<1x256xi32, #tpu.memory_space<vmem>>, %arg6: memref<256x1xf32, #tpu.memory_space<vmem>>, %arg7: memref<256x1xf32, #tpu.memory_space<vmem>>, %arg8: memref<256x1xf32, #tpu.memory_space<vmem>>, %arg9: memref<256x1xf32, #tpu.memory_space<vmem>>, %arg10: memref<256x1xf32, #tpu.memory_space<vmem>>) attributes {dimension_semantics = [#tpu.dimension_semantics<parallel>, #tpu.dimension_semantics<arbitrary>], iteration_bounds = array<i64: 1, 1>, scalar_prefetch = 0 : i64, scratch_operands = 4 : i64, tpu.core_type = #tpu.core_type<tc>, window_params = [{transform_indices = @transform_0, window_bounds = array<i64: 256, 32>}, {transform_indices = @transform_1, window_bounds = array<i64: 256, 32>}, {transform_indices = @transform_2, window_bounds = array<i64: 256, 1>}, {transform_indices = @transform_3, window_bounds = array<i64: 1, 256>}, {transform_indices = @transform_4, window_bounds = array<i64: 256, 1>}]} {
    %c0_i32 = arith.constant 0 : i32
    %0 = arith.cmpi eq, %arg1, %c0_i32 : i32
    %1 = arith.extui %0 : i1 to i32
    %c0_i32_0 = arith.constant 0 : i32
    %2 = arith.cmpi ne, %1, %c0_i32_0 : i32
    scf.if %2 {
      %cst_47 = arith.constant -1.000000e+30 : f32
      %84 = vector.broadcast %cst_47 : f32 to vector<256x1xf32>
      %c0_48 = arith.constant 0 : index
      %c0_49 = arith.constant 0 : index
      %85 = vector.load %arg7[%c0_48, %c0_49] : memref<256x1xf32, #tpu.memory_space<vmem>>, vector<256x1xf32>
      tpu.vector_store %arg7[%c0_48, %c0_49], %84 {strides = array<i32>} : memref<256x1xf32, #tpu.memory_space<vmem>>, vector<256x1xf32>,
      %cst_50 = arith.constant 0.000000e+00 : f32
      %86 = vector.broadcast %cst_50 : f32 to vector<256x1xf32>
      %c0_51 = arith.constant 0 : index
      %c0_52 = arith.constant 0 : index
      %87 = vector.load %arg8[%c0_51, %c0_52] : memref<256x1xf32, #tpu.memory_space<vmem>>, vector<256x1xf32>
      tpu.vector_store %arg8[%c0_51, %c0_52], %86 {strides = array<i32>} : memref<256x1xf32, #tpu.memory_space<vmem>>, vector<256x1xf32>,
      %cst_53 = arith.constant -1.000000e+30 : f32
      %88 = vector.broadcast %cst_53 : f32 to vector<256x1xf32>
      %c0_54 = arith.constant 0 : index
      %c0_55 = arith.constant 0 : index
      %89 = vector.load %arg9[%c0_54, %c0_55] : memref<256x1xf32, #tpu.memory_space<vmem>>, vector<256x1xf32>
      tpu.vector_store %arg9[%c0_54, %c0_55], %88 {strides = array<i32>} : memref<256x1xf32, #tpu.memory_space<vmem>>, vector<256x1xf32>,
      %cst_56 = arith.constant 0.000000e+00 : f32
      %90 = vector.broadcast %cst_56 : f32 to vector<256x1xf32>
      %c0_57 = arith.constant 0 : index
      %c0_58 = arith.constant 0 : index
      %91 = vector.load %arg10[%c0_57, %c0_58] : memref<256x1xf32, #tpu.memory_space<vmem>>, vector<256x1xf32>
      tpu.vector_store %arg10[%c0_57, %c0_58], %90 {strides = array<i32>} : memref<256x1xf32, #tpu.memory_space<vmem>>, vector<256x1xf32>,
    } else {
    }
    %c0 = arith.constant 0 : index
    %c0_1 = arith.constant 0 : index
    %3 = vector.load %arg2[%c0, %c0_1] : memref<256x32xf32, #tpu.memory_space<vmem>>, vector<256x32xf32>
    %c0_2 = arith.constant 0 : index
    %c0_3 = arith.constant 0 : index
    %4 = vector.load %arg3[%c0_2, %c0_3] : memref<256x32xf32, #tpu.memory_space<vmem>>, vector<256x32xf32>
    %cst = arith.constant dense<0.000000e+00> : vector<256x256xf32>
    %5 = tpu.matmul %3, %4, %cst {dimension_numbers = #tpu.dot_dimension_numbers<[1], [1], [0], [0], [0, 0, 1, 0], [], []>, precision = #tpu.contract_precision<fp32>} : vector<256x32xf32>, vector<256x32xf32>, vector<256x256xf32> -> vector<256x256xf32>
    %c0_4 = arith.constant 0 : index
    %c0_5 = arith.constant 0 : index
    %6 = vector.load %arg4[%c0_4, %c0_5] : memref<256x1xi32, #tpu.memory_space<vmem>>, vector<256x1xi32>
    %c0_6 = arith.constant 0 : index
    %c0_7 = arith.constant 0 : index
    %7 = vector.load %arg5[%c0_6, %c0_7] : memref<1x256xi32, #tpu.memory_space<vmem>>, vector<1x256xi32>
    %8 = vector.broadcast %6 : vector<256x1xi32> to vector<256x256xi32>
    %9 = vector.broadcast %7 : vector<1x256xi32> to vector<256x256xi32>
    %10 = arith.cmpi eq, %8, %9 : vector<256x256xi32>
    %cst_8 = arith.constant dense<true> : vector<256x256xi1>
    %11 = arith.xori %10, %cst_8 : vector<256x256xi1>
    %cst_9 = arith.constant 1.200000e+00 : f32
    %12 = vector.broadcast %cst_9 : f32 to vector<256x256xf32>
    %13 = arith.subf %12, %5 : vector<256x256xf32>
    %cst_10 = arith.constant 0.000000e+00 : f32
    %14 = vector.broadcast %cst_10 : f32 to vector<256x256xf32>
    %15 = arith.maximumf %13, %14 : vector<256x256xf32>
    %cst_11 = arith.constant 2.000000e-01 : f32
    %16 = vector.broadcast %cst_11 : f32 to vector<256x256xf32>
    %17 = arith.addf %5, %16 : vector<256x256xf32>
    %cst_12 = arith.constant 0.000000e+00 : f32
    %18 = vector.broadcast %cst_12 : f32 to vector<256x256xf32>
    %19 = arith.maximumf %17, %18 : vector<256x256xf32>
    %cst_13 = arith.constant -2.560000e+02 : f32
    %20 = vector.broadcast %cst_13 : f32 to vector<256x256xf32>
    %21 = arith.mulf %20, %15 : vector<256x256xf32>
    %cst_14 = arith.constant 8.000000e-01 : f32
    %22 = vector.broadcast %cst_14 : f32 to vector<256x256xf32>
    %23 = arith.subf %5, %22 : vector<256x256xf32>
    %24 = arith.mulf %21, %23 : vector<256x256xf32>
    %cst_15 = arith.constant 0.000000e+00 : f32
    %25 = vector.broadcast %cst_15 : f32 to vector<256x256xf32>
    %26 = arith.select %10, %24, %25 : vector<256x256xi1>, vector<256x256xf32>
    %cst_16 = arith.constant 2.560000e+02 : f32
    %27 = vector.broadcast %cst_16 : f32 to vector<256x256xf32>
    %28 = arith.mulf %27, %19 : vector<256x256xf32>
    %cst_17 = arith.constant 2.000000e-01 : f32
    %29 = vector.broadcast %cst_17 : f32 to vector<256x256xf32>
    %30 = arith.subf %5, %29 : vector<256x256xf32>
    %31 = arith.mulf %28, %30 : vector<256x256xf32>
    %cst_18 = arith.constant 0.000000e+00 : f32
    %32 = vector.broadcast %cst_18 : f32 to vector<256x256xf32>
    %33 = arith.select %11, %31, %32 : vector<256x256xi1>, vector<256x256xf32>
    %c256_i32 = arith.constant 256 : i32
    %34 = arith.muli %arg0, %c256_i32 : i32
    %c256_i32_19 = arith.constant 256 : i32
    %35 = arith.muli %arg1, %c256_i32_19 : i32
    %c256_i32_20 = arith.constant 256 : i32
    %36 = arith.addi %35, %c256_i32_20 : i32
    %37 = arith.cmpi slt, %34, %36 : i32
    %c256_i32_21 = arith.constant 256 : i32
    %38 = arith.addi %34, %c256_i32_21 : i32
    %39 = arith.cmpi slt, %35, %38 : i32
    %40 = arith.andi %37, %39 : i1
    %41 = arith.extui %40 : i1 to i32
    %c0_i32_22 = arith.constant 0 : i32
    %42 = arith.cmpi ne, %41, %c0_i32_22 : i32
    %43 = scf.if %42 -> (vector<256x256xf32>) {
      %84 = tpu.iota {dimensions = array<i32: 0>} : vector<256x256xi32>
      %85 = vector.broadcast %34 : i32 to vector<256x256xi32>
      %86 = arith.addi %85, %84 : vector<256x256xi32>
      %87 = tpu.iota {dimensions = array<i32: 1>} : vector<256x256xi32>
      %88 = vector.broadcast %35 : i32 to vector<256x256xi32>
      %89 = arith.addi %88, %87 : vector<256x256xi32>
      %90 = arith.cmpi eq, %86, %89 : vector<256x256xi32>
      %cst_47 = arith.constant 0.000000e+00 : f32
      %91 = vector.broadcast %cst_47 : f32 to vector<256x256xf32>
      %92 = arith.select %90, %91, %26 : vector<256x256xi1>, vector<256x256xf32>
      scf.yield %92 : vector<256x256xf32>
    } else {
      scf.yield %26 : vector<256x256xf32>
    }
    %c256_i32_23 = arith.constant 256 : i32
    %44 = arith.addi %35, %c256_i32_23 : i32
    %c16_i32 = arith.constant 16 : i32
    %45 = arith.cmpi sgt, %44, %c16_i32 : i32
    %46 = arith.extui %45 : i1 to i32
    %c0_i32_24 = arith.constant 0 : i32
    %47 = arith.cmpi ne, %46, %c0_i32_24 : i32
    %48:2 = scf.if %47 -> (vector<256x256xf32>, vector<256x256xf32>) {
      %84 = tpu.iota {dimensions = array<i32: 1>} : vector<256x256xi32>
      %85 = vector.broadcast %35 : i32 to vector<256x256xi32>
      %86 = arith.addi %85, %84 : vector<256x256xi32>
      %c16_i32_47 = arith.constant 16 : i32
      %87 = vector.broadcast %c16_i32_47 : i32 to vector<256x256xi32>
      %88 = arith.cmpi slt, %86, %87 : vector<256x256xi32>
      %cst_48 = arith.constant -1.000000e+30 : f32
      %89 = vector.broadcast %cst_48 : f32 to vector<256x256xf32>
      %90 = arith.select %88, %43, %89 : vector<256x256xi1>, vector<256x256xf32>
      %cst_49 = arith.constant -1.000000e+30 : f32
      %91 = vector.broadcast %cst_49 : f32 to vector<256x256xf32>
      %92 = arith.select %88, %33, %91 : vector<256x256xi1>, vector<256x256xf32>
      scf.yield %90, %92 : vector<256x256xf32>, vector<256x256xf32>
    } else {
      scf.yield %43, %33 : vector<256x256xf32>, vector<256x256xf32>
    }
    %c0_25 = arith.constant 0 : index
    %c0_26 = arith.constant 0 : index
    %49 = vector.load %arg7[%c0_25, %c0_26] : memref<256x1xf32, #tpu.memory_space<vmem>>, vector<256x1xf32>
    %cst_27 = arith.constant dense<0xFF800000> : vector<256xf32>
    %50 = vector.multi_reduction <maximumf>, %48#0, %cst_27 [1] : vector<256x256xf32> to vector<256xf32>
    %51 = vector.shape_cast %50 : vector<256xf32> to vector<256x1xf32>
    %52 = arith.maximumf %49, %51 : vector<256x1xf32>
    %c0_28 = arith.constant 0 : index
    %c0_29 = arith.constant 0 : index
    %53 = vector.load %arg8[%c0_28, %c0_29] : memref<256x1xf32, #tpu.memory_space<vmem>>, vector<256x1xf32>
    %54 = arith.subf %49, %52 : vector<256x1xf32>
    %55 = math.exp %54 : vector<256x1xf32>
    %56 = arith.mulf %53, %55 : vector<256x1xf32>
    %57 = vector.broadcast %52 : vector<256x1xf32> to vector<256x256xf32>
    %58 = arith.subf %48#0, %57 : vector<256x256xf32>
    %59 = math.exp %58 : vector<256x256xf32>
    %cst_30 = arith.constant dense<0.000000e+00> : vector<256xf32>
    %60 = vector.multi_reduction <add>, %59, %cst_30 [1] : vector<256x256xf32> to vector<256xf32>
    %61 = vector.shape_cast %60 : vector<256xf32> to vector<256x1xf32>
    %62 = arith.addf %56, %61 : vector<256x1xf32>
    %c0_31 = arith.constant 0 : index
    %c0_32 = arith.constant 0 : index
    %63 = vector.load %arg8[%c0_31, %c0_32] : memref<256x1xf32, #tpu.memory_space<vmem>>, vector<256x1xf32>
    tpu.vector_store %arg8[%c0_31, %c0_32], %62 {strides = array<i32>} : memref<256x1xf32, #tpu.memory_space<vmem>>, vector<256x1xf32>,
    %c0_33 = arith.constant 0 : index
    %c0_34 = arith.constant 0 : index
    %64 = vector.load %arg7[%c0_33, %c0_34] : memref<256x1xf32, #tpu.memory_space<vmem>>, vector<256x1xf32>
    tpu.vector_store %arg7[%c0_33, %c0_34], %52 {strides = array<i32>} : memref<256x1xf32, #tpu.memory_space<vmem>>, vector<256x1xf32>,
    %c0_35 = arith.constant 0 : index
    %c0_36 = arith.constant 0 : index
    %65 = vector.load %arg9[%c0_35, %c0_36] : memref<256x1xf32, #tpu.memory_space<vmem>>, vector<256x1xf32>
    %cst_37 = arith.constant dense<0xFF800000> : vector<256xf32>
    %66 = vector.multi_reduction <maximumf>, %48#1, %cst_37 [1] : vector<256x256xf32> to vector<256xf32>
    %67 = vector.shape_cast %66 : vector<256xf32> to vector<256x1xf32>
    %68 = arith.maximumf %65, %67 : vector<256x1xf32>
    %c0_38 = arith.constant 0 : index
    %c0_39 = arith.constant 0 : index
    %69 = vector.load %arg10[%c0_38, %c0_39] : memref<256x1xf32, #tpu.memory_space<vmem>>, vector<256x1xf32>
    %70 = arith.subf %65, %68 : vector<256x1xf32>
    %71 = math.exp %70 : vector<256x1xf32>
    %72 = arith.mulf %69, %71 : vector<256x1xf32>
    %73 = vector.broadcast %68 : vector<256x1xf32> to vector<256x256xf32>
    %74 = arith.subf %48#1, %73 : vector<256x256xf32>
    %75 = math.exp %74 : vector<256x256xf32>
    %cst_40 = arith.constant dense<0.000000e+00> : vector<256xf32>
    %76 = vector.multi_reduction <add>, %75, %cst_40 [1] : vector<256x256xf32> to vector<256xf32>
    %77 = vector.shape_cast %76 : vector<256xf32> to vector<256x1xf32>
    %78 = arith.addf %72, %77 : vector<256x1xf32>
    %c0_41 = arith.constant 0 : index
    %c0_42 = arith.constant 0 : index
    %79 = vector.load %arg10[%c0_41, %c0_42] : memref<256x1xf32, #tpu.memory_space<vmem>>, vector<256x1xf32>
    tpu.vector_store %arg10[%c0_41, %c0_42], %78 {strides = array<i32>} : memref<256x1xf32, #tpu.memory_space<vmem>>, vector<256x1xf32>,
    %c0_43 = arith.constant 0 : index
    %c0_44 = arith.constant 0 : index
    %80 = vector.load %arg9[%c0_43, %c0_44] : memref<256x1xf32, #tpu.memory_space<vmem>>, vector<256x1xf32>
    tpu.vector_store %arg9[%c0_43, %c0_44], %68 {strides = array<i32>} : memref<256x1xf32, #tpu.memory_space<vmem>>, vector<256x1xf32>,
    %c0_i32_45 = arith.constant 0 : i32
    %81 = arith.cmpi eq, %arg1, %c0_i32_45 : i32
    %82 = arith.extui %81 : i1 to i32
    %c0_i32_46 = arith.constant 0 : i32
    %83 = arith.cmpi ne, %82, %c0_i32_46 : i32
    scf.if %83 {
      %c0_47 = arith.constant 0 : index
      %c0_48 = arith.constant 0 : index
      %84 = vector.load %arg7[%c0_47, %c0_48] : memref<256x1xf32, #tpu.memory_space<vmem>>, vector<256x1xf32>
      %c0_49 = arith.constant 0 : index
      %c0_50 = arith.constant 0 : index
      %85 = vector.load %arg8[%c0_49, %c0_50] : memref<256x1xf32, #tpu.memory_space<vmem>>, vector<256x1xf32>
      %86 = math.log %85 : vector<256x1xf32>
      %87 = arith.addf %84, %86 : vector<256x1xf32>
      %c0_51 = arith.constant 0 : index
      %c0_52 = arith.constant 0 : index
      %88 = vector.load %arg9[%c0_51, %c0_52] : memref<256x1xf32, #tpu.memory_space<vmem>>, vector<256x1xf32>
      %c0_53 = arith.constant 0 : index
      %c0_54 = arith.constant 0 : index
      %89 = vector.load %arg10[%c0_53, %c0_54] : memref<256x1xf32, #tpu.memory_space<vmem>>, vector<256x1xf32>
      %90 = math.log %89 : vector<256x1xf32>
      %91 = arith.addf %88, %90 : vector<256x1xf32>
      %92 = arith.addf %87, %91 : vector<256x1xf32>
      %cst_55 = arith.constant 0.000000e+00 : f32
      %93 = vector.broadcast %cst_55 : f32 to vector<256x1xf32>
      %94 = arith.maximumf %92, %93 : vector<256x1xf32>
      %95 = math.absf %92 : vector<256x1xf32>
      %cst_56 = arith.constant 0.000000e+00 : f32
      %96 = vector.broadcast %cst_56 : f32 to vector<256x1xf32>
      %97 = arith.subf %96, %95 : vector<256x1xf32>
      %98 = math.exp %97 : vector<256x1xf32>
      %cst_57 = arith.constant 1.000000e+00 : f32
      %99 = vector.broadcast %cst_57 : f32 to vector<256x1xf32>
      %100 = arith.addf %99, %98 : vector<256x1xf32>
      %101 = math.log %100 : vector<256x1xf32>
      %102 = arith.addf %94, %101 : vector<256x1xf32>
      %c0_58 = arith.constant 0 : index
      %c0_59 = arith.constant 0 : index
      %103 = vector.load %arg6[%c0_58, %c0_59] : memref<256x1xf32, #tpu.memory_space<vmem>>, vector<256x1xf32>
      tpu.vector_store %arg6[%c0_58, %c0_59], %102 {strides = array<i32>} : memref<256x1xf32, #tpu.memory_space<vmem>>, vector<256x1xf32>,
    } else {
    }
    return
  }
  func.func @transform_0(%arg0: i32, %arg1: i32) -> (i32, i32) {
    %c0_i32 = arith.constant 0 : i32
    %c0_i32_0 = arith.constant 0 : i32
    return %arg0, %c0_i32 : i32, i32
  }
  func.func @transform_1(%arg0: i32, %arg1: i32) -> (i32, i32) {
    %c0_i32 = arith.constant 0 : i32
    %c0_i32_0 = arith.constant 0 : i32
    return %arg1, %c0_i32 : i32, i32
  }
  func.func @transform_2(%arg0: i32, %arg1: i32) -> (i32, i32) {
    %c0_i32 = arith.constant 0 : i32
    %c0_i32_0 = arith.constant 0 : i32
    return %arg0, %c0_i32 : i32, i32
  }
  func.func @transform_3(%arg0: i32, %arg1: i32) -> (i32, i32) {
    %c0_i32 = arith.constant 0 : i32
    %c0_i32_0 = arith.constant 0 : i32
    return %c0_i32, %arg1 : i32, i32
  }
  func.func @transform_4(%arg0: i32, %arg1: i32) -> (i32, i32) {
    %c0_i32 = arith.constant 0 : i32
    %c0_i32_0 = arith.constant 0 : i32
    return %arg0, %c0_i32 : i32, i32
  }
}

</mosaic_0001>

<bundles_post_ra>
// kernel: tpu_custom_call.1
= control target key start
LH: loop header
LB: loop body
LE: loop exit
PB: predicated region body
PF: predicated region fallthrough
CT: control target
= control target key end

     0   :  { %vm214_vm0 = vcmask 261120   ;;  %vm8793_vm5 = vmmov 1   ;;  %s13307_s1 = inlined_call_operand.vmem [shape: f32[256,32], index: 1, kind: input, shape index: {}]   ;;  %s13308_s0 = inlined_call_operand.vmem [shape: f32[256,32], index: 0, kind: input, shape index: {}]   ;;  %s13309_s2 = inlined_call_operand.vmem [shape: s32[256,1], index: 2, kind: input, shape index: {}]   ;;  %s13310_s3 = inlined_call_operand.vmem [shape: s32[1,256], index: 3, kind: input, shape index: {}]   ;;  %s13311_s4 = inlined_call_operand.vmem [shape: f32[256,1], index: 4, kind: output, shape index: {}]  }
   0x1   :  { %v198_v0 = vld [vmem:[%s13307_s1 + $0x80] sm:$0xff]  ;;  %v199_v1 = vld [vmem:[%s13307_s1 + $0x88] sm:$0xff]  ;;  %v200_v7 = vld [vmem:[%s13307_s1 + $0x90] sm:$0xff] }
   0x2   :  { %v182_v2 = vld [vmem:[%s13307_s1] sm:$0xff]  ;;  %v8831_v3 = vsel %vm214_vm0, %v198_v0, 0  ;;  %v8834_v4 = vsel %vm214_vm0, %v199_v1, 0  ;;  %v183_v5 = vld [vmem:[%s13307_s1 + $0x8] sm:$0xff]  ;;  %v201_v8 = vld [vmem:[%s13307_s1 + $0x98] sm:$0xff]  ;;  %v8859_v15 = vsel %vm214_vm0, %v200_v7, 0 }
   0x3   :  { %v8840_v6 = vsel %vm214_vm0, %v182_v2, 0  ;;  %v456_v9 = vand.u32 4294901760, %v8831_v3  ;;  %v459_v10 = vand.u32 4294901760, %v8834_v4  ;;  %v8851_v11 = vsel %vm214_vm0, %v183_v5, 0  ;;  %v184_v13 = vld [vmem:[%s13307_s1 + $0x10] sm:$0xff]  ;;  %v185_v17 = vld [vmem:[%s13307_s1 + $0x18] sm:$0xff] }
   0x4   :  { %v408_v12 = vand.u32 4294901760, %v8840_v6  ;;  %v411_v14 = vand.u32 4294901760, %v8851_v11  ;;  %v8862_v16 = vsel %vm214_vm0, %v201_v8, 0  ;;  %v202_v18 = vld [vmem:[%s13307_s1 + $0xa0] sm:$0xff]  ;;  %v203_v19 = vld [vmem:[%s13307_s1 + $0xa8] sm:$0xff]  ;;  %v8880_v21 = vsel %vm214_vm0, %v184_v13, 0 }
   0x5   :  { %v8877_v20 = vpack.c.bf16 %v459_v10, %v456_v9  ;;  %v13333_v23 = vand.u32 4294901760, %v8859_v15  ;;  %v13332_v24 = vand.u32 4294901760, %v8862_v16  ;;  %v8893_v25 = vsel %vm214_vm0, %v185_v17, 0  ;;  %v186_v33 = vld [vmem:[%s13307_s1 + $0x20] sm:$0xff]  ;;  %v187_v34 = vld [vmem:[%s13307_s1 + $0x28] sm:$0xff]  ;;  %v204_v35 = vld [vmem:[%s13307_s1 + $0xb0] sm:$0xff] }
   0x6   :  { %v8886_v22 = vpack.c.bf16 %v411_v14, %v408_v12  ;;  %v8896_v26 = vsel %vm214_vm0, %v202_v18, 0  ;;  %v8899_v27 = vsel %vm214_vm0, %v203_v19, 0  ;;  %v13331_v29 = vand.u32 4294901760, %v8880_v21  ;;  %v205_v36 = vld [vmem:[%s13307_s1 + $0xb8] sm:$0xff]  ;;  %v188_v47 = vld [vmem:[%s13307_s1 + $0x30] sm:$0xff]  ;;  %v206_v49 = vld [vmem:[%s13307_s1 + $0xc0] sm:$0xff] }
   0x7   :  { %7667 = vmatprep.subr.bf16.mxu1 %v8877_v20  ;;  %7763 = vmatprep.subr.bf16.mxu0 %v8877_v20  ;;  %v8907_v28 = vpack.c.bf16 %v13332_v24, %v13333_v23  ;;  %v13330_v30 = vand.u32 4294901760, %v8893_v25  ;;  %v13329_v31 = vand.u32 4294901760, %v8896_v26  ;;  %v13328_v32 = vand.u32 4294901760, %v8899_v27  ;;  %v189_v48 = vld [vmem:[%s13307_s1 + $0x38] sm:$0xff]  ;;  %v207_v50 = vld [vmem:[%s13307_s1 + $0xc8] sm:$0xff]  ;;  %v150_v61 = vld [vmem:[%s13308_s0] sm:$0xff] }
   0x8   :  { %13579 = vst [vmem:[#allocation6_spill] sm:$0xff] %v8886_v22  ;;  %7669 = vmatpush3.bf16.xpose.msra.mxu1 %v8886_v22  ;;  %7765 = vmatpush3.bf16.xpose.msra.mxu0 %v8886_v22  ;;  %v8940_v39 = vsel %vm214_vm0, %v186_v33, 0  ;;  %v8943_v40 = vsel %vm214_vm0, %v187_v34, 0  ;;  %v8946_v41 = vsel %vm214_vm0, %v204_v35, 0  ;;  %v8949_v42 = vsel %vm214_vm0, %v205_v36, 0  ;;  %v190_v62 = vld [vmem:[%s13307_s1 + $0x40] sm:$0xff] }
   0x9   :  { %13580 = vst [vmem:[#allocation7_spill] sm:$0xff] %v8907_v28  ;;  %7671 = vmatprep.subr.bf16.mxu1 %v8907_v28  ;;  %7767 = vmatprep.subr.bf16.mxu0 %v8907_v28  ;;  %v8931_v37 = vpack.c.bf16 %v13330_v30, %v13331_v29  ;;  %v8937_v38 = vpack.c.bf16 %v13328_v32, %v13329_v31  ;;  %v13327_v43 = vand.u32 4294901760, %v8940_v39  ;;  %v13322_v44 = vand.u32 4294901760, %v8943_v40  ;;  %v191_v63 = vld [vmem:[%s13307_s1 + $0x48] sm:$0xff]  ;;  %v208_v0 = vld [vmem:[%s13307_s1 + $0xd0] sm:$0xff]  ;;  %v209_v1 = vld [vmem:[%s13307_s1 + $0xd8] sm:$0xff] }
   0xa   :  { %v13321_v45 = vand.u32 4294901760, %v8946_v41  ;;  %v13320_v46 = vand.u32 4294901760, %v8949_v42  ;;  %v8984_v53 = vsel %vm214_vm0, %v188_v47, 0  ;;  %v8987_v54 = vsel %vm214_vm0, %v189_v48, 0  ;;  %v192_v48 = vld [vmem:[%s13307_s1 + $0x50] sm:$0xff] }
   0xb   :  { %13581 = vst [vmem:[#allocation8_spill] sm:$0xff] %v8931_v37  ;;  %13582 = vst [vmem:[#allocation9_spill] sm:$0xff] %v8937_v38  ;;  %v8975_v51 = vpack.c.bf16 %v13322_v44, %v13327_v43  ;;  %v8990_v55 = vsel %vm214_vm0, %v206_v49, 0  ;;  %v8993_v56 = vsel %vm214_vm0, %v207_v50, 0  ;;  %v13319_v57 = vand.u32 4294901760, %v8984_v53  ;;  %v193_v49 = vld [vmem:[%s13307_s1 + $0x58] sm:$0xff] }
   0xc   :  { %v8981_v52 = vpack.c.bf16 %v13320_v46, %v13321_v45  ;;  %v13318_v58 = vand.u32 4294901760, %v8987_v54  ;;  %v13315_v59 = vand.u32 4294901760, %v8990_v55  ;;  %v13312_v60 = vand.u32 4294901760, %v8993_v56  ;;  %v152_v31 = vld [vmem:[%s13308_s0 + $0x10] sm:$0xff] }
   0xd   :  { %13583 = vst [vmem:[#allocation10_spill] sm:$0xff] %v8975_v51  ;;  %v216_v5 = vsel %vm214_vm0, %v150_v61, 0  ;;  %v9032_v8 = vsel %vm214_vm0, %v190_v62, 0  ;;  %v9035_v13 = vsel %vm214_vm0, %v191_v63, 0  ;;  %v9038_v17 = vsel %vm214_vm0, %v208_v0, 0  ;;  %v210_v61 = vld [vmem:[%s13307_s1 + $0xe0] sm:$0xff] }
   0xe   :  { %13584 = vst [vmem:[#allocation11_spill] sm:$0xff] %v8981_v52  ;;  %v9022_v2 = vpack.c.bf16 %v13318_v58, %v13319_v57  ;;  %v9029_v7 = vpack.c.bf16 %v13312_v60, %v13315_v59  ;;  %v9041_v18 = vsel %vm214_vm0, %v209_v1, 0  ;;  %v9043_v19 = vand.u32 4294901760, %v216_v5  ;;  %v211_v62 = vld [vmem:[%s13307_s1 + $0xe8] sm:$0xff]  ;;  %v213_v58 = vld [vmem:[%s13307_s1 + $0xf8] sm:$0xff] }
   0xf   :  { %v13314_v33 = vand.u32 4294901760, %v9032_v8  ;;  %v13313_v34 = vand.u32 4294901760, %v9035_v13  ;;  %v13317_v36 = vand.u32 4294901760, %v9038_v17  ;;  %v13316_v47 = vand.u32 4294901760, %v9041_v18 }
  0x10   :  { %7673 = vmatpush3.bf16.xpose.msra.mxu1 %v8931_v37  ;;  %7769 = vmatpush3.bf16.xpose.msra.mxu0 %v8931_v37  ;;  %13585 = vst [vmem:[#allocation12_spill] sm:$0xff] %v9022_v2  ;;  %13586 = vst [vmem:[#allocation13_spill] sm:$0xff] %v9029_v7  ;;  %v9050_v35 = vsub.f32 %v216_v5, %v9043_v19  ;;  %v9087_v5 = vsel %vm214_vm0, %v192_v48, 0  ;;  %v9090_v60 = vsel %vm214_vm0, %v193_v49, 0 }
  0x11   :  { %7675 = vmatprep.subr.bf16.mxu1 %v8937_v38  ;;  %7771 = vmatprep.subr.bf16.mxu0 %v8937_v38  ;;  %v9075_v63 = vpack.c.bf16 %v13313_v34, %v13314_v33  ;;  %v9084_v1 = vpack.c.bf16 %v13316_v47, %v13317_v36  ;;  %v9093_v34 = vsel %vm214_vm0, %v210_v61, 0  ;;  %v9096_v33 = vsel %vm214_vm0, %v211_v62, 0  ;;  %v194_v62 = vld [vmem:[%s13307_s1 + $0x60] sm:$0xff]  ;;  %v212_v36 = vld [vmem:[%s13307_s1 + $0xf0] sm:$0xff] }
  0x12   :  { %13587 = vst [vmem:[#allocation14_spill] sm:$0xff] %v9050_v35  ;;  %v9063_v50 = vand.u32 4294901760, %v9050_v35  ;;  %v13326_v47 = vand.u32 4294901760, %v9087_v5  ;;  %v13325_v48 = vand.u32 4294901760, %v9090_v60  ;;  %v13324_v49 = vand.u32 4294901760, %v9093_v34 }
  0x13   :  { %13588 = vst [vmem:[#allocation15_spill] sm:$0xff] %v9075_v63  ;;  %13589 = vst [vmem:[#allocation16_spill] sm:$0xff] %v9084_v1  ;;  %v13323_v61 = vand.u32 4294901760, %v9096_v33  ;;  %v9124_v57 = vsub.f32 %v8831_v3, %v456_v9  ;;  %v9129_v46 = vsub.f32 %v8834_v4, %v459_v10  ;;  %v9138_v44 = vsel %vm214_vm0, %v194_v62, 0  ;;  %v151_v62 = vld [vmem:[%s13308_s0 + $0x8] sm:$0xff] }
  0x14   :  { %v507_v0 = vsub.f32 %v9050_v35, %v9063_v50  ;;  %7410 = vmatprep.mubr.f32.mxu0 %v9063_v50  ;;  %v9135_v45 = vpack.c.bf16 %v13325_v48, %v13326_v47  ;;  %v9150_v4 = vsel %vm214_vm0, %v212_v36, 0  ;;  %v9153_v10 = vsel %vm214_vm0, %v213_v58, 0  ;;  %v196_v58 = vld [vmem:[%s13307_s1 + $0x70] sm:$0xff]  ;;  %v197_v48 = vld [vmem:[%s13307_s1 + $0x78] sm:$0xff] }
  0x15   :  { %v9144_v3 = vpack.c.bf16 %v13323_v61, %v13324_v49  ;;  %v13335_v61 = vand.u32 4294901760, %v9138_v44  ;;  %v13336_v36 = vand.u32 4294901760, %v9153_v10  ;;  %v971_v47 = vand.u32 4294901760, %v9124_v57 }
  0x16   :  { %v9098_v59 = vand.u32 4294901760, %v507_v0  ;;  %v195_v0 = vld [vmem:[%s13307_s1 + $0x68] sm:$0xff]  ;;  %13590 = vst [vmem:[#allocation17_spill] sm:$0xff] %v9135_v45  ;;  %v978_v43 = vand.u32 4294901760, %v9129_v46  ;;  %v219_v32 = vsel %vm214_vm0, %v151_v62, 0  ;;  %v9181_v30 = vsub.f32 %v8840_v6, %v408_v12 }
  0x17   :  { %13591 = vst [vmem:[#allocation18_spill] sm:$0xff] %v9144_v3  ;;  %v9147_v9 = vsel %vm214_vm0, %v195_v0, 0  ;;  %v13337_v0 = vand.u32 4294901760, %v9150_v4  ;;  %v9186_v29 = vsub.f32 %v8851_v11, %v411_v14  ;;  %v9201_v6 = vsel %vm214_vm0, %v196_v58, 0 }
  0x18   :  { %7677 = vmatpush3.bf16.xpose.msra.mxu1 %v8975_v51  ;;  %7773 = vmatpush3.bf16.xpose.msra.mxu0 %v8975_v51  ;;  %v13334_v49 = vand.u32 4294901760, %v9147_v9  ;;  %v9204_v12 = vsel %vm214_vm0, %v197_v48, 0  ;;  %v972_v11 = vsub.f32 %v9124_v57, %v971_v47  ;;  %v979_v14 = vsub.f32 %v9129_v46, %v978_v43 }
  0x19   :  { %7679 = vmatprep.subr.bf16.mxu1 %v8981_v52  ;;  %7775 = vmatprep.subr.bf16.mxu0 %v8981_v52  ;;  %13592 = vst [vmem:[#allocation19_spill] sm:$0xff] %v9186_v29  ;;  %v9198_v62 = vpack.c.bf16 %v13336_v36, %v13337_v0  ;;  %v9208_v23 = vand.u32 4294901760, %v219_v32  ;;  %v13596_v36 = vand.u32 4294901760, %v8859_v15  ;;  %v13598_v48 = vand.u32 4294901760, %v8862_v16 }
  0x1a   :  { %7122 = vmatprep.mubr.f32.mxu1 %v9098_v59  ;;  %v9192_v24 = vpack.c.bf16 %v13334_v49, %v13335_v61  ;;  %v222_v49 = vsel %vm214_vm0, %v152_v31, 0  ;;  %v153_v61 = vld [vmem:[%s13308_s0 + $0x18] sm:$0xff]  ;;  %v859_v31 = vand.u32 4294901760, %v9181_v30  ;;  %v7794_v37 = vpack.c.bf16 %v978_v43, %v971_v47  ;;  %v155_v43 = vld [vmem:[%s13308_s0 + $0x28] sm:$0xff] }
  0x1b   :  { %13594 = vst [vmem:[#allocation21_spill] sm:$0xff] %v9198_v62  ;;  %13595 = vst [vmem:[#allocation22_spill] sm:$0xff] %v9208_v23  ;;  %v9217_v58 = vsub.f32 %v8859_v15, %v13596_v36  ;;  %v9222_v0 = vsub.f32 %v8862_v16, %v13598_v48  ;;  %v225_v15 = vsel %vm214_vm0, %v153_v61, 0  ;;  %v973_v16 = vand.u32 4294901760, %v972_v11 }
  0x1c   :  { %13593 = vst [vmem:[#allocation20_spill] sm:$0xff] %v9192_v24  ;;  %v980_v36 = vand.u32 4294901760, %v979_v14  ;;  %v9236_v48 = vsub.f32 %v219_v32, %v9208_v23  ;;  %v13604_v11 = vand.u32 4294901760, %v9204_v12  ;;  %v9254_v32 = vand.u32 4294901760, %v225_v15 }
  0x1d   :  { %13597 = vst [vmem:[#allocation23_spill] sm:$0xff] %v9217_v58  ;;  %13599 = vst [vmem:[#allocation24_spill] sm:$0xff] %v9222_v0  ;;  %v985_v35 = vand.u32 4294901760, %v9217_v58  ;;  %v13611_v47 = vand.u32 4294901760, %v8940_v39  ;;  %v13614_v23 = vand.u32 4294901760, %v8943_v40 }
  0x1e   :  { %13601 = vst [vmem:[#allocation26_spill] sm:$0xff] %v9236_v48  ;;  %13606 = vst [vmem:[#allocation28_spill] sm:$0xff] %v9254_v32  ;;  %v7698_v38 = vpack.c.bf16 %v980_v36, %v973_v16 }
  0x1f   :  { %v9288_v16 = vsub.f32 %v8940_v39, %v13611_v47  ;;  %v9304_v39 = vsub.f32 %v8943_v40, %v13614_v23 }
  0x20   :  { %7681 = vmatpush3.bf16.xpose.msra.mxu1 %v9022_v2  ;;  %7777 = vmatpush3.bf16.xpose.msra.mxu0 %v9022_v2 }
  0x21   :  { %7683 = vmatprep.subr.bf16.mxu1 %v9029_v7  ;;  %7779 = vmatprep.subr.bf16.mxu0 %v9029_v7  ;;  %v860_v7 = vsub.f32 %v9181_v30, %v859_v31 }
  0x28   :  { %7685 = vmatpush3.bf16.xpose.msra.mxu1 %v9075_v63  ;;  %7781 = vmatpush3.bf16.xpose.msra.mxu0 %v9075_v63  ;;  %v13602_v63 = vand.u32 4294901760, %v8880_v21 }
  0x29   :  { %7687 = vmatprep.subr.bf16.mxu1 %v9084_v1  ;;  %7783 = vmatprep.subr.bf16.mxu0 %v9084_v1  ;;  %v9230_v1 = vand.u32 4294901760, %v222_v49 }
  0x2a   :  { %v9246_v61 = vsub.f32 %v8880_v21, %v13602_v63  ;;  %v13608_v21 = vand.u32 4294901760, %v8893_v25 }
  0x2b   :  { %13600 = vst [vmem:[#allocation25_spill] sm:$0xff] %v9230_v1  ;;  %v9259_v52 = vsub.f32 %v222_v49, %v9230_v1  ;;  %v13610_v49 = vand.u32 4294901760, %v8899_v27 }
  0x2c   :  { %v9265_v63 = vsub.f32 %v8893_v25, %v13608_v21  ;;  %v13617_v22 = vand.u32 4294901760, %v9246_v61 }
  0x2d   :  { %13607 = vst [vmem:[#allocation29_spill] sm:$0xff] %v9259_v52  ;;  %v9278_v1 = vsub.f32 %v8899_v27, %v13610_v49  ;;  %v861_v27 = vand.u32 4294901760, %v860_v7  ;;  %v231_v7 = vsel %vm214_vm0, %v155_v43, 0  ;;  %v156_v49 = vld [vmem:[%s13308_s0 + $0x30] sm:$0xff] }
  0x2e   :  { %v880_v47 = vand.u32 4294901760, %v9265_v63 }
  0x2f   :  { %v1006_v23 = vand.u32 4294901760, %v9278_v1 }
  0x30   :  { %7689 = vmatpush3.bf16.xpose.msra.mxu1 %v9135_v45  ;;  %7785 = vmatpush3.bf16.xpose.msra.mxu0 %v9135_v45  ;;  %v866_v45 = vand.u32 4294901760, %v9186_v29 }
  0x31   :  { %7691 = vmatprep.subr.bf16.mxu1 %v9144_v3  ;;  %7787 = vmatprep.subr.bf16.mxu0 %v9144_v3  ;;  %v154_v3 = vld [vmem:[%s13308_s0 + $0x20] sm:$0xff] }
  0x32   :  { %v867_v2 = vsub.f32 %v9186_v29, %v866_v45  ;;  %v228_v51 = vsel %vm214_vm0, %v154_v3, 0  ;;  %v986_v3 = vsub.f32 %v9217_v58, %v985_v35  ;;  %v7796_v40 = vpack.c.bf16 %v866_v45, %v859_v31 }
  0x33   :  { %v9293_v36 = vand.u32 4294901760, %v228_v51  ;;  %v9331_v58 = vand.u32 4294901760, %v231_v7  ;;  %v13619_v29 = vand.u32 4294901760, %v8984_v53 }
  0x34   :  { %v868_v21 = vand.u32 4294901760, %v867_v2  ;;  %v987_v2 = vand.u32 4294901760, %v986_v3 }
  0x35   :  { %13613 = vst [vmem:[#allocation31_spill] sm:$0xff] %v9293_v36  ;;  %v9324_v3 = vsub.f32 %v228_v51, %v9293_v36  ;;  %v234_v51 = vsel %vm214_vm0, %v156_v49, 0  ;;  %v1007_v36 = vsub.f32 %v9278_v1, %v1006_v23 }
  0x36   :  { %v9365_v49 = vand.u32 4294901760, %v234_v51 }
  0x37   :  { %13616 = vst [vmem:[#allocation32_spill] sm:$0xff] %v9324_v3 }
  0x38   :  { %7693 = vmatpush3.bf16.xpose.msra.mxu1 %v9192_v24  ;;  %7789 = vmatpush3.bf16.xpose.msra.mxu0 %v9192_v24  ;;  %v992_v24 = vand.u32 4294901760, %v9222_v0 }
  0x39   :  { %7695 = vmatprep.subr.bf16.mxu1 %v9198_v62  ;;  %7791 = vmatprep.subr.bf16.mxu0 %v9198_v62  ;;  %v13603_v62 = vand.u32 4294901760, %v9201_v6 }
  0x3a   :  { %v993_v25 = vsub.f32 %v9222_v0, %v992_v24  ;;  %v874_v0 = vsub.f32 %v9246_v61, %v13617_v22 }
  0x3b   :  { %v9252_v14 = vpack.c.bf16 %v13604_v11, %v13603_v62  ;;  %v9268_v62 = vand.u32 4294901760, %v9236_v48  ;;  %v13609_v11 = vand.u32 4294901760, %v8896_v26 }
  0x3d   :  { %13605 = vst [vmem:[#allocation27_spill] sm:$0xff] %v9252_v14  ;;  %v9273_v28 = vsub.f32 %v8896_v26, %v13609_v11  ;;  %v9291_v26 = vsub.f32 %v225_v15, %v9254_v32  ;;  %v9298_v11 = vand.u32 4294901760, %v9259_v52  ;;  %v518_v15 = vsub.f32 %v9236_v48, %v9268_v62 }
  0x3f   :  { %13612 = vst [vmem:[#allocation30_spill] sm:$0xff] %v9291_v26  ;;  %v999_v32 = vand.u32 4294901760, %v9273_v28  ;;  %v9321_v48 = vand.u32 4294901760, %v9291_v26  ;;  %v529_v43 = vsub.f32 %v9259_v52, %v9298_v11  ;;  %v519_v31 = vand.u32 4294901760, %v518_v15  ;;  %v157_v52 = vld [vmem:[%s13308_s0 + $0x38] sm:$0xff] }
  0x40   :  { %7697 = vmatpush3.bf16.xpose.msra.mxu1 %v9252_v14  ;;  %7793 = vmatpush3.bf16.xpose.msra.mxu0 %v9252_v14  ;;  %v994_v14 = vand.u32 4294901760, %v993_v25  ;;  %v7700_v25 = vpack.c.bf16 %v868_v21, %v861_v27  ;;  %v7798_v21 = vpack.c.bf16 %v992_v24, %v985_v35  ;;  %v13620_v15 = vand.u32 4294901760, %v8987_v54 }
  0x41   :  { %7699 = vmatprep.subr.bf16.mxu1 %v7698_v38  ;;  %7795 = vmatprep.subr.bf16.mxu0 %v7794_v37  ;;  %v13615_v38 = vand.u32 4294901760, %v8946_v41  ;;  %v1000_v22 = vsub.f32 %v9273_v28, %v999_v32  ;;  %v540_v24 = vsub.f32 %v9291_v26, %v9321_v48  ;;  %v9360_v35 = vand.u32 4294901760, %v9324_v3 }
  0x42   :  { %v7702_v27 = vpack.c.bf16 %v994_v14, %v987_v2  ;;  %v530_v14 = vand.u32 4294901760, %v529_v43  ;;  %v13372_v2 = vand.u32 4294901760, %v9288_v16 }
  0x43   :  { %v9318_v37 = vsub.f32 %v8946_v41, %v13615_v38  ;;  %v13618_v41 = vand.u32 4294901760, %v8949_v42  ;;  %v881_v38 = vsub.f32 %v9265_v63, %v880_v47 }
  0x45   :  { %v9336_v45 = vsub.f32 %v8949_v42, %v13618_v41  ;;  %v9348_v42 = vsub.f32 %v8984_v53, %v13619_v29  ;;  %v9353_v41 = vsub.f32 %v8987_v54, %v13620_v15  ;;  %v875_v29 = vand.u32 4294901760, %v874_v0 }
  0x46   :  { %v9363_v53 = vsub.f32 %v231_v7, %v9331_v58  ;;  %v882_v54 = vand.u32 4294901760, %v881_v38  ;;  %v1001_v0 = vand.u32 4294901760, %v1000_v22  ;;  %v1008_v7 = vand.u32 4294901760, %v1007_v36 }
  0x47   :  { %7123 = vmatmul.mubr.f32.vlgmr.msra.gmra.mrb[0].mxu1 %v9098_v59  ;;  %7411 = vmatmul.mubr.f32.vlgmr.msra.gmra.mrb[0].mxu0 %v9063_v50  ;;  %v237_v59 = vsel %vm214_vm0, %v157_v52, 0  ;;  %v158_v50 = vld [vmem:[%s13308_s0 + $0x40] sm:$0xff]  ;;  %v13622_v38 = vand.u32 4294901760, %v8990_v55  ;;  %v13623_v15 = vand.u32 4294901760, %v8993_v56  ;;  %v551_v36 = vsub.f32 %v9324_v3, %v9360_v35 }
  0x48   :  { %7701 = vmatpush3.bf16.xpose.msra.mxu1 %v7700_v25  ;;  %7797 = vmatpush3.bf16.xpose.msra.mxu0 %v7796_v40  ;;  %13621 = vst [vmem:[#allocation33_spill] sm:$0xff] %v9363_v53  ;;  %v13373_v40 = vand.u32 4294901760, %v9304_v39  ;;  %v9396_v22 = vand.u32 4294901760, %v237_v59  ;;  %v7706_v43 = vpack.c.bf16 %v1008_v7, %v1001_v0  ;;  %v7802_v25 = vpack.c.bf16 %v1006_v23, %v999_v32 }
  0x49   :  { %7124 = vmatprep.mubr.f32.mxu1 %v519_v31  ;;  %7412 = vmatprep.mubr.f32.mxu0 %v9268_v62  ;;  %v9379_v52 = vsub.f32 %v8990_v55, %v13622_v38  ;;  %v9384_v26 = vsub.f32 %v8993_v56, %v13623_v15  ;;  %v9394_v55 = vsub.f32 %v234_v51, %v9365_v49  ;;  %v240_v56 = vsel %vm214_vm0, %v158_v50, 0  ;;  %v159_v51 = vld [vmem:[%s13308_s0 + $0x48] sm:$0xff] }
  0x4a   :  { %7703 = vmatprep.subr.bf16.mxu1 %v7702_v27  ;;  %7799 = vmatprep.subr.bf16.mxu0 %v7798_v21  ;;  %v541_v27 = vand.u32 4294901760, %v540_v24  ;;  %v9391_v21 = vand.u32 4294901760, %v9363_v53  ;;  %13625 = vst [vmem:[#allocation35_spill] sm:$0xff] %v9396_v22  ;;  %v888_v38 = vsub.f32 %v9288_v16, %v13372_v2  ;;  %v895_v15 = vsub.f32 %v9304_v39, %v13373_v40 }
  0x4b   :  { %7125 = vmatmul.mubr.f32.gmra.mrb[2].mxu1 %v519_v31  ;;  %7413 = vmatmul.mubr.f32.gmra.mrb[2].mxu0 %v9268_v62  ;;  %13624 = vst [vmem:[#allocation34_spill] sm:$0xff] %v9394_v55  ;;  %v7704_v31 = vpack.c.bf16 %v882_v54, %v875_v29  ;;  %v13626_v62 = vand.u32 4294901760, %v9246_v61  ;;  %v13627_v50 = vand.u32 4294901760, %v9318_v37  ;;  %v13630_v40 = vand.u32 4294901760, %v9035_v13 }
  0x4c   :  { %7126 = vmatprep.mubr.f32.mxu1 %v530_v14  ;;  %7414 = vmatprep.mubr.f32.mxu0 %v9298_v11  ;;  %v552_v32 = vand.u32 4294901760, %v551_v36  ;;  %v9427_v23 = vand.u32 4294901760, %v240_v56  ;;  %v562_v0 = vsub.f32 %v9363_v53, %v9391_v21  ;;  %v9436_v7 = vsub.f32 %v237_v59, %v9396_v22 }
  0x4d   :  { %v7800_v24 = vpack.c.bf16 %v880_v47, %v13626_v62  ;;  %v1014_v29 = vsub.f32 %v9318_v37, %v13627_v50  ;;  %v13628_v47 = vand.u32 4294901760, %v9336_v45  ;;  %v13629_v62 = vand.u32 4294901760, %v9032_v8 }
  0x4e   :  { %v9424_v3 = vsub.f32 %v9035_v13, %v13630_v40  ;;  %13631 = vst [vmem:[#allocation36_spill] sm:$0xff] %v9427_v23  ;;  %13632 = vst [vmem:[#allocation37_spill] sm:$0xff] %v9436_v7  ;;  %v243_v13 = vsel %vm214_vm0, %v159_v51, 0  ;;  %v160_v40 = vld [vmem:[%s13308_s0 + $0x50] sm:$0xff]  ;;  %v13380_v36 = vand.u32 4294901760, %v9348_v42  ;;  %v13383_v50 = vand.u32 4294901760, %v9353_v41 }
  0x4f   :  { %v1021_v54 = vsub.f32 %v9336_v45, %v13628_v47  ;;  %v9419_v2 = vsub.f32 %v9032_v8, %v13629_v62  ;;  %7127 = vmatmul.mubr.f32.gmra.mrb[4].mxu1 %v530_v14  ;;  %7415 = vmatmul.mubr.f32.gmra.mrb[4].mxu0 %v9298_v11  ;;  %v9433_v8 = vand.u32 4294901760, %v9394_v55  ;;  %v889_v11 = vand.u32 4294901760, %v888_v38 }
  0x50   :  { %7128 = vmatprep.mubr.f32.mxu1 %v541_v27  ;;  %7416 = vmatprep.mubr.f32.mxu0 %v9321_v48  ;;  %v896_v14 = vand.u32 4294901760, %v895_v15  ;;  %v1015_v47 = vand.u32 4294901760, %v1014_v29  ;;  %v13634_v38 = vand.u32 4294901760, %v9041_v18  ;;  %v563_v29 = vand.u32 4294901760, %v562_v0 }
  0x51   :  { %7705 = vmatpush3.bf16.xpose.msra.mxu1 %v7704_v31  ;;  %7801 = vmatpush3.bf16.xpose.msra.mxu0 %v7800_v24  ;;  %v1022_v62 = vand.u32 4294901760, %v1021_v54  ;;  %v13633_v31 = vand.u32 4294901760, %v9038_v17  ;;  %v9466_v54 = vand.u32 4294901760, %v9436_v7  ;;  %v902_v0 = vsub.f32 %v9348_v42, %v13380_v36 }
  0x52   :  { %7707 = vmatprep.subr.bf16.mxu1 %v7706_v43  ;;  %7803 = vmatprep.subr.bf16.mxu0 %v7802_v25  ;;  %v9454_v15 = vsub.f32 %v9041_v18, %v13634_v38  ;;  %v9458_v25 = vsub.f32 %v240_v56, %v9427_v23  ;;  %v9460_v43 = vand.u32 4294901760, %v243_v13  ;;  %v246_v18 = vsel %vm214_vm0, %v160_v40, 0  ;;  %v161_v38 = vld [vmem:[%s13308_s0 + $0x58] sm:$0xff] }
  0x53   :  { %v9449_v24 = vsub.f32 %v9038_v17, %v13633_v31  ;;  %7129 = vmatmul.mubr.f32.gmra.mrb[6].mxu1 %v541_v27  ;;  %7417 = vmatmul.mubr.f32.gmra.mrb[6].mxu0 %v9321_v48  ;;  %v573_v17 = vsub.f32 %v9394_v55, %v9433_v8  ;;  %v7708_v27 = vpack.c.bf16 %v896_v14, %v889_v11  ;;  %v13637_v48 = vand.u32 4294901760, %v9288_v16 }
  0x54   :  { %13635 = vst [vmem:[#allocation38_spill] sm:$0xff] %v9458_v25  ;;  %13636 = vst [vmem:[#allocation39_spill] sm:$0xff] %v9460_v43  ;;  %7130 = vmatprep.mubr.f32.mxu1 %v552_v32  ;;  %7418 = vmatprep.mubr.f32.mxu0 %v9360_v35  ;;  %v13638_v56 = vand.u32 4294901760, %v9304_v39  ;;  %v909_v51 = vsub.f32 %v9353_v41, %v13383_v50  ;;  %v7710_v59 = vpack.c.bf16 %v1022_v62, %v1015_v47 }
  0x55   :  { %v13639_v11 = vand.u32 4294901760, %v9318_v37  ;;  %v13640_v14 = vand.u32 4294901760, %v9336_v45  ;;  %v13642_v55 = vand.u32 4294901760, %v9384_v26  ;;  %v13643_v36 = vand.u32 4294901760, %v9087_v5 }
  0x56   :  { %v7804_v31 = vpack.c.bf16 %v13638_v56, %v13637_v48  ;;  %v13641_v48 = vand.u32 4294901760, %v9379_v52  ;;  %v13644_v47 = vand.u32 4294901760, %v9090_v60 }
  0x57   :  { %v7806_v40 = vpack.c.bf16 %v13640_v14, %v13639_v11  ;;  %v1035_v53 = vsub.f32 %v9384_v26, %v13642_v55  ;;  %v9495_v23 = vsub.f32 %v9087_v5, %v13643_v36  ;;  %7131 = vmatmul.mubr.f32.gmra.mrb[8].mxu1 %v552_v32  ;;  %7419 = vmatmul.mubr.f32.gmra.mrb[8].mxu0 %v9360_v35  ;;  %v9506_v14 = vand.u32 4294901760, %v246_v18  ;;  %v162_v35 = vld [vmem:[%s13308_s0 + $0x60] sm:$0xff] }
  0x58   :  { %v1028_v56 = vsub.f32 %v9379_v52, %v13641_v48  ;;  %v9500_v62 = vsub.f32 %v9090_v60, %v13644_v47  ;;  %v9504_v11 = vsub.f32 %v243_v13, %v9460_v43  ;;  %7132 = vmatprep.mubr.f32.mxu1 %v563_v29  ;;  %7420 = vmatprep.mubr.f32.mxu0 %v9391_v21  ;;  %v574_v55 = vand.u32 4294901760, %v573_v17 }
  0x59   :  { %13646 = vst [vmem:[#allocation41_spill] sm:$0xff] %v9506_v14  ;;  %v584_v5 = vsub.f32 %v9436_v7, %v9466_v54  ;;  %v9512_v36 = vand.u32 4294901760, %v9458_v25  ;;  %v249_v60 = vsel %vm214_vm0, %v161_v38, 0  ;;  %7709 = vmatpush3.bf16.xpose.msra.mxu1 %v7708_v27  ;;  %7805 = vmatpush3.bf16.xpose.msra.mxu0 %v7804_v31  ;;  %v903_v32 = vand.u32 4294901760, %v902_v0 }
  0x5a   :  { %13645 = vst [vmem:[#allocation40_spill] sm:$0xff] %v9504_v11  ;;  %v910_v13 = vand.u32 4294901760, %v909_v51  ;;  %v13386_v48 = vand.u32 4294901760, %v9419_v2  ;;  %v13389_v17 = vand.u32 4294901760, %v9424_v3  ;;  %7711 = vmatprep.subr.bf16.mxu1 %v7710_v59  ;;  %7807 = vmatprep.subr.bf16.mxu0 %v7806_v40  ;;  %v1029_v47 = vand.u32 4294901760, %v1028_v56 }
  0x5b   :  { %v1036_v50 = vand.u32 4294901760, %v1035_v53  ;;  %v13647_v27 = vand.u32 4294901760, %v9093_v34  ;;  %7133 = vmatmul.mubr.f32.gmra.mrb[10].mxu1 %v563_v29  ;;  %7421 = vmatmul.mubr.f32.gmra.mrb[10].mxu0 %v9391_v21  ;;  %v9529_v51 = vand.u32 4294901760, %v9504_v11  ;;  %v9532_v59 = vsub.f32 %v246_v18, %v9506_v14 }
  0x5c   :  { %v9534_v0 = vand.u32 4294901760, %v249_v60  ;;  %v13650_v53 = vand.u32 4294901760, %v9096_v33  ;;  %7134 = vmatprep.mubr.f32.mxu1 %v574_v55  ;;  %7422 = vmatprep.mubr.f32.mxu0 %v9433_v8  ;;  %v595_v21 = vsub.f32 %v9458_v25, %v9512_v36  ;;  %v252_v29 = vsel %vm214_vm0, %v162_v35, 0 }
  0x5d   :  { %v9525_v31 = vsub.f32 %v9093_v34, %v13647_v27  ;;  %13648 = vst [vmem:[#allocation42_spill] sm:$0xff] %v9532_v59  ;;  %v585_v34 = vand.u32 4294901760, %v584_v5  ;;  %v7712_v56 = vpack.c.bf16 %v910_v13, %v903_v32  ;;  %v13651_v18 = vand.u32 4294901760, %v9348_v42  ;;  %v163_v5 = vld [vmem:[%s13308_s0 + $0x68] sm:$0xff] }
  0x5e   :  { %13649 = vst [vmem:[#allocation43_spill] sm:$0xff] %v9534_v0  ;;  %v9539_v40 = vsub.f32 %v9096_v33, %v13650_v53  ;;  %v13652_v27 = vand.u32 4294901760, %v9353_v41  ;;  %v916_v33 = vsub.f32 %v9419_v2, %v13386_v48  ;;  %v923_v53 = vsub.f32 %v9424_v3, %v13389_v17 }
  0x5f   :  { %v7714_v7 = vpack.c.bf16 %v1036_v50, %v1029_v47  ;;  %v13653_v35 = vand.u32 4294901760, %v9379_v52  ;;  %v13654_v32 = vand.u32 4294901760, %v9384_v26  ;;  %v13656_v48 = vand.u32 4294901760, %v9454_v15  ;;  %7135 = vmatmul.mubr.f32.gmra.mrb[12].mxu1 %v574_v55  ;;  %7423 = vmatmul.mubr.f32.gmra.mrb[12].mxu0 %v9433_v8 }
  0x60   :  { %v7808_v38 = vpack.c.bf16 %v13652_v27, %v13651_v18  ;;  %v13655_v18 = vand.u32 4294901760, %v9449_v24  ;;  %v606_v17 = vsub.f32 %v9504_v11, %v9529_v51  ;;  %v9572_v50 = vand.u32 4294901760, %v9532_v59  ;;  %7136 = vmatprep.mubr.f32.mxu1 %v585_v34  ;;  %7424 = vmatprep.mubr.f32.mxu0 %v9466_v54 }
  0x61   :  { %v7810_v13 = vpack.c.bf16 %v13654_v32, %v13653_v35  ;;  %v1049_v25 = vsub.f32 %v9454_v15, %v13656_v48  ;;  %v9575_v47 = vsub.f32 %v249_v60, %v9534_v0  ;;  %v9577_v35 = vand.u32 4294901760, %v252_v29  ;;  %7713 = vmatpush3.bf16.xpose.msra.mxu1 %v7712_v56 }
  0x62   :  { %v1042_v27 = vsub.f32 %v9449_v24, %v13655_v18  ;;  %v13659_v32 = vand.u32 4294901760, %v9138_v44  ;;  %v596_v8 = vand.u32 4294901760, %v595_v21  ;;  %v13660_v11 = vand.u32 4294901760, %v9147_v9  ;;  %7809 = vmatpush3.bf16.xpose.msra.mxu0 %v7808_v38  ;;  %7715 = vmatprep.subr.bf16.mxu1 %v7714_v7 }
  0x63   :  { %13657 = vst [vmem:[#allocation44_spill] sm:$0xff] %v9575_v47  ;;  %13658 = vst [vmem:[#allocation45_spill] sm:$0xff] %v9577_v35  ;;  %v255_v0 = vsel %vm214_vm0, %v163_v5, 0  ;;  %v924_v14 = vand.u32 4294901760, %v923_v53  ;;  %7811 = vmatprep.subr.bf16.mxu0 %v7810_v13  ;;  %v1050_v55 = vand.u32 4294901760, %v1049_v25  ;;  %7137 = vmatmul.mubr.f32.gmra.mrb[14].mxu1 %v585_v34  ;;  %v9602_v38 = vand.u32 4294901760, %v9575_v47 }
  0x64   :  { %v9582_v18 = vsub.f32 %v9138_v44, %v13659_v32  ;;  %v9590_v60 = vsub.f32 %v9147_v9, %v13660_v11  ;;  %v164_v44 = vld [vmem:[%s13308_s0 + $0x70] sm:$0xff]  ;;  %v917_v32 = vand.u32 4294901760, %v916_v33  ;;  %v1043_v21 = vand.u32 4294901760, %v1042_v27  ;;  %7425 = vmatmul.mubr.f32.gmra.mrb[14].mxu0 %v9466_v54  ;;  %7138 = vmatprep.mubr.f32.mxu1 %v596_v8  ;;  %v165_v27 = vld [vmem:[%s13308_s0 + $0x78] sm:$0xff] }
  0x65   :  { %v607_v9 = vand.u32 4294901760, %v606_v17  ;;  %v617_v11 = vsub.f32 %v9532_v59, %v9572_v50  ;;  %v9605_v56 = vsub.f32 %v252_v29, %v9577_v35  ;;  %7426 = vmatprep.mubr.f32.mxu0 %v9512_v36  ;;  %v9608_v7 = vand.u32 4294901760, %v255_v0 }
  0x66   :  { %13661 = vst [vmem:[#allocation46_spill] sm:$0xff] %v9590_v60  ;;  %v258_v25 = vsel %vm214_vm0, %v164_v44, 0  ;;  %v13664_v34 = vand.u32 4294901760, %v9495_v23  ;;  %v13665_v17 = vand.u32 4294901760, %v9500_v62  ;;  %v13666_v53 = vand.u32 4294901760, %v9150_v4 }
  0x67   :  { %13662 = vst [vmem:[#allocation47_spill] sm:$0xff] %v9605_v56  ;;  %13663 = vst [vmem:[#allocation48_spill] sm:$0xff] %v9608_v7  ;;  %v13667_v5 = vand.u32 4294901760, %v9153_v10  ;;  %v7716_v44 = vpack.c.bf16 %v924_v14, %v917_v32  ;;  %v13670_v43 = vand.u32 4294901760, %v9424_v3  ;;  %v7718_v48 = vpack.c.bf16 %v1050_v55, %v1043_v21  ;;  %7139 = vmatmul.mubr.f32.gmra.mrb[16].mxu1 %v596_v8 }
  0x68   :  { %v930_v54 = vsub.f32 %v9495_v23, %v13664_v34  ;;  %v937_v33 = vsub.f32 %v9500_v62, %v13665_v17  ;;  %v9620_v29 = vsub.f32 %v9150_v4, %v13666_v53  ;;  %v13669_v34 = vand.u32 4294901760, %v9419_v2  ;;  %7427 = vmatmul.mubr.f32.gmra.mrb[16].mxu0 %v9512_v36  ;;  %7140 = vmatprep.mubr.f32.mxu1 %v607_v9  ;;  %v166_v36 = vld [vmem:[%s13308_s0 + $0x80] sm:$0xff] }
  0x69   :  { %v9625_v13 = vsub.f32 %v9153_v10, %v13667_v5  ;;  %v13671_v59 = vand.u32 4294901760, %v9449_v24  ;;  %v13672_v4 = vand.u32 4294901760, %v9454_v15  ;;  %v13673_v35 = vand.u32 4294901760, %v9525_v31  ;;  %7428 = vmatprep.mubr.f32.mxu0 %v9529_v51  ;;  %7717 = vmatpush3.bf16.xpose.msra.mxu1 %v7716_v44 }
  0x6a   :  { %v7812_v17 = vpack.c.bf16 %v13670_v43, %v13669_v34  ;;  %v13674_v5 = vand.u32 4294901760, %v9539_v40  ;;  %v618_v14 = vand.u32 4294901760, %v617_v11  ;;  %v628_v43 = vsub.f32 %v9575_v47, %v9602_v38  ;;  %7719 = vmatprep.subr.bf16.mxu1 %v7718_v48 }
  0x6b   :  { %13668 = vst [vmem:[#allocation49_spill] sm:$0xff] %v9625_v13  ;;  %v7814_v53 = vpack.c.bf16 %v13672_v4, %v13671_v59  ;;  %v1056_v10 = vsub.f32 %v9525_v31, %v13673_v35  ;;  %v9648_v55 = vand.u32 4294901760, %v9605_v56  ;;  %v9650_v32 = vand.u32 4294901760, %v258_v25  ;;  %7141 = vmatmul.mubr.f32.gmra.mrb[18].mxu1 %v607_v9 }
  0x6c   :  { %v1063_v22 = vsub.f32 %v9539_v40, %v13674_v5  ;;  %v9654_v59 = vsub.f32 %v255_v0, %v9608_v7  ;;  %v261_v35 = vsel %vm214_vm0, %v165_v27, 0  ;;  %v931_v8 = vand.u32 4294901760, %v930_v54  ;;  %7813 = vmatpush3.bf16.xpose.msra.mxu0 %v7812_v17  ;;  %7142 = vmatprep.mubr.f32.mxu1 %v618_v14 }
  0x6d   :  { %13675 = vst [vmem:[#allocation50_spill] sm:$0xff] %v9650_v32  ;;  %v938_v21 = vand.u32 4294901760, %v937_v33  ;;  %v13677_v11 = vand.u32 4294901760, %v9201_v6  ;;  %v13678_v4 = vand.u32 4294901760, %v9204_v12  ;;  %v943_v0 = vand.u32 4294901760, %v9582_v18  ;;  %7815 = vmatprep.subr.bf16.mxu0 %v7814_v53  ;;  %7429 = vmatmul.mubr.f32.gmra.mrb[18].mxu0 %v9529_v51 }
  0x6e   :  { %13676 = vst [vmem:[#allocation51_spill] sm:$0xff] %v9654_v59  ;;  %v950_v27 = vand.u32 4294901760, %v9590_v60  ;;  %v1057_v54 = vand.u32 4294901760, %v1056_v10  ;;  %v1064_v33 = vand.u32 4294901760, %v1063_v22  ;;  %v1069_v47 = vand.u32 4294901760, %v9620_v29  ;;  %7430 = vmatprep.mubr.f32.mxu0 %v9572_v50 }
  0x6f   :  { %v9663_v34 = vsub.f32 %v9201_v6, %v13677_v11  ;;  %v9668_v5 = vsub.f32 %v9204_v12, %v13678_v4  ;;  %v1076_v6 = vand.u32 4294901760, %v9625_v13  ;;  %v629_v11 = vand.u32 4294901760, %v628_v43  ;;  %v167_v43 = vld [vmem:[%s13308_s0 + $0x88] sm:$0xff]  ;;  %7143 = vmatmul.mubr.f32.gmra.mrb[20].mxu1 %v618_v14 }
  0x70   :  { %v639_v12 = vsub.f32 %v9605_v56, %v9648_v55  ;;  %v9677_v44 = vand.u32 4294901760, %v261_v35  ;;  %v264_v17 = vsel %vm214_vm0, %v166_v36, 0  ;;  %v9682_v22 = vand.u32 4294901760, %v9654_v59 }
  0x71   :  { %v9685_v48 = vsub.f32 %v258_v25, %v9650_v32  ;;  %v7720_v9 = vpack.c.bf16 %v938_v21, %v931_v8  ;;  %v13681_v51 = vand.u32 4294901760, %v9495_v23  ;;  %v13682_v53 = vand.u32 4294901760, %v9500_v62  ;;  %7431 = vmatmul.mubr.f32.gmra.mrb[20].mxu0 %v9572_v50  ;;  %7144 = vmatprep.mubr.f32.mxu1 %v629_v11  ;;  %v168_v50 = vld [vmem:[%s13308_s0 + $0x90] sm:$0xff] }
  0x72   :  { %13679 = vst [vmem:[#allocation52_spill] sm:$0xff] %v9677_v44  ;;  %v944_v36 = vsub.f32 %v9582_v18, %v943_v0  ;;  %v951_v4 = vsub.f32 %v9590_v60, %v950_v27  ;;  %v7722_v8 = vpack.c.bf16 %v1064_v33, %v1057_v54  ;;  %v13683_v21 = vand.u32 4294901760, %v9525_v31  ;;  %7432 = vmatprep.mubr.f32.mxu0 %v9602_v38 }
  0x73   :  { %13680 = vst [vmem:[#allocation53_spill] sm:$0xff] %v9685_v48  ;;  %v7816_v10 = vpack.c.bf16 %v13682_v53, %v13681_v51  ;;  %v13684_v32 = vand.u32 4294901760, %v9539_v40  ;;  %v1070_v53 = vsub.f32 %v9620_v29, %v1069_v47  ;;  %v1077_v7 = vsub.f32 %v9625_v13, %v1076_v6  ;;  %7721 = vmatpush3.bf16.xpose.msra.mxu1 %v7720_v9 }
  0x74   :  { %v9708_v60 = vsub.f32 %v261_v35, %v9677_v44  ;;  %v9710_v56 = vand.u32 4294901760, %v264_v17  ;;  %v640_v54 = vand.u32 4294901760, %v639_v12  ;;  %v650_v33 = vsub.f32 %v9654_v59, %v9682_v22  ;;  %7723 = vmatprep.subr.bf16.mxu1 %v7722_v8  ;;  %7145 = vmatmul.mubr.f32.gmra.mrb[22].mxu1 %v629_v11 }
  0x75   :  { %v7818_v51 = vpack.c.bf16 %v13684_v32, %v13683_v21  ;;  %v9716_v32 = vand.u32 4294901760, %v9685_v48  ;;  %v267_v21 = vsel %vm214_vm0, %v167_v43, 0  ;;  %7817 = vmatpush3.bf16.xpose.msra.mxu0 %v7816_v10  ;;  %v945_v14 = vand.u32 4294901760, %v944_v36 }
  0x76   :  { %v952_v35 = vand.u32 4294901760, %v951_v4  ;;  %v957_v25 = vand.u32 4294901760, %v9663_v34  ;;  %v964_v12 = vand.u32 4294901760, %v9668_v5  ;;  %v1071_v59 = vand.u32 4294901760, %v1070_v53  ;;  %7433 = vmatmul.mubr.f32.gmra.mrb[22].mxu0 %v9602_v38  ;;  %7146 = vmatprep.mubr.f32.mxu1 %v640_v54  ;;  %v169_v38 = vld [vmem:[%s13308_s0 + $0x98] sm:$0xff] }
  0x77   :  { %7819 = vmatprep.subr.bf16.mxu0 %v7818_v51  ;;  %v1078_v44 = vand.u32 4294901760, %v1077_v7  ;;  %v9726_v43 = vand.u32 4294901760, %v9708_v60  ;;  %v9729_v13 = vsub.f32 %v264_v17, %v9710_v56  ;;  %7434 = vmatprep.mubr.f32.mxu0 %v9648_v55  ;;  %v651_v9 = vand.u32 4294901760, %v650_v33 }
  0x78   :  { %v661_v10 = vsub.f32 %v9685_v48, %v9716_v32  ;;  %v9734_v36 = vand.u32 4294901760, %v267_v21  ;;  %v270_v7 = vsel %vm214_vm0, %v168_v50, 0  ;;  %v7724_v11 = vpack.c.bf16 %v952_v35, %v945_v14  ;;  %7147 = vmatmul.mubr.f32.gmra.mrb[24].mxu1 %v640_v54 }
  0x79   :  { %v7820_v4 = vpack.c.bf16 %v950_v27, %v943_v0  ;;  %v958_v17 = vsub.f32 %v9663_v34, %v957_v25  ;;  %v965_v8 = vsub.f32 %v9668_v5, %v964_v12  ;;  %v7726_v51 = vpack.c.bf16 %v1078_v44, %v1071_v59  ;;  %7148 = vmatprep.mubr.f32.mxu1 %v651_v9  ;;  %v177_v0 = vld [vmem:[%s13308_s0 + $0xd8] sm:$0xff] }
  0x7a   :  { %v7822_v53 = vpack.c.bf16 %v1076_v6, %v1069_v47  ;;  %7435 = vmatmul.mubr.f32.gmra.mrb[24].mxu0 %v9648_v55  ;;  %v672_v33 = vsub.f32 %v9708_v60, %v9726_v43  ;;  %v682_v50 = vand.u32 4294901760, %v9729_v13  ;;  %v662_v27 = vand.u32 4294901760, %v661_v10  ;;  %v170_v6 = vld [vmem:[%s13308_s0 + $0xa0] sm:$0xff] }
  0x7b   :  { %7436 = vmatprep.mubr.f32.mxu0 %v9682_v22  ;;  %v9752_v47 = vsub.f32 %v267_v21, %v9734_v36  ;;  %v9754_v59 = vand.u32 4294901760, %v270_v7  ;;  %v273_v55 = vsel %vm214_vm0, %v169_v38, 0  ;;  %7725 = vmatpush3.bf16.xpose.msra.mxu1 %v7724_v11  ;;  %v959_v44 = vand.u32 4294901760, %v958_v17 }
  0x7c   :  { %v966_v54 = vand.u32 4294901760, %v965_v8  ;;  %7727 = vmatprep.subr.bf16.mxu1 %v7726_v51  ;;  %7149 = vmatmul.mubr.f32.gmra.mrb[26].mxu1 %v651_v9  ;;  %v683_v21 = vsub.f32 %v9729_v13, %v682_v50  ;;  %v9762_v14 = vand.u32 4294901760, %v273_v55  ;;  %v673_v35 = vand.u32 4294901760, %v672_v33 }
  0x7d   :  { %7821 = vmatpush3.bf16.xpose.msra.mxu0 %v7820_v4  ;;  %7150 = vmatprep.mubr.f32.mxu1 %v662_v27  ;;  %v693_v10 = vand.u32 4294901760, %v9752_v47  ;;  %v9767_v38 = vsub.f32 %v270_v7, %v9754_v59  ;;  %v276_v11 = vsel %vm214_vm0, %v170_v6, 0  ;;  %v7824_v17 = vpack.c.bf16 %v964_v12, %v957_v25 }
  0x7e   :  { %7823 = vmatprep.subr.bf16.mxu0 %v7822_v53  ;;  %7437 = vmatmul.mubr.f32.gmra.mrb[26].mxu0 %v9682_v22  ;;  %v7728_v4 = vpack.c.bf16 %v966_v54, %v959_v44  ;;  %v171_v22 = vld [vmem:[%s13308_s0 + $0xa8] sm:$0xff]  ;;  %v7730_v9 = vpack.c.bf16 %v9129_v46, %v9124_v57  ;;  %v9777_v8 = vsub.f32 %v273_v55, %v9762_v14  ;;  %v9779_v51 = vand.u32 4294901760, %v276_v11  ;;  %v172_v46 = vld [vmem:[%s13308_s0 + $0xb0] sm:$0xff] }
  0x7f   :  { %7438 = vmatprep.mubr.f32.mxu0 %v9716_v32  ;;  %13685 = vst [vmem:[#allocation54_spill] sm:$0xff] %v9767_v38  ;;  %v684_v7 = vand.u32 4294901760, %v683_v21  ;;  %v694_v25 = vsub.f32 %v9752_v47, %v693_v10  ;;  %v704_v12 = vand.u32 4294901760, %v9767_v38  ;;  %v279_v53 = vsel %vm214_vm0, %v171_v22, 0 }
  0x80   :  { %7151 = vmatmul.mubr.f32.gmra.mrb[28].mxu1 %v662_v27  ;;  %13686 = vst [vmem:[#allocation55_spill] sm:$0xff] %v9777_v8  ;;  %v715_v57 = vand.u32 4294901760, %v9777_v8  ;;  %v9795_v55 = vand.u32 4294901760, %v279_v53  ;;  %v282_v6 = vsel %vm214_vm0, %v172_v46, 0 }
  0x81   :  { %7152 = vmatprep.mubr.f32.mxu1 %v673_v35  ;;  %v695_v33 = vand.u32 4294901760, %v694_v25  ;;  %v705_v27 = vsub.f32 %v9767_v38, %v704_v12 }
  0x82   :  { %7439 = vmatmul.mubr.f32.gmra.mrb[28].mxu0 %v9716_v32  ;;  %v9792_v32 = vsub.f32 %v276_v11, %v9779_v51  ;;  %v9804_v21 = vsub.f32 %v279_v53, %v9795_v55  ;;  %v175_v53 = vld [vmem:[%s13308_s0 + $0xc8] sm:$0xff] }
  0x83   :  { %7440 = vmatprep.mubr.f32.mxu0 %v9726_v43  ;;  %7729 = vmatpush3.bf16.xpose.msra.mxu1 %v7728_v4  ;;  %v706_v54 = vand.u32 4294901760, %v705_v27  ;;  %v174_v4 = vld [vmem:[%s13308_s0 + $0xc0] sm:$0xff] }
  0x84   :  { %7731 = vmatprep.subr.bf16.mxu1 %v7730_v9  ;;  %7153 = vmatmul.mubr.f32.gmra.mrb[30].mxu1 %v673_v35  ;;  %13687 = vst [vmem:[#allocation56_spill] sm:$0xff] %v9792_v32  ;;  %v726_v44 = vand.u32 4294901760, %v9792_v32  ;;  %13688 = vst [vmem:[#allocation57_spill] sm:$0xff] %v9804_v21  ;;  %v9806_v35 = vand.u32 4294901760, %v282_v6  ;;  %v737_v9 = vand.u32 4294901760, %v9804_v21  ;;  %v288_v25 = vsel %vm214_vm0, %v174_v4, 0 }
  0x85   :  { %7825 = vmatpush3.bf16.xpose.msra.mxu0 %v7824_v17  ;;  %7154 = vmatprep.mubr.f32.mxu1 %v684_v7  ;;  %v9826_v46 = vand.u32 4294901760, %v288_v25 }
  0x86   :  { %7827 = vmatprep.subr.bf16.mxu0 %v8877_v20  ;;  %7441 = vmatmul.mubr.f32.gmra.mrb[30].mxu0 %v9726_v43  ;;  %v173_v20 = vld [vmem:[%s13308_s0 + $0xb8] sm:$0xff]  ;;  %v716_v43 = vsub.f32 %v9777_v8, %v715_v57  ;;  %v738_v27 = vsub.f32 %v9804_v21, %v737_v9  ;;  %v179_v21 = vld [vmem:[%s13308_s0 + $0xe8] sm:$0xff] }
  0x87   :  { %7442 = vmatprep.mubr.f32.mxu0 %v682_v50  ;;  %v285_v11 = vsel %vm214_vm0, %v173_v20, 0  ;;  %v291_v20 = vsel %vm214_vm0, %v175_v53, 0  ;;  %v181_v8 = vld [vmem:[%s13308_s0 + $0xf8] sm:$0xff] }
  0x88   :  { %7155 = vmatmul.mubr.f32.gmra.mrb[32].mxu1 %v684_v7  ;;  %v9813_v17 = vand.u32 4294901760, %v285_v11  ;;  %v717_v22 = vand.u32 4294901760, %v716_v43  ;;  %v9817_v7 = vsub.f32 %v282_v6, %v9806_v35  ;;  %v176_v43 = vld [vmem:[%s13308_s0 + $0xd0] sm:$0xff] }
  0x89   :  { %7156 = vmatprep.mubr.f32.mxu1 %v695_v33  ;;  %v294_v53 = vsel %vm214_vm0, %v176_v43, 0  ;;  %v297_v43 = vsel %vm214_vm0, %v177_v0, 0 }
  0x8a   :  { %7443 = vmatmul.mubr.f32.gmra.mrb[32].mxu0 %v682_v50  ;;  %v727_v50 = vsub.f32 %v9792_v32, %v726_v44  ;;  %13689 = vst [vmem:[#allocation58_spill] sm:$0xff] %v9817_v7  ;;  %v748_v6 = vand.u32 4294901760, %v9817_v7  ;;  %v9850_v48 = vand.u32 4294901760, %v294_v53  ;;  %v180_v32 = vld [vmem:[%s13308_s0 + $0xf0] sm:$0xff] }
  0x8b   :  { %7444 = vmatprep.mubr.f32.mxu0 %v693_v10 }
  0x8c   :  { %7157 = vmatmul.mubr.f32.gmra.mrb[34].mxu1 %v695_v33  ;;  %v728_v33 = vand.u32 4294901760, %v727_v50  ;;  %v749_v4 = vsub.f32 %v9817_v7, %v748_v6  ;;  %v9839_v50 = vand.u32 4294901760, %v291_v20  ;;  %v178_v7 = vld [vmem:[%s13308_s0 + $0xe0] sm:$0xff] }
  0x8d   :  { %7158 = vmatprep.mubr.f32.mxu1 %v706_v54  ;;  %v300_v0 = vsel %vm214_vm0, %v178_v7, 0  ;;  %v303_v7 = vsel %vm214_vm0, %v179_v21, 0  ;;  %v306_v21 = vsel %vm214_vm0, %v180_v32, 0  ;;  %v309_v32 = vsel %vm214_vm0, %v181_v8, 0 }
  0x8e   :  { %7445 = vmatmul.mubr.f32.gmra.mrb[34].mxu0 %v693_v10  ;;  %v9824_v10 = vsub.f32 %v285_v11, %v9813_v17  ;;  %v739_v11 = vand.u32 4294901760, %v738_v27  ;;  %v9848_v27 = vsub.f32 %v291_v20, %v9839_v50  ;;  %v9859_v20 = vsub.f32 %v294_v53, %v9850_v48 }
  0x8f   :  { %7446 = vmatprep.mubr.f32.mxu0 %v704_v12 }
  0x90   :  { %7159 = vmatmul.mubr.f32.gmra.mrb[36].mxu1 %v706_v54  ;;  %13690 = vst [vmem:[#allocation59_spill] sm:$0xff] %v9824_v10  ;;  %v9836_v54 = vsub.f32 %v288_v25, %v9826_v46  ;;  %v750_v25 = vand.u32 4294901760, %v749_v4  ;;  %13692 = vst [vmem:[#allocation61_spill] sm:$0xff] %v9848_v27  ;;  %v781_v4 = vand.u32 4294901760, %v9848_v27  ;;  %v792_v53 = vand.u32 4294901760, %v9859_v20 }
  0x91   :  { %7160 = vmatprep.mubr.f32.mxu1 %v717_v22  ;;  %13693 = vst [vmem:[#allocation62_spill] sm:$0xff] %v9859_v20 }
  0x92   :  { %7447 = vmatmul.mubr.f32.gmra.mrb[36].mxu0 %v704_v12  ;;  %v759_v12 = vand.u32 4294901760, %v9824_v10  ;;  %13691 = vst [vmem:[#allocation60_spill] sm:$0xff] %v9836_v54 }
  0x93   :  { %7448 = vmatprep.mubr.f32.mxu0 %v715_v57 }
  0x94   :  { %7161 = vmatmul.mubr.f32.gmra.mrb[38].mxu1 %v717_v22  ;;  %v770_v22 = vand.u32 4294901760, %v9836_v54 }
  0x95   :  { %7162 = vmatprep.mubr.f32.mxu1 %v728_v33 }
  0x96   :  { %7449 = vmatmul.mubr.f32.gmra.mrb[38].mxu0 %v715_v57  ;;  %v760_v57 = vsub.f32 %v9824_v10, %v759_v12  ;;  %v9861_v10 = vand.u32 4294901760, %v297_v43 }
  0x97   :  { %7450 = vmatprep.mubr.f32.mxu0 %v726_v44 }
  0x98   :  { %7163 = vmatmul.mubr.f32.gmra.mrb[40].mxu1 %v728_v33  ;;  %v771_v33 = vsub.f32 %v9836_v54, %v770_v22  ;;  %v9872_v54 = vsub.f32 %v297_v43, %v9861_v10  ;;  %v9883_v43 = vand.u32 4294901760, %v303_v7 }
  0x99   :  { %7164 = vmatprep.mubr.f32.mxu1 %v739_v11 }
  0x9a   :  { %7451 = vmatmul.mubr.f32.gmra.mrb[40].mxu0 %v726_v44  ;;  %v761_v44 = vand.u32 4294901760, %v760_v57  ;;  %v782_v57 = vsub.f32 %v9848_v27, %v781_v4  ;;  %13694 = vst [vmem:[#allocation63_spill] sm:$0xff] %v9872_v54  ;;  %v803_v27 = vand.u32 4294901760, %v9872_v54 }
  0x9b   :  { %7452 = vmatprep.mubr.f32.mxu0 %v737_v9 }
  0x9c   :  { %7165 = vmatmul.mubr.f32.gmra.mrb[42].mxu1 %v739_v11  ;;  %v772_v11 = vand.u32 4294901760, %v771_v33  ;;  %v793_v33 = vsub.f32 %v9859_v20, %v792_v53  ;;  %v9894_v20 = vand.u32 4294901760, %v306_v21 }
  0x9d   :  { %7166 = vmatprep.mubr.f32.mxu1 %v750_v25 }
  0x9e   :  { %7453 = vmatmul.mubr.f32.gmra.mrb[42].mxu0 %v737_v9  ;;  %v9867_v9 = vand.u32 4294901760, %v300_v0 }
  0x9f   :  { %7454 = vmatprep.mubr.f32.mxu0 %v748_v6 }
  0xa0   :  { %7167 = vmatmul.mubr.f32.gmra.mrb[44].mxu1 %v750_v25  ;;  %v783_v25 = vand.u32 4294901760, %v782_v57  ;;  %v9892_v57 = vsub.f32 %v303_v7, %v9883_v43 }
  0xa1   :  { %7168 = vmatprep.mubr.f32.mxu1 %v761_v44 }
  0xa2   :  { %7455 = vmatmul.mubr.f32.gmra.mrb[44].mxu0 %v748_v6  ;;  %v9879_v6 = vsub.f32 %v300_v0, %v9867_v9  ;;  %v804_v0 = vsub.f32 %v9872_v54, %v803_v27  ;;  %v9902_v54 = vand.u32 4294901760, %v309_v32 }
  0xa3   :  { %7456 = vmatprep.mubr.f32.mxu0 %v759_v12 }
  0xa4   :  { %7169 = vmatmul.mubr.f32.gmra.mrb[46].mxu1 %v761_v44  ;;  %v794_v44 = vand.u32 4294901760, %v793_v33  ;;  %v9900_v33 = vsub.f32 %v306_v21, %v9894_v20 }
  0xa5   :  { %7170 = vmatprep.mubr.f32.mxu1 %v772_v11 }
  0xa6   :  { %7457 = vmatmul.mubr.f32.gmra.mrb[46].mxu0 %v759_v12  ;;  %v814_v12 = vand.u32 4294901760, %v9879_v6 }
  0xa7   :  { %7458 = vmatprep.mubr.f32.mxu0 %v770_v22 }
  0xa8   :  { %7171 = vmatmul.mubr.f32.gmra.mrb[48].mxu1 %v772_v11  ;;  %v815_v38 = vsub.f32 %v9879_v6, %v814_v12  ;;  %v825_v11 = vand.u32 4294901760, %v9892_v57 }
  0xa9   :  { %7172 = vmatprep.mubr.f32.mxu1 %v783_v25 }
  0xaa   :  { %7459 = vmatmul.mubr.f32.gmra.mrb[48].mxu0 %v770_v22  ;;  %v805_v22 = vand.u32 4294901760, %v804_v0  ;;  %v816_v7 = vand.u32 4294901760, %v815_v38  ;;  %v826_v8 = vsub.f32 %v9892_v57, %v825_v11 }
  0xab   :  { %7460 = vmatprep.mubr.f32.mxu0 %v781_v4 }
  0xac   :  { %7173 = vmatmul.mubr.f32.gmra.mrb[50].mxu1 %v783_v25  ;;  %v9907_v25 = vsub.f32 %v309_v32, %v9902_v54  ;;  %v827_v21 = vand.u32 4294901760, %v826_v8 }
  0xad   :  { %7174 = vmatprep.mubr.f32.mxu1 %v794_v44 }
  0xae   :  { %7461 = vmatmul.mubr.f32.gmra.mrb[50].mxu0 %v781_v4  ;;  %v836_v4 = vand.u32 4294901760, %v9900_v33 }
  0xaf   :  { %7462 = vmatprep.mubr.f32.mxu0 %v792_v53 }
  0xb0   :  { %7175 = vmatmul.mubr.f32.gmra.mrb[52].mxu1 %v794_v44  ;;  %v837_v0 = vsub.f32 %v9900_v33, %v836_v4  ;;  %v847_v44 = vand.u32 4294901760, %v9907_v25 }
  0xb1   :  { %7176 = vmatprep.mubr.f32.mxu1 %v805_v22 }
  0xb2   :  { %7463 = vmatmul.mubr.f32.gmra.mrb[52].mxu0 %v792_v53  ;;  %v838_v38 = vand.u32 4294901760, %v837_v0  ;;  %v848_v53 = vsub.f32 %v9907_v25, %v847_v44  ;;  %v7736_v0 = vpack.c.bf16 %v9265_v63, %v9246_v61  ;;  %v13706_v61 = vld [vmem:[#allocation31_spill] sm:$0xff]  ;;  %v13709_v63 = vpack.c.bf16 %v9336_v45, %v9318_v37  ;;  %v13713_v45 = vld [vmem:[#allocation12_spill] sm:$0xff] }
  0xb3   :  { %7464 = vmatprep.mubr.f32.mxu0 %v803_v27  ;;  %v13712_v37 = vpack.c.bf16 %v9353_v41, %v9348_v42  ;;  %v7750_v42 = vpack.c.bf16 %v9454_v15, %v9449_v24  ;;  %v13716_v41 = vld [vmem:[#allocation39_spill] sm:$0xff]  ;;  %v7752_v24 = vpack.c.bf16 %v9500_v62, %v9495_v23  ;;  %v8792_v15 = vmov 0   ;;  %v13722_v23 = vld [vmem:[#allocation18_spill] sm:$0xff] }
  0xb4   :  { %7177 = vmatmul.mubr.f32.gmra.mrb[54].mxu1 %v805_v22  ;;  %v849_v32 = vand.u32 4294901760, %v848_v53  ;;  %v13696_v22 = vld [vmem:[#allocation23_spill] sm:$0xff]  ;;  %v13704_v53 = vpack.c.bf16 %v9278_v1, %v9273_v28  ;;  %v13707_v28 = vpack.c.bf16 %v9304_v39, %v9288_v16  ;;  %v13708_v1 = vld [vmem:[#allocation10_spill] sm:$0xff]  ;;  %v7746_v16 = vpack.c.bf16 %v9384_v26, %v9379_v52  ;;  %v13715_v26 = vld [vmem:[#allocation36_spill] sm:$0xff]  ;;  %8150 = vset.pattern.permute.xlu0 %v8792_v15 }
  0xb5   :  { %7178 = vmatprep.mubr.f32.mxu1 %v816_v7  ;;  %v13711_v39 = vld [vmem:[#allocation35_spill] sm:$0xff]  ;;  %v7748_v52 = vpack.c.bf16 %v9424_v3, %v9419_v2  ;;  %v2781_v3 = vld [vmem:[%s13309_s2] sm:$0xff]  ;;  %v13719_v2 = vld [vmem:[#allocation41_spill] sm:$0xff]  ;;  %8151 = vset.pattern.permute.xlu1 %v8792_v15 }
  0xb6   :  { %7465 = vmatmul.mubr.f32.gmra.mrb[54].mxu0 %v803_v27  ;;  %v13695_v27 = vld [vmem:[#allocation19_spill] sm:$0xff]  ;;  %2815 = vperm.xlu0 %8150, %v2781_v3   ;;  %v2792_v3 = vld [vmem:[%s13309_s2 + $0x58] sm:$0xff] }
  0xb7   :  { %7466 = vmatprep.mubr.f32.mxu0 %v814_v12  ;;  %v2782_v62 = vld [vmem:[%s13309_s2 + $0x8] sm:$0xff] }
  0xb8   :  { %7179 = vmatmul.mubr.f32.gmra.mrb[56].mxu1 %v816_v7  ;;  %v13697_v7 = vld [vmem:[#allocation24_spill] sm:$0xff]  ;;  %v2794_v15 = vld [vmem:[%s13309_s2 + $0x68] sm:$0xff] }
  0xb9   :  { %7180 = vmatprep.mubr.f32.mxu1 %v827_v21  ;;  %v7734_v8 = vpack.c.bf16 %v13697_v7, %v13696_v22  ;;  %v13717_v22 = vld [vmem:[#allocation15_spill] sm:$0xff]  ;;  %v13718_v7 = vld [vmem:[#allocation16_spill] sm:$0xff] }
  0xba   :  { %7467 = vmatmul.mubr.f32.gmra.mrb[56].mxu0 %v814_v12  ;;  %v7732_v12 = vpack.c.bf16 %v13695_v27, %v9181_v30  ;;  %v13701_v30 = vld [vmem:[#allocation25_spill] sm:$0xff]  ;;  %v13710_v27 = vld [vmem:[#allocation11_spill] sm:$0xff]  ;;  %2818 = vperm.xlu0 %8150, %v2782_v62  }
  0xbb   :  { %7468 = vmatprep.mubr.f32.mxu0 %v825_v11  ;;  %v2798_v62 = vld [vmem:[%s13309_s2 + $0x88] sm:$0xff] }
  0xbc   :  { %7181 = vmatmul.mubr.f32.gmra.mrb[58].mxu1 %v827_v21  ;;  %v13700_v21 = vld [vmem:[#allocation7_spill] sm:$0xff] }
  0xbd   :  { %7182 = vmatprep.mubr.f32.mxu1 %v838_v38 }
  0xbe   :  { %7469 = vmatmul.mubr.f32.gmra.mrb[58].mxu0 %v825_v11  ;;  %v13698_v11 = vld [vmem:[#allocation6_spill] sm:$0xff] }
  0xbf   :  { %7470 = vmatprep.mubr.f32.mxu0 %v836_v4 }
  0xc0   :  { %7183 = vmatmul.mubr.f32.gmra.mrb[60].mxu1 %v838_v38  ;;  %v13703_v38 = vld [vmem:[#allocation8_spill] sm:$0xff] }
  0xc1   :  { %7184 = vmatprep.mubr.f32.mxu1 %v849_v32 }
  0xc2   :  { %7471 = vmatmul.mubr.f32.gmra.mrb[60].mxu0 %v836_v4  ;;  %v13699_v4 = vld [vmem:[#allocation22_spill] sm:$0xff] }
  0xc3   :  { %7472 = vmatprep.mubr.f32.mxu0 %v847_v44 }
  0xc4   :  { %7185 = vmatmul.mubr.f32.gmra.mrb[62].mxu1 %v849_v32  ;;  %v13705_v32 = vld [vmem:[#allocation9_spill] sm:$0xff] }
  0xc5   :  { %7218 = vmatprep.mubr.f32.mxu1 %v9043_v19 }
  0xc6   :  { %7473 = vmatmul.mubr.f32.gmra.mrb[62].mxu0 %v847_v44  ;;  %v13702_v44 = vld [vmem:[#allocation28_spill] sm:$0xff] }
  0xc7   :  { %7506 = vmatprep.mubr.f32.mxu0 %v9043_v19 }
  0xc8   :  { %7219 = vmatmul.mubr.f32.vlgmr.msra.gmra.mrb[0].mxu1 %v9043_v19 }
  0xc9   :  { %7733 = vmatpush3.bf16.xpose.msra.mxu1 %v7732_v12  ;;  %7220 = vmatprep.mubr.f32.mxu1 %v13699_v4  ;;  %v13714_v12 = vld [vmem:[#allocation13_spill] sm:$0xff] }
  0xca   :  { %7507 = vmatmul.mubr.f32.vlgmr.msra.gmra.mrb[0].mxu0 %v9043_v19  ;;  %7735 = vmatprep.subr.bf16.mxu1 %v7734_v8  ;;  %v7754_v8 = vpack.c.bf16 %v9539_v40, %v9525_v31  ;;  %v2783_v31 = vld [vmem:[%s13309_s2 + $0x10] sm:$0xff]  ;;  %v13723_v40 = vld [vmem:[#allocation45_spill] sm:$0xff] }
  0xcb   :  { %7829 = vmatpush3.bf16.xpose.msra.mxu0 %v13698_v11  ;;  %7508 = vmatprep.mubr.f32.mxu0 %v13699_v4  ;;  %v13720_v11 = vld [vmem:[#allocation43_spill] sm:$0xff] }
  0xcc   :  { %7831 = vmatprep.subr.bf16.mxu0 %v13700_v21  ;;  %7221 = vmatmul.mubr.f32.gmra.mrb[2].mxu1 %v13699_v4  ;;  %v13721_v21 = vld [vmem:[#allocation17_spill] sm:$0xff] }
  0xcd   :  { %7222 = vmatprep.mubr.f32.mxu1 %v13701_v30  ;;  %2821 = vperm.xlu1 %8151, %v2783_v31   ;;  %v2801_v31 = vld [vmem:[%s13309_s2 + $0xa0] sm:$0xff] }
  0xce   :  { %7509 = vmatmul.mubr.f32.gmra.mrb[2].mxu0 %v13699_v4 }
  0xcf   :  { %7510 = vmatprep.mubr.f32.mxu0 %v13701_v30 }
  0xd0   :  { %7223 = vmatmul.mubr.f32.gmra.mrb[4].mxu1 %v13701_v30 }
  0xd1   :  { %7224 = vmatprep.mubr.f32.mxu1 %v13702_v44  ;;  %7737 = vmatpush3.bf16.xpose.msra.mxu1 %v7736_v0  ;;  %v13724_v0 = vld [vmem:[#allocation46_spill] sm:$0xff] }
  0xd2   :  { %7511 = vmatmul.mubr.f32.gmra.mrb[4].mxu0 %v13701_v30  ;;  %7739 = vmatprep.subr.bf16.mxu1 %v13704_v53  ;;  %v13725_v53 = vld [vmem:[#allocation49_spill] sm:$0xff] }
  0xd3   :  { %7512 = vmatprep.mubr.f32.mxu0 %v13702_v44  ;;  %7833 = vmatpush3.bf16.xpose.msra.mxu0 %v13703_v38  ;;  %v7756_v38 = vpack.c.bf16 %v13724_v0, %v9582_v18  ;;  %v2785_v18 = vld [vmem:[%s13309_s2 + $0x20] sm:$0xff]  ;;  %v2800_v0 = vld [vmem:[%s13309_s2 + $0x98] sm:$0xff] }
  0xd4   :  { %7835 = vmatprep.subr.bf16.mxu0 %v13705_v32  ;;  %7225 = vmatmul.mubr.f32.gmra.mrb[6].mxu1 %v13702_v44  ;;  %v7758_v32 = vpack.c.bf16 %v13725_v53, %v9620_v29  ;;  %v2784_v29 = vld [vmem:[%s13309_s2 + $0x18] sm:$0xff]  ;;  %v2802_v53 = vld [vmem:[%s13309_s2 + $0xa8] sm:$0xff] }
  0xd5   :  { %7226 = vmatprep.mubr.f32.mxu1 %v13706_v61  ;;  %2827 = vperm.xlu0 %8150, %v2785_v18   ;;  %v2806_v18 = vld [vmem:[%s13309_s2 + $0xc8] sm:$0xff] }
  0xd6   :  { %7513 = vmatmul.mubr.f32.gmra.mrb[6].mxu0 %v13702_v44  ;;  %2824 = vperm.xlu1 %8151, %v2784_v29   ;;  %v2809_v29 = vld [vmem:[%s13309_s2 + $0xe0] sm:$0xff] }
  0xd7   :  { %7514 = vmatprep.mubr.f32.mxu0 %v13706_v61 }
  0xd8   :  { %7227 = vmatmul.mubr.f32.gmra.mrb[8].mxu1 %v13706_v61 }
  0xd9   :  { %7228 = vmatprep.mubr.f32.mxu1 %v9331_v58  ;;  %7741 = vmatpush3.bf16.xpose.msra.mxu1 %v13707_v28  ;;  %v13726_v28 = vld [vmem:[#allocation48_spill] sm:$0xff] }
  0xda   :  { %7515 = vmatmul.mubr.f32.gmra.mrb[8].mxu0 %v13706_v61  ;;  %7743 = vmatprep.subr.bf16.mxu1 %v13709_v63  ;;  %v13728_v63 = vld [vmem:[#allocation21_spill] sm:$0xff] }
  0xdb   :  { %7516 = vmatprep.mubr.f32.mxu0 %v9331_v58  ;;  %7837 = vmatpush3.bf16.xpose.msra.mxu0 %v13708_v1  ;;  %v13727_v1 = vld [vmem:[#allocation20_spill] sm:$0xff] }
  0xdc   :  { %7839 = vmatprep.subr.bf16.mxu0 %v13710_v27  ;;  %7229 = vmatmul.mubr.f32.gmra.mrb[10].mxu1 %v9331_v58  ;;  %v13729_v27 = vld [vmem:[#allocation50_spill] sm:$0xff] }
  0xdd   :  { %7230 = vmatprep.mubr.f32.mxu1 %v9365_v49 }
  0xde   :  { %7517 = vmatmul.mubr.f32.gmra.mrb[10].mxu0 %v9331_v58 }
  0xdf   :  { %7518 = vmatprep.mubr.f32.mxu0 %v9365_v49 }
  0xe0   :  { %7231 = vmatmul.mubr.f32.gmra.mrb[12].mxu1 %v9365_v49 }
  0xe1   :  { %7232 = vmatprep.mubr.f32.mxu1 %v13711_v39  ;;  %7745 = vmatpush3.bf16.xpose.msra.mxu1 %v13712_v37  ;;  %v2787_v37 = vld [vmem:[%s13309_s2 + $0x30] sm:$0xff] }
  0xe2   :  { %7519 = vmatmul.mubr.f32.gmra.mrb[12].mxu0 %v9365_v49  ;;  %7747 = vmatprep.subr.bf16.mxu1 %v7746_v16  ;;  %v7760_v16 = vpack.c.bf16 %v9668_v5, %v9663_v34  ;;  %v13731_v34 = vld [vmem:[#allocation27_spill] sm:$0xff]  ;;  %v2789_v5 = vld [vmem:[%s13309_s2 + $0x40] sm:$0xff] }
  0xe3   :  { %7520 = vmatprep.mubr.f32.mxu0 %v13711_v39  ;;  %7841 = vmatpush3.bf16.xpose.msra.mxu0 %v13713_v45  ;;  %v2786_v45 = vld [vmem:[%s13309_s2 + $0x28] sm:$0xff] }
  0xe4   :  { %7843 = vmatprep.subr.bf16.mxu0 %v13714_v12  ;;  %7233 = vmatmul.mubr.f32.gmra.mrb[14].mxu1 %v13711_v39  ;;  %v13730_v12 = vld [vmem:[#allocation52_spill] sm:$0xff] }
  0xe5   :  { %7234 = vmatprep.mubr.f32.mxu1 %v13715_v26  ;;  %2833 = vperm.xlu0 %8150, %v2787_v37   ;;  %v2811_v37 = vld [vmem:[%s13309_s2 + $0xf0] sm:$0xff] }
  0xe6   :  { %7521 = vmatmul.mubr.f32.gmra.mrb[14].mxu0 %v13711_v39  ;;  %2830 = vperm.xlu1 %8151, %v2786_v45   ;;  %v2810_v45 = vld [vmem:[%s13309_s2 + $0xe8] sm:$0xff] }
  0xe7   :  { %7522 = vmatprep.mubr.f32.mxu0 %v13715_v26 }
  0xe8   :  { %7235 = vmatmul.mubr.f32.gmra.mrb[16].mxu1 %v13715_v26 }
  0xe9   :  { %7236 = vmatprep.mubr.f32.mxu1 %v13716_v41  ;;  %7749 = vmatpush3.bf16.xpose.msra.mxu1 %v7748_v52  ;;  %v2788_v52 = vld [vmem:[%s13309_s2 + $0x38] sm:$0xff] }
  0xea   :  { %7523 = vmatmul.mubr.f32.gmra.mrb[16].mxu0 %v13715_v26  ;;  %7751 = vmatprep.subr.bf16.mxu1 %v7750_v42  ;;  %v2791_v42 = vld [vmem:[%s13309_s2 + $0x50] sm:$0xff] }
  0xeb   :  { %7524 = vmatprep.mubr.f32.mxu0 %v13716_v41  ;;  %7845 = vmatpush3.bf16.xpose.msra.mxu0 %v13717_v22  ;;  %v2790_v22 = vld [vmem:[%s13309_s2 + $0x48] sm:$0xff] }
  0xec   :  { %7847 = vmatprep.subr.bf16.mxu0 %v13718_v7  ;;  %7237 = vmatmul.mubr.f32.gmra.mrb[18].mxu1 %v13716_v41  ;;  %v2793_v7 = vld [vmem:[%s13309_s2 + $0x60] sm:$0xff] }
  0xed   :  { %7238 = vmatprep.mubr.f32.mxu1 %v13719_v2  ;;  %2839 = vperm.xlu0 %8150, %v2789_v5   ;;  %v13732_v5 = vld [vmem:[#allocation14_spill] sm:$0xff] }
  0xee   :  { %7525 = vmatmul.mubr.f32.gmra.mrb[18].mxu0 %v13716_v41  ;;  %2836 = vperm.xlu1 %8151, %v2788_v52   ;;  %v13733_v52 = vld [vmem:[#allocation26_spill] sm:$0xff] }
  0xef   :  { %7526 = vmatprep.mubr.f32.mxu0 %v13719_v2 }
  0xf0   :  { %7239 = vmatmul.mubr.f32.gmra.mrb[20].mxu1 %v13719_v2 }
  0xf1   :  { %7240 = vmatprep.mubr.f32.mxu1 %v13720_v11  ;;  %7753 = vmatpush3.bf16.xpose.msra.mxu1 %v7752_v24  ;;  %v2795_v24 = vld [vmem:[%s13309_s2 + $0x70] sm:$0xff] }
  0xf2   :  { %7527 = vmatmul.mubr.f32.gmra.mrb[20].mxu0 %v13719_v2  ;;  %7755 = vmatprep.subr.bf16.mxu1 %v7754_v8  ;;  %v2797_v8 = vld [vmem:[%s13309_s2 + $0x80] sm:$0xff] }
  0xf3   :  { %7528 = vmatprep.mubr.f32.mxu0 %v13720_v11  ;;  %7849 = vmatpush3.bf16.xpose.msra.mxu0 %v13721_v21  ;;  %v2796_v21 = vld [vmem:[%s13309_s2 + $0x78] sm:$0xff] }
  0xf4   :  { %7851 = vmatprep.subr.bf16.mxu0 %v13722_v23  ;;  %7241 = vmatmul.mubr.f32.gmra.mrb[22].mxu1 %v13720_v11  ;;  %v2799_v23 = vld [vmem:[%s13309_s2 + $0x90] sm:$0xff] }
  0xf5   :  { %7242 = vmatprep.mubr.f32.mxu1 %v13723_v40  ;;  %2845 = vperm.xlu0 %8150, %v2791_v42   ;;  %v13734_v42 = vld [vmem:[#allocation29_spill] sm:$0xff] }
  0xf6   :  { %7529 = vmatmul.mubr.f32.gmra.mrb[22].mxu0 %v13720_v11  ;;  %2842 = vperm.xlu1 %8151, %v2790_v22   ;;  %v13735_v22 = vld [vmem:[#allocation30_spill] sm:$0xff] }
  0xf7   :  { %7530 = vmatprep.mubr.f32.mxu0 %v13723_v40 }
  0xf8   :  { %7243 = vmatmul.mubr.f32.gmra.mrb[24].mxu1 %v13723_v40 }
  0xf9   :  { %7244 = vmatprep.mubr.f32.mxu1 %v13726_v28  ;;  %7757 = vmatpush3.bf16.xpose.msra.mxu1 %v7756_v38  ;;  %v2803_v38 = vld [vmem:[%s13309_s2 + $0xb0] sm:$0xff] }
  0xfa   :  { %7531 = vmatmul.mubr.f32.gmra.mrb[24].mxu0 %v13723_v40  ;;  %7759 = vmatprep.subr.bf16.mxu1 %v7758_v32  ;;  %v2805_v32 = vld [vmem:[%s13309_s2 + $0xc0] sm:$0xff] }
  0xfb   :  { %7532 = vmatprep.mubr.f32.mxu0 %v13726_v28  ;;  %7853 = vmatpush3.bf16.xpose.msra.mxu0 %v13727_v1  ;;  %v2804_v1 = vld [vmem:[%s13309_s2 + $0xb8] sm:$0xff] }
  0xfc   :  { %7855 = vmatprep.subr.bf16.mxu0 %v13728_v63  ;;  %7245 = vmatmul.mubr.f32.gmra.mrb[26].mxu1 %v13726_v28  ;;  %v2807_v63 = vld [vmem:[%s13309_s2 + $0xd0] sm:$0xff] }
  0xfd   :  { %7246 = vmatprep.mubr.f32.mxu1 %v13729_v27  ;;  %2851 = vperm.xlu0 %8150, %v2793_v7  }
  0xfe   :  { %7533 = vmatmul.mubr.f32.gmra.mrb[26].mxu0 %v13726_v28  ;;  %2848 = vperm.xlu1 %8151, %v2792_v3  }
  0xff   :  { %7534 = vmatprep.mubr.f32.mxu0 %v13729_v27 }
 0x100   :  { %7247 = vmatmul.mubr.f32.gmra.mrb[28].mxu1 %v13729_v27 }
 0x101   :  { %7248 = vmatprep.mubr.f32.mxu1 %v13730_v12  ;;  %7761 = vmatpush3.bf16.xpose.msra.mxu1 %v7760_v16  ;;  %v2808_v16 = vld [vmem:[%s13309_s2 + $0xd8] sm:$0xff] }
 0x102   :  { %7535 = vmatmul.mubr.f32.gmra.mrb[28].mxu0 %v13729_v27  ;;  %2857 = vperm.xlu0 %8150, %v2795_v24  }
 0x103   :  { %7536 = vmatprep.mubr.f32.mxu0 %v13730_v12  ;;  %7857 = vmatpush3.bf16.xpose.msra.mxu0 %v13731_v34  ;;  %v2812_v34 = vld [vmem:[%s13309_s2 + $0xf8] sm:$0xff] }
 0x104   :  { %7249 = vmatmul.mubr.f32.gmra.mrb[30].mxu1 %v13730_v12  ;;  %2854 = vperm.xlu1 %8151, %v2794_v15  }
 0x105   :  { %7250 = vmatprep.mubr.f32.mxu1 %v9710_v56 }
 0x106   :  { %7537 = vmatmul.mubr.f32.gmra.mrb[30].mxu0 %v13730_v12  ;;  %2863 = vperm.xlu0 %8150, %v2797_v8  }
 0x107   :  { %7538 = vmatprep.mubr.f32.mxu0 %v9710_v56 }
 0x108   :  { %7251 = vmatmul.mubr.f32.gmra.mrb[32].mxu1 %v9710_v56  ;;  %2860 = vperm.xlu1 %8151, %v2796_v21  }
 0x109   :  { %7252 = vmatprep.mubr.f32.mxu1 %v9734_v36 }
 0x10a   :  { %7539 = vmatmul.mubr.f32.gmra.mrb[32].mxu0 %v9710_v56  ;;  %2869 = vperm.xlu0 %8150, %v2799_v23  }
 0x10b   :  { %7540 = vmatprep.mubr.f32.mxu0 %v9734_v36 }
 0x10c   :  { %7253 = vmatmul.mubr.f32.gmra.mrb[34].mxu1 %v9734_v36  ;;  %2866 = vperm.xlu1 %8151, %v2798_v62  }
 0x10d   :  { %7254 = vmatprep.mubr.f32.mxu1 %v9754_v59 }
 0x10e   :  { %7541 = vmatmul.mubr.f32.gmra.mrb[34].mxu0 %v9734_v36  ;;  %2875 = vperm.xlu0 %8150, %v2801_v31  }
 0x10f   :  { %7542 = vmatprep.mubr.f32.mxu0 %v9754_v59 }
 0x110   :  { %7255 = vmatmul.mubr.f32.gmra.mrb[36].mxu1 %v9754_v59  ;;  %2872 = vperm.xlu1 %8151, %v2800_v0  }
 0x111   :  { %7256 = vmatprep.mubr.f32.mxu1 %v9762_v14 }
 0x112   :  { %7543 = vmatmul.mubr.f32.gmra.mrb[36].mxu0 %v9754_v59  ;;  %2881 = vperm.xlu0 %8150, %v2803_v38  }
 0x113   :  { %7544 = vmatprep.mubr.f32.mxu0 %v9762_v14 }
 0x114   :  { %7257 = vmatmul.mubr.f32.gmra.mrb[38].mxu1 %v9762_v14  ;;  %2878 = vperm.xlu1 %8151, %v2802_v53  }
 0x115   :  { %7258 = vmatprep.mubr.f32.mxu1 %v9779_v51 }
 0x116   :  { %7545 = vmatmul.mubr.f32.gmra.mrb[38].mxu0 %v9762_v14  ;;  %2887 = vperm.xlu0 %8150, %v2805_v32  }
 0x117   :  { %7546 = vmatprep.mubr.f32.mxu0 %v9779_v51 }
 0x118   :  { %7259 = vmatmul.mubr.f32.gmra.mrb[40].mxu1 %v9779_v51  ;;  %2884 = vperm.xlu1 %8151, %v2804_v1  }
 0x119   :  { %7260 = vmatprep.mubr.f32.mxu1 %v9795_v55 }
 0x11a   :  { %7547 = vmatmul.mubr.f32.gmra.mrb[40].mxu0 %v9779_v51  ;;  %2893 = vperm.xlu0 %8150, %v2807_v63  }
 0x11b   :  { %7548 = vmatprep.mubr.f32.mxu0 %v9795_v55 }
 0x11c   :  { %7261 = vmatmul.mubr.f32.gmra.mrb[42].mxu1 %v9795_v55  ;;  %2890 = vperm.xlu1 %8151, %v2806_v18  }
 0x11d   :  { %7262 = vmatprep.mubr.f32.mxu1 %v9806_v35 }
 0x11e   :  { %7549 = vmatmul.mubr.f32.gmra.mrb[42].mxu0 %v9795_v55  ;;  %2899 = vperm.xlu0 %8150, %v2809_v29  }
 0x11f   :  { %7550 = vmatprep.mubr.f32.mxu0 %v9806_v35 }
 0x120   :  { %7263 = vmatmul.mubr.f32.gmra.mrb[44].mxu1 %v9806_v35  ;;  %2896 = vperm.xlu1 %8151, %v2808_v16  }
 0x121   :  { %7264 = vmatprep.mubr.f32.mxu1 %v9813_v17 }
 0x122   :  { %7551 = vmatmul.mubr.f32.gmra.mrb[44].mxu0 %v9806_v35  ;;  %2905 = vperm.xlu0 %8150, %v2811_v37  }
 0x123   :  { %7552 = vmatprep.mubr.f32.mxu0 %v9813_v17 }
 0x124   :  { %7265 = vmatmul.mubr.f32.gmra.mrb[46].mxu1 %v9813_v17  ;;  %2902 = vperm.xlu1 %8151, %v2810_v45  }
 0x125   :  { %7266 = vmatprep.mubr.f32.mxu1 %v9826_v46 }
 0x126   :  { %7553 = vmatmul.mubr.f32.gmra.mrb[46].mxu0 %v9813_v17 }
 0x127   :  { %7554 = vmatprep.mubr.f32.mxu0 %v9826_v46 }
 0x128   :  { %7267 = vmatmul.mubr.f32.gmra.mrb[48].mxu1 %v9826_v46  ;;  %2908 = vperm.xlu1 %8151, %v2812_v34  }
 0x129   :  { %7268 = vmatprep.mubr.f32.mxu1 %v9839_v50 }
 0x12a   :  { %7555 = vmatmul.mubr.f32.gmra.mrb[48].mxu0 %v9826_v46 }
 0x12b   :  { %7556 = vmatprep.mubr.f32.mxu0 %v9839_v50 }
 0x12c   :  { %7269 = vmatmul.mubr.f32.gmra.mrb[50].mxu1 %v9839_v50 }
 0x12d   :  { %7270 = vmatprep.mubr.f32.mxu1 %v9850_v48 }
 0x12e   :  { %7557 = vmatmul.mubr.f32.gmra.mrb[50].mxu0 %v9839_v50 }
 0x12f   :  { %7558 = vmatprep.mubr.f32.mxu0 %v9850_v48 }
 0x130   :  { %7271 = vmatmul.mubr.f32.gmra.mrb[52].mxu1 %v9850_v48 }
 0x131   :  { %7272 = vmatprep.mubr.f32.mxu1 %v9861_v10 }
 0x132   :  { %7559 = vmatmul.mubr.f32.gmra.mrb[52].mxu0 %v9850_v48 }
 0x133   :  { %7560 = vmatprep.mubr.f32.mxu0 %v9861_v10 }
 0x134   :  { %7273 = vmatmul.mubr.f32.gmra.mrb[54].mxu1 %v9861_v10 }
 0x135   :  { %7274 = vmatprep.mubr.f32.mxu1 %v9867_v9 }
 0x136   :  { %7561 = vmatmul.mubr.f32.gmra.mrb[54].mxu0 %v9861_v10 }
 0x137   :  { %7562 = vmatprep.mubr.f32.mxu0 %v9867_v9 }
 0x138   :  { %7275 = vmatmul.mubr.f32.gmra.mrb[56].mxu1 %v9867_v9 }
 0x139   :  { %7276 = vmatprep.mubr.f32.mxu1 %v9883_v43 }
 0x13a   :  { %7563 = vmatmul.mubr.f32.gmra.mrb[56].mxu0 %v9867_v9 }
 0x13b   :  { %7564 = vmatprep.mubr.f32.mxu0 %v9883_v43 }
 0x13c   :  { %7277 = vmatmul.mubr.f32.gmra.mrb[58].mxu1 %v9883_v43 }
 0x13d   :  { %7278 = vmatprep.mubr.f32.mxu1 %v9894_v20 }
 0x13e   :  { %7565 = vmatmul.mubr.f32.gmra.mrb[58].mxu0 %v9883_v43 }
 0x13f   :  { %7566 = vmatprep.mubr.f32.mxu0 %v9894_v20 }
 0x140   :  { %7279 = vmatmul.mubr.f32.gmra.mrb[60].mxu1 %v9894_v20 }
 0x141   :  { %7280 = vmatprep.mubr.f32.mxu1 %v9902_v54 }
 0x142   :  { %7567 = vmatmul.mubr.f32.gmra.mrb[60].mxu0 %v9894_v20 }
 0x143   :  { %7568 = vmatprep.mubr.f32.mxu0 %v9902_v54 }
 0x144   :  { %7281 = vmatmul.mubr.f32.gmra.mrb[62].mxu1 %v9902_v54 }
 0x145   :  { %7314 = vmatprep.mubr.f32.mxu1 %v13732_v5 }
 0x146   :  { %7569 = vmatmul.mubr.f32.gmra.mrb[62].mxu0 %v9902_v54 }
 0x147   :  { %7602 = vmatprep.mubr.f32.mxu0 %v9043_v19 }
 0x148   :  { %7315 = vmatmul.mubr.f32.vlgmr.msra.gmra.mrb[0].mxu1 %v13732_v5 }
 0x149   :  { %7316 = vmatprep.mubr.f32.mxu1 %v13733_v52 }
 0x14a   :  { %7603 = vmatmul.mubr.f32.vlgmr.msra.gmra.mrb[0].mxu0 %v9043_v19  ;;  %v13736_v19 = vld [vmem:[#allocation32_spill] sm:$0xff] }
 0x14b   :  { %7604 = vmatprep.mubr.f32.mxu0 %v13699_v4 }
 0x14c   :  { %7317 = vmatmul.mubr.f32.gmra.mrb[2].mxu1 %v13733_v52 }
 0x14d   :  { %7318 = vmatprep.mubr.f32.mxu1 %v13734_v42 }
 0x14e   :  { %7605 = vmatmul.mubr.f32.gmra.mrb[2].mxu0 %v13699_v4  ;;  %v13737_v4 = vld [vmem:[#allocation33_spill] sm:$0xff] }
 0x14f   :  { %7606 = vmatprep.mubr.f32.mxu0 %v13701_v30 }
 0x150   :  { %7319 = vmatmul.mubr.f32.gmra.mrb[4].mxu1 %v13734_v42 }
 0x151   :  { %7320 = vmatprep.mubr.f32.mxu1 %v13735_v22 }
 0x152   :  { %7607 = vmatmul.mubr.f32.gmra.mrb[4].mxu0 %v13701_v30  ;;  %v13738_v30 = vld [vmem:[#allocation34_spill] sm:$0xff] }
 0x153   :  { %7608 = vmatprep.mubr.f32.mxu0 %v13702_v44 }
 0x154   :  { %7321 = vmatmul.mubr.f32.gmra.mrb[6].mxu1 %v13735_v22 }
 0x155   :  { %7322 = vmatprep.mubr.f32.mxu1 %v13736_v19 }
 0x156   :  { %7609 = vmatmul.mubr.f32.gmra.mrb[6].mxu0 %v13702_v44  ;;  %v13739_v44 = vld [vmem:[#allocation37_spill] sm:$0xff] }
 0x157   :  { %7610 = vmatprep.mubr.f32.mxu0 %v13706_v61 }
 0x158   :  { %7323 = vmatmul.mubr.f32.gmra.mrb[8].mxu1 %v13736_v19 }
 0x159   :  { %7324 = vmatprep.mubr.f32.mxu1 %v13737_v4 }
 0x15a   :  { %7611 = vmatmul.mubr.f32.gmra.mrb[8].mxu0 %v13706_v61  ;;  %v13740_v61 = vld [vmem:[#allocation38_spill] sm:$0xff] }
 0x15b   :  { %7612 = vmatprep.mubr.f32.mxu0 %v9331_v58 }
 0x15c   :  { %7325 = vmatmul.mubr.f32.gmra.mrb[10].mxu1 %v13737_v4 }
 0x15d   :  { %7326 = vmatprep.mubr.f32.mxu1 %v13738_v30 }
 0x15e   :  { %7613 = vmatmul.mubr.f32.gmra.mrb[10].mxu0 %v9331_v58  ;;  %v13741_v58 = vld [vmem:[#allocation40_spill] sm:$0xff] }
 0x15f   :  { %7614 = vmatprep.mubr.f32.mxu0 %v9365_v49 }
 0x160   :  { %7327 = vmatmul.mubr.f32.gmra.mrb[12].mxu1 %v13738_v30 }
 0x161   :  { %7328 = vmatprep.mubr.f32.mxu1 %v13739_v44 }
 0x162   :  { %7615 = vmatmul.mubr.f32.gmra.mrb[12].mxu0 %v9365_v49  ;;  %v13742_v49 = vld [vmem:[#allocation42_spill] sm:$0xff] }
 0x163   :  { %7616 = vmatprep.mubr.f32.mxu0 %v13711_v39 }
 0x164   :  { %7329 = vmatmul.mubr.f32.gmra.mrb[14].mxu1 %v13739_v44 }
 0x165   :  { %7330 = vmatprep.mubr.f32.mxu1 %v13740_v61 }
 0x166   :  { %7617 = vmatmul.mubr.f32.gmra.mrb[14].mxu0 %v13711_v39  ;;  %v13743_v39 = vld [vmem:[#allocation44_spill] sm:$0xff] }
 0x167   :  { %7618 = vmatprep.mubr.f32.mxu0 %v13715_v26 }
 0x168   :  { %7331 = vmatmul.mubr.f32.gmra.mrb[16].mxu1 %v13740_v61 }
 0x169   :  { %7332 = vmatprep.mubr.f32.mxu1 %v13741_v58 }
 0x16a   :  { %7619 = vmatmul.mubr.f32.gmra.mrb[16].mxu0 %v13715_v26  ;;  %v13744_v26 = vld [vmem:[#allocation47_spill] sm:$0xff] }
 0x16b   :  { %7620 = vmatprep.mubr.f32.mxu0 %v13716_v41 }
 0x16c   :  { %7333 = vmatmul.mubr.f32.gmra.mrb[18].mxu1 %v13741_v58 }
 0x16d   :  { %7334 = vmatprep.mubr.f32.mxu1 %v13742_v49 }
 0x16e   :  { %7621 = vmatmul.mubr.f32.gmra.mrb[18].mxu0 %v13716_v41  ;;  %v13745_v41 = vld [vmem:[#allocation51_spill] sm:$0xff] }
 0x16f   :  { %7622 = vmatprep.mubr.f32.mxu0 %v13719_v2 }
 0x170   :  { %7335 = vmatmul.mubr.f32.gmra.mrb[20].mxu1 %v13742_v49 }
 0x171   :  { %7336 = vmatprep.mubr.f32.mxu1 %v13743_v39 }
 0x172   :  { %7623 = vmatmul.mubr.f32.gmra.mrb[20].mxu0 %v13719_v2  ;;  %v13746_v2 = vld [vmem:[#allocation53_spill] sm:$0xff] }
 0x173   :  { %7624 = vmatprep.mubr.f32.mxu0 %v13720_v11 }
 0x174   :  { %7337 = vmatmul.mubr.f32.gmra.mrb[22].mxu1 %v13743_v39 }
 0x175   :  { %7338 = vmatprep.mubr.f32.mxu1 %v13744_v26 }
 0x176   :  { %7625 = vmatmul.mubr.f32.gmra.mrb[22].mxu0 %v13720_v11  ;;  %v13747_v11 = vld [vmem:[#allocation54_spill] sm:$0xff] }
 0x177   :  { %7626 = vmatprep.mubr.f32.mxu0 %v13723_v40 }
 0x178   :  { %7339 = vmatmul.mubr.f32.gmra.mrb[24].mxu1 %v13744_v26 }
 0x179   :  { %7340 = vmatprep.mubr.f32.mxu1 %v13745_v41 }
 0x17a   :  { %7627 = vmatmul.mubr.f32.gmra.mrb[24].mxu0 %v13723_v40  ;;  %v10334_v40 = vpop.permute.xlu1 %2821 }
 0x17b   :  { %7628 = vmatprep.mubr.f32.mxu0 %v13726_v28 }
 0x17c   :  { %7341 = vmatmul.mubr.f32.gmra.mrb[26].mxu1 %v13745_v41 }
 0x17d   :  { %7342 = vmatprep.mubr.f32.mxu1 %v13746_v2 }
 0x17e   :  { %7629 = vmatmul.mubr.f32.gmra.mrb[26].mxu0 %v13726_v28 }
 0x17f   :  { %7630 = vmatprep.mubr.f32.mxu0 %v13729_v27 }
 0x180   :  { %7343 = vmatmul.mubr.f32.gmra.mrb[28].mxu1 %v13746_v2 }
 0x181   :  { %7344 = vmatprep.mubr.f32.mxu1 %v9708_v60 }
 0x182   :  { %7631 = vmatmul.mubr.f32.gmra.mrb[28].mxu0 %v13729_v27 }
 0x183   :  { %7632 = vmatprep.mubr.f32.mxu0 %v13730_v12 }
 0x184   :  { %7345 = vmatmul.mubr.f32.gmra.mrb[30].mxu1 %v9708_v60  ;;  %v13748_v60 = vld [vmem:[#allocation55_spill] sm:$0xff] }
 0x185   :  { %7346 = vmatprep.mubr.f32.mxu1 %v9729_v13 }
 0x186   :  { %7633 = vmatmul.mubr.f32.gmra.mrb[30].mxu0 %v13730_v12 }
 0x187   :  { %7634 = vmatprep.mubr.f32.mxu0 %v9710_v56 }
 0x188   :  { %7347 = vmatmul.mubr.f32.gmra.mrb[32].mxu1 %v9729_v13  ;;  %v13750_v13 = vld [vmem:[#allocation57_spill] sm:$0xff] }
 0x189   :  { %7348 = vmatprep.mubr.f32.mxu1 %v9752_v47 }
 0x18a   :  { %7635 = vmatmul.mubr.f32.gmra.mrb[32].mxu0 %v9710_v56  ;;  %v13749_v56 = vld [vmem:[#allocation56_spill] sm:$0xff] }
 0x18b   :  { %7636 = vmatprep.mubr.f32.mxu0 %v9734_v36 }
 0x18c   :  { %7349 = vmatmul.mubr.f32.gmra.mrb[34].mxu1 %v9752_v47  ;;  %v13752_v47 = vld [vmem:[#allocation59_spill] sm:$0xff] }
 0x18d   :  { %7350 = vmatprep.mubr.f32.mxu1 %v13747_v11 }
 0x18e   :  { %7637 = vmatmul.mubr.f32.gmra.mrb[34].mxu0 %v9734_v36  ;;  %v13751_v36 = vld [vmem:[#allocation58_spill] sm:$0xff] }
 0x18f   :  { %7638 = vmatprep.mubr.f32.mxu0 %v9754_v59 }
 0x190   :  { %7351 = vmatmul.mubr.f32.gmra.mrb[36].mxu1 %v13747_v11 }
 0x191   :  { %7352 = vmatprep.mubr.f32.mxu1 %v13748_v60 }
 0x192   :  { %7639 = vmatmul.mubr.f32.gmra.mrb[36].mxu0 %v9754_v59  ;;  %v13753_v59 = vld [vmem:[#allocation60_spill] sm:$0xff] }
 0x193   :  { %7640 = vmatprep.mubr.f32.mxu0 %v9762_v14 }
 0x194   :  { %7353 = vmatmul.mubr.f32.gmra.mrb[38].mxu1 %v13748_v60 }
 0x195   :  { %7354 = vmatprep.mubr.f32.mxu1 %v13749_v56 }
 0x196   :  { %7641 = vmatmul.mubr.f32.gmra.mrb[38].mxu0 %v9762_v14  ;;  %v13754_v14 = vld [vmem:[#allocation61_spill] sm:$0xff] }
 0x197   :  { %7642 = vmatprep.mubr.f32.mxu0 %v9779_v51 }
 0x198   :  { %7355 = vmatmul.mubr.f32.gmra.mrb[40].mxu1 %v13749_v56  ;;  %v10387_v56 = vpop.permute.xlu1 %2824 }
 0x199   :  { %7356 = vmatprep.mubr.f32.mxu1 %v13750_v13 }
 0x19a   :  { %7643 = vmatmul.mubr.f32.gmra.mrb[40].mxu0 %v9779_v51  ;;  %v13755_v51 = vld [vmem:[#allocation62_spill] sm:$0xff] }
 0x19b   :  { %7644 = vmatprep.mubr.f32.mxu0 %v9795_v55 }
 0x19c   :  { %7357 = vmatmul.mubr.f32.gmra.mrb[42].mxu1 %v13750_v13 }
 0x19d   :  { %7358 = vmatprep.mubr.f32.mxu1 %v13751_v36 }
 0x19e   :  { %7645 = vmatmul.mubr.f32.gmra.mrb[42].mxu0 %v9795_v55  ;;  %v13756_v55 = vld [vmem:[#allocation63_spill] sm:$0xff] }
 0x19f   :  { %7646 = vmatprep.mubr.f32.mxu0 %v9806_v35 }
 0x1a0   :  { %7359 = vmatmul.mubr.f32.gmra.mrb[44].mxu1 %v13751_v36 }
 0x1a1   :  { %7360 = vmatprep.mubr.f32.mxu1 %v13752_v47 }
 0x1a2   :  { %7647 = vmatmul.mubr.f32.gmra.mrb[44].mxu0 %v9806_v35 }
 0x1a3   :  { %7648 = vmatprep.mubr.f32.mxu0 %v9813_v17 }
 0x1a4   :  { %7361 = vmatmul.mubr.f32.gmra.mrb[46].mxu1 %v13752_v47 }
 0x1a5   :  { %7362 = vmatprep.mubr.f32.mxu1 %v13753_v59 }
 0x1a6   :  { %7649 = vmatmul.mubr.f32.gmra.mrb[46].mxu0 %v9813_v17 }
 0x1a7   :  { %7650 = vmatprep.mubr.f32.mxu0 %v9826_v46 }
 0x1a8   :  { %7363 = vmatmul.mubr.f32.gmra.mrb[48].mxu1 %v13753_v59 }
 0x1a9   :  { %7364 = vmatprep.mubr.f32.mxu1 %v13754_v14 }
 0x1aa   :  { %7651 = vmatmul.mubr.f32.gmra.mrb[48].mxu0 %v9826_v46  ;;  %v2816_v46 = vpop.permute.xlu0 %2815 }
 0x1ab   :  { %7652 = vmatprep.mubr.f32.mxu0 %v9839_v50 }
 0x1ac   :  { %7365 = vmatmul.mubr.f32.gmra.mrb[50].mxu1 %v13754_v14 }
 0x1ad   :  { %7366 = vmatprep.mubr.f32.mxu1 %v13755_v51 }
 0x1ae   :  { %7653 = vmatmul.mubr.f32.gmra.mrb[50].mxu0 %v9839_v50 }
 0x1af   :  { %7654 = vmatprep.mubr.f32.mxu0 %v9850_v48 }
 0x1b0   :  { %7367 = vmatmul.mubr.f32.gmra.mrb[52].mxu1 %v13755_v51 }
 0x1b1   :  { %7368 = vmatprep.mubr.f32.mxu1 %v13756_v55 }
 0x1b2   :  { %7655 = vmatmul.mubr.f32.gmra.mrb[52].mxu0 %v9850_v48  ;;  %v2910_v48 = vlaneseq }
 0x1b3   :  { %7656 = vmatprep.mubr.f32.mxu0 %v9861_v10 }
 0x1b4   :  { %7369 = vmatmul.mubr.f32.gmra.mrb[54].mxu1 %v13756_v55  ;;  %v10313_v35 = vshrl.u32 %v2910_v48, 7 }
 0x1b5   :  { %7370 = vmatprep.mubr.f32.mxu1 %v9879_v6 }
 0x1b6   :  { %7657 = vmatmul.mubr.f32.gmra.mrb[54].mxu0 %v9861_v10  ;;  %v2912_v17 = vsub.s32 0, %v10313_v35  ;;  %v2813_v10 = vld [vmem:[%s13310_s3] sm:$0x3]  ;;  %v10337_v12 = vadd.s32 16, %v10313_v35  ;;  %v10340_v7 = vadd.s32 24, %v10313_v35  ;;  %v10343_v15 = vadd.s32 32, %v10313_v35 }
 0x1b7   :  { %7658 = vmatprep.mubr.f32.mxu0 %v9867_v9  ;;  %v10346_v8 = vadd.s32 40, %v10313_v35  ;;  %v10349_v21 = vadd.s32 48, %v10313_v35  ;;  %v10352_v23 = vadd.s32 56, %v10313_v35  ;;  %v10355_v32 = vadd.s32 64, %v10313_v35 }
 0x1b8   :  { %7371 = vmatmul.mubr.f32.gmra.mrb[56].mxu1 %v9879_v6  ;;  %v10319_v50 = vrot.slane %v2813_v10, %v2912_v17  ;;  %v10358_v18 = vadd.s32 72, %v10313_v35  ;;  %v10361_v29 = vadd.s32 80, %v10313_v35  ;;  %v10373_v22 = vadd.s32 88, %v10313_v35 }
 0x1b9   :  { %7372 = vmatprep.mubr.f32.mxu1 %v9892_v57  ;;  %v10376_v19 = vadd.s32 96, %v10313_v35  ;;  %v10379_v4 = vadd.s32 104, %v10313_v35  ;;  %v10382_v30 = vadd.s32 112, %v10313_v35  ;;  %v10385_v60 = vadd.s32 120, %v10313_v35 }
 0x1ba   :  { %7659 = vmatmul.mubr.f32.gmra.mrb[56].mxu0 %v9867_v9  ;;  %vm2918_vm1 = vcmp.eq.s32.totalorder %v2816_v46, %v10319_v50  ;;  %vm2922_vm7 = vcmp.eq.s32.totalorder %v10334_v40, %v10319_v50  ;;  %vm2924_vm10 = vcmp.eq.s32.totalorder %v10387_v56, %v10319_v50 }
 0x1bb   :  { %7660 = vmatprep.mubr.f32.mxu0 %v9883_v43  ;;  %vm10366_vm6 = vmxor %vm2918_vm1, %vm8793_vm5 }
 0x1bc   :  { %7373 = vmatmul.mubr.f32.gmra.mrb[58].mxu1 %v9892_v57  ;;  %vm10449_vm13 = vmxor %vm2922_vm7, %vm8793_vm5 }
 0x1bd   :  { %7374 = vmatprep.mubr.f32.mxu1 %v9900_v33 }
 0x1be   :  { %7661 = vmatmul.mubr.f32.gmra.mrb[58].mxu0 %v9883_v43 }
 0x1bf   :  { %7662 = vmatprep.mubr.f32.mxu0 %v9894_v20 }
 0x1c0   :  { %7375 = vmatmul.mubr.f32.gmra.mrb[60].mxu1 %v9900_v33 }
 0x1c1   :  { %7376 = vmatprep.mubr.f32.mxu1 %v9907_v25 }
 0x1c2   :  { %7663 = vmatmul.mubr.f32.gmra.mrb[60].mxu0 %v9894_v20  ;;  %v10321_v20 = vand.u32 127, %v2910_v48 }
 0x1c3   :  { %7664 = vmatprep.mubr.f32.mxu0 %v9902_v54 }
 0x1c4   :  { %7377 = vmatmul.mubr.f32.gmra.mrb[62].mxu1 %v9907_v25  ;;  %vm4165_vm2 = vcmp.lt.s32.totalorder %v10321_v20, 16  ;;  %vm3896_vm3 = vcmp.eq.s32.totalorder %v10313_v35, %v10321_v20  ;;  %v10330_v25 = vadd.s32 8, %v10313_v35  ;;  %vm3900_vm11 = vcmp.eq.s32.totalorder %v10337_v12, %v10321_v20 }
 0x1c5   :  { %vm3902_vm15 = vcmp.eq.s32.totalorder %v10340_v7, %v10321_v20  ;;  %vm3904_vm0 = vcmp.eq.s32.totalorder %v10343_v15, %v10321_v20 }
 0x1c6   :  { %7665 = vmatmul.mubr.f32.gmra.mrb[62].mxu0 %v9902_v54  ;;  %v10324_v54 = vpop.permute.xlu0 %2818  ;;  %vm3898_vm8 = vcmp.eq.s32.totalorder %v10330_v25, %v10321_v20 }
 0x1c7   :  { %vm2920_vm4 = vcmp.eq.s32.totalorder %v10324_v54, %v10319_v50 }
 0x1c8   :  { %vm10413_vm9 = vmxor %vm2920_vm4, %vm8793_vm5 }
 0x21b   :  { %v1437_v9 = vpop.f32.mrb[0].mxu1 }
 0x21c   :  { %v1439_v57 = vpop.f32.mrb[1].mxu1 }
 0x21d   :  { %v2559_v6 = vpop.f32.mrb[0].mxu0 }
 0x21e   :  { %v7858_v43 = vadd.f32 %v2559_v6, %v1437_v9  ;;  %v2561_v33 = vpop.f32.mrb[1].mxu0 }
 0x21f   :  { %v1445_v3 = vpop.f32.mrb[2].mxu1 }
 0x220   :  { %v3046_v28 = vsub.f32 1.2, %v7858_v43  ;;  %v3174_v27 = vadd.f32 0.2, %v7858_v43  ;;  %v1447_v31 = vpop.f32.mrb[3].mxu1 }
 0x221   :  { %v2566_v24 = vpop.f32.mrb[2].mxu0  ;;  %v7026_v1 = vadd.f32 -0.2, %v7858_v43  ;;  %v6962_v63 = vadd.f32 -0.8, %v7858_v43 }
 0x222   :  { %v7859_v62 = vadd.f32 %v2566_v24, %v1445_v3  ;;  %v2568_v0 = vpop.f32.mrb[3].mxu0  ;;  %v3238_v38 = vmax.f32 %v3174_v27, 0.0  ;;  %v3110_v53 = vmax.f32 %v3046_v28, 0.0  ;;  %v10420_v24 = vpop.permute.xlu0 %2827 }
 0x223   :  { %v1453_v52 = vpop.f32.mrb[4].mxu1  ;;  %vm2926_vm12 = vcmp.eq.s32.totalorder %v10420_v24, %v10319_v50 }
 0x224   :  { %v3048_v16 = vsub.f32 1.2, %v7859_v62  ;;  %v3558_v37 = vmul.f32 256.0, %v3238_v38  ;;  %v3302_v45 = vmul.f32 -256.0, %v3110_v53  ;;  %v3176_v34 = vadd.f32 0.2, %v7859_v62 }
 0x225   :  { %v2573_v42 = vpop.f32.mrb[4].mxu0  ;;  %v1455_v61 = vpop.f32.mrb[5].mxu1  ;;  %v7028_v41 = vadd.f32 -0.2, %v7859_v62  ;;  %v6964_v11 = vadd.f32 -0.8, %v7859_v62 }
 0x226   :  { %v7860_v44 = vadd.f32 %v2573_v42, %v1453_v52  ;;  %v2575_v58 = vpop.f32.mrb[5].mxu0  ;;  %v3686_v49 = vmul.f32 %v7026_v1, %v3558_v37  ;;  %v3430_v39 = vmul.f32 %v6962_v63, %v3302_v45  ;;  %v3240_v26 = vmax.f32 %v3176_v34, 0.0 }
 0x227   :  { %v3112_v2 = vmax.f32 %v3048_v16, 0.0  ;;  %v1461_v14 = vpop.f32.mrb[6].mxu1 }
 0x228   :  { %v3050_v13 = vsub.f32 1.2, %v7860_v44  ;;  %v3750_v36 = vsel %vm10366_vm6, %v3686_v49, 0.0  ;;  %v3494_v47 = vsel %vm2918_vm1, %v3430_v39, 0.0  ;;  %v3560_v59 = vmul.f32 256.0, %v3240_v26  ;;  %v1463_v9 = vpop.f32.mrb[7].mxu1  ;;  %v10453_v26 = vpop.permute.xlu1 %2830  ;;  %vm10488_vm1 = vmxor %vm2924_vm10, %vm8793_vm5 }
 0x229   :  { %v2580_v51 = vpop.f32.mrb[6].mxu0  ;;  %v10395_v55 = vsel %vm4165_vm2, %v3750_v36, -1e+30  ;;  %v3960_v48 = vsel %vm3896_vm3, 0.0, %v3494_v47  ;;  %v3304_v17 = vmul.f32 -256.0, %v3112_v2  ;;  %vm2928_vm14 = vcmp.eq.s32.totalorder %v10453_v26, %v10319_v50  ;;  %v10498_v39 = vpop.permute.xlu0 %2833  ;;  %vm2990_vm3 = vmxor %vm2926_vm12, %vm8793_vm5 }
 0x22a   :  { %v10402_v10 = vadd.f32 %v2580_v51, %v1461_v14  ;;  %v2582_v46 = vpop.f32.mrb[7].mxu0  ;;  %v5451_v6 = vmax.f32 %v10395_v55, -1e+30  ;;  %v10407_v43 = vsel %vm4165_vm2, %v3960_v48, -1e+30  ;;  %v3688_v57 = vmul.f32 %v7028_v41, %v3560_v59  ;;  %vm10544_vm6 = vmxor %vm2928_vm14, %vm8793_vm5 }
 0x22b   :  { %v4586_v33 = vmax.f32 %v10407_v43, -1e+30  ;;  %v3432_v28 = vmul.f32 %v6964_v11, %v3304_v17  ;;  %v3178_v27 = vadd.f32 0.2, %v7860_v44  ;;  %v7030_v3 = vadd.f32 -0.2, %v7860_v44 }
 0x22c   :  { %v3052_v62 = vsub.f32 1.2, %v10402_v10  ;;  %5452 = vmax.xlane.f32.xlu1 %v5451_v6  ;;  %v3752_v31 = vsel %vm10413_vm9, %v3688_v57, 0.0  ;;  %v3114_v0 = vmax.f32 %v3050_v13, 0.0  ;;  %v6966_v38 = vadd.f32 -0.8, %v7860_v44 }
 0x22d   :  { %v2587_v53 = vpop.f32.mrb[8].mxu0  ;;  %4587 = vmax.xlane.f32.xlu0 %v4586_v33  ;;  %v1469_v1 = vpop.f32.mrb[8].mxu1  ;;  %v10427_v63 = vsel %vm4165_vm2, %v3752_v31, -1e+30  ;;  %v3496_v16 = vsel %vm2920_vm4, %v3432_v28, 0.0  ;;  %v3242_v37 = vmax.f32 %v3178_v27, 0.0  ;;  %vm2930_vm4 = vcmp.eq.s32.totalorder %v10498_v39, %v10319_v50 }
 0x22e   :  { %v7862_v45 = vadd.f32 %v2587_v53, %v1469_v1  ;;  %v1471_v34 = vpop.f32.mrb[9].mxu1  ;;  %v2589_v5 = vpop.f32.mrb[9].mxu0  ;;  %v5454_v52 = vmax.f32 %v10427_v63, -1e+30  ;;  %v3962_v42 = vsel %vm3898_vm8, 0.0, %v3496_v16  ;;  %v3306_v44 = vmul.f32 -256.0, %v3114_v0 }
 0x22f   :  { %v10442_v54 = vsel %vm4165_vm2, %v3962_v42, -1e+30  ;;  %v3562_v61 = vmul.f32 256.0, %v3242_v37  ;;  %v3180_v58 = vadd.f32 0.2, %v10402_v10  ;;  %v3116_v49 = vmax.f32 %v3052_v62, 0.0 }
 0x230   :  { %v3054_v25 = vsub.f32 1.2, %v7862_v45  ;;  %v4589_v41 = vmax.f32 %v10442_v54, -1e+30  ;;  %v3434_v2 = vmul.f32 %v6966_v38, %v3306_v44  ;;  %v7032_v11 = vadd.f32 -0.2, %v10402_v10 }
 0x231   :  { %v2594_v13 = vpop.f32.mrb[10].mxu0  ;;  %5455 = vmax.xlane.f32.xlu0 %v5454_v52  ;;  %v1477_v36 = vpop.f32.mrb[10].mxu1  ;;  %v3690_v47 = vmul.f32 %v7030_v3, %v3562_v61  ;;  %v3244_v59 = vmax.f32 %v3180_v58, 0.0  ;;  %v3182_v14 = vadd.f32 0.2, %v7862_v45  ;;  %v3308_v51 = vmul.f32 -256.0, %v3116_v49 }
 0x232   :  { %4590 = vmax.xlane.f32.xlu1 %v4589_v41  ;;  %v10457_v48 = vadd.f32 %v2594_v13, %v1477_v36  ;;  %v1479_v17 = vpop.f32.mrb[11].mxu1  ;;  %v2596_v9 = vpop.f32.mrb[11].mxu0  ;;  %v3498_v46 = vsel %vm2922_vm7, %v3434_v2, 0.0  ;;  %v7034_v6 = vadd.f32 -0.2, %v7862_v45  ;;  %v3118_v57 = vmax.f32 %v3054_v25, 0.0 }
 0x233   :  { %v3754_v35 = vsel %vm10449_vm13, %v3690_v47, 0.0  ;;  %v3964_v33 = vsel %vm3900_vm11, 0.0, %v3498_v46  ;;  %v3564_v28 = vmul.f32 256.0, %v3244_v59  ;;  %v3246_v27 = vmax.f32 %v3182_v14, 0.0  ;;  %v1485_v38 = vpop.f32.mrb[12].mxu1  ;;  %vm2994_vm11 = vmxor %vm2930_vm4, %vm8793_vm5 }
 0x234   :  { %v3056_v3 = vsub.f32 1.2, %v10457_v48  ;;  %v10472_v40 = vsel %vm4165_vm2, %v3754_v35, -1e+30  ;;  %v10476_v62 = vsel %vm4165_vm2, %v3964_v33, -1e+30  ;;  %vm3906_vm9 = vcmp.eq.s32.totalorder %v10346_v8, %v10321_v20 }
 0x235   :  { %v2601_v31 = vpop.f32.mrb[12].mxu0  ;;  %v5457_v0 = vmax.f32 %v10472_v40, -1e+30  ;;  %v4592_v12 = vmax.f32 %v10476_v62, -1e+30  ;;  %v3692_v53 = vmul.f32 %v7032_v11, %v3564_v28  ;;  %v1487_v37 = vpop.f32.mrb[13].mxu1  ;;  %vm3910_vm13 = vcmp.eq.s32.totalorder %v10352_v23, %v10321_v20 }
 0x236   :  { %v10492_v16 = vadd.f32 %v2601_v31, %v1485_v38  ;;  %v2603_v34 = vpop.f32.mrb[13].mxu0  ;;  %v3566_v5 = vmul.f32 256.0, %v3246_v27  ;;  %v6968_v52 = vadd.f32 -0.8, %v10402_v10  ;;  %v3310_v42 = vmul.f32 -256.0, %v3118_v57  ;;  %v10526_v27 = vpop.permute.xlu1 %2836 }
 0x237   :  { %5458 = vmax.xlane.f32.xlu1 %v5457_v0  ;;  %4593 = vmax.xlane.f32.xlu0 %v4592_v12  ;;  %v3756_v44 = vsel %vm10488_vm1, %v3692_v53, 0.0  ;;  %v6970_v61 = vadd.f32 -0.8, %v7862_v45  ;;  %v3184_v58 = vadd.f32 0.2, %v10457_v48  ;;  %v3120_v49 = vmax.f32 %v3056_v3, 0.0 }
 0x238   :  { %v3058_v25 = vsub.f32 1.2, %v10492_v16  ;;  %v10503_v41 = vsel %vm4165_vm2, %v3756_v44, -1e+30  ;;  %v3694_v2 = vmul.f32 %v7034_v6, %v3566_v5  ;;  %v3436_v10 = vmul.f32 %v6968_v52, %v3308_v51  ;;  %v1493_v13 = vpop.f32.mrb[14].mxu1 }
 0x239   :  { %v2608_v11 = vpop.f32.mrb[14].mxu0  ;;  %v5460_v45 = vmax.f32 %v10503_v41, -1e+30  ;;  %v3438_v36 = vmul.f32 %v6970_v61, %v3310_v42  ;;  %v3248_v47 = vmax.f32 %v3184_v58, 0.0  ;;  %v3312_v59 = vmul.f32 -256.0, %v3120_v49  ;;  %v1495_v17 = vpop.f32.mrb[15].mxu1 }
 0x23a   :  { %v10510_v14 = vadd.f32 %v2608_v11, %v1493_v13  ;;  %v2610_v9 = vpop.f32.mrb[15].mxu0  ;;  %v3758_v46 = vsel %vm2990_vm3, %v3694_v2, 0.0  ;;  %v3500_v51 = vsel %vm2924_vm10, %v3436_v10, 0.0  ;;  %v7036_v6 = vadd.f32 -0.2, %v10457_v48  ;;  %v10561_v49 = vpop.permute.xlu0 %2839 }
 0x23b   :  { %5461 = vmax.xlane.f32.xlu0 %v5460_v45  ;;  %v10518_v57 = vsel %vm4165_vm2, %v3758_v46, -1e+30  ;;  %v3966_v35 = vsel %vm3902_vm15, 0.0, %v3500_v51  ;;  %v3502_v33 = vsel %vm2926_vm12, %v3438_v36, 0.0  ;;  %v3568_v28 = vmul.f32 256.0, %v3248_v47  ;;  %v1501_v7 = vpop.f32.mrb[16].mxu1 }
 0x23c   :  { %v3060_v56 = vsub.f32 1.2, %v10510_v14  ;;  %v5463_v3 = vmax.f32 %v10518_v57, -1e+30  ;;  %v10532_v31 = vsel %vm4165_vm2, %v3966_v35, -1e+30  ;;  %vm2932_vm7 = vcmp.eq.s32.totalorder %v10526_v27, %v10319_v50 }
 0x23d   :  { %v2615_v0 = vpop.f32.mrb[16].mxu0  ;;  %v4595_v12 = vmax.f32 %v10532_v31, -1e+30  ;;  %v3968_v24 = vsel %vm3904_vm0, 0.0, %v3502_v33  ;;  %v3696_v38 = vmul.f32 %v7036_v6, %v3568_v28  ;;  %v3122_v53 = vmax.f32 %v3058_v25, 0.0  ;;  %v1503_v34 = vpop.f32.mrb[17].mxu1 }
 0x23e   :  { %5464 = vmax.xlane.f32.xlu1 %v5463_v3  ;;  %v10548_v37 = vadd.f32 %v2615_v0, %v1501_v7  ;;  %v2617_v5 = vpop.f32.mrb[17].mxu0  ;;  %v10552_v15 = vsel %vm4165_vm2, %v3968_v24, -1e+30  ;;  %v3186_v52 = vadd.f32 0.2, %v10492_v16  ;;  %v3124_v11 = vmax.f32 %v3060_v56, 0.0  ;;  %v10582_v3 = vpop.permute.xlu1 %2842 }
 0x23f   :  { %4596 = vmax.xlane.f32.xlu0 %v4595_v12  ;;  %v4598_v42 = vmax.f32 %v10552_v15, -1e+30  ;;  %v3760_v44 = vsel %vm10544_vm6, %v3696_v38, 0.0  ;;  %v7038_v61 = vadd.f32 -0.2, %v10492_v16  ;;  %v3314_v58 = vmul.f32 -256.0, %v3122_v53 }
 0x240   :  { %v3062_v25 = vsub.f32 1.2, %v10548_v37  ;;  %v10566_v2 = vsel %vm4165_vm2, %v3760_v44, -1e+30  ;;  %v3250_v10 = vmax.f32 %v3186_v52, 0.0  ;;  %vm2934_vm8 = vcmp.eq.s32.totalorder %v10561_v49, %v10319_v50  ;;  %v1509_v36 = vpop.f32.mrb[18].mxu1 }
 0x241   :  { %v2622_v45 = vpop.f32.mrb[18].mxu0  ;;  %v5466_v13 = vmax.f32 %v10566_v2, -1e+30  ;;  %v6972_v47 = vadd.f32 -0.8, %v10457_v48  ;;  %vm3908_vm10 = vcmp.eq.s32.totalorder %v10349_v21, %v10321_v20  ;;  %v1511_v9 = vpop.f32.mrb[19].mxu1  ;;  %vm2936_vm12 = vcmp.eq.s32.totalorder %v10582_v3, %v10319_v50  ;;  %vm2998_vm0 = vmxor %vm2934_vm8, %vm8793_vm5 }
 0x242   :  { %4599 = vmax.xlane.f32.xlu1 %v4598_v42  ;;  %v10576_v17 = vadd.f32 %v2622_v45, %v1509_v36  ;;  %v2624_v46 = vpop.f32.mrb[19].mxu0  ;;  %v3570_v51 = vmul.f32 256.0, %v3250_v10  ;;  %v6974_v6 = vadd.f32 -0.8, %v10492_v16  ;;  %v3316_v35 = vmul.f32 -256.0, %v3124_v11 }
 0x243   :  { %5467 = vmax.xlane.f32.xlu0 %v5466_v13  ;;  %v3440_v33 = vmul.f32 %v6972_v47, %v3312_v59  ;;  %v3188_v28 = vadd.f32 0.2, %v10510_v14  ;;  %v7040_v48 = vadd.f32 -0.2, %v10510_v14  ;;  %v3190_v56 = vadd.f32 0.2, %v10548_v37 }
 0x244   :  { %v3064_v0 = vsub.f32 1.2, %v10576_v17  ;;  %v3698_v12 = vmul.f32 %v7038_v61, %v3570_v51  ;;  %v3442_v7 = vmul.f32 %v6974_v6, %v3314_v58  ;;  %v7042_v24 = vadd.f32 -0.2, %v10548_v37  ;;  %v1517_v38 = vpop.f32.mrb[20].mxu1 }
 0x245   :  { %v2629_v16 = vpop.f32.mrb[20].mxu0  ;;  %v3504_v59 = vsel %vm2928_vm14, %v3440_v33, 0.0  ;;  %v3252_v53 = vmax.f32 %v3188_v28, 0.0  ;;  %v3254_v1 = vmax.f32 %v3190_v56, 0.0  ;;  %v3126_v34 = vmax.f32 %v3062_v25, 0.0  ;;  %v1519_v44 = vpop.f32.mrb[21].mxu1  ;;  %vm10627_vm14 = vmxor %vm2932_vm7, %vm8793_vm5 }
 0x246   :  { %v3762_v5 = vsel %vm2994_vm11, %v3698_v12, 0.0  ;;  %v3970_v52 = vsel %vm3906_vm9, 0.0, %v3504_v59  ;;  %v10596_v42 = vadd.f32 %v2629_v16, %v1517_v38  ;;  %v2631_v61 = vpop.f32.mrb[21].mxu0  ;;  %v3506_v58 = vsel %vm2930_vm4, %v3442_v7, 0.0  ;;  %v10645_v38 = vpop.permute.xlu0 %2845  ;;  %vm10693_vm4 = vmxor %vm2936_vm12, %vm8793_vm5 }
 0x247   :  { %v10605_v26 = vsel %vm4165_vm2, %v3762_v5, -1e+30  ;;  %v10609_v25 = vsel %vm4165_vm2, %v3970_v52, -1e+30  ;;  %v3972_v8 = vsel %vm3908_vm10, 0.0, %v3506_v58  ;;  %v3572_v10 = vmul.f32 256.0, %v3252_v53 }
 0x248   :  { %v5469_v11 = vmax.f32 %v10605_v26, -1e+30  ;;  %v4601_v39 = vmax.f32 %v10609_v25, -1e+30  ;;  %v3066_v45 = vsub.f32 1.2, %v10596_v42  ;;  %vm3912_vm15 = vcmp.eq.s32.totalorder %v10355_v32, %v10321_v20 }
 0x249   :  { %v10621_v13 = vsel %vm4165_vm2, %v3972_v8, -1e+30  ;;  %v2636_v36 = vpop.f32.mrb[22].mxu0  ;;  %v3700_v47 = vmul.f32 %v7040_v48, %v3572_v10  ;;  %v1525_v9 = vpop.f32.mrb[22].mxu1  ;;  %v3574_v46 = vmul.f32 256.0, %v3254_v1  ;;  %v3318_v21 = vmul.f32 -256.0, %v3126_v34 }
 0x24a   :  { %5470 = vmax.xlane.f32.xlu1 %v5469_v11  ;;  %4602 = vmax.xlane.f32.xlu0 %v4601_v39  ;;  %v4604_v6 = vmax.f32 %v10621_v13, -1e+30  ;;  %v10632_v33 = vadd.f32 %v2636_v36, %v1525_v9  ;;  %v1527_v28 = vpop.f32.mrb[23].mxu1  ;;  %v2638_v56 = vpop.f32.mrb[23].mxu0  ;;  %v6976_v48 = vadd.f32 -0.8, %v10510_v14  ;;  %vm2938_vm1 = vcmp.eq.s32.totalorder %v10645_v38, %v10319_v50 }
 0x24b   :  { %v3764_v12 = vsel %vm10627_vm14, %v3700_v47, 0.0  ;;  %v3702_v7 = vmul.f32 %v7042_v24, %v3574_v46  ;;  %v6978_v16 = vadd.f32 -0.8, %v10548_v37  ;;  %v3192_v59 = vadd.f32 0.2, %v10576_v17  ;;  %v1533_v52 = vpop.f32.mrb[24].mxu1 }
 0x24c   :  { %v10649_v14 = vsel %vm4165_vm2, %v3764_v12, -1e+30  ;;  %v3068_v53 = vsub.f32 1.2, %v10632_v33  ;;  %v3444_v1 = vmul.f32 %v6976_v48, %v3316_v35  ;;  %v7044_v24 = vadd.f32 -0.2, %v10576_v17 }
 0x24d   :  { %v5472_v37 = vmax.f32 %v10649_v14, -1e+30  ;;  %v3766_v34 = vsel %vm2998_vm0, %v3702_v7, 0.0  ;;  %v2643_v5 = vpop.f32.mrb[24].mxu0  ;;  %v3446_v44 = vmul.f32 %v6978_v16, %v3318_v21  ;;  %v3256_v61 = vmax.f32 %v3192_v59, 0.0  ;;  %v1535_v10 = vpop.f32.mrb[25].mxu1 }
 0x24e   :  { %4605 = vmax.xlane.f32.xlu1 %v4604_v6  ;;  %v10658_v58 = vsel %vm4165_vm2, %v3766_v34, -1e+30  ;;  %v3508_v35 = vsel %vm2932_vm7, %v3444_v1, 0.0  ;;  %v10663_v8 = vadd.f32 %v2643_v5, %v1533_v52  ;;  %v2645_v11 = vpop.f32.mrb[25].mxu0  ;;  %v3128_v39 = vmax.f32 %v3064_v0, 0.0  ;;  %v10709_v5 = vpop.permute.xlu0 %2851 }
 0x24f   :  { %5473 = vmax.xlane.f32.xlu0 %v5472_v37  ;;  %v5475_v36 = vmax.f32 %v10658_v58, -1e+30  ;;  %v3974_v47 = vsel %vm3910_vm13, 0.0, %v3508_v35  ;;  %v3510_v9 = vsel %vm2934_vm8, %v3446_v44, 0.0  ;;  %v3576_v27 = vmul.f32 256.0, %v3256_v61  ;;  %v1541_v56 = vpop.f32.mrb[26].mxu1  ;;  %v10711_v52 = vpop.permute.xlu1 %2848  ;;  %vm3002_vm8 = vmxor %vm2938_vm1, %vm8793_vm5 }
 0x250   :  { %v10676_v46 = vsel %vm4165_vm2, %v3974_v47, -1e+30  ;;  %v3070_v21 = vsub.f32 1.2, %v10663_v8  ;;  %v3976_v0 = vsel %vm3912_vm15, 0.0, %v3510_v9  ;;  %v3320_v51 = vmul.f32 -256.0, %v3128_v39 }
 0x251   :  { %v4607_v6 = vmax.f32 %v10676_v46, -1e+30  ;;  %v10685_v23 = vsel %vm4165_vm2, %v3976_v0, -1e+30  ;;  %v2650_v49 = vpop.f32.mrb[26].mxu0  ;;  %v3704_v28 = vmul.f32 %v7044_v24, %v3576_v27  ;;  %vm3914_vm3 = vcmp.eq.s32.totalorder %v10358_v18, %v10321_v20  ;;  %v1543_v7 = vpop.f32.mrb[27].mxu1 }
 0x252   :  { %5476 = vmax.xlane.f32.xlu1 %v5475_v36  ;;  %v4610_v48 = vmax.f32 %v10685_v23, -1e+30  ;;  %v10698_v12 = vadd.f32 %v2650_v49, %v1541_v56  ;;  %v2652_v16 = vpop.f32.mrb[27].mxu0  ;;  %v3194_v59 = vadd.f32 0.2, %v10596_v42  ;;  %vm3916_vm6 = vcmp.eq.s32.totalorder %v10361_v29, %v10321_v20 }
 0x253   :  { %4608 = vmax.xlane.f32.xlu0 %v4607_v6  ;;  %v3768_v1 = vsel %vm10693_vm4, %v3704_v28, 0.0  ;;  %v7046_v24 = vadd.f32 -0.2, %v10596_v42  ;;  %v6980_v37 = vadd.f32 -0.8, %v10576_v17  ;;  %v3130_v34 = vmax.f32 %v3066_v45, 0.0 }
 0x254   :  { %v10715_v44 = vsel %vm4165_vm2, %v3768_v1, -1e+30  ;;  %v3072_v61 = vsub.f32 1.2, %v10698_v12  ;;  %v3258_v35 = vmax.f32 %v3194_v59, 0.0  ;;  %v3132_v10 = vmax.f32 %v3068_v53, 0.0 }
 0x255   :  { %v5478_v11 = vmax.f32 %v10715_v44, -1e+30  ;;  %v2657_v39 = vpop.f32.mrb[28].mxu0  ;;  %v3448_v36 = vmul.f32 %v6980_v37, %v3320_v51  ;;  %v1549_v17 = vpop.f32.mrb[28].mxu1  ;;  %v3322_v47 = vmul.f32 -256.0, %v3130_v34  ;;  %v3134_v9 = vmax.f32 %v3070_v21, 0.0 }
 0x256   :  { %4611 = vmax.xlane.f32.xlu1 %v4610_v48  ;;  %v3578_v45 = vmul.f32 256.0, %v3258_v35  ;;  %v10719_v27 = vadd.f32 %v2657_v39, %v1549_v17  ;;  %v1551_v0 = vpop.f32.mrb[29].mxu1  ;;  %v2659_v6 = vpop.f32.mrb[29].mxu0  ;;  %v6982_v49 = vadd.f32 -0.8, %v10596_v42  ;;  %v3324_v28 = vmul.f32 -256.0, %v3132_v10 }
 0x257   :  { %vm2942_vm7 = vcmp.eq.s32.totalorder %v10709_v5, %v10319_v50  ;;  %5479 = vmax.xlane.f32.xlu0 %v5478_v11  ;;  %v3512_v53 = vsel %vm2936_vm12, %v3448_v36, 0.0  ;;  %v3196_v51 = vadd.f32 0.2, %v10632_v33  ;;  %v7048_v21 = vadd.f32 -0.2, %v10632_v33  ;;  %v1557_v1 = vpop.f32.mrb[30].mxu1  ;;  %v10749_v39 = vpop.permute.xlu1 %2854 }
 0x258   :  { %v3326_v56 = vmul.f32 -256.0, %v3134_v9  ;;  %v3706_v32 = vmul.f32 %v7046_v24, %v3578_v45  ;;  %v3978_v48 = vsel %vm3914_vm3, 0.0, %v3512_v53  ;;  %v3074_v42 = vsub.f32 1.2, %v10719_v27  ;;  %v1559_v10 = vpop.f32.mrb[31].mxu1  ;;  %vm10792_vm14 = vmxor %vm2942_vm7, %vm8793_vm5 }
 0x259   :  { %v3450_v7 = vmul.f32 %v6982_v49, %v3322_v47  ;;  %vm2940_vm9 = vcmp.eq.s32.totalorder %v10711_v52, %v10319_v50  ;;  %v10741_v3 = vsel %vm4165_vm2, %v3978_v48, -1e+30  ;;  %v2664_v16 = vpop.f32.mrb[30].mxu0  ;;  %v3260_v59 = vmax.f32 %v3196_v51, 0.0 }
 0x25a   :  { %v3136_v18 = vmax.f32 %v3072_v61, 0.0  ;;  %v3770_v24 = vsel %vm3002_vm8, %v3706_v32, 0.0  ;;  %v4613_v37 = vmax.f32 %v10741_v3, -1e+30  ;;  %v10747_v35 = vadd.f32 %v2664_v16, %v1557_v1  ;;  %v2666_v11 = vpop.f32.mrb[31].mxu0  ;;  %vm3004_vm11 = vmxor %vm2940_vm9, %vm8793_vm5 }
 0x25b   :  { %v3514_v34 = vsel %vm2938_vm1, %v3450_v7, 0.0  ;;  %v10753_v36 = vsel %vm4165_vm2, %v3770_v24, -1e+30  ;;  %v3580_v17 = vmul.f32 256.0, %v3260_v59  ;;  %v3198_v47 = vadd.f32 0.2, %v10663_v8 }
 0x25c   :  { %v3980_v61 = vsel %vm3916_vm6, 0.0, %v3514_v34  ;;  %vm2944_vm10 = vcmp.eq.s32.totalorder %v10749_v39, %v10319_v50  ;;  %v5481_v38 = vmax.f32 %v10753_v36, -1e+30  ;;  %4614 = vmax.xlane.f32.xlu0 %v4613_v37  ;;  %v3076_v45 = vsub.f32 1.2, %v10747_v35  ;;  %v1565_v32 = vpop.f32.mrb[32].mxu1 }
 0x25d   :  { %v10764_v9 = vsel %vm4165_vm2, %v3980_v61, -1e+30  ;;  %v3708_v6 = vmul.f32 %v7048_v21, %v3580_v17  ;;  %v3262_v29 = vmax.f32 %v3198_v47, 0.0  ;;  %v7050_v49 = vadd.f32 -0.2, %v10663_v8  ;;  %v2671_v53 = vpop.f32.mrb[32].mxu0  ;;  %vm3008_vm0 = vmxor %vm2944_vm10, %vm8793_vm5 }
 0x25e   :  { %v4616_v0 = vmax.f32 %v10764_v9, -1e+30  ;;  %5482 = vmax.xlane.f32.xlu1 %v5481_v38  ;;  %v6984_v51 = vadd.f32 -0.8, %v10632_v33  ;;  %vm3918_vm12 = vcmp.eq.s32.totalorder %v10373_v22, %v10321_v20  ;;  %v2673_v48 = vpop.f32.mrb[33].mxu0  ;;  %vm3920_vm13 = vcmp.eq.s32.totalorder %v10376_v19, %v10321_v20  ;;  %v1567_v1 = vpop.f32.mrb[33].mxu1 }
 0x25f   :  { %v6986_v7 = vadd.f32 -0.8, %v10663_v8  ;;  %v3772_v21 = vsel %vm3004_vm11, %v3708_v6, 0.0  ;;  %v3582_v16 = vmul.f32 256.0, %v3262_v29  ;;  %v10779_v59 = vadd.f32 %v2671_v53, %v1565_v32  ;;  %v1573_v47 = vpop.f32.mrb[34].mxu1  ;;  %v10826_v22 = vpop.permute.xlu1 %2860 }
 0x260   :  { %v3200_v24 = vadd.f32 0.2, %v10698_v12  ;;  %v10784_v33 = vsel %vm4165_vm2, %v3772_v21, -1e+30  ;;  %v3452_v37 = vmul.f32 %v6984_v51, %v3324_v28  ;;  %v7052_v10 = vadd.f32 -0.2, %v10698_v12  ;;  %v2858_v51 = vpop.permute.xlu0 %2857 }
 0x261   :  { %v3454_v34 = vmul.f32 %v6986_v7, %v3326_v56  ;;  %v5484_v8 = vmax.f32 %v10784_v33, -1e+30  ;;  %v3710_v11 = vmul.f32 %v7050_v49, %v3582_v16  ;;  %v2678_v61 = vpop.f32.mrb[34].mxu0  ;;  %v3328_v38 = vmul.f32 -256.0, %v3136_v18  ;;  %v1575_v18 = vpop.f32.mrb[35].mxu1 }
 0x262   :  { %v3264_v17 = vmax.f32 %v3200_v24, 0.0  ;;  %4617 = vmax.xlane.f32.xlu1 %v4616_v0  ;;  %v3516_v28 = vsel %vm2940_vm9, %v3452_v37, 0.0  ;;  %v10802_v29 = vadd.f32 %v2678_v61, %v1573_v47  ;;  %v2680_v49 = vpop.f32.mrb[35].mxu0  ;;  %v3202_v53 = vadd.f32 0.2, %v10719_v27 }
 0x263   :  { %v3518_v56 = vsel %vm2942_vm7, %v3454_v34, 0.0  ;;  %5485 = vmax.xlane.f32.xlu0 %v5484_v8  ;;  %v3774_v32 = vsel %vm10792_vm14, %v3710_v11, 0.0  ;;  %v3982_v52 = vsel %vm3918_vm12, 0.0, %v3516_v28  ;;  %vm2946_vm15 = vcmp.eq.s32.totalorder %v2858_v51, %v10319_v50 }
 0x264   :  { %v3984_v5 = vsel %vm3920_vm13, 0.0, %v3518_v56  ;;  %v3584_v0 = vmul.f32 256.0, %v3264_v17  ;;  %v10816_v48 = vsel %vm4165_vm2, %v3774_v32, -1e+30  ;;  %v10820_v7 = vsel %vm4165_vm2, %v3982_v52, -1e+30  ;;  %vm3010_vm6 = vmxor %vm2946_vm15, %vm8793_vm5 }
 0x265   :  { %v10824_v21 = vsel %vm4165_vm2, %v3984_v5, -1e+30  ;;  %v5487_v19 = vmax.f32 %v10816_v48, -1e+30  ;;  %v4619_v16 = vmax.f32 %v10820_v7, -1e+30  ;;  %vm2948_vm1 = vcmp.eq.s32.totalorder %v10826_v22, %v10319_v50 }
 0x266   :  { %v4622_v1 = vmax.f32 %v10824_v21, -1e+30  ;;  %v3712_v24 = vmul.f32 %v7052_v10, %v3584_v0  ;;  %v3266_v37 = vmax.f32 %v3202_v53, 0.0  ;;  %v7054_v34 = vadd.f32 -0.2, %v10719_v27  ;;  %v2685_v8 = vpop.f32.mrb[36].mxu0  ;;  %vm3012_vm7 = vmxor %vm2948_vm1, %vm8793_vm5 }
 0x267   :  { %v6988_v11 = vadd.f32 -0.8, %v10698_v12  ;;  %5488 = vmax.xlane.f32.xlu1 %v5487_v19  ;;  %4620 = vmax.xlane.f32.xlu0 %v4619_v16  ;;  %vm3922_vm3 = vcmp.eq.s32.totalorder %v10379_v4, %v10321_v20  ;;  %v1581_v10 = vpop.f32.mrb[36].mxu1  ;;  %v2687_v17 = vpop.f32.mrb[37].mxu0  ;;  %v3138_v47 = vmax.f32 %v3074_v42, 0.0  ;;  %vm3924_vm4 = vcmp.eq.s32.totalorder %v10382_v30, %v10321_v20 }
 0x268   :  { %v3776_v61 = vsel %vm3008_vm0, %v3712_v24, 0.0  ;;  %v6990_v6 = vadd.f32 -0.8, %v10719_v27  ;;  %v3586_v56 = vmul.f32 256.0, %v3266_v37  ;;  %v10848_v12 = vadd.f32 %v2685_v8, %v1581_v10  ;;  %v1583_v49 = vpop.f32.mrb[37].mxu1 }
 0x269   :  { %v10846_v28 = vsel %vm4165_vm2, %v3776_v61, -1e+30  ;;  %v3456_v18 = vmul.f32 %v6988_v11, %v3328_v38  ;;  %v3330_v32 = vmul.f32 -256.0, %v3138_v47  ;;  %v2692_v52 = vpop.f32.mrb[38].mxu0  ;;  %v3204_v42 = vadd.f32 0.2, %v10747_v35 }
 0x26a   :  { %v5490_v53 = vmax.f32 %v10846_v28, -1e+30  ;;  %v3714_v5 = vmul.f32 %v7054_v34, %v3586_v56  ;;  %v7056_v0 = vadd.f32 -0.2, %v10747_v35  ;;  %v1589_v38 = vpop.f32.mrb[38].mxu1  ;;  %v2694_v19 = vpop.f32.mrb[39].mxu0  ;;  %vm3926_vm8 = vcmp.eq.s32.totalorder %v10385_v60, %v10321_v20 }
 0x26b   :  { %v3520_v27 = vsel %vm2944_vm10, %v3456_v18, 0.0  ;;  %v3140_v16 = vmax.f32 %v3076_v45, 0.0  ;;  %4623 = vmax.xlane.f32.xlu1 %v4622_v1  ;;  %v3458_v37 = vmul.f32 %v6990_v6, %v3330_v32  ;;  %v3268_v39 = vmax.f32 %v3204_v42, 0.0  ;;  %v1591_v8 = vpop.f32.mrb[39].mxu1  ;;  %v2864_v6 = vpop.permute.xlu0 %2863 }
 0x26c   :  { %5491 = vmax.xlane.f32.xlu0 %v5490_v53  ;;  %v3986_v24 = vsel %vm3922_vm3, 0.0, %v3520_v27  ;;  %v10866_v34 = vadd.f32 %v2692_v52, %v1589_v38  ;;  %v3778_v11 = vsel %vm3010_vm6, %v3714_v5, 0.0  ;;  %v3078_v45 = vsub.f32 1.2, %v10779_v59  ;;  %v1597_v5 = vpop.f32.mrb[40].mxu1 }
 0x26d   :  { %v10870_v61 = vsel %vm4165_vm2, %v3986_v24, -1e+30  ;;  %v3332_v10 = vmul.f32 -256.0, %v3140_v16  ;;  %v10875_v1 = vsel %vm4165_vm2, %v3778_v11, -1e+30  ;;  %v3522_v17 = vsel %vm2946_vm15, %v3458_v37, 0.0  ;;  %v10899_v16 = vpop.permute.xlu1 %2866 }
 0x26e   :  { %13773 = vst [vmem:[#allocation19_spill] sm:$0xff] %v10870_v61  ;;  %v4625_v4 = vmax.f32 %v10870_v61, -1e+30  ;;  %v3588_v47 = vmul.f32 256.0, %v3268_v39  ;;  %v5493_v56 = vmax.f32 %v10875_v1, -1e+30  ;;  %vm2950_vm9 = vcmp.eq.s32.totalorder %v2864_v6, %v10319_v50 }
 0x26f   :  { %v3988_v18 = vsel %vm3924_vm4, 0.0, %v3522_v17  ;;  %v3142_v49 = vmax.f32 %v3078_v45, 0.0  ;;  %v6994_v53 = vadd.f32 -0.8, %v10779_v59  ;;  %v2699_v42 = vpop.f32.mrb[40].mxu0  ;;  %v1599_v19 = vpop.f32.mrb[41].mxu1  ;;  %vm2952_vm11 = vcmp.eq.s32.totalorder %v10899_v16, %v10319_v50  ;;  %vm10945_vm12 = vmxor %vm2950_vm9, %vm8793_vm5 }
 0x270   :  { %4626 = vmax.xlane.f32.xlu0 %v4625_v4  ;;  %v10887_v32 = vsel %vm4165_vm2, %v3988_v18, -1e+30  ;;  %v3716_v52 = vmul.f32 %v7056_v0, %v3588_v47  ;;  %v6992_v51 = vadd.f32 -0.8, %v10747_v35  ;;  %5494 = vmax.xlane.f32.xlu1 %v5493_v56  ;;  %v10897_v38 = vadd.f32 %v2699_v42, %v1597_v5  ;;  %v2701_v0 = vpop.f32.mrb[41].mxu0  ;;  %vm10981_vm15 = vmxor %vm2952_vm11, %vm8793_vm5 }
 0x271   :  { %13774 = vst [vmem:[#allocation23_spill] sm:$0xff] %v10887_v32  ;;  %v4628_v30 = vmax.f32 %v10887_v32, -1e+30  ;;  %v3334_v27 = vmul.f32 -256.0, %v3142_v49  ;;  %v3206_v37 = vadd.f32 0.2, %v10779_v59  ;;  %v10914_v49 = vpop.permute.xlu0 %2869 }
 0x272   :  { %v3780_v35 = vsel %vm3012_vm7, %v3716_v52, 0.0  ;;  %v3460_v24 = vmul.f32 %v6992_v51, %v3332_v10  ;;  %v7058_v39 = vadd.f32 -0.2, %v10779_v59  ;;  %v2706_v8 = vpop.f32.mrb[42].mxu0  ;;  %v3080_v4 = vsub.f32 1.2, %v10802_v29 }
 0x273   :  { %v10905_v11 = vsel %vm4165_vm2, %v3780_v35, -1e+30  ;;  %v3462_v45 = vmul.f32 %v6994_v53, %v3334_v27  ;;  %v6996_v17 = vadd.f32 -0.8, %v10802_v29  ;;  %v3270_v56 = vmax.f32 %v3206_v37, 0.0  ;;  %v1605_v59 = vpop.f32.mrb[42].mxu1  ;;  %v10937_v37 = vpop.permute.xlu1 %2872 }
 0x274   :  { %13775 = vst [vmem:[#allocation24_spill] sm:$0xff] %v10905_v11  ;;  %v5496_v47 = vmax.f32 %v10905_v11, -1e+30  ;;  %v3524_v10 = vsel %vm2948_vm1, %v3460_v24, 0.0  ;;  %v2708_v18 = vpop.f32.mrb[43].mxu0  ;;  %4629 = vmax.xlane.f32.xlu1 %v4628_v30  ;;  %v3144_v42 = vmax.f32 %v3080_v4, 0.0  ;;  %v10921_v51 = vadd.f32 %v2706_v8, %v1605_v59 }
 0x275   :  { %v3526_v53 = vsel %vm2950_vm9, %v3462_v45, 0.0  ;;  %v3990_v52 = vsel %vm3926_vm8, 0.0, %v3524_v10  ;;  %v1607_v5 = vpop.f32.mrb[43].mxu1  ;;  %vm2954_vm10 = vcmp.eq.s32.totalorder %v10914_v49, %v10319_v50  ;;  %v3590_v27 = vmul.f32 256.0, %v3270_v56  ;;  %v2713_v19 = vpop.f32.mrb[44].mxu0 }
 0x276   :  { %5497 = vmax.xlane.f32.xlu0 %v5496_v47  ;;  %v10927_v22 = vsel %vm4165_vm2, %v3526_v53, -1e+30  ;;  %v10931_v30 = vsel %vm4165_vm2, %v3990_v52, -1e+30  ;;  %v3336_v35 = vmul.f32 -256.0, %v3144_v42  ;;  %v1613_v24 = vpop.f32.mrb[44].mxu1  ;;  %vm2956_vm13 = vcmp.eq.s32.totalorder %v10937_v37, %v10319_v50  ;;  %vm3018_vm0 = vmxor %vm2954_vm10, %vm8793_vm5 }
 0x277   :  { %13776 = vst [vmem:[#allocation6_spill] sm:$0xff] %v10927_v22  ;;  %13777 = vst [vmem:[#allocation22_spill] sm:$0xff] %v10931_v30  ;;  %v4634_v60 = vmax.f32 %v10927_v22, -1e+30  ;;  %v4631_v0 = vmax.f32 %v10931_v30, -1e+30  ;;  %v3718_v8 = vmul.f32 %v7058_v39, %v3590_v27  ;;  %v10950_v18 = vadd.f32 %v2713_v19, %v1613_v24 }
 0x278   :  { %v3082_v45 = vsub.f32 1.2, %v10848_v12  ;;  %v6998_v4 = vadd.f32 -0.8, %v10848_v12  ;;  %v3208_v47 = vadd.f32 0.2, %v10802_v29  ;;  %v3464_v56 = vmul.f32 %v6996_v17, %v3336_v35  ;;  %vm3020_vm4 = vmxor %vm2956_vm13, %vm8793_vm5 }
 0x279   :  { %4635 = vmax.xlane.f32.xlu1 %v4634_v60  ;;  %v7060_v59 = vadd.f32 -0.2, %v10802_v29  ;;  %v1615_v39 = vpop.f32.mrb[45].mxu1  ;;  %v2715_v53 = vpop.f32.mrb[45].mxu0  ;;  %v3210_v52 = vadd.f32 0.2, %v10848_v12 }
 0x27a   :  { %4632 = vmax.xlane.f32.xlu0 %v4631_v0  ;;  %v3782_v6 = vsel %vm10945_vm12, %v3718_v8, 0.0  ;;  %v3146_v42 = vmax.f32 %v3082_v45, 0.0  ;;  %v3272_v5 = vmax.f32 %v3208_v47, 0.0  ;;  %v7062_v27 = vadd.f32 -0.2, %v10848_v12  ;;  %v2720_v17 = vpop.f32.mrb[46].mxu0  ;;  %v10971_v45 = vpop.permute.xlu0 %2875 }
 0x27b   :  { %v10960_v29 = vsel %vm4165_vm2, %v3782_v6, -1e+30  ;;  %v3528_v19 = vsel %vm2952_vm11, %v3464_v56, 0.0  ;;  %v3274_v60 = vmax.f32 %v3210_v52, 0.0  ;;  %v3084_v35 = vsub.f32 1.2, %v10866_v34 }
 0x27c   :  { %13780 = vst [vmem:[#allocation7_spill] sm:$0xff] %v10960_v29  ;;  %v5499_v0 = vmax.f32 %v10960_v29, -1e+30  ;;  %v10969_v24 = vsel %vm4165_vm2, %v3528_v19, -1e+30  ;;  %v3338_v8 = vmul.f32 -256.0, %v3146_v42  ;;  %vm2958_vm1 = vcmp.eq.s32.totalorder %v10971_v45, %v10319_v50 }
 0x27d   :  { %13781 = vst [vmem:[#allocation25_spill] sm:$0xff] %v10969_v24  ;;  %v3592_v12 = vmul.f32 256.0, %v3272_v5  ;;  %v4637_v47 = vmax.f32 %v10969_v24, -1e+30  ;;  %v3594_v10 = vmul.f32 256.0, %v3274_v60  ;;  %v3148_v39 = vmax.f32 %v3084_v35, 0.0  ;;  %vm11215_vm7 = vmxor %vm2958_vm1, %vm8793_vm5 }
 0x27e   :  { %v7000_v53 = vadd.f32 -0.8, %v10866_v34  ;;  %5500 = vmax.xlane.f32.xlu1 %v5499_v0  ;;  %v3466_v56 = vmul.f32 %v6998_v4, %v3338_v8  ;;  %v1621_v6 = vpop.f32.mrb[46].mxu1  ;;  %v2722_v30 = vpop.f32.mrb[47].mxu0  ;;  %v3086_v29 = vsub.f32 1.2, %v10897_v38 }
 0x27f   :  { %v3720_v52 = vmul.f32 %v7060_v59, %v3592_v12  ;;  %v7002_v19 = vadd.f32 -0.8, %v10897_v38  ;;  %vm21_vm14 = vcmask 7168   ;;  %4638 = vmax.xlane.f32.xlu0 %v4637_v47  ;;  %v3722_v5 = vmul.f32 %v7062_v27, %v3594_v10  ;;  %v1623_v59 = vpop.f32.mrb[47].mxu1  ;;  %v2727_v30 = vpop.f32.mrb[48].mxu0 }
 0x280   :  { %v3340_v60 = vmul.f32 -256.0, %v3148_v39  ;;  %v10985_v4 = vadd.f32 %v2720_v17, %v1621_v6  ;;  %v3212_v35 = vadd.f32 0.2, %v10866_v34  ;;  %v3530_v16 = vsel %vm2954_vm10, %v3466_v56, 0.0  ;;  %v1629_v8 = vpop.f32.mrb[48].mxu1 }
 0x281   :  { %v3784_v0 = vsel %vm10981_vm15, %v3720_v52, 0.0  ;;  %v3150_v27 = vmax.f32 %v3086_v29, 0.0  ;;  %v7064_v17 = vadd.f32 -0.2, %v10866_v34  ;;  %v11000_v12 = vsel %vm4165_vm2, %v3530_v16, -1e+30 }
 0x282   :  { %13784 = vst [vmem:[#allocation28_spill] sm:$0xff] %v11000_v12  ;;  %v11004_v47 = vsel %vm4165_vm2, %v3784_v0, -1e+30  ;;  %v3786_v10 = vsel %vm3018_vm0, %v3722_v5, 0.0  ;;  %v3468_v39 = vmul.f32 %v7000_v53, %v3340_v60  ;;  %v1631_v6 = vpop.f32.mrb[49].mxu1  ;;  %v11012_v34 = vadd.f32 %v2727_v30, %v1629_v8  ;;  %v2729_v53 = vpop.f32.mrb[49].mxu0 }
 0x283   :  { %13785 = vst [vmem:[#allocation8_spill] sm:$0xff] %v11004_v47  ;;  %v4640_v49 = vmax.f32 %v11000_v12, -1e+30  ;;  %v5502_v56 = vmax.f32 %v11004_v47, -1e+30  ;;  %v3342_v59 = vmul.f32 -256.0, %v3150_v27  ;;  %v11018_v60 = vpop.permute.xlu0 %2881  ;;  %v11030_v8 = vpop.permute.xlu1 %2878 }
 0x284   :  { %v11010_v29 = vsel %vm4165_vm2, %v3786_v10, -1e+30  ;;  %v3532_v42 = vsel %vm2956_vm13, %v3468_v39, 0.0  ;;  %v3276_v5 = vmax.f32 %v3212_v35, 0.0  ;;  %v11025_v30 = vadd.f32 0.2, %v10897_v38 }
 0x285   :  { %13786 = vst [vmem:[#allocation9_spill] sm:$0xff] %v11010_v29  ;;  %4641 = vmax.xlane.f32.xlu1 %v4640_v49  ;;  %5503 = vmax.xlane.f32.xlu0 %v5502_v56  ;;  %v11022_v16 = vsel %vm4165_vm2, %v3532_v42, -1e+30  ;;  %v11028_v0 = vadd.f32 -0.2, %v10897_v38  ;;  %v3470_v35 = vmul.f32 %v7002_v19, %v3342_v59  ;;  %v2734_v39 = vpop.f32.mrb[50].mxu0  ;;  %vm2962_vm3 = vcmp.eq.s32.totalorder %v11018_v60, %v10319_v50 }
 0x286   :  { %13787 = vst [vmem:[#allocation31_spill] sm:$0xff] %v11022_v16  ;;  %v3596_v10 = vmul.f32 256.0, %v3276_v5  ;;  %v3088_v6 = vsub.f32 1.2, %v10921_v51  ;;  %v11038_v56 = vadd.f32 -0.8, %v10921_v51  ;;  %vm2960_vm6 = vcmp.eq.s32.totalorder %v11030_v8, %v10319_v50  ;;  %vm3026_vm11 = vmxor %vm2962_vm3, %vm8793_vm5 }
 0x287   :  { %v1637_v42 = vpop.f32.mrb[50].mxu1  ;;  %v2736_v38 = vpop.f32.mrb[51].mxu0  ;;  %v11045_v19 = vsel %vm2958_vm1, %v3470_v35, 0.0  ;;  %v8794_v52 = vmov 0.0   ;;  %v13789_v35 = vmax.f32 %v11022_v16, -1e+30  ;;  %vm3024_vm10 = vmxor %vm2960_vm6, %vm8793_vm5 }
 0x288   :  { %v11047_v59 = vmul.f32 %v7064_v17, %v3596_v10  ;;  %v11049_v5 = vmax.f32 %v3088_v6, 0.0  ;;  %v11051_v53 = vadd.f32 %v2734_v39, %v1637_v42  ;;  %v1639_v49 = vpop.f32.mrb[51].mxu1  ;;  %v11053_v27 = vpop.f32.mrb[52].mxu0  ;;  %118 = vst.msk [vmem:[#allocation5] sm:$0xff] %vm21_vm14, %v8794_v52  ;;  %54 = vst.msk [vmem:[#allocation3] sm:$0xff] %vm21_vm14, %v8794_v52 }
 0x289   :  { %55 = vst.msk [vmem:[#allocation3 + $0x8] sm:$0xff] %vm21_vm14, %v8794_v52  ;;  %56 = vst.msk [vmem:[#allocation3 + $0x10] sm:$0xff] %vm21_vm14, %v8794_v52  ;;  %v13788_v17 = vmax.f32 %v11010_v29, -1e+30  ;;  %4644 = vmax.xlane.f32.xlu0 %v13789_v35  ;;  %v11196_v10 = vsel %vm4165_vm2, %v11045_v19, -1e+30  ;;  %v11228_v24 = vpop.permute.xlu0 %2887 }
 0x28a   :  { %57 = vst.msk [vmem:[#allocation3 + $0x18] sm:$0xff] %vm21_vm14, %v8794_v52  ;;  %58 = vst.msk [vmem:[#allocation3 + $0x20] sm:$0xff] %vm21_vm14, %v8794_v52  ;;  %v3090_v37 = vsub.f32 1.2, %v10950_v18  ;;  %v1645_v6 = vpop.f32.mrb[52].mxu1  ;;  %v3788_v42 = vsel %vm3020_vm4, %v11047_v59, 0.0  ;;  %vm2966_vm8 = vcmp.eq.s32.totalorder %v11228_v24, %v10319_v50 }
 0x28b   :  { %59 = vst.msk [vmem:[#allocation3 + $0x28] sm:$0xff] %vm21_vm14, %v8794_v52  ;;  %60 = vst.msk [vmem:[#allocation3 + $0x30] sm:$0xff] %vm21_vm14, %v8794_v52  ;;  %5506 = vmax.xlane.f32.xlu1 %v13788_v17  ;;  %v4646_v49 = vmax.f32 %v11196_v10, -1e+30  ;;  %v3344_v38 = vmul.f32 -256.0, %v11049_v5 }
 0x28c   :  { %61 = vst.msk [vmem:[#allocation3 + $0x38] sm:$0xff] %vm21_vm14, %v8794_v52  ;;  %62 = vst.msk [vmem:[#allocation3 + $0x40] sm:$0xff] %vm21_vm14, %v8794_v52  ;;  %v7006_v17 = vadd.f32 -0.8, %v10950_v18  ;;  %v11207_v35 = vsel %vm4165_vm2, %v3788_v42, -1e+30 }
 0x28d   :  { %63 = vst.msk [vmem:[#allocation3 + $0x48] sm:$0xff] %vm21_vm14, %v8794_v52  ;;  %64 = vst.msk [vmem:[#allocation3 + $0x50] sm:$0xff] %vm21_vm14, %v8794_v52  ;;  %v3154_v16 = vmax.f32 %v3090_v37, 0.0  ;;  %v5508_v5 = vmax.f32 %v11207_v35, -1e+30 }
 0x28e   :  { %65 = vst.msk [vmem:[#allocation3 + $0x58] sm:$0xff] %vm21_vm14, %v8794_v52  ;;  %66 = vst.msk [vmem:[#allocation3 + $0x60] sm:$0xff] %vm21_vm14, %v8794_v52  ;;  %v7068_v42 = vadd.f32 -0.2, %v10921_v51  ;;  %v3218_v47 = vadd.f32 0.2, %v10950_v18 }
 0x28f   :  { %67 = vst.msk [vmem:[#allocation3 + $0x68] sm:$0xff] %vm21_vm14, %v8794_v52  ;;  %68 = vst.msk [vmem:[#allocation3 + $0x70] sm:$0xff] %vm21_vm14, %v8794_v52  ;;  %4647 = vmax.xlane.f32.xlu1 %v4646_v49  ;;  %v3346_v45 = vmul.f32 -256.0, %v3154_v16  ;;  %5509 = vmax.xlane.f32.xlu0 %v5508_v5  ;;  %v2885_v49 = vpop.permute.xlu1 %2884 }
 0x290   :  { %69 = vst.msk [vmem:[#allocation3 + $0x78] sm:$0xff] %vm21_vm14, %v8794_v52  ;;  %70 = vst.msk [vmem:[#allocation3 + $0x80] sm:$0xff] %vm21_vm14, %v8794_v52  ;;  %vm2964_vm9 = vcmp.eq.s32.totalorder %v2885_v49, %v10319_v50 }
 0x291   :  { %71 = vst.msk [vmem:[#allocation3 + $0x88] sm:$0xff] %vm21_vm14, %v8794_v52  ;;  %72 = vst.msk [vmem:[#allocation3 + $0x90] sm:$0xff] %vm21_vm14, %v8794_v52 }
 0x292   :  { %73 = vst.msk [vmem:[#allocation3 + $0x98] sm:$0xff] %vm21_vm14, %v8794_v52  ;;  %74 = vst.msk [vmem:[#allocation3 + $0xa0] sm:$0xff] %vm21_vm14, %v8794_v52 }
 0x293   :  { %75 = vst.msk [vmem:[#allocation3 + $0xa8] sm:$0xff] %vm21_vm14, %v8794_v52  ;;  %76 = vst.msk [vmem:[#allocation3 + $0xb0] sm:$0xff] %vm21_vm14, %v8794_v52 }
 0x294   :  { %77 = vst.msk [vmem:[#allocation3 + $0xb8] sm:$0xff] %vm21_vm14, %v8794_v52  ;;  %78 = vst.msk [vmem:[#allocation3 + $0xc0] sm:$0xff] %vm21_vm14, %v8794_v52 }
 0x295   :  { %79 = vst.msk [vmem:[#allocation3 + $0xc8] sm:$0xff] %vm21_vm14, %v8794_v52  ;;  %80 = vst.msk [vmem:[#allocation3 + $0xd0] sm:$0xff] %vm21_vm14, %v8794_v52 }
 0x296   :  { %81 = vst.msk [vmem:[#allocation3 + $0xd8] sm:$0xff] %vm21_vm14, %v8794_v52  ;;  %82 = vst.msk [vmem:[#allocation3 + $0xe0] sm:$0xff] %vm21_vm14, %v8794_v52 }
 0x297   :  { %83 = vst.msk [vmem:[#allocation3 + $0xe8] sm:$0xff] %vm21_vm14, %v8794_v52  ;;  %84 = vst.msk [vmem:[#allocation3 + $0xf0] sm:$0xff] %vm21_vm14, %v8794_v52 }
 0x298   :  { %85 = vst.msk [vmem:[#allocation3 + $0xf8] sm:$0xff] %vm21_vm14, %v8794_v52  ;;  %119 = vst.msk [vmem:[#allocation5 + $0x8] sm:$0xff] %vm21_vm14, %v8794_v52 }
 0x299   :  { %120 = vst.msk [vmem:[#allocation5 + $0x10] sm:$0xff] %vm21_vm14, %v8794_v52  ;;  %121 = vst.msk [vmem:[#allocation5 + $0x18] sm:$0xff] %vm21_vm14, %v8794_v52 }
 0x29a   :  { %122 = vst.msk [vmem:[#allocation5 + $0x20] sm:$0xff] %vm21_vm14, %v8794_v52  ;;  %123 = vst.msk [vmem:[#allocation5 + $0x28] sm:$0xff] %vm21_vm14, %v8794_v52 }
 0x29b   :  { %124 = vst.msk [vmem:[#allocation5 + $0x30] sm:$0xff] %vm21_vm14, %v8794_v52  ;;  %125 = vst.msk [vmem:[#allocation5 + $0x38] sm:$0xff] %vm21_vm14, %v8794_v52 }
 0x29c   :  { %126 = vst.msk [vmem:[#allocation5 + $0x40] sm:$0xff] %vm21_vm14, %v8794_v52  ;;  %127 = vst.msk [vmem:[#allocation5 + $0x48] sm:$0xff] %vm21_vm14, %v8794_v52 }
 0x29d   :  { %128 = vst.msk [vmem:[#allocation5 + $0x50] sm:$0xff] %vm21_vm14, %v8794_v52  ;;  %129 = vst.msk [vmem:[#allocation5 + $0x58] sm:$0xff] %vm21_vm14, %v8794_v52 }
 0x29e   :  { %130 = vst.msk [vmem:[#allocation5 + $0x60] sm:$0xff] %vm21_vm14, %v8794_v52  ;;  %131 = vst.msk [vmem:[#allocation5 + $0x68] sm:$0xff] %vm21_vm14, %v8794_v52 }
 0x29f   :  { %132 = vst.msk [vmem:[#allocation5 + $0x70] sm:$0xff] %vm21_vm14, %v8794_v52  ;;  %133 = vst.msk [vmem:[#allocation5 + $0x78] sm:$0xff] %vm21_vm14, %v8794_v52 }
 0x2a0   :  { %134 = vst.msk [vmem:[#allocation5 + $0x80] sm:$0xff] %vm21_vm14, %v8794_v52  ;;  %135 = vst.msk [vmem:[#allocation5 + $0x88] sm:$0xff] %vm21_vm14, %v8794_v52 }
 0x2a1   :  { %136 = vst.msk [vmem:[#allocation5 + $0x90] sm:$0xff] %vm21_vm14, %v8794_v52  ;;  %137 = vst.msk [vmem:[#allocation5 + $0x98] sm:$0xff] %vm21_vm14, %v8794_v52 }
 0x2a2   :  { %138 = vst.msk [vmem:[#allocation5 + $0xa0] sm:$0xff] %vm21_vm14, %v8794_v52  ;;  %139 = vst.msk [vmem:[#allocation5 + $0xa8] sm:$0xff] %vm21_vm14, %v8794_v52 }
 0x2a3   :  { %140 = vst.msk [vmem:[#allocation5 + $0xb0] sm:$0xff] %vm21_vm14, %v8794_v52  ;;  %141 = vst.msk [vmem:[#allocation5 + $0xb8] sm:$0xff] %vm21_vm14, %v8794_v52 }
 0x2a4   :  { %142 = vst.msk [vmem:[#allocation5 + $0xc0] sm:$0xff] %vm21_vm14, %v8794_v52  ;;  %143 = vst.msk [vmem:[#allocation5 + $0xc8] sm:$0xff] %vm21_vm14, %v8794_v52 }
 0x2a5   :  { %144 = vst.msk [vmem:[#allocation5 + $0xd0] sm:$0xff] %vm21_vm14, %v8794_v52  ;;  %145 = vst.msk [vmem:[#allocation5 + $0xd8] sm:$0xff] %vm21_vm14, %v8794_v52 }
 0x2a6   :  { %146 = vst.msk [vmem:[#allocation5 + $0xe0] sm:$0xff] %vm21_vm14, %v8794_v52  ;;  %147 = vst.msk [vmem:[#allocation5 + $0xe8] sm:$0xff] %vm21_vm14, %v8794_v52 }
 0x2a7   :  { %148 = vst.msk [vmem:[#allocation5 + $0xf0] sm:$0xff] %vm21_vm14, %v8794_v52  ;;  %149 = vst.msk [vmem:[#allocation5 + $0xf8] sm:$0xff] %vm21_vm14, %v8794_v52  ;;  %v13791_v52 = vmax.f32 %v11025_v30, 0.0  ;;  %v3216_v30 = vadd.f32 0.2, %v10921_v51 }
 0x2a8   :  { %13790 = vst [vmem:[#allocation10_spill] sm:$0xff] %v11196_v10  ;;  %13792 = vst [vmem:[#allocation11_spill] sm:$0xff] %v11207_v35  ;;  %v3472_v10 = vmul.f32 %v11038_v56, %v3344_v38  ;;  %v7070_v56 = vadd.f32 -0.2, %v10950_v18 }
 0x2a9   :  { %v3598_v39 = vmul.f32 256.0, %v13791_v52  ;;  %v1647_v52 = vpop.f32.mrb[53].mxu1  ;;  %v3280_v29 = vmax.f32 %v3216_v30, 0.0  ;;  %v3474_v30 = vmul.f32 %v7006_v17, %v3346_v45  ;;  %v3094_v17 = vsub.f32 1.2, %v11012_v34  ;;  %vm11299_vm12 = vmxor %vm2964_vm9, %vm8793_vm5 }
 0x2aa   :  { %v1653_v37 = vpop.f32.mrb[54].mxu1  ;;  %vm3030_vm15 = vmxor %vm2966_vm8, %vm8793_vm5 }
 0x2ab   :  { %v3726_v19 = vmul.f32 %v11028_v0, %v3598_v39  ;;  %v11223_v0 = vadd.f32 %v11053_v27, %v1645_v6  ;;  %v2743_v39 = vpop.f32.mrb[53].mxu0  ;;  %v3536_v27 = vsel %vm2960_vm6, %v3472_v10, 0.0  ;;  %v1655_v16 = vpop.f32.mrb[55].mxu1  ;;  %v3600_v59 = vmul.f32 256.0, %v3280_v29 }
 0x2ac   :  { %v2748_v12 = vpop.f32.mrb[54].mxu0  ;;  %v3092_v10 = vsub.f32 1.2, %v10985_v4  ;;  %v7008_v29 = vadd.f32 -0.8, %v10985_v4  ;;  %v1661_v45 = vpop.f32.mrb[56].mxu1 }
 0x2ad   :  { %v3790_v52 = vsel %vm11215_vm7, %v3726_v19, 0.0  ;;  %v11238_v6 = vadd.f32 %v2748_v12, %v1653_v37  ;;  %v11243_v19 = vsel %vm4165_vm2, %v3536_v27, -1e+30  ;;  %v2750_v5 = vpop.f32.mrb[55].mxu0  ;;  %v3282_v12 = vmax.f32 %v3218_v47, 0.0 }
 0x2ae   :  { %v11232_v51 = vsel %vm4165_vm2, %v3790_v52, -1e+30  ;;  %13796 = vst [vmem:[#allocation12_spill] sm:$0xff] %v11243_v19  ;;  %v4649_v18 = vmax.f32 %v11243_v19, -1e+30  ;;  %v2755_v39 = vpop.f32.mrb[56].mxu0  ;;  %v3728_v52 = vmul.f32 %v7068_v42, %v3600_v59 }
 0x2af   :  { %13795 = vst [vmem:[#allocation35_spill] sm:$0xff] %v11232_v51  ;;  %v5511_v38 = vmax.f32 %v11232_v51, -1e+30  ;;  %v3538_v37 = vsel %vm2962_vm3, %v3474_v30, 0.0  ;;  %v3602_v27 = vmul.f32 256.0, %v3282_v12  ;;  %v3156_v16 = vmax.f32 %v3092_v10, 0.0 }
 0x2b0   :  { %4650 = vmax.xlane.f32.xlu0 %v4649_v18  ;;  %v11261_v47 = vsel %vm4165_vm2, %v3538_v37, -1e+30  ;;  %v3792_v30 = vsel %vm3024_vm10, %v3728_v52, 0.0  ;;  %v3158_v59 = vmax.f32 %v3094_v17, 0.0  ;;  %v3220_v5 = vadd.f32 0.2, %v10985_v4 }
 0x2b1   :  { %5512 = vmax.xlane.f32.xlu1 %v5511_v38  ;;  %13797 = vst [vmem:[#allocation13_spill] sm:$0xff] %v11261_v47  ;;  %v7010_v38 = vadd.f32 -0.8, %v11012_v34  ;;  %v4652_v42 = vmax.f32 %v11261_v47, -1e+30  ;;  %v3730_v8 = vmul.f32 %v7070_v56, %v3602_v27  ;;  %v3348_v18 = vmul.f32 -256.0, %v3156_v16 }
 0x2b2   :  { %v11268_v19 = vsel %vm4165_vm2, %v3792_v30, -1e+30  ;;  %v7072_v51 = vadd.f32 -0.2, %v10985_v4  ;;  %v1663_v37 = vpop.f32.mrb[57].mxu1  ;;  %v3350_v10 = vmul.f32 -256.0, %v3158_v59  ;;  %v11276_v17 = vadd.f32 %v2755_v39, %v1661_v45 }
 0x2b3   :  { %13798 = vst [vmem:[#allocation36_spill] sm:$0xff] %v11268_v19  ;;  %v5514_v12 = vmax.f32 %v11268_v19, -1e+30  ;;  %v3284_v52 = vmax.f32 %v3220_v5, 0.0  ;;  %v2757_v47 = vpop.f32.mrb[57].mxu0  ;;  %v1669_v30 = vpop.f32.mrb[58].mxu1  ;;  %v3476_v56 = vmul.f32 %v7008_v29, %v3348_v18 }
 0x2b4   :  { %v3794_v35 = vsel %vm3026_vm11, %v3730_v8, 0.0  ;;  %v3222_v27 = vadd.f32 0.2, %v11012_v34  ;;  %v7074_v4 = vadd.f32 -0.2, %v11012_v34  ;;  %v2762_v16 = vpop.f32.mrb[58].mxu0 }
 0x2b5   :  { %4653 = vmax.xlane.f32.xlu1 %v4652_v42  ;;  %5515 = vmax.xlane.f32.xlu0 %v5514_v12  ;;  %v11282_v60 = vsel %vm4165_vm2, %v3794_v35, -1e+30  ;;  %v3478_v42 = vmul.f32 %v7010_v38, %v3350_v10  ;;  %v3604_v37 = vmul.f32 256.0, %v3284_v52  ;;  %v3096_v59 = vsub.f32 1.2, %v11051_v53  ;;  %v1671_v39 = vpop.f32.mrb[59].mxu1  ;;  %v11303_v52 = vpop.permute.xlu0 %2893 }
 0x2b6   :  { %13799 = vst [vmem:[#allocation39_spill] sm:$0xff] %v11282_v60  ;;  %v5517_v45 = vmax.f32 %v11282_v60, -1e+30  ;;  %v3540_v29 = vsel %vm2964_vm9, %v3476_v56, 0.0  ;;  %v3286_v47 = vmax.f32 %v3222_v27, 0.0  ;;  %v2764_v18 = vpop.f32.mrb[59].mxu0  ;;  %vm2970_vm0 = vcmp.eq.s32.totalorder %v11303_v52, %v10319_v50 }
 0x2b7   :  { %v7012_v5 = vadd.f32 -0.8, %v11051_v53  ;;  %v11291_v34 = vsel %vm4165_vm2, %v3540_v29, -1e+30  ;;  %v3542_v35 = vsel %vm2966_vm8, %v3478_v42, 0.0  ;;  %v3732_v38 = vmul.f32 %v7072_v51, %v3604_v37  ;;  %v1677_v12 = vpop.f32.mrb[60].mxu1  ;;  %vm3034_vm4 = vmxor %vm2970_vm0, %vm8793_vm5 }
 0x2b8   :  { %13800 = vst [vmem:[#allocation15_spill] sm:$0xff] %v11291_v34  ;;  %v3160_v8 = vmax.f32 %v3096_v59, 0.0  ;;  %v4655_v56 = vmax.f32 %v11291_v34, -1e+30  ;;  %v11308_v27 = vsel %vm4165_vm2, %v3542_v35, -1e+30  ;;  %v11310_v42 = vadd.f32 %v2762_v16, %v1669_v30  ;;  %v2891_v59 = vpop.permute.xlu1 %2890 }
 0x2b9   :  { %5518 = vmax.xlane.f32.xlu1 %v5517_v45  ;;  %13803 = vst [vmem:[#allocation16_spill] sm:$0xff] %v11308_v27  ;;  %v3606_v51 = vmul.f32 256.0, %v3286_v47  ;;  %v2769_v37 = vpop.f32.mrb[60].mxu0  ;;  %v4658_v49 = vmax.f32 %v11308_v27, -1e+30  ;;  %v3796_v39 = vsel %vm11299_vm12, %v3732_v38, 0.0  ;;  %vm2968_vm13 = vcmp.eq.s32.totalorder %v2891_v59, %v10319_v50 }
 0x2ba   :  { %v3352_v29 = vmul.f32 -256.0, %v3160_v8  ;;  %v3098_v18 = vsub.f32 1.2, %v11223_v0  ;;  %4656 = vmax.xlane.f32.xlu0 %v4655_v56  ;;  %v11319_v45 = vsel %vm4165_vm2, %v3796_v39, -1e+30  ;;  %v1679_v10 = vpop.f32.mrb[61].mxu1  ;;  %v11328_v39 = vadd.f32 %v2769_v37, %v1677_v12  ;;  %vm3032_vm3 = vmxor %vm2968_vm13, %vm8793_vm5 }
 0x2bb   :  { %13804 = vst [vmem:[#allocation41_spill] sm:$0xff] %v11319_v45  ;;  %v3734_v47 = vmul.f32 %v7074_v4, %v3606_v51  ;;  %v3224_v30 = vadd.f32 0.2, %v11051_v53  ;;  %v5520_v16 = vmax.f32 %v11319_v45, -1e+30  ;;  %v2771_v4 = vpop.f32.mrb[61].mxu0  ;;  %v11338_v10 = vpop.permute.xlu0 %2899 }
 0x2bc   :  { %v3480_v35 = vmul.f32 %v7012_v5, %v3352_v29  ;;  %v3162_v38 = vmax.f32 %v3098_v18, 0.0  ;;  %v7014_v8 = vadd.f32 -0.8, %v11223_v0  ;;  %v3226_v51 = vadd.f32 0.2, %v11223_v0  ;;  %v1685_v34 = vpop.f32.mrb[62].mxu1 }
 0x2bd   :  { %4659 = vmax.xlane.f32.xlu1 %v4658_v49  ;;  %v3798_v56 = vsel %vm3030_vm15, %v3734_v47, 0.0  ;;  %v3288_v27 = vmax.f32 %v3224_v30, 0.0  ;;  %v7076_v18 = vadd.f32 -0.2, %v11051_v53  ;;  %v3100_v53 = vsub.f32 1.2, %v11238_v6 }
 0x2be   :  { %v11333_v24 = vsel %vm4165_vm2, %v3798_v56, -1e+30  ;;  %v3544_v5 = vsel %vm2968_vm13, %v3480_v35, 0.0  ;;  %v3354_v29 = vmul.f32 -256.0, %v3162_v38  ;;  %5521 = vmax.xlane.f32.xlu0 %v5520_v16  ;;  %v3290_v47 = vmax.f32 %v3226_v51, 0.0  ;;  %v2776_v38 = vpop.f32.mrb[62].mxu0 }
 0x2bf   :  { %13805 = vst [vmem:[#allocation43_spill] sm:$0xff] %v11333_v24  ;;  %v5523_v12 = vmax.f32 %v11333_v24, -1e+30  ;;  %v11343_v37 = vsel %vm4165_vm2, %v3544_v5, -1e+30  ;;  %v3608_v49 = vmul.f32 256.0, %v3288_v27  ;;  %vm2974_vm1 = vcmp.eq.s32.totalorder %v11338_v10, %v10319_v50 }
 0x2c0   :  { %13806 = vst [vmem:[#allocation17_spill] sm:$0xff] %v11343_v37  ;;  %v4661_v30 = vmax.f32 %v11343_v37, -1e+30  ;;  %v3482_v35 = vmul.f32 %v7014_v8, %v3354_v29  ;;  %v1687_v56 = vpop.f32.mrb[63].mxu1  ;;  %v3610_v4 = vmul.f32 256.0, %v3290_v47  ;;  %v11352_v27 = vadd.f32 %v2776_v38, %v1685_v34  ;;  %v2778_v51 = vpop.f32.mrb[63].mxu0  ;;  %vm3038_vm9 = vmxor %vm2974_vm1, %vm8793_vm5 }
 0x2c1   :  { %5524 = vmax.xlane.f32.xlu1 %v5523_v12  ;;  %v3736_v16 = vmul.f32 %v7076_v18, %v3608_v49  ;;  %v7078_v5 = vadd.f32 -0.2, %v11223_v0  ;;  %v3164_v29 = vmax.f32 %v3100_v53, 0.0  ;;  %v7016_v56 = vadd.f32 -0.8, %v11238_v6  ;;  %v11376_v38 = vpop.permute.xlu0 %2905  ;;  %v2897_v51 = vpop.permute.xlu1 %2896 }
 0x2c2   :  { %v3546_v8 = vsel %vm2970_vm0, %v3482_v35, 0.0  ;;  %v3102_v12 = vsub.f32 1.2, %v11276_v17  ;;  %4662 = vmax.xlane.f32.xlu0 %v4661_v30  ;;  %v3228_v49 = vadd.f32 0.2, %v11238_v6  ;;  %vm2972_vm6 = vcmp.eq.s32.totalorder %v2897_v51, %v10319_v50 }
 0x2c3   :  { %v11364_v0 = vsel %vm4165_vm2, %v3546_v8, -1e+30  ;;  %v3800_v34 = vsel %vm3032_vm3, %v3736_v16, 0.0  ;;  %v3738_v18 = vmul.f32 %v7078_v5, %v3610_v4  ;;  %v3356_v30 = vmul.f32 -256.0, %v3164_v29  ;;  %vm3036_vm8 = vmxor %vm2972_vm6, %vm8793_vm5 }
 0x2c4   :  { %13807 = vst [vmem:[#allocation18_spill] sm:$0xff] %v11364_v0  ;;  %v4664_v59 = vmax.f32 %v11364_v0, -1e+30  ;;  %v11374_v47 = vsel %vm4165_vm2, %v3800_v34, -1e+30  ;;  %v3166_v35 = vmax.f32 %v3102_v12, 0.0  ;;  %vm2978_vm7 = vcmp.eq.s32.totalorder %v11376_v38, %v10319_v50 }
 0x2c5   :  { %13808 = vst [vmem:[#allocation45_spill] sm:$0xff] %v11374_v47  ;;  %v5526_v53 = vmax.f32 %v11374_v47, -1e+30  ;;  %v3802_v16 = vsel %vm3034_vm4, %v3738_v18, 0.0  ;;  %v7018_v4 = vadd.f32 -0.8, %v11276_v17  ;;  %v3484_v8 = vmul.f32 %v7016_v56, %v3356_v30  ;;  %vm11469_vm12 = vmxor %vm2978_vm7, %vm8793_vm5 }
 0x2c6   :  { %v3292_v5 = vmax.f32 %v3228_v49, 0.0  ;;  %4665 = vmax.xlane.f32.xlu1 %v4664_v59  ;;  %v11382_v52 = vsel %vm4165_vm2, %v3802_v16, -1e+30  ;;  %v3358_v0 = vmul.f32 -256.0, %v3166_v35  ;;  %v3230_v34 = vadd.f32 0.2, %v11276_v17 }
 0x2c7   :  { %13809 = vst [vmem:[#allocation46_spill] sm:$0xff] %v11382_v52  ;;  %5527 = vmax.xlane.f32.xlu0 %v5526_v53  ;;  %v5529_v29 = vmax.f32 %v11382_v52, -1e+30  ;;  %v7080_v18 = vadd.f32 -0.2, %v11238_v6  ;;  %v3548_v49 = vsel %vm2972_vm6, %v3484_v8, 0.0 }
 0x2c8   :  { %v3612_v12 = vmul.f32 256.0, %v3292_v5  ;;  %v3486_v59 = vmul.f32 %v7018_v4, %v3358_v0  ;;  %v3294_v47 = vmax.f32 %v3230_v34, 0.0  ;;  %v3104_v16 = vsub.f32 1.2, %v11310_v42 }
 0x2c9   :  { %v11393_v56 = vsel %vm4165_vm2, %v3548_v49, -1e+30  ;;  %v7082_v35 = vadd.f32 -0.2, %v11276_v17  ;;  %v3106_v53 = vsub.f32 1.2, %v11328_v39 }
 0x2ca   :  { %13810 = vst [vmem:[#allocation49_spill] sm:$0xff] %v11393_v56  ;;  %v3740_v30 = vmul.f32 %v7080_v18, %v3612_v12  ;;  %5530 = vmax.xlane.f32.xlu1 %v5529_v29  ;;  %v4667_v6 = vmax.f32 %v11393_v56, -1e+30  ;;  %v3550_v0 = vsel %vm2974_vm1, %v3486_v59, 0.0  ;;  %v3614_v4 = vmul.f32 256.0, %v3294_v47  ;;  %v2903_v12 = vpop.permute.xlu1 %2902 }
 0x2cb   :  { %v3168_v5 = vmax.f32 %v3104_v16, 0.0  ;;  %v11404_v51 = vsel %vm4165_vm2, %v3550_v0, -1e+30  ;;  %v7020_v17 = vadd.f32 -0.8, %v11310_v42  ;;  %v3170_v34 = vmax.f32 %v3106_v53, 0.0 }
 0x2cc   :  { %13811 = vst [vmem:[#allocation48_spill] sm:$0xff] %v11404_v51  ;;  %v3804_v8 = vsel %vm3036_vm8, %v3740_v30, 0.0  ;;  %4668 = vmax.xlane.f32.xlu0 %v4667_v6  ;;  %v4670_v29 = vmax.f32 %v11404_v51, -1e+30  ;;  %v3742_v49 = vmul.f32 %v7082_v35, %v3614_v4  ;;  %vm2976_vm10 = vcmp.eq.s32.totalorder %v2903_v12, %v10319_v50 }
 0x2cd   :  { %v11410_v18 = vsel %vm4165_vm2, %v3804_v8, -1e+30  ;;  %v3360_v59 = vmul.f32 -256.0, %v3168_v5  ;;  %v3362_v47 = vmul.f32 -256.0, %v3170_v34  ;;  %v7022_v16 = vadd.f32 -0.8, %v11328_v39  ;;  %vm11452_vm11 = vmxor %vm2976_vm10, %vm8793_vm5 }
 0x2ce   :  { %13812 = vst [vmem:[#allocation20_spill] sm:$0xff] %v11410_v18  ;;  %v3232_v30 = vadd.f32 0.2, %v11310_v42  ;;  %4671 = vmax.xlane.f32.xlu1 %v4670_v29  ;;  %v5532_v53 = vmax.f32 %v11410_v18, -1e+30  ;;  %v3806_v6 = vsel %vm3038_vm9, %v3742_v49, 0.0 }
 0x2cf   :  { %v3488_v0 = vmul.f32 %v7020_v17, %v3360_v59  ;;  %v3234_v35 = vadd.f32 0.2, %v11328_v39  ;;  %v11423_v4 = vsel %vm4165_vm2, %v3806_v6, -1e+30  ;;  %v3490_v10 = vmul.f32 %v7022_v16, %v3362_v47 }
 0x2d0   :  { %13813 = vst [vmem:[#allocation21_spill] sm:$0xff] %v11423_v4  ;;  %v3296_v5 = vmax.f32 %v3232_v30, 0.0  ;;  %v7084_v8 = vadd.f32 -0.2, %v11310_v42  ;;  %5533 = vmax.xlane.f32.xlu0 %v5532_v53  ;;  %v5535_v34 = vmax.f32 %v11423_v4, -1e+30 }
 0x2d1   :  { %v3552_v29 = vsel %vm2976_vm10, %v3488_v0, 0.0  ;;  %v3298_v51 = vmax.f32 %v3234_v35, 0.0  ;;  %v3108_v49 = vsub.f32 1.2, %v11352_v27  ;;  %v3554_v59 = vsel %vm2978_vm7, %v3490_v10, 0.0  ;;  %v11456_v10 = vpop.permute.xlu1 %2908 }
 0x2d2   :  { %v11432_v17 = vsel %vm4165_vm2, %v3552_v29, -1e+30  ;;  %v3616_v47 = vmul.f32 256.0, %v3296_v5  ;;  %v7086_v42 = vadd.f32 -0.2, %v11328_v39  ;;  %5536 = vmax.xlane.f32.xlu1 %v5535_v34  ;;  %vm2980_vm13 = vcmp.eq.s32.totalorder %v11456_v10, %v10319_v50 }
 0x2d3   :  { %13814 = vst [vmem:[#allocation50_spill] sm:$0xff] %v11432_v17  ;;  %v4673_v16 = vmax.f32 %v11432_v17, -1e+30  ;;  %v11441_v30 = vsel %vm4165_vm2, %v3554_v59, -1e+30  ;;  %v3618_v53 = vmul.f32 256.0, %v3298_v51  ;;  %vm3044_vm15 = vmxor %vm2980_vm13, %vm8793_vm5 }
 0x2d4   :  { %13815 = vst [vmem:[#allocation52_spill] sm:$0xff] %v11441_v30  ;;  %v3172_v6 = vmax.f32 %v3108_v49, 0.0  ;;  %v4676_v0 = vmax.f32 %v11441_v30, -1e+30  ;;  %v11444_v35 = vmul.f32 %v7084_v8, %v3616_v47  ;;  %v11447_v29 = vadd.f32 0.2, %v11352_v27 }
 0x2d5   :  { %4674 = vmax.xlane.f32.xlu0 %v4673_v16  ;;  %v11458_v5 = vmul.f32 %v7086_v42, %v3618_v53  ;;  %v11463_v8 = vadd.f32 -0.8, %v11352_v27  ;;  %v8795_v59 = vmov -1e+30   ;;  %v7088_v16 = vadd.f32 -0.2, %v11352_v27  ;;  %v5453_v10 = vpop.xlane.xlu1 %5452 }
 0x2d6   :  { %v11460_v51 = vmul.f32 -256.0, %v3172_v6  ;;  %v3808_v34 = vsel %vm11452_vm11, %v11444_v35, 0.0  ;;  %v3300_v49 = vmax.f32 %v11447_v29, 0.0  ;;  %86 = vst.msk [vmem:[#allocation4] sm:$0xff] %vm21_vm14, %v8795_v59  ;;  %22 = vst.msk [vmem:[#allocation2] sm:$0xff] %vm21_vm14, %v8795_v59  ;;  %4677 = vmax.xlane.f32.xlu1 %v4676_v0 }
 0x2d7   :  { %23 = vst.msk [vmem:[#allocation2 + $0x8] sm:$0xff] %vm21_vm14, %v8795_v59  ;;  %24 = vst.msk [vmem:[#allocation2 + $0x10] sm:$0xff] %vm21_vm14, %v8795_v59  ;;  %v11613_v38 = vsel %vm4165_vm2, %v3808_v34, -1e+30  ;;  %v3810_v47 = vsel %vm11469_vm12, %v11458_v5, 0.0 }
 0x2d8   :  { %25 = vst.msk [vmem:[#allocation2 + $0x18] sm:$0xff] %vm21_vm14, %v8795_v59  ;;  %26 = vst.msk [vmem:[#allocation2 + $0x20] sm:$0xff] %vm21_vm14, %v8795_v59  ;;  %v3492_v42 = vmul.f32 %v11463_v8, %v11460_v51  ;;  %v5538_v53 = vmax.f32 %v11613_v38, -1e+30  ;;  %v11626_v6 = vsel %vm4165_vm2, %v3810_v47, -1e+30  ;;  %v4588_v8 = vpop.xlane.xlu0 %4587 }
 0x2d9   :  { %27 = vst.msk [vmem:[#allocation2 + $0x28] sm:$0xff] %vm21_vm14, %v8795_v59  ;;  %28 = vst.msk [vmem:[#allocation2 + $0x30] sm:$0xff] %vm21_vm14, %v8795_v59  ;;  %v3620_v0 = vmul.f32 256.0, %v3300_v49  ;;  %v5541_v35 = vmax.f32 %v11626_v6, -1e+30 }
 0x2da   :  { %29 = vst.msk [vmem:[#allocation2 + $0x38] sm:$0xff] %vm21_vm14, %v8795_v59  ;;  %30 = vst.msk [vmem:[#allocation2 + $0x40] sm:$0xff] %vm21_vm14, %v8795_v59  ;;  %v3556_v39 = vsel %vm2980_vm13, %v3492_v42, 0.0  ;;  %5539 = vmax.xlane.f32.xlu0 %v5538_v53 }
 0x2db   :  { %31 = vst.msk [vmem:[#allocation2 + $0x48] sm:$0xff] %vm21_vm14, %v8795_v59  ;;  %32 = vst.msk [vmem:[#allocation2 + $0x50] sm:$0xff] %vm21_vm14, %v8795_v59  ;;  %v11633_v5 = vsel %vm4165_vm2, %v3556_v39, -1e+30  ;;  %v3748_v27 = vmul.f32 %v7088_v16, %v3620_v0  ;;  %5542 = vmax.xlane.f32.xlu1 %v5541_v35  ;;  %v4591_v39 = vpop.xlane.xlu1 %4590 }
 0x2dc   :  { %33 = vst.msk [vmem:[#allocation2 + $0x58] sm:$0xff] %vm21_vm14, %v8795_v59  ;;  %34 = vst.msk [vmem:[#allocation2 + $0x60] sm:$0xff] %vm21_vm14, %v8795_v59  ;;  %v4679_v50 = vmax.f32 %v11633_v5, -1e+30  ;;  %v5456_v0 = vpop.xlane.xlu0 %5455 }
 0x2dd   :  { %35 = vst.msk [vmem:[#allocation2 + $0x68] sm:$0xff] %vm21_vm14, %v8795_v59  ;;  %36 = vst.msk [vmem:[#allocation2 + $0x70] sm:$0xff] %vm21_vm14, %v8795_v59  ;;  %v3812_v51 = vsel %vm3044_vm15, %v3748_v27, 0.0  ;;  %v11641_v12 = vld [vmem:[#allocation4] sm:$0xff] }
 0x2de   :  { %37 = vst.msk [vmem:[#allocation2 + $0x78] sm:$0xff] %vm21_vm14, %v8795_v59  ;;  %38 = vst.msk [vmem:[#allocation2 + $0x80] sm:$0xff] %vm21_vm14, %v8795_v59  ;;  %v11639_v29 = vsel %vm4165_vm2, %v3812_v51, -1e+30  ;;  %v11643_v34 = vld [vmem:[#allocation2] sm:$0xff]  ;;  %4680 = vmax.xlane.f32.xlu0 %v4679_v50  ;;  %v11646_v49 = vmax.f32 %v11641_v12, %v5453_v10  ;;  %v11653_v42 = vld [vmem:[#allocation2 + $0x8] sm:$0xff] }
 0x2df   :  { %39 = vst.msk [vmem:[#allocation2 + $0x88] sm:$0xff] %vm21_vm14, %v8795_v59  ;;  %40 = vst.msk [vmem:[#allocation2 + $0x90] sm:$0xff] %vm21_vm14, %v8795_v59  ;;  %v5544_v16 = vmax.f32 %v11639_v29, -1e+30  ;;  %v11668_v27 = vmax.f32 %v11653_v42, %v4591_v39  ;;  %v11716_v30 = vld [vmem:[#allocation2 + $0x20] sm:$0xff] }
 0x2e0   :  { %41 = vst.msk [vmem:[#allocation2 + $0x98] sm:$0xff] %vm21_vm14, %v8795_v59  ;;  %42 = vst.msk [vmem:[#allocation2 + $0xa0] sm:$0xff] %vm21_vm14, %v8795_v59  ;;  %v11746_v52 = vld [vmem:[#allocation2 + $0x28] sm:$0xff] }
 0x2e1   :  { %43 = vst.msk [vmem:[#allocation2 + $0xa8] sm:$0xff] %vm21_vm14, %v8795_v59  ;;  %44 = vst.msk [vmem:[#allocation2 + $0xb0] sm:$0xff] %vm21_vm14, %v8795_v59  ;;  %v11796_v45 = vld [vmem:[#allocation2 + $0x40] sm:$0xff] }
 0x2e2   :  { %45 = vst.msk [vmem:[#allocation2 + $0xb8] sm:$0xff] %vm21_vm14, %v8795_v59  ;;  %46 = vst.msk [vmem:[#allocation2 + $0xc0] sm:$0xff] %vm21_vm14, %v8795_v59  ;;  %5545 = vmax.xlane.f32.xlu0 %v5544_v16  ;;  %v5459_v16 = vpop.xlane.xlu1 %5458 }
 0x2e3   :  { %47 = vst.msk [vmem:[#allocation2 + $0xc8] sm:$0xff] %vm21_vm14, %v8795_v59  ;;  %48 = vst.msk [vmem:[#allocation2 + $0xd0] sm:$0xff] %vm21_vm14, %v8795_v59 }
 0x2e4   :  { %49 = vst.msk [vmem:[#allocation2 + $0xd8] sm:$0xff] %vm21_vm14, %v8795_v59  ;;  %50 = vst.msk [vmem:[#allocation2 + $0xe0] sm:$0xff] %vm21_vm14, %v8795_v59 }
 0x2e5   :  { %51 = vst.msk [vmem:[#allocation2 + $0xe8] sm:$0xff] %vm21_vm14, %v8795_v59  ;;  %52 = vst.msk [vmem:[#allocation2 + $0xf0] sm:$0xff] %vm21_vm14, %v8795_v59 }
 0x2e6   :  { %53 = vst.msk [vmem:[#allocation2 + $0xf8] sm:$0xff] %vm21_vm14, %v8795_v59  ;;  %87 = vst.msk [vmem:[#allocation4 + $0x8] sm:$0xff] %vm21_vm14, %v8795_v59  ;;  %v5465_v20 = vpop.xlane.xlu1 %5464 }
 0x2e7   :  { %88 = vst.msk [vmem:[#allocation4 + $0x10] sm:$0xff] %vm21_vm14, %v8795_v59  ;;  %89 = vst.msk [vmem:[#allocation4 + $0x18] sm:$0xff] %vm21_vm14, %v8795_v59 }
 0x2e8   :  { %90 = vst.msk [vmem:[#allocation4 + $0x20] sm:$0xff] %vm21_vm14, %v8795_v59  ;;  %91 = vst.msk [vmem:[#allocation4 + $0x28] sm:$0xff] %vm21_vm14, %v8795_v59 }
 0x2e9   :  { %92 = vst.msk [vmem:[#allocation4 + $0x30] sm:$0xff] %vm21_vm14, %v8795_v59  ;;  %93 = vst.msk [vmem:[#allocation4 + $0x38] sm:$0xff] %vm21_vm14, %v8795_v59 }
 0x2ea   :  { %94 = vst.msk [vmem:[#allocation4 + $0x40] sm:$0xff] %vm21_vm14, %v8795_v59  ;;  %95 = vst.msk [vmem:[#allocation4 + $0x48] sm:$0xff] %vm21_vm14, %v8795_v59 }
 0x2eb   :  { %96 = vst.msk [vmem:[#allocation4 + $0x50] sm:$0xff] %vm21_vm14, %v8795_v59  ;;  %97 = vst.msk [vmem:[#allocation4 + $0x58] sm:$0xff] %vm21_vm14, %v8795_v59 }
 0x2ec   :  { %98 = vst.msk [vmem:[#allocation4 + $0x60] sm:$0xff] %vm21_vm14, %v8795_v59  ;;  %99 = vst.msk [vmem:[#allocation4 + $0x68] sm:$0xff] %vm21_vm14, %v8795_v59  ;;  %5741 = vperm.xlu1 %8151, %v11646_v49  }
 0x2ed   :  { %100 = vst.msk [vmem:[#allocation4 + $0x70] sm:$0xff] %vm21_vm14, %v8795_v59  ;;  %101 = vst.msk [vmem:[#allocation4 + $0x78] sm:$0xff] %vm21_vm14, %v8795_v59  ;;  %v11651_v47 = vld [vmem:[#allocation4 + $0x8] sm:$0xff] }
 0x2ee   :  { %102 = vst.msk [vmem:[#allocation4 + $0x80] sm:$0xff] %vm21_vm14, %v8795_v59  ;;  %103 = vst.msk [vmem:[#allocation4 + $0x88] sm:$0xff] %vm21_vm14, %v8795_v59  ;;  %v11665_v35 = vmax.f32 %v11651_v47, %v5456_v0  ;;  %v11678_v51 = vld [vmem:[#allocation4 + $0x10] sm:$0xff]  ;;  %v4594_v0 = vpop.xlane.xlu0 %4593  ;;  %v11688_v53 = vld [vmem:[#allocation4 + $0x18] sm:$0xff] }
 0x2ef   :  { %104 = vst.msk [vmem:[#allocation4 + $0x90] sm:$0xff] %vm21_vm14, %v8795_v59  ;;  %105 = vst.msk [vmem:[#allocation4 + $0x98] sm:$0xff] %vm21_vm14, %v8795_v59  ;;  %v11683_v39 = vmax.f32 %v11678_v51, %v5459_v16  ;;  %v11723_v10 = vld [vmem:[#allocation4 + $0x28] sm:$0xff] }
 0x2f0   :  { %106 = vst.msk [vmem:[#allocation4 + $0xa0] sm:$0xff] %vm21_vm14, %v8795_v59  ;;  %107 = vst.msk [vmem:[#allocation4 + $0xa8] sm:$0xff] %vm21_vm14, %v8795_v59 }
 0x2f1   :  { %108 = vst.msk [vmem:[#allocation4 + $0xb0] sm:$0xff] %vm21_vm14, %v8795_v59  ;;  %109 = vst.msk [vmem:[#allocation4 + $0xb8] sm:$0xff] %vm21_vm14, %v8795_v59 }
 0x2f2   :  { %110 = vst.msk [vmem:[#allocation4 + $0xc0] sm:$0xff] %vm21_vm14, %v8795_v59  ;;  %111 = vst.msk [vmem:[#allocation4 + $0xc8] sm:$0xff] %vm21_vm14, %v8795_v59 }
 0x2f3   :  { %112 = vst.msk [vmem:[#allocation4 + $0xd0] sm:$0xff] %vm21_vm14, %v8795_v59  ;;  %113 = vst.msk [vmem:[#allocation4 + $0xd8] sm:$0xff] %vm21_vm14, %v8795_v59 }
 0x2f4   :  { %114 = vst.msk [vmem:[#allocation4 + $0xe0] sm:$0xff] %vm21_vm14, %v8795_v59  ;;  %115 = vst.msk [vmem:[#allocation4 + $0xe8] sm:$0xff] %vm21_vm14, %v8795_v59 }
 0x2f5   :  { %116 = vst.msk [vmem:[#allocation4 + $0xf0] sm:$0xff] %vm21_vm14, %v8795_v59  ;;  %117 = vst.msk [vmem:[#allocation4 + $0xf8] sm:$0xff] %vm21_vm14, %v8795_v59  ;;  %v11649_v59 = vmax.f32 %v11643_v34, %v4588_v8  ;;  %v11680_v8 = vld [vmem:[#allocation2 + $0x10] sm:$0xff] }
 0x2f6   :  { %13820 = vst [vmem:[#allocation27_spill] sm:$0xff] %v11613_v38  ;;  %13821 = vst [vmem:[#allocation14_spill] sm:$0xff] %v11626_v6  ;;  %v11686_v50 = vmax.f32 %v11680_v8, %v4594_v0  ;;  %v11701_v0 = vld [vmem:[#allocation4 + $0x20] sm:$0xff] }
 0x2f7   :  { %13822 = vst [vmem:[#allocation26_spill] sm:$0xff] %v11633_v5  ;;  %13823 = vst [vmem:[#allocation29_spill] sm:$0xff] %v11639_v29  ;;  %v5462_v29 = vpop.xlane.xlu0 %5461  ;;  %v11704_v5 = vld [vmem:[#allocation2 + $0x18] sm:$0xff]  ;;  %v11711_v6 = vmax.f32 %v11701_v0, %v5465_v20  ;;  %4876 = vperm.xlu1 %8151, %v11649_v59   ;;  %v11756_v20 = vld [vmem:[#allocation2 + $0x30] sm:$0xff] }
 0x2f8   :  { %6251 = vst.msk [vmem:[#allocation4] sm:$0xff] %vm21_vm14, %v11646_v49  ;;  %5387 = vst.msk [vmem:[#allocation2] sm:$0xff] %vm21_vm14, %v11649_v59  ;;  %v11699_v16 = vmax.f32 %v11688_v53, %v5462_v29  ;;  %5746 = vperm.xlu0 %8150, %v11665_v35  }
 0x2f9   :  { %6252 = vst.msk [vmem:[#allocation4 + $0x8] sm:$0xff] %vm21_vm14, %v11665_v35  ;;  %5388 = vst.msk [vmem:[#allocation2 + $0x8] sm:$0xff] %vm21_vm14, %v11668_v27 }
 0x2fa   :  { %6253 = vst.msk [vmem:[#allocation4 + $0x10] sm:$0xff] %vm21_vm14, %v11683_v39  ;;  %5389 = vst.msk [vmem:[#allocation2 + $0x10] sm:$0xff] %vm21_vm14, %v11686_v50 }
 0x2fb   :  { %6254 = vst.msk [vmem:[#allocation4 + $0x18] sm:$0xff] %vm21_vm14, %v11699_v16  ;;  %v4597_v38 = vpop.xlane.xlu0 %4596  ;;  %6255 = vst.msk [vmem:[#allocation4 + $0x20] sm:$0xff] %vm21_vm14, %v11711_v6  ;;  %5751 = vperm.xlu1 %8151, %v11683_v39  }
 0x2fc   :  { %v11714_v29 = vmax.f32 %v11704_v5, %v4597_v38  ;;  %13824 = vst [vmem:[#allocation30_spill] sm:$0xff] %v11723_v10  ;;  %v4600_v38 = vpop.xlane.xlu1 %4599  ;;  %13827 = vst [vmem:[#allocation34_spill] sm:$0xff] %v11746_v52  ;;  %4881 = vperm.xlu0 %8150, %v11668_v27  }
 0x2fd   :  { %v11730_v4 = vmax.f32 %v11716_v30, %v4600_v38  ;;  %v11744_v38 = vld [vmem:[#allocation4 + $0x30] sm:$0xff]  ;;  %13828 = vst [vmem:[#allocation37_spill] sm:$0xff] %v11756_v20  ;;  %13836 = vst [vmem:[#allocation54_spill] sm:$0xff] %v11796_v45 }
 0x2fe   :  { %5390 = vst.msk [vmem:[#allocation2 + $0x18] sm:$0xff] %vm21_vm14, %v11714_v29  ;;  %13826 = vst [vmem:[#allocation33_spill] sm:$0xff] %v11744_v38 }
 0x2ff   :  { %v5468_v18 = vpop.xlane.xlu0 %5467  ;;  %5391 = vst.msk [vmem:[#allocation2 + $0x20] sm:$0xff] %vm21_vm14, %v11730_v4  ;;  %4886 = vperm.xlu1 %8151, %v11686_v50  }
 0x300   :  { %v11733_v56 = vmax.f32 %v11723_v10, %v5468_v18  ;;  %v5471_v18 = vpop.xlane.xlu1 %5470  ;;  %v11776_v10 = vld [vmem:[#allocation4 + $0x40] sm:$0xff]  ;;  %5761 = vperm.xlu0 %8150, %v11711_v6  }
 0x301   :  { %v11751_v17 = vmax.f32 %v11744_v38, %v5471_v18  ;;  %13832 = vst [vmem:[#allocation44_spill] sm:$0xff] %v11776_v10 }
 0x302   :  { %13825 = vst [vmem:[#allocation32_spill] sm:$0xff] %v11733_v56  ;;  %6256 = vst.msk [vmem:[#allocation4 + $0x28] sm:$0xff] %vm21_vm14, %v11733_v56 }
 0x303   :  { %v4603_v37 = vpop.xlane.xlu0 %4602  ;;  %5756 = vperm.xlu1 %8151, %v11699_v16   ;;  %6257 = vst.msk [vmem:[#allocation4 + $0x30] sm:$0xff] %vm21_vm14, %v11751_v17 }
 0x304   :  { %v11754_v24 = vmax.f32 %v11746_v52, %v4603_v37  ;;  %v11768_v37 = vld [vmem:[#allocation4 + $0x38] sm:$0xff]  ;;  %v4606_v18 = vpop.xlane.xlu1 %4605  ;;  %4896 = vperm.xlu0 %8150, %v11730_v4  }
 0x305   :  { %13829 = vst [vmem:[#allocation38_spill] sm:$0xff] %v11768_v37  ;;  %v11771_v60 = vmax.f32 %v11756_v20, %v4606_v18  ;;  %v11784_v52 = vld [vmem:[#allocation2 + $0x38] sm:$0xff] }
 0x306   :  { %5392 = vst.msk [vmem:[#allocation2 + $0x28] sm:$0xff] %vm21_vm14, %v11754_v24  ;;  %13833 = vst [vmem:[#allocation47_spill] sm:$0xff] %v11784_v52 }
 0x307   :  { %13830 = vst [vmem:[#allocation40_spill] sm:$0xff] %v11771_v60  ;;  %v5474_v19 = vpop.xlane.xlu0 %5473  ;;  %4891 = vperm.xlu1 %8151, %v11714_v29   ;;  %5393 = vst.msk [vmem:[#allocation2 + $0x30] sm:$0xff] %vm21_vm14, %v11771_v60 }
 0x308   :  { %v11774_v22 = vmax.f32 %v11768_v37, %v5474_v19  ;;  %v5477_v19 = vpop.xlane.xlu1 %5476  ;;  %v11804_v37 = vld [vmem:[#allocation4 + $0x48] sm:$0xff]  ;;  %5771 = vperm.xlu0 %8150, %v11751_v17  }
 0x309   :  { %v11791_v38 = vmax.f32 %v11776_v10, %v5477_v19  ;;  %13837 = vst [vmem:[#allocation55_spill] sm:$0xff] %v11804_v37 }
 0x30a   :  { %13831 = vst [vmem:[#allocation42_spill] sm:$0xff] %v11774_v22  ;;  %6258 = vst.msk [vmem:[#allocation4 + $0x38] sm:$0xff] %vm21_vm14, %v11774_v22 }
 0x30b   :  { %13834 = vst [vmem:[#allocation51_spill] sm:$0xff] %v11791_v38  ;;  %v4609_v11 = vpop.xlane.xlu0 %4608  ;;  %5766 = vperm.xlu1 %8151, %v11733_v56   ;;  %6259 = vst.msk [vmem:[#allocation4 + $0x40] sm:$0xff] %vm21_vm14, %v11791_v38 }
 0x30c   :  { %v11794_v32 = vmax.f32 %v11784_v52, %v4609_v11  ;;  %v4612_v11 = vpop.xlane.xlu1 %4611  ;;  %4906 = vperm.xlu0 %8150, %v11771_v60  }
 0x30d   :  { %v11811_v20 = vmax.f32 %v11796_v45, %v4612_v11  ;;  %v11826_v11 = vld [vmem:[#allocation2 + $0x48] sm:$0xff] }
 0x30e   :  { %13835 = vst [vmem:[#allocation53_spill] sm:$0xff] %v11794_v32  ;;  %5394 = vst.msk [vmem:[#allocation2 + $0x38] sm:$0xff] %vm21_vm14, %v11794_v32 }
 0x30f   :  { %13838 = vst [vmem:[#allocation56_spill] sm:$0xff] %v11811_v20  ;;  %v5480_v61 = vpop.xlane.xlu0 %5479  ;;  %4901 = vperm.xlu1 %8151, %v11754_v24   ;;  %5395 = vst.msk [vmem:[#allocation2 + $0x40] sm:$0xff] %vm21_vm14, %v11811_v20 }
 0x310   :  { %v11814_v56 = vmax.f32 %v11804_v37, %v5480_v61  ;;  %13840 = vst [vmem:[#allocation58_spill] sm:$0xff] %v11826_v11  ;;  %v11828_v61 = vld [vmem:[#allocation4 + $0x50] sm:$0xff]  ;;  %v5483_v45 = vpop.xlane.xlu1 %5482  ;;  %5781 = vperm.xlu0 %8150, %v11791_v38  }
 0x311   :  { %13841 = vst [vmem:[#allocation59_spill] sm:$0xff] %v11828_v61  ;;  %v11836_v10 = vmax.f32 %v11828_v61, %v5483_v45  ;;  %v11842_v37 = vld [vmem:[#allocation2 + $0x50] sm:$0xff]  ;;  %v11850_v45 = vld [vmem:[#allocation4 + $0x58] sm:$0xff]  ;;  %v11864_v61 = vld [vmem:[#allocation4 + $0x60] sm:$0xff] }
 0x312   :  { %13839 = vst [vmem:[#allocation57_spill] sm:$0xff] %v11814_v56  ;;  %6260 = vst.msk [vmem:[#allocation4 + $0x48] sm:$0xff] %vm21_vm14, %v11814_v56 }
 0x313   :  { %v4615_v52 = vpop.xlane.xlu0 %4614  ;;  %5776 = vperm.xlu1 %8151, %v11774_v22   ;;  %13843 = vst [vmem:[#allocation61_spill] sm:$0xff] %v11836_v10  ;;  %13844 = vst [vmem:[#allocation62_spill] sm:$0xff] %v11842_v37 }
 0x314   :  { %v11833_v18 = vmax.f32 %v11826_v11, %v4615_v52  ;;  %6261 = vst.msk [vmem:[#allocation4 + $0x50] sm:$0xff] %vm21_vm14, %v11836_v10  ;;  %13845 = vst [vmem:[#allocation63_spill] sm:$0xff] %v11850_v45  ;;  %v4618_v52 = vpop.xlane.xlu1 %4617  ;;  %4916 = vperm.xlu0 %8150, %v11811_v20  }
 0x315   :  { %v11853_v19 = vmax.f32 %v11842_v37, %v4618_v52  ;;  %13847 = vst [vmem:[#allocation65_spill] sm:$0xff] %v11864_v61  ;;  %v11880_v37 = vld [vmem:[#allocation2 + $0x60] sm:$0xff]  ;;  %v11900_v52 = vld [vmem:[#allocation2 + $0x68] sm:$0xff] }
 0x316   :  { %13842 = vst [vmem:[#allocation60_spill] sm:$0xff] %v11833_v18  ;;  %5396 = vst.msk [vmem:[#allocation2 + $0x48] sm:$0xff] %vm21_vm14, %v11833_v18 }
 0x317   :  { %4911 = vperm.xlu1 %8151, %v11794_v32   ;;  %v5486_v11 = vpop.xlane.xlu0 %5485  ;;  %5397 = vst.msk [vmem:[#allocation2 + $0x50] sm:$0xff] %vm21_vm14, %v11853_v19  ;;  %v11866_v32 = vld [vmem:[#allocation2 + $0x58] sm:$0xff]  ;;  %13851 = vst [vmem:[#allocation69_spill] sm:$0xff] %v11880_v37 }
 0x318   :  { %v11856_v60 = vmax.f32 %v11850_v45, %v5486_v11  ;;  %13848 = vst [vmem:[#allocation66_spill] sm:$0xff] %v11866_v32  ;;  %v5489_v11 = vpop.xlane.xlu1 %5488  ;;  %5791 = vperm.xlu0 %8150, %v11836_v10   ;;  %13855 = vst [vmem:[#allocation73_spill] sm:$0xff] %v11900_v52 }
 0x319   :  { %v11873_v38 = vmax.f32 %v11864_v61, %v5489_v11 }
 0x31a   :  { %13846 = vst [vmem:[#allocation64_spill] sm:$0xff] %v11856_v60  ;;  %6262 = vst.msk [vmem:[#allocation4 + $0x58] sm:$0xff] %vm21_vm14, %v11856_v60 }
 0x31b   :  { %5786 = vperm.xlu1 %8151, %v11814_v56   ;;  %v4621_v20 = vpop.xlane.xlu0 %4620  ;;  %13849 = vst [vmem:[#allocation67_spill] sm:$0xff] %v11873_v38  ;;  %v11882_v56 = vld [vmem:[#allocation4 + $0x68] sm:$0xff]  ;;  %6263 = vst.msk [vmem:[#allocation4 + $0x60] sm:$0xff] %vm21_vm14, %v11873_v38 }
 0x31c   :  { %v11876_v22 = vmax.f32 %v11866_v32, %v4621_v20  ;;  %13852 = vst [vmem:[#allocation70_spill] sm:$0xff] %v11882_v56  ;;  %v4624_v20 = vpop.xlane.xlu1 %4623  ;;  %4926 = vperm.xlu0 %8150, %v11853_v19  }
 0x31d   :  { %v11893_v10 = vmax.f32 %v11880_v37, %v4624_v20 }
 0x31e   :  { %13850 = vst [vmem:[#allocation68_spill] sm:$0xff] %v11876_v22  ;;  %5398 = vst.msk [vmem:[#allocation2 + $0x58] sm:$0xff] %vm21_vm14, %v11876_v22 }
 0x31f   :  { %4921 = vperm.xlu1 %8151, %v11833_v18   ;;  %v5492_v45 = vpop.xlane.xlu0 %5491  ;;  %13853 = vst [vmem:[#allocation71_spill] sm:$0xff] %v11893_v10  ;;  %5399 = vst.msk [vmem:[#allocation2 + $0x60] sm:$0xff] %vm21_vm14, %v11893_v10 }
 0x320   :  { %v11896_v18 = vmax.f32 %v11882_v56, %v5492_v45  ;;  %v11910_v45 = vld [vmem:[#allocation4 + $0x70] sm:$0xff]  ;;  %v5495_v61 = vpop.xlane.xlu1 %5494  ;;  %5801 = vperm.xlu0 %8150, %v11873_v38   ;;  %v11940_v38 = vld [vmem:[#allocation2 + $0x80] sm:$0xff] }
 0x321   :  { %13856 = vst [vmem:[#allocation74_spill] sm:$0xff] %v11910_v45  ;;  %v11917_v11 = vmax.f32 %v11910_v45, %v5495_v61  ;;  %v11924_v56 = vld [vmem:[#allocation2 + $0x70] sm:$0xff]  ;;  %13862 = vst [vmem:[#allocation80_spill] sm:$0xff] %v11940_v38  ;;  %v11946_v45 = vld [vmem:[#allocation2 + $0x78] sm:$0xff] }
 0x322   :  { %13854 = vst [vmem:[#allocation72_spill] sm:$0xff] %v11896_v18  ;;  %6264 = vst.msk [vmem:[#allocation4 + $0x68] sm:$0xff] %vm21_vm14, %v11896_v18 }
 0x323   :  { %5796 = vperm.xlu1 %8151, %v11856_v60   ;;  %v4627_v20 = vpop.xlane.xlu0 %4626  ;;  %13857 = vst [vmem:[#allocation75_spill] sm:$0xff] %v11917_v11  ;;  %13858 = vst [vmem:[#allocation76_spill] sm:$0xff] %v11924_v56 }
 0x324   :  { %v11913_v60 = vmax.f32 %v11900_v52, %v4627_v20  ;;  %6265 = vst.msk [vmem:[#allocation4 + $0x70] sm:$0xff] %vm21_vm14, %v11917_v11  ;;  %v11930_v20 = vld [vmem:[#allocation4 + $0x78] sm:$0xff]  ;;  %v4630_v61 = vpop.xlane.xlu1 %4629  ;;  %4936 = vperm.xlu0 %8150, %v11893_v10   ;;  %13863 = vst [vmem:[#allocation81_spill] sm:$0xff] %v11946_v45 }
 0x325   :  { %13859 = vst [vmem:[#allocation77_spill] sm:$0xff] %v11930_v20 }
 0x326   :  { %5400 = vst.msk [vmem:[#allocation2 + $0x68] sm:$0xff] %vm21_vm14, %v11913_v60 }
 0x327   :  { %4931 = vperm.xlu1 %8151, %v11876_v22   ;;  %v11934_v22 = vmax.f32 %v11924_v56, %v4630_v61  ;;  %v5498_v32 = vpop.xlane.xlu0 %5497  ;;  %v11964_v61 = vld [vmem:[#allocation4 + $0x80] sm:$0xff] }
 0x328   :  { %v11938_v52 = vmax.f32 %v11930_v20, %v5498_v32  ;;  %5811 = vperm.xlu0 %8150, %v11917_v11   ;;  %13866 = vst [vmem:[#allocation84_spill] sm:$0xff] %v11964_v61 }
 0x329   :  { %13860 = vst [vmem:[#allocation78_spill] sm:$0xff] %v11934_v22  ;;  %5401 = vst.msk [vmem:[#allocation2 + $0x70] sm:$0xff] %vm21_vm14, %v11934_v22 }
 0x32a   :  { %13861 = vst [vmem:[#allocation79_spill] sm:$0xff] %v11938_v52  ;;  %6266 = vst.msk [vmem:[#allocation4 + $0x78] sm:$0xff] %vm21_vm14, %v11938_v52 }
 0x32b   :  { %5806 = vperm.xlu1 %8151, %v11896_v18   ;;  %v4636_v18 = vpop.xlane.xlu1 %4635  ;;  %v4633_v37 = vpop.xlane.xlu0 %4632 }
 0x32c   :  { %v11954_v32 = vmax.f32 %v11940_v38, %v4636_v18  ;;  %v11958_v56 = vmax.f32 %v11946_v45, %v4633_v37  ;;  %v11970_v18 = vld [vmem:[#allocation2 + $0x88] sm:$0xff]  ;;  %4946 = vperm.xlu0 %8150, %v11934_v22   ;;  %v12001_v45 = vld [vmem:[#allocation4 + $0x90] sm:$0xff] }
 0x32d   :  { %13867 = vst [vmem:[#allocation85_spill] sm:$0xff] %v11970_v18  ;;  %13874 = vst [vmem:[#allocation92_spill] sm:$0xff] %v12001_v45 }
 0x32e   :  { %13864 = vst [vmem:[#allocation82_spill] sm:$0xff] %v11954_v32  ;;  %13865 = vst [vmem:[#allocation83_spill] sm:$0xff] %v11958_v56 }
 0x32f   :  { %4941 = vperm.xlu1 %8151, %v11913_v60   ;;  %5403 = vst.msk [vmem:[#allocation2 + $0x80] sm:$0xff] %vm21_vm14, %v11954_v32  ;;  %5402 = vst.msk [vmem:[#allocation2 + $0x78] sm:$0xff] %vm21_vm14, %v11958_v56  ;;  %v5501_v37 = vpop.xlane.xlu1 %5500  ;;  %v4639_v38 = vpop.xlane.xlu0 %4638 }
 0x330   :  { %v11975_v10 = vmax.f32 %v11964_v61, %v5501_v37  ;;  %v11978_v11 = vmax.f32 %v11970_v18, %v4639_v38  ;;  %4956 = vperm.xlu0 %8150, %v11954_v32   ;;  %v11989_v37 = vld [vmem:[#allocation2 + $0x90] sm:$0xff]  ;;  %v11992_v38 = vld [vmem:[#allocation4 + $0x88] sm:$0xff]  ;;  %v12004_v18 = vld [vmem:[#allocation2 + $0x98] sm:$0xff] }
 0x331   :  { %13870 = vst [vmem:[#allocation88_spill] sm:$0xff] %v11989_v37  ;;  %13871 = vst [vmem:[#allocation89_spill] sm:$0xff] %v11992_v38 }
 0x332   :  { %13868 = vst [vmem:[#allocation86_spill] sm:$0xff] %v11975_v10  ;;  %13869 = vst [vmem:[#allocation87_spill] sm:$0xff] %v11978_v11 }
 0x333   :  { %5816 = vperm.xlu1 %8151, %v11938_v52   ;;  %6267 = vst.msk [vmem:[#allocation4 + $0x80] sm:$0xff] %vm21_vm14, %v11975_v10  ;;  %5404 = vst.msk [vmem:[#allocation2 + $0x88] sm:$0xff] %vm21_vm14, %v11978_v11  ;;  %v4642_v52 = vpop.xlane.xlu1 %4641  ;;  %v5504_v22 = vpop.xlane.xlu0 %5503 }
 0x334   :  { %v11995_v20 = vmax.f32 %v11989_v37, %v4642_v52  ;;  %v11998_v61 = vmax.f32 %v11992_v38, %v5504_v22  ;;  %5821 = vperm.xlu0 %8150, %v11975_v10   ;;  %13875 = vst [vmem:[#allocation93_spill] sm:$0xff] %v12004_v18 }
 0x336   :  { %13872 = vst [vmem:[#allocation90_spill] sm:$0xff] %v11995_v20  ;;  %13873 = vst [vmem:[#allocation91_spill] sm:$0xff] %v11998_v61 }
 0x337   :  { %4951 = vperm.xlu1 %8151, %v11958_v56   ;;  %5405 = vst.msk [vmem:[#allocation2 + $0x90] sm:$0xff] %vm21_vm14, %v11995_v20  ;;  %6268 = vst.msk [vmem:[#allocation4 + $0x88] sm:$0xff] %vm21_vm14, %v11998_v61  ;;  %v5507_v22 = vpop.xlane.xlu1 %5506  ;;  %v4645_v10 = vpop.xlane.xlu0 %4644  ;;  %v12021_v56 = vld [vmem:[#allocation2 + $0xa0] sm:$0xff] }
 0x338   :  { %v12015_v32 = vmax.f32 %v12001_v45, %v5507_v22  ;;  %4966 = vperm.xlu0 %8150, %v11995_v20   ;;  %13878 = vst [vmem:[#allocation96_spill] sm:$0xff] %v12021_v56  ;;  %v12041_v45 = vld [vmem:[#allocation4 + $0xa0] sm:$0xff] }
 0x339   :  { %13882 = vst [vmem:[#allocation100_spill] sm:$0xff] %v12041_v45 }
 0x33a   :  { %13876 = vst [vmem:[#allocation94_spill] sm:$0xff] %v12015_v32  ;;  %6269 = vst.msk [vmem:[#allocation4 + $0x90] sm:$0xff] %vm21_vm14, %v12015_v32 }
 0x33b   :  { %4961 = vperm.xlu1 %8151, %v11978_v11   ;;  %v12018_v11 = vmax.f32 %v12004_v18, %v4645_v10  ;;  %v12032_v10 = vld [vmem:[#allocation4 + $0x98] sm:$0xff]  ;;  %v4648_v22 = vpop.xlane.xlu1 %4647  ;;  %v5510_v37 = vpop.xlane.xlu0 %5509  ;;  %v12048_v18 = vld [vmem:[#allocation2 + $0xa8] sm:$0xff] }
 0x33c   :  { %13879 = vst [vmem:[#allocation97_spill] sm:$0xff] %v12032_v10  ;;  %v12035_v20 = vmax.f32 %v12021_v56, %v4648_v22  ;;  %5831 = vperm.xlu0 %8150, %v12015_v32   ;;  %v12039_v52 = vmax.f32 %v12032_v10, %v5510_v37  ;;  %13883 = vst [vmem:[#allocation101_spill] sm:$0xff] %v12048_v18  ;;  %v12061_v56 = vld [vmem:[#allocation2 + $0xb0] sm:$0xff] }
 0x33d   :  { %13877 = vst [vmem:[#allocation95_spill] sm:$0xff] %v12018_v11  ;;  %5406 = vst.msk [vmem:[#allocation2 + $0x98] sm:$0xff] %vm21_vm14, %v12018_v11 }
 0x33e   :  { %13880 = vst [vmem:[#allocation98_spill] sm:$0xff] %v12035_v20  ;;  %13881 = vst [vmem:[#allocation99_spill] sm:$0xff] %v12039_v52 }
 0x33f   :  { %5826 = vperm.xlu1 %8151, %v11998_v61   ;;  %5407 = vst.msk [vmem:[#allocation2 + $0xa0] sm:$0xff] %vm21_vm14, %v12035_v20  ;;  %6270 = vst.msk [vmem:[#allocation4 + $0x98] sm:$0xff] %vm21_vm14, %v12039_v52  ;;  %v5513_v37 = vpop.xlane.xlu1 %5512  ;;  %v4651_v61 = vpop.xlane.xlu0 %4650 }
 0x340   :  { %v12055_v32 = vmax.f32 %v12041_v45, %v5513_v37  ;;  %4976 = vperm.xlu0 %8150, %v12035_v20   ;;  %v12059_v38 = vmax.f32 %v12048_v18, %v4651_v61  ;;  %13886 = vst [vmem:[#allocation104_spill] sm:$0xff] %v12061_v56  ;;  %v12072_v20 = vld [vmem:[#allocation4 + $0xa8] sm:$0xff]  ;;  %v12086_v18 = vld [vmem:[#allocation4 + $0xb0] sm:$0xff]  ;;  %v12092_v45 = vld [vmem:[#allocation2 + $0xb8] sm:$0xff] }
 0x341   :  { %13887 = vst [vmem:[#allocation105_spill] sm:$0xff] %v12072_v20  ;;  %13890 = vst [vmem:[#allocation108_spill] sm:$0xff] %v12086_v18 }
 0x342   :  { %13884 = vst [vmem:[#allocation102_spill] sm:$0xff] %v12055_v32  ;;  %13885 = vst [vmem:[#allocation103_spill] sm:$0xff] %v12059_v38 }
 0x343   :  { %4971 = vperm.xlu1 %8151, %v12018_v11   ;;  %6271 = vst.msk [vmem:[#allocation4 + $0xa0] sm:$0xff] %vm21_vm14, %v12055_v32  ;;  %5408 = vst.msk [vmem:[#allocation2 + $0xa8] sm:$0xff] %vm21_vm14, %v12059_v38  ;;  %v4654_v10 = vpop.xlane.xlu1 %4653  ;;  %v12108_v11 = vld [vmem:[#allocation4 + $0xb8] sm:$0xff] }
 0x344   :  { %v12075_v61 = vmax.f32 %v12061_v56, %v4654_v10  ;;  %5841 = vperm.xlu0 %8150, %v12055_v32   ;;  %13891 = vst [vmem:[#allocation109_spill] sm:$0xff] %v12092_v45  ;;  %v12099_v56 = vld [vmem:[#allocation2 + $0xc0] sm:$0xff]  ;;  %13895 = vst [vmem:[#allocation113_spill] sm:$0xff] %v12108_v11 }
 0x345   :  { %13893 = vst [vmem:[#allocation111_spill] sm:$0xff] %v12099_v56 }
 0x346   :  { %13888 = vst [vmem:[#allocation106_spill] sm:$0xff] %v12075_v61  ;;  %5409 = vst.msk [vmem:[#allocation2 + $0xb0] sm:$0xff] %vm21_vm14, %v12075_v61 }
 0x347   :  { %5836 = vperm.xlu1 %8151, %v12039_v52   ;;  %v5516_v52 = vpop.xlane.xlu0 %5515  ;;  %v5519_v32 = vpop.xlane.xlu1 %5518 }
 0x348   :  { %v12084_v37 = vmax.f32 %v12072_v20, %v5516_v52  ;;  %4986 = vperm.xlu0 %8150, %v12075_v61   ;;  %v12096_v22 = vmax.f32 %v12086_v18, %v5519_v32  ;;  %v12119_v18 = vld [vmem:[#allocation4 + $0xc0] sm:$0xff]  ;;  %v12128_v61 = vld [vmem:[#allocation2 + $0xc8] sm:$0xff] }
 0x349   :  { %13897 = vst [vmem:[#allocation115_spill] sm:$0xff] %v12119_v18  ;;  %13899 = vst [vmem:[#allocation117_spill] sm:$0xff] %v12128_v61 }
 0x34a   :  { %13889 = vst [vmem:[#allocation107_spill] sm:$0xff] %v12084_v37  ;;  %6272 = vst.msk [vmem:[#allocation4 + $0xa8] sm:$0xff] %vm21_vm14, %v12084_v37 }
 0x34b   :  { %4981 = vperm.xlu1 %8151, %v12059_v38   ;;  %13892 = vst [vmem:[#allocation110_spill] sm:$0xff] %v12096_v22  ;;  %v4657_v52 = vpop.xlane.xlu0 %4656  ;;  %6273 = vst.msk [vmem:[#allocation4 + $0xb0] sm:$0xff] %vm21_vm14, %v12096_v22  ;;  %v4660_v20 = vpop.xlane.xlu1 %4659 }
 0x34c   :  { %v12106_v10 = vmax.f32 %v12092_v45, %v4657_v52  ;;  %5851 = vperm.xlu0 %8150, %v12096_v22  }
 0x34e   :  { %13894 = vst [vmem:[#allocation112_spill] sm:$0xff] %v12106_v10  ;;  %5410 = vst.msk [vmem:[#allocation2 + $0xb8] sm:$0xff] %vm21_vm14, %v12106_v10 }
 0x34f   :  { %5846 = vperm.xlu1 %8151, %v12084_v37   ;;  %v12116_v37 = vmax.f32 %v12099_v56, %v4660_v20  ;;  %v5522_v38 = vpop.xlane.xlu0 %5521  ;;  %v5525_v45 = vpop.xlane.xlu1 %5524  ;;  %v12146_v20 = vld [vmem:[#allocation2 + $0xd0] sm:$0xff] }
 0x350   :  { %v12126_v32 = vmax.f32 %v12108_v11, %v5522_v38  ;;  %13902 = vst [vmem:[#allocation120_spill] sm:$0xff] %v12146_v20  ;;  %v12148_v11 = vld [vmem:[#allocation4 + $0xc8] sm:$0xff] }
 0x351   :  { %13896 = vst [vmem:[#allocation114_spill] sm:$0xff] %v12116_v37  ;;  %5411 = vst.msk [vmem:[#allocation2 + $0xc0] sm:$0xff] %vm21_vm14, %v12116_v37  ;;  %4996 = vperm.xlu0 %8150, %v12116_v37   ;;  %v12162_v37 = vld [vmem:[#allocation4 + $0xd0] sm:$0xff] }
 0x352   :  { %13898 = vst [vmem:[#allocation116_spill] sm:$0xff] %v12126_v32  ;;  %6274 = vst.msk [vmem:[#allocation4 + $0xb8] sm:$0xff] %vm21_vm14, %v12126_v32 }
 0x353   :  { %4991 = vperm.xlu1 %8151, %v12106_v10   ;;  %v12136_v10 = vmax.f32 %v12119_v18, %v5525_v45  ;;  %v4663_v52 = vpop.xlane.xlu0 %4662  ;;  %13903 = vst [vmem:[#allocation121_spill] sm:$0xff] %v12148_v11  ;;  %13906 = vst [vmem:[#allocation124_spill] sm:$0xff] %v12162_v37 }
 0x354   :  { %v12144_v56 = vmax.f32 %v12128_v61, %v4663_v52 }
 0x355   :  { %13900 = vst [vmem:[#allocation118_spill] sm:$0xff] %v12136_v10  ;;  %6275 = vst.msk [vmem:[#allocation4 + $0xc0] sm:$0xff] %vm21_vm14, %v12136_v10  ;;  %5861 = vperm.xlu0 %8150, %v12136_v10  }
 0x356   :  { %13901 = vst [vmem:[#allocation119_spill] sm:$0xff] %v12144_v56  ;;  %5412 = vst.msk [vmem:[#allocation2 + $0xc8] sm:$0xff] %vm21_vm14, %v12144_v56 }
 0x357   :  { %5856 = vperm.xlu1 %8151, %v12126_v32   ;;  %v4666_v32 = vpop.xlane.xlu1 %4665  ;;  %v5528_v52 = vpop.xlane.xlu0 %5527 }
 0x358   :  { %v12157_v38 = vmax.f32 %v12146_v20, %v4666_v32  ;;  %v12160_v18 = vmax.f32 %v12148_v11, %v5528_v52  ;;  %v12179_v20 = vld [vmem:[#allocation2 + $0xe0] sm:$0xff] }
 0x359   :  { %13909 = vst [vmem:[#allocation127_spill] sm:$0xff] %v12179_v20 }
 0x35a   :  { %13904 = vst [vmem:[#allocation122_spill] sm:$0xff] %v12157_v38  ;;  %13905 = vst [vmem:[#allocation123_spill] sm:$0xff] %v12160_v18  ;;  %5006 = vperm.xlu0 %8150, %v12157_v38  }
 0x35b   :  { %5001 = vperm.xlu1 %8151, %v12144_v56   ;;  %5413 = vst.msk [vmem:[#allocation2 + $0xd0] sm:$0xff] %vm21_vm14, %v12157_v38  ;;  %6276 = vst.msk [vmem:[#allocation4 + $0xc8] sm:$0xff] %vm21_vm14, %v12160_v18  ;;  %v5531_v32 = vpop.xlane.xlu1 %5530  ;;  %v12173_v56 = vld [vmem:[#allocation2 + $0xd8] sm:$0xff]  ;;  %v4669_v45 = vpop.xlane.xlu0 %4668 }
 0x35c   :  { %13907 = vst [vmem:[#allocation125_spill] sm:$0xff] %v12173_v56  ;;  %v12177_v52 = vmax.f32 %v12162_v37, %v5531_v32  ;;  %v12186_v61 = vmax.f32 %v12173_v56, %v4669_v45  ;;  %v12189_v38 = vld [vmem:[#allocation4 + $0xd8] sm:$0xff]  ;;  %v12199_v37 = vld [vmem:[#allocation4 + $0xe0] sm:$0xff]  ;;  %v12209_v56 = vld [vmem:[#allocation2 + $0xe8] sm:$0xff] }
 0x35d   :  { %13911 = vst [vmem:[#allocation129_spill] sm:$0xff] %v12189_v38  ;;  %13913 = vst [vmem:[#allocation131_spill] sm:$0xff] %v12199_v37 }
 0x35e   :  { %13908 = vst [vmem:[#allocation126_spill] sm:$0xff] %v12177_v52  ;;  %6277 = vst.msk [vmem:[#allocation4 + $0xd0] sm:$0xff] %vm21_vm14, %v12177_v52  ;;  %5871 = vperm.xlu0 %8150, %v12177_v52  }
 0x35f   :  { %5866 = vperm.xlu1 %8151, %v12160_v18   ;;  %13910 = vst [vmem:[#allocation128_spill] sm:$0xff] %v12186_v61  ;;  %v4672_v11 = vpop.xlane.xlu1 %4671  ;;  %5414 = vst.msk [vmem:[#allocation2 + $0xd8] sm:$0xff] %vm21_vm14, %v12186_v61  ;;  %v5534_v10 = vpop.xlane.xlu0 %5533 }
 0x360   :  { %v12196_v18 = vmax.f32 %v12179_v20, %v4672_v11  ;;  %v12206_v52 = vmax.f32 %v12189_v38, %v5534_v10  ;;  %13915 = vst [vmem:[#allocation133_spill] sm:$0xff] %v12209_v56  ;;  %v12219_v20 = vld [vmem:[#allocation2 + $0xf0] sm:$0xff]  ;;  %v12236_v38 = vld [vmem:[#allocation4 + $0xe8] sm:$0xff] }
 0x361   :  { %13917 = vst [vmem:[#allocation135_spill] sm:$0xff] %v12219_v20  ;;  %13920 = vst [vmem:[#allocation138_spill] sm:$0xff] %v12236_v38  ;;  %v12239_v10 = vld [vmem:[#allocation4 + $0xf0] sm:$0xff] }
 0x362   :  { %13912 = vst [vmem:[#allocation130_spill] sm:$0xff] %v12196_v18  ;;  %5415 = vst.msk [vmem:[#allocation2 + $0xe0] sm:$0xff] %vm21_vm14, %v12196_v18  ;;  %5016 = vperm.xlu0 %8150, %v12196_v18  }
 0x363   :  { %5011 = vperm.xlu1 %8151, %v12186_v61   ;;  %13914 = vst [vmem:[#allocation132_spill] sm:$0xff] %v12206_v52  ;;  %v5537_v32 = vpop.xlane.xlu1 %5536  ;;  %6278 = vst.msk [vmem:[#allocation4 + $0xd8] sm:$0xff] %vm21_vm14, %v12206_v52  ;;  %v4675_v45 = vpop.xlane.xlu0 %4674 }
 0x364   :  { %v12216_v61 = vmax.f32 %v12199_v37, %v5537_v32  ;;  %v12226_v18 = vmax.f32 %v12209_v56, %v4675_v45  ;;  %13921 = vst [vmem:[#allocation139_spill] sm:$0xff] %v12239_v10  ;;  %v12252_v37 = vld [vmem:[#allocation2 + $0xf8] sm:$0xff] }
 0x365   :  { %13924 = vst [vmem:[#allocation142_spill] sm:$0xff] %v12252_v37 }
 0x366   :  { %13916 = vst [vmem:[#allocation134_spill] sm:$0xff] %v12216_v61  ;;  %6279 = vst.msk [vmem:[#allocation4 + $0xe0] sm:$0xff] %vm21_vm14, %v12216_v61  ;;  %5881 = vperm.xlu0 %8150, %v12216_v61  }
 0x367   :  { %5876 = vperm.xlu1 %8151, %v12206_v52   ;;  %13918 = vst [vmem:[#allocation136_spill] sm:$0xff] %v12226_v18  ;;  %v4678_v11 = vpop.xlane.xlu1 %4677  ;;  %5416 = vst.msk [vmem:[#allocation2 + $0xe8] sm:$0xff] %vm21_vm14, %v12226_v18  ;;  %v5540_v61 = vpop.xlane.xlu0 %5539 }
 0x368   :  { %v12234_v52 = vmax.f32 %v12219_v20, %v4678_v11  ;;  %v12246_v32 = vmax.f32 %v12236_v38, %v5540_v61  ;;  %v12267_v20 = vld [vmem:[#allocation4 + $0xf8] sm:$0xff]  ;;  %v13928_v38 = vsub.f32 %v11643_v34, %v11649_v59 }
 0x36a   :  { %13919 = vst [vmem:[#allocation137_spill] sm:$0xff] %v12234_v52  ;;  %5417 = vst.msk [vmem:[#allocation2 + $0xf0] sm:$0xff] %vm21_vm14, %v12234_v52  ;;  %5026 = vperm.xlu0 %8150, %v12234_v52   ;;  %v4778_v22 = vmul.f32 1.442695, %v13928_v38  ;;  %v13931_v38 = vsub.f32 %v11678_v51, %v11683_v39  ;;  %v13934_v39 = vsub.f32 %v11701_v0, %v11711_v6 }
 0x36b   :  { %5021 = vperm.xlu1 %8151, %v12226_v18   ;;  %13922 = vst [vmem:[#allocation140_spill] sm:$0xff] %v12246_v32  ;;  %v5543_v11 = vpop.xlane.xlu1 %5542  ;;  %6280 = vst.msk [vmem:[#allocation4 + $0xe8] sm:$0xff] %vm21_vm14, %v12246_v32  ;;  %v4681_v45 = vpop.xlane.xlu0 %4680  ;;  %v13932_v18 = vsub.f32 %v11680_v8, %v11686_v50  ;;  %v13936_v6 = vsub.f32 %v11716_v30, %v11730_v4 }
 0x36c   :  { %v12250_v56 = vmax.f32 %v12239_v10, %v5543_v11  ;;  %v12264_v11 = vmax.f32 %v12252_v37, %v4681_v45  ;;  %v13927_v45 = vsub.f32 %v11641_v12, %v11646_v49  ;;  %v13930_v12 = vsub.f32 %v11653_v42, %v11668_v27 }
 0x36d   :  { %v5651_v50 = vmul.f32 1.442695, %v13934_v39  ;;  %v4786_v0 = vmul.f32 1.442695, %v13936_v6 }
 0x36e   :  { %13923 = vst [vmem:[#allocation141_spill] sm:$0xff] %v12250_v56  ;;  %6281 = vst.msk [vmem:[#allocation4 + $0xf0] sm:$0xff] %vm21_vm14, %v12250_v56  ;;  %5891 = vperm.xlu0 %8150, %v12250_v56   ;;  %v5643_v56 = vmul.f32 1.442695, %v13927_v45  ;;  %v4780_v49 = vmul.f32 1.442695, %v13930_v12 }
 0x36f   :  { %5886 = vperm.xlu1 %8151, %v12246_v32   ;;  %13925 = vst [vmem:[#allocation143_spill] sm:$0xff] %v12264_v11  ;;  %v5742_v52 = vpop.permute.xlu1 %5741  ;;  %5418 = vst.msk [vmem:[#allocation2 + $0xf8] sm:$0xff] %vm21_vm14, %v12264_v11  ;;  %v5546_v61 = vpop.xlane.xlu0 %5545  ;;  %v5647_v45 = vmul.f32 1.442695, %v13931_v38 }
 0x370   :  { %v12275_v10 = vmax.f32 %v12267_v20, %v5546_v61  ;;  %v13929_v61 = vsub.f32 %v11651_v47, %v11665_v35  ;;  %v5899_v37 = vsub.f32 %v10395_v55, %v5742_v52  ;;  %v5900_v34 = vsub.f32 -1e+30, %v5742_v52 }
 0x371   :  { %8152 = vpow2.f32 %v5643_v56  ;;  %v13933_v56 = vsub.f32 %v11688_v53, %v11699_v16 }
 0x372   :  { %13926 = vst [vmem:[#allocation144_spill] sm:$0xff] %v12275_v10  ;;  %6282 = vst.msk [vmem:[#allocation4 + $0xf8] sm:$0xff] %vm21_vm14, %v12275_v10  ;;  %8154 = vpow2.f32 %v4778_v22  ;;  %v5963_v47 = vmul.f32 1.442695, %v5899_v37  ;;  %v5965_v42 = vmul.f32 1.442695, %v5900_v34 }
 0x373   :  { %5031 = vperm.xlu1 %8151, %v12264_v11   ;;  %v5645_v11 = vmul.f32 1.442695, %v13929_v61  ;;  %v5649_v51 = vmul.f32 1.442695, %v13933_v56 }
 0x375   :  { %8156 = vpow2.f32 %v5645_v11  ;;  %v13935_v11 = vsub.f32 %v11704_v5, %v11714_v29 }
 0x376   :  { %v4877_v32 = vpop.permute.xlu1 %4876  ;;  %8158 = vpow2.f32 %v4780_v49 }
 0x377   :  { %5896 = vperm.xlu1 %8151, %v12275_v10   ;;  %v4782_v10 = vmul.f32 1.442695, %v13932_v18  ;;  %v5034_v55 = vsub.f32 %v10407_v43, %v4877_v32  ;;  %v5747_v35 = vpop.permute.xlu0 %5746  ;;  %v5035_v27 = vsub.f32 -1e+30, %v4877_v32  ;;  %8160 = vpow2.f32 %v5647_v45 }
 0x378   :  { %v4784_v53 = vmul.f32 1.442695, %v13935_v11  ;;  %v5901_v16 = vsub.f32 %v10427_v63, %v5747_v35 }
 0x379   :  { %8162 = vpow2.f32 %v4782_v10  ;;  %v5098_v8 = vmul.f32 1.442695, %v5034_v55  ;;  %v5100_v22 = vmul.f32 1.442695, %v5035_v27  ;;  %v5902_v10 = vsub.f32 -1e+30, %v5747_v35 }
 0x37a   :  { %v5752_v59 = vpop.permute.xlu1 %5751  ;;  %8164 = vpow2.f32 %v5963_v47  ;;  %v5967_v38 = vmul.f32 1.442695, %v5901_v16 }
 0x37b   :  { %v5903_v18 = vsub.f32 %v10472_v40, %v5752_v59  ;;  %v4882_v43 = vpop.permute.xlu0 %4881  ;;  %8166 = vpow2.f32 %v5965_v42  ;;  %v5904_v37 = vsub.f32 -1e+30, %v5752_v59  ;;  %v12316_v61 = vpop.eup %8152  ;;  %v5969_v45 = vmul.f32 1.442695, %v5902_v10 }
 0x37c   :  { %8168 = vpow2.f32 %v5649_v51  ;;  %v12319_v34 = vpop.eup %8154  ;;  %v5036_v4 = vsub.f32 %v10442_v54, %v4882_v43  ;;  %v5037_v47 = vsub.f32 -1e+30, %v4882_v43 }
 0x37d   :  { %8170 = vpow2.f32 %v5651_v50  ;;  %v5971_v40 = vmul.f32 1.442695, %v5903_v18  ;;  %v5973_v5 = vmul.f32 1.442695, %v5904_v37 }
 0x37e   :  { %v4887_v52 = vpop.permute.xlu1 %4886  ;;  %8172 = vpow2.f32 %v5098_v8  ;;  %v5102_v54 = vmul.f32 1.442695, %v5036_v4  ;;  %v5104_v18 = vmul.f32 1.442695, %v5037_v47 }
 0x37f   :  { %v5038_v12 = vsub.f32 %v10476_v62, %v4887_v52  ;;  %v5762_v49 = vpop.permute.xlu0 %5761  ;;  %8174 = vpow2.f32 %v5100_v22  ;;  %v5039_v29 = vsub.f32 -1e+30, %v4887_v52  ;;  %v12321_v63 = vpop.eup %8156 }
 0x380   :  { %8176 = vpow2.f32 %v4784_v53  ;;  %v12324_v30 = vpop.eup %8158  ;;  %v5907_v50 = vsub.f32 %v10518_v57, %v5762_v49  ;;  %v5908_v43 = vsub.f32 -1e+30, %v5762_v49 }
 0x381   :  { %8178 = vpow2.f32 %v4786_v0  ;;  %v12326_v55 = vpop.eup %8160  ;;  %v5106_v62 = vmul.f32 1.442695, %v5038_v12  ;;  %v5108_v52 = vmul.f32 1.442695, %v5039_v29 }
 0x382   :  { %v5757_v32 = vpop.permute.xlu1 %5756  ;;  %8180 = vpow2.f32 %v5971_v40  ;;  %v5979_v57 = vmul.f32 1.442695, %v5907_v50  ;;  %v5981_v49 = vmul.f32 1.442695, %v5908_v43 }
 0x383   :  { %v5905_v35 = vsub.f32 %v10503_v41, %v5757_v32  ;;  %v4897_v42 = vpop.permute.xlu0 %4896  ;;  %v12329_v27 = vpop.eup %8162  ;;  %8182 = vpow2.f32 %v5973_v5  ;;  %v5906_v56 = vsub.f32 -1e+30, %v5757_v32 }
 0x384   :  { %v8165_v39 = vpop.eup %8164  ;;  %8184 = vpow2.f32 %v5967_v38  ;;  %v5042_v10 = vsub.f32 %v10552_v15, %v4897_v42  ;;  %v5043_v5 = vsub.f32 -1e+30, %v4897_v42 }
 0x385   :  { %v8167_v8 = vpop.eup %8166  ;;  %8186 = vpow2.f32 %v5969_v45  ;;  %v5975_v41 = vmul.f32 1.442695, %v5905_v35  ;;  %v5977_v32 = vmul.f32 1.442695, %v5906_v56 }
 0x386   :  { %v4892_v59 = vpop.permute.xlu1 %4891  ;;  %v12332_v22 = vpop.eup %8168  ;;  %8188 = vpow2.f32 %v5106_v62  ;;  %v6091_v40 = vadd.f32 %v8167_v8, %v8165_v39  ;;  %v5114_v35 = vmul.f32 1.442695, %v5042_v10  ;;  %v5116_v39 = vmul.f32 1.442695, %v5043_v5 }
 0x387   :  { %v5040_v37 = vsub.f32 %v10532_v31, %v4892_v59  ;;  %v5772_v11 = vpop.permute.xlu0 %5771  ;;  %v12335_v53 = vpop.eup %8170  ;;  %8190 = vpow2.f32 %v5108_v52  ;;  %v5041_v16 = vsub.f32 -1e+30, %v4892_v59 }
 0x388   :  { %v8173_v0 = vpop.eup %8172  ;;  %8192 = vpow2.f32 %v5102_v54  ;;  %v5911_v52 = vsub.f32 %v10605_v26, %v5772_v11  ;;  %v5912_v54 = vsub.f32 -1e+30, %v5772_v11 }
 0x389   :  { %v8175_v12 = vpop.eup %8174  ;;  %8194 = vpow2.f32 %v5104_v18  ;;  %v5110_v31 = vmul.f32 1.442695, %v5040_v37  ;;  %v5112_v45 = vmul.f32 1.442695, %v5041_v16 }
 0x38a   :  { %v5767_v51 = vpop.permute.xlu1 %5766  ;;  %v12338_v29 = vpop.eup %8176  ;;  %8196 = vpow2.f32 %v5975_v41  ;;  %v5226_v42 = vadd.f32 %v8175_v12, %v8173_v0  ;;  %v5987_v26 = vmul.f32 1.442695, %v5911_v52  ;;  %v5989_v11 = vmul.f32 1.442695, %v5912_v54 }
 0x38b   :  { %v5909_v38 = vsub.f32 %v10566_v2, %v5767_v51  ;;  %v4907_v4 = vpop.permute.xlu0 %4906  ;;  %v12341_v59 = vpop.eup %8178  ;;  %8198 = vpow2.f32 %v5977_v32  ;;  %v5910_v47 = vsub.f32 -1e+30, %v5767_v51 }
 0x38c   :  { %v8181_v15 = vpop.eup %8180  ;;  %8200 = vpow2.f32 %v5979_v57  ;;  %v5046_v16 = vsub.f32 %v10621_v13, %v4907_v4  ;;  %v5047_v10 = vsub.f32 -1e+30, %v4907_v4 }
 0x38d   :  { %6092 = vadd.xlane.f32.xlu0 %v6091_v40  ;;  %v8183_v56 = vpop.eup %8182  ;;  %8202 = vpow2.f32 %v5981_v49  ;;  %v5983_v2 = vmul.f32 1.442695, %v5909_v38  ;;  %v5985_v51 = vmul.f32 1.442695, %v5910_v47 }
 0x38e   :  { %v4902_v6 = vpop.permute.xlu1 %4901  ;;  %v8185_v50 = vpop.eup %8184  ;;  %8204 = vpow2.f32 %v5110_v31  ;;  %v6097_v0 = vadd.f32 %v8183_v56, %v8181_v15  ;;  %v5122_v47 = vmul.f32 1.442695, %v5046_v16  ;;  %v5124_v52 = vmul.f32 1.442695, %v5047_v10 }
 0x38f   :  { %v5044_v8 = vsub.f32 %v10609_v25, %v4902_v6  ;;  %v5782_v18 = vpop.permute.xlu0 %5781  ;;  %v8187_v43 = vpop.eup %8186  ;;  %8206 = vpow2.f32 %v5112_v45  ;;  %v5045_v41 = vsub.f32 -1e+30, %v4902_v6 }
 0x390   :  { %v8189_v32 = vpop.eup %8188  ;;  %8208 = vpow2.f32 %v5114_v35  ;;  %v6094_v45 = vadd.f32 %v8187_v43, %v8185_v50  ;;  %v5915_v15 = vsub.f32 %v10658_v58, %v5782_v18 }
 0x391   :  { %5227 = vadd.xlane.f32.xlu0 %v5226_v42  ;;  %v8191_v57 = vpop.eup %8190  ;;  %8210 = vpow2.f32 %v5116_v39  ;;  %v5118_v25 = vmul.f32 1.442695, %v5044_v8  ;;  %v5120_v6 = vmul.f32 1.442695, %v5045_v41  ;;  %v5916_v42 = vsub.f32 -1e+30, %v5782_v18 }
 0x392   :  { %v5777_v62 = vpop.permute.xlu1 %5776  ;;  %v8193_v40 = vpop.eup %8192  ;;  %8212 = vpow2.f32 %v5983_v2  ;;  %v5232_v4 = vadd.f32 %v8191_v57, %v8189_v32 }
 0x393   :  { %v5913_v12 = vsub.f32 %v10649_v14, %v5777_v62  ;;  %v4917_v49 = vpop.permute.xlu0 %4916  ;;  %v8195_v5 = vpop.eup %8194  ;;  %8214 = vpow2.f32 %v5985_v51  ;;  %v5914_v31 = vsub.f32 -1e+30, %v5777_v62  ;;  %v5995_v51 = vmul.f32 1.442695, %v5915_v15 }
 0x394   :  { %v8197_v13 = vpop.eup %8196  ;;  %8216 = vpow2.f32 %v5987_v26  ;;  %v5229_v58 = vadd.f32 %v8195_v5, %v8193_v40  ;;  %v5050_v18 = vsub.f32 %v10685_v23, %v4917_v49  ;;  %v5997_v26 = vmul.f32 1.442695, %v5916_v42 }
 0x395   :  { %6098 = vadd.xlane.f32.xlu0 %v6097_v0  ;;  %v8199_v35 = vpop.eup %8198  ;;  %8218 = vpow2.f32 %v5989_v11  ;;  %v5991_v56 = vmul.f32 1.442695, %v5913_v12  ;;  %v5993_v50 = vmul.f32 1.442695, %v5914_v31  ;;  %v5051_v16 = vsub.f32 -1e+30, %v4917_v49 }
 0x396   :  { %v4912_v37 = vpop.permute.xlu1 %4911  ;;  %v8201_v14 = vpop.eup %8200  ;;  %8220 = vpow2.f32 %v5118_v25  ;;  %v6100_v41 = vadd.f32 %v8199_v35, %v8197_v13  ;;  %v5130_v49 = vmul.f32 1.442695, %v5050_v18 }
 0x397   :  { %v5048_v39 = vsub.f32 %v10676_v46, %v4912_v37  ;;  %v5792_v62 = vpop.permute.xlu0 %5791  ;;  %v8203_v54 = vpop.eup %8202  ;;  %8222 = vpow2.f32 %v5120_v6  ;;  %v5049_v2 = vsub.f32 -1e+30, %v4912_v37 }
 0x398   :  { %v8205_v43 = vpop.eup %8204  ;;  %8224 = vpow2.f32 %v5122_v47  ;;  %v6103_v25 = vadd.f32 %v8203_v54, %v8201_v14  ;;  %v5919_v5 = vsub.f32 %v10753_v36, %v5792_v62 }
 0x399   :  { %5233 = vadd.xlane.f32.xlu0 %v5232_v4  ;;  %v8207_v32 = vpop.eup %8206  ;;  %8226 = vpow2.f32 %v5124_v52  ;;  %v5126_v0 = vmul.f32 1.442695, %v5048_v39  ;;  %v5128_v10 = vmul.f32 1.442695, %v5049_v2 }
 0x39a   :  { %v12347_v38 = vpop.permute.xlu1 %5786  ;;  %v8209_v46 = vpop.eup %8208  ;;  %8228 = vpow2.f32 %v5991_v56  ;;  %v5235_v6 = vadd.f32 %v8207_v32, %v8205_v43  ;;  %v6003_v56 = vmul.f32 1.442695, %v5919_v5 }
 0x39b   :  { %6095 = vadd.xlane.f32.xlu1 %v6094_v45  ;;  %v5917_v37 = vsub.f32 %v10715_v44, %v12347_v38  ;;  %v4927_v57 = vpop.permute.xlu0 %4926  ;;  %v8211_v11 = vpop.eup %8210  ;;  %8230 = vpow2.f32 %v5993_v50  ;;  %v5918_v40 = vsub.f32 -1e+30, %v12347_v38  ;;  %v5132_v45 = vmul.f32 1.442695, %v5051_v16 }
 0x39c   :  { %v8213_v12 = vpop.eup %8212  ;;  %8232 = vpow2.f32 %v5995_v51  ;;  %v5920_v44 = vsub.f32 -1e+30, %v5792_v62  ;;  %v5238_v42 = vadd.f32 %v8211_v11, %v8209_v46  ;;  %v5054_v39 = vsub.f32 %v10764_v9, %v4927_v57 }
 0x39d   :  { %6101 = vadd.xlane.f32.xlu0 %v6100_v41  ;;  %v8215_v31 = vpop.eup %8214  ;;  %8234 = vpow2.f32 %v5997_v26  ;;  %v5999_v47 = vmul.f32 1.442695, %v5917_v37  ;;  %v6001_v35 = vmul.f32 1.442695, %v5918_v40 }
 0x39e   :  { %v12351_v8 = vpop.permute.xlu1 %4921  ;;  %v8217_v13 = vpop.eup %8216  ;;  %8236 = vpow2.f32 %v5126_v0  ;;  %v6106_v62 = vadd.f32 %v8215_v31, %v8213_v12  ;;  %v6005_v50 = vmul.f32 1.442695, %v5920_v44  ;;  %v5138_v16 = vmul.f32 1.442695, %v5054_v39 }
 0x39f   :  { %5230 = vadd.xlane.f32.xlu1 %v5229_v58  ;;  %v5052_v38 = vsub.f32 %v10741_v3, %v12351_v8  ;;  %v5802_v15 = vpop.permute.xlu0 %5801  ;;  %v8219_v4 = vpop.eup %8218  ;;  %8238 = vpow2.f32 %v5128_v10  ;;  %v5053_v52 = vsub.f32 -1e+30, %v12351_v8  ;;  %v5055_v3 = vsub.f32 -1e+30, %v4927_v57 }
 0x3a0   :  { %v8221_v14 = vpop.eup %8220  ;;  %8240 = vpow2.f32 %v5130_v49  ;;  %v6109_v32 = vadd.f32 %v8219_v4, %v8217_v13  ;;  %v5923_v46 = vsub.f32 %v10816_v48, %v5802_v15 }
 0x3a1   :  { %5236 = vadd.xlane.f32.xlu0 %v5235_v6  ;;  %v8223_v54 = vpop.eup %8222  ;;  %8242 = vpow2.f32 %v5132_v45  ;;  %v5134_v58 = vmul.f32 1.442695, %v5052_v38  ;;  %v5136_v18 = vmul.f32 1.442695, %v5053_v52  ;;  %v5140_v57 = vmul.f32 1.442695, %v5055_v3 }
 0x3a2   :  { %v12357_v23 = vpop.permute.xlu1 %5796  ;;  %v8225_v2 = vpop.eup %8224  ;;  %8244 = vpow2.f32 %v5999_v47  ;;  %v5241_v0 = vadd.f32 %v8223_v54, %v8221_v14  ;;  %v6011_v31 = vmul.f32 1.442695, %v5923_v46  ;;  %v13938_v46 = vld [vmem:[#allocation23_spill] sm:$0xff] }
 0x3a3   :  { %6104 = vadd.xlane.f32.xlu1 %v6103_v25  ;;  %v5921_v8 = vsub.f32 %v10784_v33, %v12357_v23  ;;  %v4937_v43 = vpop.permute.xlu0 %4936  ;;  %v8227_v51 = vpop.eup %8226  ;;  %8246 = vpow2.f32 %v6001_v35  ;;  %v5922_v41 = vsub.f32 -1e+30, %v12357_v23  ;;  %v5924_v33 = vsub.f32 -1e+30, %v5802_v15 }
 0x3a4   :  { %v8229_v26 = vpop.eup %8228  ;;  %8248 = vpow2.f32 %v6003_v56  ;;  %v5244_v5 = vadd.f32 %v8227_v51, %v8225_v2  ;;  %v5058_v45 = vsub.f32 %v10824_v21, %v4937_v43 }
 0x3a5   :  { %6107 = vadd.xlane.f32.xlu0 %v6106_v62  ;;  %v8231_v37 = vpop.eup %8230  ;;  %8250 = vpow2.f32 %v6005_v50  ;;  %v6007_v10 = vmul.f32 1.442695, %v5921_v8  ;;  %v6009_v12 = vmul.f32 1.442695, %v5922_v41  ;;  %v6013_v47 = vmul.f32 1.442695, %v5924_v33 }
 0x3a6   :  { %v12363_v36 = vpop.permute.xlu1 %4931  ;;  %v8233_v11 = vpop.eup %8232  ;;  %8252 = vpow2.f32 %v5134_v58  ;;  %v6112_v44 = vadd.f32 %v8231_v37, %v8229_v26  ;;  %v5146_v39 = vmul.f32 1.442695, %v5058_v45  ;;  %v13937_v8 = vld [vmem:[#allocation19_spill] sm:$0xff] }
 0x3a7   :  { %5239 = vadd.xlane.f32.xlu1 %v5238_v42  ;;  %v5056_v40 = vsub.f32 %v10820_v7, %v12363_v36  ;;  %v5812_v23 = vpop.permute.xlu0 %5811  ;;  %v8235_v25 = vpop.eup %8234  ;;  %8254 = vpow2.f32 %v5136_v18  ;;  %v5057_v49 = vsub.f32 -1e+30, %v12363_v36  ;;  %v5059_v7 = vsub.f32 -1e+30, %v4937_v43 }
 0x3a8   :  { %v8237_v6 = vpop.eup %8236  ;;  %8256 = vpow2.f32 %v5138_v16  ;;  %v6115_v14 = vadd.f32 %v8235_v25, %v8233_v11  ;;  %v5927_v62 = vsub.f32 %v10875_v1, %v5812_v23 }
 0x3a9   :  { %5242 = vadd.xlane.f32.xlu0 %v5241_v0  ;;  %v8239_v13 = vpop.eup %8238  ;;  %8258 = vpow2.f32 %v5140_v57  ;;  %v5142_v15 = vmul.f32 1.442695, %v5056_v40  ;;  %v5144_v36 = vmul.f32 1.442695, %v5057_v49  ;;  %v5148_v3 = vmul.f32 1.442695, %v5059_v7 }
 0x3aa   :  { %v12369_v9 = vpop.permute.xlu1 %5806  ;;  %v8241_v38 = vpop.eup %8240  ;;  %8260 = vpow2.f32 %v6007_v10  ;;  %v5247_v54 = vadd.f32 %v8239_v13, %v8237_v6  ;;  %v6019_v16 = vmul.f32 1.442695, %v5927_v62  ;;  %v13940_v13 = vld [vmem:[#allocation6_spill] sm:$0xff] }
 0x3ab   :  { %6110 = vadd.xlane.f32.xlu1 %v6109_v32  ;;  %v5925_v4 = vsub.f32 %v10846_v28, %v12369_v9  ;;  %v4947_v35 = vpop.permute.xlu0 %4946  ;;  %v8243_v52 = vpop.eup %8242  ;;  %8262 = vpow2.f32 %v6009_v12  ;;  %v5926_v42 = vsub.f32 -1e+30, %v12369_v9  ;;  %v5928_v28 = vsub.f32 -1e+30, %v5812_v23  ;;  %v13939_v23 = vld [vmem:[#allocation24_spill] sm:$0xff] }
 0x3ac   :  { %v8245_v56 = vpop.eup %8244  ;;  %8264 = vpow2.f32 %v6011_v31  ;;  %v5250_v32 = vadd.f32 %v8243_v52, %v8241_v38  ;;  %v5062_v0 = vsub.f32 %v13938_v46, %v4947_v35  ;;  %v5063_v11 = vsub.f32 -1e+30, %v4947_v35 }
 0x3ad   :  { %6113 = vadd.xlane.f32.xlu0 %v6112_v44  ;;  %v8247_v50 = vpop.eup %8246  ;;  %8266 = vpow2.f32 %v6013_v47  ;;  %v6015_v58 = vmul.f32 1.442695, %v5925_v4  ;;  %v6017_v41 = vmul.f32 1.442695, %v5926_v42  ;;  %v6021_v33 = vmul.f32 1.442695, %v5928_v28 }
 0x3ae   :  { %v12375_v48 = vpop.permute.xlu1 %4941  ;;  %v8249_v2 = vpop.eup %8248  ;;  %8268 = vpow2.f32 %v5142_v15  ;;  %v6118_v37 = vadd.f32 %v8247_v50, %v8245_v56  ;;  %v5154_v44 = vmul.f32 1.442695, %v5062_v0  ;;  %v5156_v15 = vmul.f32 1.442695, %v5063_v11  ;;  %v13942_v28 = vld [vmem:[#allocation7_spill] sm:$0xff]  ;;  %v13944_v11 = vld [vmem:[#allocation28_spill] sm:$0xff] }
 0x3af   :  { %5245 = vadd.xlane.f32.xlu1 %v5244_v5  ;;  %v5060_v43 = vsub.f32 %v13937_v8, %v12375_v48  ;;  %v4957_v51 = vpop.permute.xlu0 %4956  ;;  %v8251_v18 = vpop.eup %8250  ;;  %8270 = vpow2.f32 %v5144_v36  ;;  %v5061_v9 = vsub.f32 -1e+30, %v12375_v48  ;;  %v13941_v36 = vld [vmem:[#allocation22_spill] sm:$0xff] }
 0x3b0   :  { %v8253_v26 = vpop.eup %8252  ;;  %8272 = vpow2.f32 %v5146_v39  ;;  %v6121_v31 = vadd.f32 %v8251_v18, %v8249_v2  ;;  %v5066_v47 = vsub.f32 %v13940_v13, %v4957_v51  ;;  %v5067_v4 = vsub.f32 -1e+30, %v4957_v51 }
 0x3b1   :  { %5248 = vadd.xlane.f32.xlu0 %v5247_v54  ;;  %v8255_v57 = vpop.eup %8254  ;;  %8274 = vpow2.f32 %v5148_v3  ;;  %v5150_v40 = vmul.f32 1.442695, %v5060_v43  ;;  %v5152_v48 = vmul.f32 1.442695, %v5061_v9  ;;  %v13943_v9 = vld [vmem:[#allocation25_spill] sm:$0xff] }
 0x3b2   :  { %v12381_v21 = vpop.permute.xlu1 %5816  ;;  %v8257_v10 = vpop.eup %8256  ;;  %8276 = vpow2.f32 %v6015_v58  ;;  %v5253_v7 = vadd.f32 %v8255_v57, %v8253_v26  ;;  %v5162_v3 = vmul.f32 1.442695, %v5066_v47  ;;  %v5164_v43 = vmul.f32 1.442695, %v5067_v4  ;;  %v13946_v4 = vld [vmem:[#allocation9_spill] sm:$0xff] }
 0x3b3   :  { %6116 = vadd.xlane.f32.xlu1 %v6115_v14  ;;  %v5929_v25 = vsub.f32 %v13939_v23, %v12381_v21  ;;  %v5822_v12 = vpop.permute.xlu0 %5821  ;;  %v8259_v49 = vpop.eup %8258  ;;  %8278 = vpow2.f32 %v6017_v41  ;;  %v5930_v5 = vsub.f32 -1e+30, %v12381_v21 }
 0x3b4   :  { %v8261_v45 = vpop.eup %8260  ;;  %8280 = vpow2.f32 %v6019_v16  ;;  %v5256_v54 = vadd.f32 %v8259_v49, %v8257_v10  ;;  %v5931_v2 = vsub.f32 %v13942_v28, %v5822_v12  ;;  %v5932_v51 = vsub.f32 -1e+30, %v5822_v12 }
 0x3b5   :  { %6119 = vadd.xlane.f32.xlu0 %v6118_v37  ;;  %v8263_v38 = vpop.eup %8262  ;;  %8282 = vpow2.f32 %v6021_v33  ;;  %v6023_v52 = vmul.f32 1.442695, %v5929_v25  ;;  %v6025_v56 = vmul.f32 1.442695, %v5930_v5  ;;  %v13945_v5 = vld [vmem:[#allocation8_spill] sm:$0xff] }
 0x3b6   :  { %v12387_v1 = vpop.permute.xlu1 %4951  ;;  %v8265_v35 = vpop.eup %8264  ;;  %8284 = vpow2.f32 %v5150_v40  ;;  %v6124_v58 = vadd.f32 %v8263_v38, %v8261_v45  ;;  %v6027_v33 = vmul.f32 1.442695, %v5931_v2  ;;  %v6029_v25 = vmul.f32 1.442695, %v5932_v51  ;;  %v13948_v51 = vld [vmem:[#allocation10_spill] sm:$0xff] }
 0x3b7   :  { %5251 = vadd.xlane.f32.xlu1 %v5250_v32  ;;  %v5064_v42 = vsub.f32 %v13941_v36, %v12387_v1  ;;  %v4967_v21 = vpop.permute.xlu0 %4966  ;;  %v8267_v14 = vpop.eup %8266  ;;  %8286 = vpow2.f32 %v5152_v48  ;;  %v5065_v39 = vsub.f32 -1e+30, %v12387_v1 }
 0x3b8   :  { %v8269_v50 = vpop.eup %8268  ;;  %8288 = vpow2.f32 %v5154_v44  ;;  %v6127_v37 = vadd.f32 %v8267_v14, %v8265_v35  ;;  %v5070_v10 = vsub.f32 %v13944_v11, %v4967_v21  ;;  %v5071_v12 = vsub.f32 -1e+30, %v4967_v21 }
 0x3b9   :  { %5254 = vadd.xlane.f32.xlu0 %v5253_v7  ;;  %v8271_v8 = vpop.eup %8270  ;;  %8290 = vpow2.f32 %v5156_v15  ;;  %v5158_v41 = vmul.f32 1.442695, %v5064_v42  ;;  %v5160_v16 = vmul.f32 1.442695, %v5065_v39  ;;  %v13947_v39 = vld [vmem:[#allocation31_spill] sm:$0xff] }
 0x3ba   :  { %v12393_v6 = vpop.permute.xlu1 %4961  ;;  %v8273_v18 = vpop.eup %8272  ;;  %8292 = vpow2.f32 %v6023_v52  ;;  %v5259_v40 = vadd.f32 %v8271_v8, %v8269_v50  ;;  %v5170_v15 = vmul.f32 1.442695, %v5070_v10  ;;  %v5172_v42 = vmul.f32 1.442695, %v5071_v12  ;;  %v13950_v12 = vld [vmem:[#allocation35_spill] sm:$0xff] }
 0x3bb   :  { %6122 = vadd.xlane.f32.xlu1 %v6121_v31  ;;  %v5068_v1 = vsub.f32 %v13943_v9, %v12393_v6  ;;  %v5832_v32 = vpop.permute.xlu0 %5831  ;;  %v8275_v26 = vpop.eup %8274  ;;  %8294 = vpow2.f32 %v6025_v56  ;;  %v5069_v46 = vsub.f32 -1e+30, %v12393_v6 }
 0x3bc   :  { %v8277_v57 = vpop.eup %8276  ;;  %8296 = vpow2.f32 %v5162_v3  ;;  %v5262_v7 = vadd.f32 %v8275_v26, %v8273_v18  ;;  %v5935_v35 = vsub.f32 %v13946_v4, %v5832_v32  ;;  %v5936_v21 = vsub.f32 -1e+30, %v5832_v32 }
 0x3bd   :  { %6125 = vadd.xlane.f32.xlu0 %v6124_v58  ;;  %v8279_v23 = vpop.eup %8278  ;;  %8298 = vpow2.f32 %v5164_v43  ;;  %v5166_v48 = vmul.f32 1.442695, %v5068_v1  ;;  %v5168_v44 = vmul.f32 1.442695, %v5069_v46  ;;  %v13949_v46 = vld [vmem:[#allocation11_spill] sm:$0xff] }
 0x3be   :  { %v12399_v62 = vpop.permute.xlu1 %5826  ;;  %v8281_v49 = vpop.eup %8280  ;;  %8300 = vpow2.f32 %v5158_v41  ;;  %v6130_v52 = vadd.f32 %v8279_v23, %v8277_v57  ;;  %v6035_v43 = vmul.f32 1.442695, %v5935_v35  ;;  %v6037_v1 = vmul.f32 1.442695, %v5936_v21  ;;  %v13952_v21 = vld [vmem:[#allocation13_spill] sm:$0xff] }
 0x3bf   :  { %5257 = vadd.xlane.f32.xlu1 %v5256_v54  ;;  %v5933_v6 = vsub.f32 %v13945_v5, %v12399_v62  ;;  %v4977_v31 = vpop.permute.xlu0 %4976  ;;  %v8283_v45 = vpop.eup %8282  ;;  %8302 = vpow2.f32 %v5160_v16  ;;  %v5934_v13 = vsub.f32 -1e+30, %v12399_v62 }
 0x3c0   :  { %v8285_v38 = vpop.eup %8284  ;;  %8304 = vpow2.f32 %v6027_v33  ;;  %v6133_v58 = vadd.f32 %v8283_v45, %v8281_v49  ;;  %v5074_v18 = vsub.f32 %v13948_v51, %v4977_v31  ;;  %v5075_v32 = vsub.f32 -1e+30, %v4977_v31 }
 0x3c1   :  { %5260 = vadd.xlane.f32.xlu0 %v5259_v40  ;;  %v8287_v36 = vpop.eup %8286  ;;  %8306 = vpow2.f32 %v6029_v25  ;;  %v6031_v56 = vmul.f32 1.442695, %v5933_v6  ;;  %v6033_v3 = vmul.f32 1.442695, %v5934_v13  ;;  %v13951_v13 = vld [vmem:[#allocation12_spill] sm:$0xff] }
 0x3c2   :  { %v12405_v0 = vpop.permute.xlu1 %4971  ;;  %v8289_v14 = vpop.eup %8288  ;;  %8308 = vpow2.f32 %v5166_v48  ;;  %v5265_v41 = vadd.f32 %v8287_v36, %v8285_v38  ;;  %v5178_v25 = vmul.f32 1.442695, %v5074_v18  ;;  %v5180_v6 = vmul.f32 1.442695, %v5075_v32  ;;  %v13954_v32 = vld [vmem:[#allocation39_spill] sm:$0xff] }
 0x3c3   :  { %6128 = vadd.xlane.f32.xlu1 %v6127_v37  ;;  %v5072_v62 = vsub.f32 %v13947_v39, %v12405_v0  ;;  %v5842_v54 = vpop.permute.xlu0 %5841  ;;  %v8291_v50 = vpop.eup %8290  ;;  %8310 = vpow2.f32 %v5168_v44  ;;  %v5073_v28 = vsub.f32 -1e+30, %v12405_v0 }
 0x3c4   :  { %v8293_v8 = vpop.eup %8292  ;;  %8312 = vpow2.f32 %v5170_v15  ;;  %v5268_v40 = vadd.f32 %v8291_v50, %v8289_v14  ;;  %v5939_v49 = vsub.f32 %v13950_v12, %v5842_v54  ;;  %v5940_v31 = vsub.f32 -1e+30, %v5842_v54 }
 0x3c5   :  { %6131 = vadd.xlane.f32.xlu0 %v6130_v52  ;;  %v8295_v9 = vpop.eup %8294  ;;  %8314 = vpow2.f32 %v5172_v42  ;;  %v5174_v16 = vmul.f32 1.442695, %v5072_v62  ;;  %v5176_v33 = vmul.f32 1.442695, %v5073_v28  ;;  %v13953_v28 = vld [vmem:[#allocation36_spill] sm:$0xff] }
 0x3c6   :  { %v12411_v47 = vpop.permute.xlu1 %5836  ;;  %v8297_v26 = vpop.eup %8296  ;;  %8316 = vpow2.f32 %v6031_v56  ;;  %v6136_v48 = vadd.f32 %v8295_v9, %v8293_v8  ;;  %v6043_v42 = vmul.f32 1.442695, %v5939_v49  ;;  %v6045_v62 = vmul.f32 1.442695, %v5940_v31  ;;  %v13956_v31 = vld [vmem:[#allocation16_spill] sm:$0xff] }
 0x3c7   :  { %5263 = vadd.xlane.f32.xlu1 %v5262_v7  ;;  %v5937_v0 = vsub.f32 %v13949_v46, %v12411_v47  ;;  %v4987_v37 = vpop.permute.xlu0 %4986  ;;  %v8299_v57 = vpop.eup %8298  ;;  %8318 = vpow2.f32 %v6033_v3  ;;  %v5938_v11 = vsub.f32 -1e+30, %v12411_v47 }
 0x3c8   :  { %v8301_v23 = vpop.eup %8300  ;;  %8320 = vpow2.f32 %v6035_v43  ;;  %v5274_v52 = vadd.f32 %v8299_v57, %v8297_v26  ;;  %v5078_v14 = vsub.f32 %v13952_v21, %v4987_v37  ;;  %v5079_v54 = vsub.f32 -1e+30, %v4987_v37 }
 0x3c9   :  { %5266 = vadd.xlane.f32.xlu0 %v5265_v41  ;;  %v8303_v5 = vpop.eup %8302  ;;  %8322 = vpow2.f32 %v6037_v1  ;;  %v6039_v44 = vmul.f32 1.442695, %v5937_v0  ;;  %v6041_v15 = vmul.f32 1.442695, %v5938_v11  ;;  %v13955_v11 = vld [vmem:[#allocation15_spill] sm:$0xff] }
 0x3ca   :  { %v12417_v2 = vpop.permute.xlu1 %4981  ;;  %v8305_v45 = vpop.eup %8304  ;;  %8324 = vpow2.f32 %v5174_v16  ;;  %v5271_v56 = vadd.f32 %v8303_v5, %v8301_v23  ;;  %v5186_v1 = vmul.f32 1.442695, %v5078_v14  ;;  %v5188_v0 = vmul.f32 1.442695, %v5079_v54  ;;  %v13958_v54 = vld [vmem:[#allocation43_spill] sm:$0xff] }
 0x3cb   :  { %6134 = vadd.xlane.f32.xlu1 %v6133_v58  ;;  %v5076_v47 = vsub.f32 %v13951_v13, %v12417_v2  ;;  %v5852_v7 = vpop.permute.xlu0 %5851  ;;  %v8307_v38 = vpop.eup %8306  ;;  %8326 = vpow2.f32 %v5176_v33  ;;  %v5077_v4 = vsub.f32 -1e+30, %v12417_v2 }
 0x3cc   :  { %v8309_v36 = vpop.eup %8308  ;;  %8328 = vpow2.f32 %v5178_v25  ;;  %v6139_v41 = vadd.f32 %v8307_v38, %v8305_v45  ;;  %v5943_v26 = vsub.f32 %v13954_v32, %v5852_v7  ;;  %v5944_v37 = vsub.f32 -1e+30, %v5852_v7 }
 0x3cd   :  { %6137 = vadd.xlane.f32.xlu0 %v6136_v48  ;;  %v8311_v39 = vpop.eup %8310  ;;  %8330 = vpow2.f32 %v5180_v6  ;;  %v5182_v3 = vmul.f32 1.442695, %v5076_v47  ;;  %v5184_v43 = vmul.f32 1.442695, %v5077_v4  ;;  %v13957_v4 = vld [vmem:[#allocation41_spill] sm:$0xff] }
 0x3ce   :  { %v12423_v10 = vpop.permute.xlu1 %5846  ;;  %v8313_v50 = vpop.eup %8312  ;;  %8332 = vpow2.f32 %v6039_v44  ;;  %v5277_v16 = vadd.f32 %v8311_v39, %v8309_v36  ;;  %v6051_v6 = vmul.f32 1.442695, %v5943_v26  ;;  %v6053_v47 = vmul.f32 1.442695, %v5944_v37  ;;  %v13960_v37 = vld [vmem:[#allocation18_spill] sm:$0xff] }
 0x3cf   :  { %5269 = vadd.xlane.f32.xlu1 %v5268_v40  ;;  %v5941_v2 = vsub.f32 %v13953_v28, %v12423_v10  ;;  %v8315_v8 = vpop.eup %8314  ;;  %8334 = vpow2.f32 %v6041_v15  ;;  %v5942_v51 = vsub.f32 -1e+30, %v12423_v10 }
 0x3d0   :  { %v4997_v58 = vpop.permute.xlu0 %4996  ;;  %v8317_v9 = vpop.eup %8316  ;;  %8336 = vpow2.f32 %v6043_v42  ;;  %v5280_v48 = vadd.f32 %v8315_v8, %v8313_v50 }
 0x3d1   :  { %5272 = vadd.xlane.f32.xlu0 %v5271_v56  ;;  %v8319_v46 = vpop.eup %8318  ;;  %8338 = vpow2.f32 %v6045_v62  ;;  %v6047_v33 = vmul.f32 1.442695, %v5941_v2  ;;  %v6049_v25 = vmul.f32 1.442695, %v5942_v51  ;;  %v5082_v45 = vsub.f32 %v13956_v31, %v4997_v58  ;;  %v13959_v51 = vld [vmem:[#allocation17_spill] sm:$0xff] }
 0x3d2   :  { %v12429_v35 = vpop.permute.xlu1 %4991  ;;  %v8321_v57 = vpop.eup %8320  ;;  %8340 = vpow2.f32 %v5182_v3  ;;  %v6142_v44 = vadd.f32 %v8319_v46, %v8317_v9  ;;  %v5083_v7 = vsub.f32 -1e+30, %v4997_v58 }
 0x3d3   :  { %5275 = vadd.xlane.f32.xlu1 %v5274_v52  ;;  %v5080_v10 = vsub.f32 %v13955_v11, %v12429_v35  ;;  %v8323_v23 = vpop.eup %8322  ;;  %8342 = vpow2.f32 %v5184_v43  ;;  %v5081_v12 = vsub.f32 -1e+30, %v12429_v35  ;;  %v5194_v62 = vmul.f32 1.442695, %v5082_v45 }
 0x3d4   :  { %v5862_v40 = vpop.permute.xlu0 %5861  ;;  %v8325_v5 = vpop.eup %8324  ;;  %8344 = vpow2.f32 %v5186_v1  ;;  %v6145_v56 = vadd.f32 %v8323_v23, %v8321_v57  ;;  %v5196_v2 = vmul.f32 1.442695, %v5083_v7  ;;  %v13962_v7 = vld [vmem:[#allocation46_spill] sm:$0xff] }
 0x3d5   :  { %5278 = vadd.xlane.f32.xlu0 %v5277_v16  ;;  %v8327_v13 = vpop.eup %8326  ;;  %8346 = vpow2.f32 %v5188_v0  ;;  %v5190_v15 = vmul.f32 1.442695, %v5080_v10  ;;  %v5192_v42 = vmul.f32 1.442695, %v5081_v12  ;;  %v5947_v50 = vsub.f32 %v13958_v54, %v5862_v40  ;;  %v13961_v12 = vld [vmem:[#allocation45_spill] sm:$0xff] }
 0x3d6   :  { %v12435_v18 = vpop.permute.xlu1 %5856  ;;  %v8329_v38 = vpop.eup %8328  ;;  %8348 = vpow2.f32 %v6047_v33  ;;  %v5283_v3 = vadd.f32 %v8327_v13, %v8325_v5  ;;  %v5948_v58 = vsub.f32 -1e+30, %v5862_v40 }
 0x3d7   :  { %6140 = vadd.xlane.f32.xlu1 %v6139_v41  ;;  %v5945_v35 = vsub.f32 %v13957_v4, %v12435_v18  ;;  %v8331_v36 = vpop.eup %8330  ;;  %8350 = vpow2.f32 %v6049_v25  ;;  %v5946_v21 = vsub.f32 -1e+30, %v12435_v18  ;;  %v6059_v0 = vmul.f32 1.442695, %v5947_v50 }
 0x3d8   :  { %v8333_v39 = vpop.eup %8332  ;;  %8352 = vpow2.f32 %v6051_v6  ;;  %v5286_v16 = vadd.f32 %v8331_v36, %v8329_v38  ;;  %v6061_v10 = vmul.f32 1.442695, %v5948_v58  ;;  %v13964_v58 = vld [vmem:[#allocation48_spill] sm:$0xff] }
 0x3d9   :  { %6143 = vadd.xlane.f32.xlu0 %v6142_v44  ;;  %v5007_v52 = vpop.permute.xlu0 %5006  ;;  %v8335_v28 = vpop.eup %8334  ;;  %8354 = vpow2.f32 %v6053_v47  ;;  %v6055_v43 = vmul.f32 1.442695, %v5945_v35  ;;  %v6057_v1 = vmul.f32 1.442695, %v5946_v21  ;;  %v13963_v21 = vld [vmem:[#allocation49_spill] sm:$0xff] }
 0x3da   :  { %v12441_v49 = vpop.permute.xlu1 %5001  ;;  %v8337_v8 = vpop.eup %8336  ;;  %8356 = vpow2.f32 %v5190_v15  ;;  %v5086_v57 = vsub.f32 %v13960_v37, %v5007_v52  ;;  %v6148_v33 = vadd.f32 %v8335_v28, %v8333_v39  ;;  %v5087_v40 = vsub.f32 -1e+30, %v5007_v52 }
 0x3db   :  { %5281 = vadd.xlane.f32.xlu1 %v5280_v48  ;;  %v5084_v18 = vsub.f32 %v13959_v51, %v12441_v49  ;;  %v8339_v9 = vpop.eup %8338  ;;  %8358 = vpow2.f32 %v5192_v42  ;;  %v5085_v32 = vsub.f32 -1e+30, %v12441_v49 }
 0x3dc   :  { %v8341_v46 = vpop.eup %8340  ;;  %8360 = vpow2.f32 %v5194_v62  ;;  %v6151_v44 = vadd.f32 %v8339_v9, %v8337_v8  ;;  %v5202_v47 = vmul.f32 1.442695, %v5086_v57  ;;  %v5204_v35 = vmul.f32 1.442695, %v5087_v40 }
 0x3dd   :  { %5284 = vadd.xlane.f32.xlu0 %v5283_v3  ;;  %v5872_v41 = vpop.permute.xlu0 %5871  ;;  %v8343_v11 = vpop.eup %8342  ;;  %8362 = vpow2.f32 %v5196_v2  ;;  %v5198_v25 = vmul.f32 1.442695, %v5084_v18  ;;  %v5200_v6 = vmul.f32 1.442695, %v5085_v32  ;;  %v13965_v32 = vld [vmem:[#allocation20_spill] sm:$0xff] }
 0x3de   :  { %v12447_v14 = vpop.permute.xlu1 %5866  ;;  %v8345_v23 = vpop.eup %8344  ;;  %8364 = vpow2.f32 %v6055_v43  ;;  %v5951_v38 = vsub.f32 %v13962_v7, %v5872_v41  ;;  %v5289_v15 = vadd.f32 %v8343_v11, %v8341_v46  ;;  %v5952_v52 = vsub.f32 -1e+30, %v5872_v41 }
 0x3df   :  { %6146 = vadd.xlane.f32.xlu1 %v6145_v56  ;;  %v5949_v49 = vsub.f32 %v13961_v12, %v12447_v14  ;;  %v8347_v5 = vpop.eup %8346  ;;  %8366 = vpow2.f32 %v6057_v1  ;;  %v5950_v31 = vsub.f32 -1e+30, %v12447_v14 }
 0x3e0   :  { %v8349_v13 = vpop.eup %8348  ;;  %8368 = vpow2.f32 %v6059_v0  ;;  %v5292_v3 = vadd.f32 %v8347_v5, %v8345_v23  ;;  %v6067_v2 = vmul.f32 1.442695, %v5951_v38  ;;  %v6069_v18 = vmul.f32 1.442695, %v5952_v52 }
 0x3e1   :  { %6149 = vadd.xlane.f32.xlu0 %v6148_v33  ;;  %v5017_v48 = vpop.permute.xlu0 %5016  ;;  %v8351_v4 = vpop.eup %8350  ;;  %8370 = vpow2.f32 %v6061_v10  ;;  %v6063_v42 = vmul.f32 1.442695, %v5949_v49  ;;  %v6065_v62 = vmul.f32 1.442695, %v5950_v31  ;;  %v13966_v10 = vld [vmem:[#allocation21_spill] sm:$0xff]  ;;  %v13967_v31 = vld [vmem:[#allocation50_spill] sm:$0xff] }
 0x3e2   :  { %v12453_v26 = vpop.permute.xlu1 %5011  ;;  %v8353_v36 = vpop.eup %8352  ;;  %8372 = vpow2.f32 %v5198_v25  ;;  %v5090_v8 = vsub.f32 %v13964_v58, %v5017_v48  ;;  %v6154_v43 = vadd.f32 %v8351_v4, %v8349_v13  ;;  %v5091_v41 = vsub.f32 -1e+30, %v5017_v48  ;;  %v13968_v4 = vld [vmem:[#allocation52_spill] sm:$0xff] }
 0x3e3   :  { %5287 = vadd.xlane.f32.xlu1 %v5286_v16  ;;  %v5088_v14 = vsub.f32 %v13963_v21, %v12453_v26  ;;  %v8355_v39 = vpop.eup %8354  ;;  %8374 = vpow2.f32 %v5200_v6  ;;  %v5089_v54 = vsub.f32 -1e+30, %v12453_v26 }
 0x3e4   :  { %v8357_v28 = vpop.eup %8356  ;;  %8376 = vpow2.f32 %v5202_v47  ;;  %v6157_v57 = vadd.f32 %v8355_v39, %v8353_v36  ;;  %v5210_v11 = vmul.f32 1.442695, %v5090_v8  ;;  %v5212_v49 = vmul.f32 1.442695, %v5091_v41 }
 0x3e5   :  { %5290 = vadd.xlane.f32.xlu0 %v5289_v15  ;;  %v5882_v56 = vpop.permute.xlu0 %5881  ;;  %v8359_v51 = vpop.eup %8358  ;;  %8378 = vpow2.f32 %v5204_v35  ;;  %v5206_v1 = vmul.f32 1.442695, %v5088_v14  ;;  %v5208_v46 = vmul.f32 1.442695, %v5089_v54  ;;  %v13969_v54 = vld [vmem:[#allocation27_spill] sm:$0xff] }
 0x3e6   :  { %v12459_v45 = vpop.permute.xlu1 %5876  ;;  %v8361_v9 = vpop.eup %8360  ;;  %8380 = vpow2.f32 %v6063_v42  ;;  %v5955_v40 = vsub.f32 %v13966_v10, %v5882_v56  ;;  %v5295_v23 = vadd.f32 %v8359_v51, %v8357_v28  ;;  %v5956_v48 = vsub.f32 -1e+30, %v5882_v56  ;;  %v13970_v51 = vld [vmem:[#allocation14_spill] sm:$0xff] }
 0x3e7   :  { %6152 = vadd.xlane.f32.xlu1 %v6151_v44  ;;  %v5953_v26 = vsub.f32 %v13965_v32, %v12459_v45  ;;  %v8363_v16 = vpop.eup %8362  ;;  %8382 = vpow2.f32 %v6065_v62  ;;  %v5954_v0 = vsub.f32 -1e+30, %v12459_v45 }
 0x3e8   :  { %v8365_v33 = vpop.eup %8364  ;;  %8384 = vpow2.f32 %v6067_v2  ;;  %v5298_v7 = vadd.f32 %v8363_v16, %v8361_v9  ;;  %v6075_v15 = vmul.f32 1.442695, %v5955_v40  ;;  %v6077_v42 = vmul.f32 1.442695, %v5956_v48 }
 0x3e9   :  { %6155 = vadd.xlane.f32.xlu0 %v6154_v43  ;;  %v5027_v37 = vpop.permute.xlu0 %5026  ;;  %v8367_v12 = vpop.eup %8366  ;;  %8386 = vpow2.f32 %v6069_v18  ;;  %v6071_v6 = vmul.f32 1.442695, %v5953_v26  ;;  %v6073_v13 = vmul.f32 1.442695, %v5954_v0 }
 0x3ea   :  { %v12465_v50 = vpop.permute.xlu1 %5021  ;;  %v8369_v5 = vpop.eup %8368  ;;  %8388 = vpow2.f32 %v5206_v1  ;;  %v5094_v35 = vsub.f32 %v13968_v4, %v5027_v37  ;;  %v6160_v52 = vadd.f32 %v8367_v12, %v8365_v33  ;;  %v5095_v21 = vsub.f32 -1e+30, %v5027_v37 }
 0x3eb   :  { %5293 = vadd.xlane.f32.xlu1 %v5292_v3  ;;  %v5092_v45 = vsub.f32 %v13967_v31, %v12465_v50  ;;  %v8371_v44 = vpop.eup %8370  ;;  %8390 = vpow2.f32 %v5208_v46  ;;  %v5093_v47 = vsub.f32 -1e+30, %v12465_v50  ;;  %v13971_v46 = vld [vmem:[#allocation26_spill] sm:$0xff] }
 0x3ec   :  { %v8373_v38 = vpop.eup %8372  ;;  %8392 = vpow2.f32 %v5210_v11  ;;  %v6163_v58 = vadd.f32 %v8371_v44, %v8369_v5  ;;  %v5218_v43 = vmul.f32 1.442695, %v5094_v35  ;;  %v5220_v1 = vmul.f32 1.442695, %v5095_v21 }
 0x3ed   :  { %5296 = vadd.xlane.f32.xlu0 %v5295_v23  ;;  %v8375_v36 = vpop.eup %8374  ;;  %8394 = vpow2.f32 %v5212_v49  ;;  %v5892_v14 = vpop.permute.xlu0 %5891  ;;  %v5214_v62 = vmul.f32 1.442695, %v5092_v45  ;;  %v5216_v28 = vmul.f32 1.442695, %v5093_v47 }
 0x3ee   :  { %v5887_v25 = vpop.permute.xlu1 %5886  ;;  %v8377_v39 = vpop.eup %8376  ;;  %8396 = vpow2.f32 %v6071_v6  ;;  %v5959_v18 = vsub.f32 %v13970_v51, %v5892_v14  ;;  %v5301_v41 = vadd.f32 %v8375_v36, %v8373_v38  ;;  %v5960_v32 = vsub.f32 -1e+30, %v5892_v14  ;;  %v13972_v6 = vld [vmem:[#allocation29_spill] sm:$0xff]  ;;  %v13973_v38 = vld [vmem:[#allocation30_spill] sm:$0xff]  ;;  %v13981_v51 = vld [vmem:[#allocation40_spill] sm:$0xff] }
 0x3ef   :  { %6158 = vadd.xlane.f32.xlu1 %v6157_v57  ;;  %v5957_v3 = vsub.f32 %v13969_v54, %v5887_v25  ;;  %v8379_v50 = vpop.eup %8378  ;;  %8398 = vpow2.f32 %v6073_v13  ;;  %v5958_v2 = vsub.f32 -1e+30, %v5887_v25 }
 0x3f0   :  { %v8381_v8 = vpop.eup %8380  ;;  %8400 = vpow2.f32 %v6075_v15  ;;  %v5304_v10 = vadd.f32 %v8379_v50, %v8377_v39  ;;  %v6083_v23 = vmul.f32 1.442695, %v5959_v18  ;;  %v6085_v49 = vmul.f32 1.442695, %v5960_v32  ;;  %v13974_v15 = vld [vmem:[#allocation32_spill] sm:$0xff]  ;;  %v13984_v32 = vld [vmem:[#allocation42_spill] sm:$0xff] }
 0x3f1   :  { %6161 = vadd.xlane.f32.xlu0 %v6160_v52  ;;  %v8383_v9 = vpop.eup %8382  ;;  %8402 = vpow2.f32 %v6077_v42  ;;  %v6079_v16 = vmul.f32 1.442695, %v5957_v3  ;;  %v6081_v57 = vmul.f32 1.442695, %v5958_v2  ;;  %v13975_v4 = vsub.f32 %v13973_v38, %v13974_v15  ;;  %v13976_v42 = vld [vmem:[#allocation33_spill] sm:$0xff]  ;;  %v13998_v15 = vld [vmem:[#allocation58_spill] sm:$0xff] }
 0x3f2   :  { %v5032_v56 = vpop.permute.xlu1 %5031  ;;  %v8385_v26 = vpop.eup %8384  ;;  %8404 = vpow2.f32 %v5214_v62  ;;  %v6166_v25 = vadd.f32 %v8383_v9, %v8381_v8  ;;  %v13977_v21 = vsub.f32 %v13976_v42, %v11751_v17  ;;  %v13980_v17 = vld [vmem:[#allocation37_spill] sm:$0xff] }
 0x3f3   :  { %5299 = vadd.xlane.f32.xlu1 %v5298_v7  ;;  %v5096_v0 = vsub.f32 %v13971_v46, %v5032_v56  ;;  %v8387_v37 = vpop.eup %8386  ;;  %8406 = vpow2.f32 %v5216_v28  ;;  %v5097_v33 = vsub.f32 -1e+30, %v5032_v56  ;;  %v5653_v35 = vmul.f32 1.442695, %v13975_v4  ;;  %v13978_v28 = vld [vmem:[#allocation34_spill] sm:$0xff]  ;;  %v13999_v4 = vld [vmem:[#allocation60_spill] sm:$0xff] }
 0x3f4   :  { %v8389_v40 = vpop.eup %8388  ;;  %8408 = vpow2.f32 %v5218_v43  ;;  %v6169_v47 = vadd.f32 %v8387_v37, %v8385_v26  ;;  %v5655_v14 = vmul.f32 1.442695, %v13977_v21  ;;  %v13979_v2 = vsub.f32 %v13978_v28, %v11754_v24  ;;  %v13987_v37 = vld [vmem:[#allocation51_spill] sm:$0xff] }
 0x3f5   :  { %5302 = vadd.xlane.f32.xlu0 %v5301_v41  ;;  %v8391_v12 = vpop.eup %8390  ;;  %8410 = vpow2.f32 %v5220_v1  ;;  %v5222_v5 = vmul.f32 1.442695, %v5096_v0  ;;  %v5224_v44 = vmul.f32 1.442695, %v5097_v33  ;;  %v13982_v18 = vsub.f32 %v13980_v17, %v13981_v51  ;;  %v13983_v1 = vld [vmem:[#allocation38_spill] sm:$0xff]  ;;  %v13986_v0 = vld [vmem:[#allocation44_spill] sm:$0xff] }
 0x3f6   :  { %v5897_v11 = vpop.permute.xlu1 %5896  ;;  %v8393_v48 = vpop.eup %8392  ;;  %8412 = vpow2.f32 %v6079_v16  ;;  %v5307_v52 = vadd.f32 %v8391_v12, %v8389_v40  ;;  %v13985_v26 = vsub.f32 %v13983_v1, %v13984_v32  ;;  %v13988_v24 = vsub.f32 %v13986_v0, %v13987_v37  ;;  %v13990_v40 = vld [vmem:[#allocation53_spill] sm:$0xff]  ;;  %v14001_v21 = vld [vmem:[#allocation59_spill] sm:$0xff] }
 0x3f7   :  { %6164 = vadd.xlane.f32.xlu1 %v6163_v58  ;;  %v5961_v31 = vsub.f32 %v13972_v6, %v5897_v11  ;;  %v8395_v45 = vpop.eup %8394  ;;  %8414 = vpow2.f32 %v6081_v57  ;;  %v5962_v13 = vsub.f32 -1e+30, %v5897_v11  ;;  %v4788_v58 = vmul.f32 1.442695, %v13979_v2 }
 0x3f8   :  { %v8397_v7 = vpop.eup %8396  ;;  %8416 = vpow2.f32 %v6083_v23  ;;  %v5310_v3 = vadd.f32 %v8395_v45, %v8393_v48  ;;  %v4790_v41 = vmul.f32 1.442695, %v13982_v18  ;;  %v5657_v16 = vmul.f32 1.442695, %v13985_v26  ;;  %v13992_v48 = vld [vmem:[#allocation54_spill] sm:$0xff]  ;;  %v14009_v18 = vld [vmem:[#allocation65_spill] sm:$0xff] }
 0x3f9   :  { %6167 = vadd.xlane.f32.xlu0 %v6166_v25  ;;  %v8399_v36 = vpop.eup %8398  ;;  %8418 = vpow2.f32 %v6085_v49  ;;  %v6087_v39 = vmul.f32 1.442695, %v5961_v31  ;;  %v6089_v54 = vmul.f32 1.442695, %v5962_v13  ;;  %v5659_v57 = vmul.f32 1.442695, %v13988_v24 }
 0x3fa   :  { %v8401_v56 = vpop.eup %8400  ;;  %8420 = vpow2.f32 %v5222_v5  ;;  %v6172_v8 = vadd.f32 %v8399_v36, %v8397_v7  ;;  %v13993_v5 = vld [vmem:[#allocation56_spill] sm:$0xff]  ;;  %v13996_v13 = vld [vmem:[#allocation57_spill] sm:$0xff] }
 0x3fb   :  { %5305 = vadd.xlane.f32.xlu1 %v5304_v10  ;;  %v8403_v62 = vpop.eup %8402  ;;  %8422 = vpow2.f32 %v5224_v44  ;;  %v13989_v10 = vld [vmem:[#allocation47_spill] sm:$0xff]  ;;  %v13994_v6 = vsub.f32 %v13992_v48, %v13993_v5  ;;  %v14021_v5 = vld [vmem:[#allocation73_spill] sm:$0xff] }
 0x3fc   :  { %v8405_v50 = vpop.eup %8404  ;;  %8424 = vpow2.f32 %v5653_v35  ;;  %v6175_v33 = vadd.f32 %v8403_v62, %v8401_v56  ;;  %v13991_v23 = vsub.f32 %v13989_v10, %v13990_v40  ;;  %v13995_v44 = vld [vmem:[#allocation55_spill] sm:$0xff]  ;;  %v14000_v35 = vsub.f32 %v13998_v15, %v13999_v4  ;;  %v14026_v4 = vld [vmem:[#allocation76_spill] sm:$0xff] }
 0x3fd   :  { %5308 = vadd.xlane.f32.xlu0 %v5307_v52  ;;  %v8407_v43 = vpop.eup %8406  ;;  %8426 = vpow2.f32 %v5655_v14  ;;  %v4794_v31 = vmul.f32 1.442695, %v13994_v6  ;;  %v14002_v14 = vld [vmem:[#allocation61_spill] sm:$0xff]  ;;  %v14022_v6 = vsub.f32 %v14021_v5, %v11913_v60 }
 0x3fe   :  { %v8409_v9 = vpop.eup %8408  ;;  %8428 = vpow2.f32 %v6087_v39  ;;  %v4792_v25 = vmul.f32 1.442695, %v13991_v23  ;;  %v5313_v12 = vadd.f32 %v8407_v43, %v8405_v50  ;;  %v4796_v52 = vmul.f32 1.442695, %v14000_v35  ;;  %v14018_v23 = vld [vmem:[#allocation70_spill] sm:$0xff]  ;;  %v14029_v60 = vld [vmem:[#allocation77_spill] sm:$0xff] }
 0x3ff   :  { %6170 = vadd.xlane.f32.xlu1 %v6169_v47  ;;  %v8411_v46 = vpop.eup %8410  ;;  %8430 = vpow2.f32 %v6089_v54  ;;  %v13997_v47 = vsub.f32 %v13995_v44, %v13996_v13  ;;  %v14003_v56 = vsub.f32 %v14001_v21, %v14002_v14  ;;  %v14023_v44 = vld [vmem:[#allocation74_spill] sm:$0xff]  ;;  %v14024_v13 = vld [vmem:[#allocation75_spill] sm:$0xff] }
 0x400   :  { %v8413_v11 = vpop.eup %8412  ;;  %8432 = vpow2.f32 %v4788_v58  ;;  %v5316_v36 = vadd.f32 %v8411_v46, %v8409_v9  ;;  %v14006_v58 = vld [vmem:[#allocation63_spill] sm:$0xff]  ;;  %v14027_v35 = vld [vmem:[#allocation78_spill] sm:$0xff] }
 0x401   :  { %6173 = vadd.xlane.f32.xlu0 %v6172_v8  ;;  %v8415_v49 = vpop.eup %8414  ;;  %8434 = vpow2.f32 %v4790_v41  ;;  %v5661_v7 = vmul.f32 1.442695, %v13997_v47  ;;  %v5663_v39 = vmul.f32 1.442695, %v14003_v56  ;;  %v14007_v8 = vld [vmem:[#allocation64_spill] sm:$0xff]  ;;  %v14010_v41 = vld [vmem:[#allocation67_spill] sm:$0xff]  ;;  %v14025_v47 = vsub.f32 %v14023_v44, %v14024_v13 }
 0x402   :  { %v8417_v45 = vpop.eup %8416  ;;  %8436 = vpow2.f32 %v5657_v16  ;;  %v6178_v62 = vadd.f32 %v8415_v49, %v8413_v11  ;;  %v14008_v43 = vsub.f32 %v14006_v58, %v14007_v8  ;;  %v14011_v9 = vsub.f32 %v14009_v18, %v14010_v41  ;;  %v14013_v16 = vld [vmem:[#allocation68_spill] sm:$0xff]  ;;  %v14030_v21 = vld [vmem:[#allocation79_spill] sm:$0xff]  ;;  %v14035_v58 = vld [vmem:[#allocation81_spill] sm:$0xff] }
 0x403   :  { %5311 = vadd.xlane.f32.xlu1 %v5310_v3  ;;  %v8419_v38 = vpop.eup %8418  ;;  %8438 = vpow2.f32 %v5659_v57  ;;  %v14004_v3 = vld [vmem:[#allocation62_spill] sm:$0xff]  ;;  %v14015_v57 = vld [vmem:[#allocation69_spill] sm:$0xff]  ;;  %v14031_v14 = vsub.f32 %v14029_v60, %v14030_v21  ;;  %v14036_v8 = vld [vmem:[#allocation83_spill] sm:$0xff] }
 0x404   :  { %v8421_v42 = vpop.eup %8420  ;;  %8440 = vpow2.f32 %v4792_v25  ;;  %v14005_v50 = vsub.f32 %v14004_v3, %v11853_v19  ;;  %v5665_v17 = vmul.f32 1.442695, %v14008_v43  ;;  %v5667_v1 = vmul.f32 1.442695, %v14011_v9  ;;  %v14012_v19 = vld [vmem:[#allocation66_spill] sm:$0xff]  ;;  %v14019_v25 = vld [vmem:[#allocation72_spill] sm:$0xff] }
 0x405   :  { %5314 = vadd.xlane.f32.xlu0 %v5313_v12  ;;  %v8423_v54 = vpop.eup %8422  ;;  %8442 = vpow2.f32 %v4794_v31  ;;  %v6181_v32 = vadd.f32 %v8419_v38, %v8417_v45  ;;  %v14014_v46 = vsub.f32 %v14012_v19, %v14013_v16  ;;  %v14020_v12 = vsub.f32 %v14018_v23, %v14019_v25  ;;  %v14038_v41 = vld [vmem:[#allocation84_spill] sm:$0xff]  ;;  %v14039_v9 = vld [vmem:[#allocation86_spill] sm:$0xff]  ;;  %v14041_v19 = vld [vmem:[#allocation85_spill] sm:$0xff] }
 0x406   :  { %v4798_v28 = vmul.f32 1.442695, %v14005_v50  ;;  %v12516_v2 = vpop.eup %8424  ;;  %8444 = vpow2.f32 %v5661_v7  ;;  %v5319_v37 = vadd.f32 %v8423_v54, %v8421_v42  ;;  %v4804_v31 = vmul.f32 1.442695, %v14022_v6  ;;  %v14033_v54 = vld [vmem:[#allocation82_spill] sm:$0xff]  ;;  %v14042_v16 = vld [vmem:[#allocation87_spill] sm:$0xff] }
 0x407   :  { %6176 = vadd.xlane.f32.xlu1 %v6175_v33  ;;  %v12521_v51 = vpop.eup %8426  ;;  %8446 = vpow2.f32 %v4796_v52  ;;  %v4800_v0 = vmul.f32 1.442695, %v14014_v46  ;;  %v14016_v33 = vld [vmem:[#allocation71_spill] sm:$0xff]  ;;  %v5669_v49 = vmul.f32 1.442695, %v14020_v12  ;;  %v14028_v52 = vsub.f32 %v14026_v4, %v14027_v35  ;;  %v14047_v25 = vld [vmem:[#allocation89_spill] sm:$0xff] }
 0x408   :  { %v8429_v26 = vpop.eup %8428  ;;  %8448 = vpow2.f32 %v5663_v39  ;;  %v14017_v11 = vsub.f32 %v14015_v57, %v14016_v33  ;;  %v5671_v7 = vmul.f32 1.442695, %v14025_v47  ;;  %v5673_v56 = vmul.f32 1.442695, %v14031_v14  ;;  %v14045_v57 = vld [vmem:[#allocation90_spill] sm:$0xff]  ;;  %v14048_v12 = vld [vmem:[#allocation91_spill] sm:$0xff] }
 0x409   :  { %6179 = vadd.xlane.f32.xlu0 %v6178_v62  ;;  %v8431_v24 = vpop.eup %8430  ;;  %8450 = vpow2.f32 %v4798_v28  ;;  %v14032_v62 = vld [vmem:[#allocation80_spill] sm:$0xff]  ;;  %v14037_v43 = vsub.f32 %v14035_v58, %v14036_v8  ;;  %v14043_v46 = vsub.f32 %v14041_v19, %v14042_v16  ;;  %v14051_v44 = vld [vmem:[#allocation94_spill] sm:$0xff]  ;;  %v14054_v4 = vld [vmem:[#allocation95_spill] sm:$0xff] }
 0x40a   :  { %v4802_v10 = vmul.f32 1.442695, %v14017_v11  ;;  %v12532_v40 = vpop.eup %8432  ;;  %8452 = vpow2.f32 %v5665_v17  ;;  %v6184_v38 = vadd.f32 %v8431_v24, %v8429_v26  ;;  %v14034_v3 = vsub.f32 %v14032_v62, %v14033_v54  ;;  %v14044_v24 = vld [vmem:[#allocation88_spill] sm:$0xff]  ;;  %v14057_v14 = vld [vmem:[#allocation98_spill] sm:$0xff]  ;;  %v14059_v58 = vld [vmem:[#allocation97_spill] sm:$0xff] }
 0x40b   :  { %5317 = vadd.xlane.f32.xlu1 %v5316_v36  ;;  %v12537_v48 = vpop.eup %8434  ;;  %8454 = vpow2.f32 %v5667_v1  ;;  %v4806_v36 = vmul.f32 1.442695, %v14028_v52  ;;  %v4808_v17 = vmul.f32 1.442695, %v14037_v43  ;;  %v14040_v1 = vsub.f32 %v14038_v41, %v14039_v9  ;;  %v14056_v21 = vld [vmem:[#allocation96_spill] sm:$0xff]  ;;  %v14060_v8 = vld [vmem:[#allocation99_spill] sm:$0xff] }
 0x40c   :  { %v12542_v45 = vpop.eup %8436  ;;  %8456 = vpow2.f32 %v4800_v0  ;;  %v4810_v50 = vmul.f32 1.442695, %v14034_v3  ;;  %v4812_v0 = vmul.f32 1.442695, %v14043_v46  ;;  %v14046_v33 = vsub.f32 %v14044_v24, %v14045_v57  ;;  %v4714_v3 = vld [vmem:[#allocation3] sm:$0xff]  ;;  %v14065_v46 = vld [vmem:[#allocation101_spill] sm:$0xff] }
 0x40d   :  { %5320 = vadd.xlane.f32.xlu0 %v5319_v37  ;;  %v12547_v15 = vpop.eup %8438  ;;  %8458 = vpow2.f32 %v4802_v10  ;;  %v5579_v10 = vld [vmem:[#allocation5] sm:$0xff]  ;;  %v14061_v43 = vsub.f32 %v14059_v58, %v14060_v8  ;;  %v14077_v8 = vld [vmem:[#allocation109_spill] sm:$0xff] }
 0x40e   :  { %v12552_v42 = vpop.eup %8440  ;;  %8460 = vpow2.f32 %v5669_v49  ;;  %v4814_v11 = vmul.f32 1.442695, %v14046_v33  ;;  %v14049_v49 = vsub.f32 %v14047_v25, %v14048_v12  ;;  %v4842_v33 = vmul.f32 %v12319_v34, %v4714_v3  ;;  %v14069_v25 = vld [vmem:[#allocation106_spill] sm:$0xff]  ;;  %v14074_v34 = vld [vmem:[#allocation108_spill] sm:$0xff]  ;;  %v4715_v3 = vld [vmem:[#allocation3 + $0x8] sm:$0xff] }
 0x40f   :  { %6182 = vadd.xlane.f32.xlu1 %v6181_v32  ;;  %v12557_v39 = vpop.eup %8442  ;;  %8462 = vpow2.f32 %v4804_v31  ;;  %v5675_v32 = vmul.f32 1.442695, %v14040_v1  ;;  %v14050_v31 = vld [vmem:[#allocation92_spill] sm:$0xff]  ;;  %v14063_v1 = vld [vmem:[#allocation102_spill] sm:$0xff] }
 0x410   :  { %v12562_v28 = vpop.eup %8444  ;;  %8464 = vpow2.f32 %v5671_v7  ;;  %v5677_v5 = vmul.f32 1.442695, %v14049_v49  ;;  %v14052_v13 = vsub.f32 %v14050_v31, %v14051_v44  ;;  %v5581_v31 = vld [vmem:[#allocation5 + $0x10] sm:$0xff] }
 0x411   :  { %6185 = vadd.xlane.f32.xlu0 %v6184_v38  ;;  %v12567_v18 = vpop.eup %8446  ;;  %8466 = vpow2.f32 %v4806_v36  ;;  %v14053_v38 = vld [vmem:[#allocation93_spill] sm:$0xff]  ;;  %v5707_v36 = vmul.f32 %v12316_v61, %v5579_v10  ;;  %v14062_v61 = vld [vmem:[#allocation100_spill] sm:$0xff] }
 0x412   :  { %v12572_v26 = vpop.eup %8448  ;;  %8468 = vpow2.f32 %v5673_v56  ;;  %v5679_v47 = vmul.f32 1.442695, %v14052_v13  ;;  %v14055_v35 = vsub.f32 %v14053_v38, %v14054_v4  ;;  %v14058_v56 = vsub.f32 %v14056_v21, %v14057_v14  ;;  %v14068_v10 = vld [vmem:[#allocation104_spill] sm:$0xff]  ;;  %v14071_v13 = vld [vmem:[#allocation105_spill] sm:$0xff] }
 0x413   :  { %v12577_v37 = vpop.eup %8450  ;;  %8470 = vpow2.f32 %v4810_v50  ;;  %v14070_v12 = vsub.f32 %v14068_v10, %v14069_v25  ;;  %v4717_v10 = vld [vmem:[#allocation3 + $0x18] sm:$0xff] }
 0x414   :  { %v12582_v23 = vpop.eup %8452  ;;  %8472 = vpow2.f32 %v4808_v17  ;;  %v4816_v52 = vmul.f32 1.442695, %v14055_v35  ;;  %v4818_v62 = vmul.f32 1.442695, %v14058_v56  ;;  %v5681_v17 = vmul.f32 1.442695, %v14061_v43 }
 0x415   :  { %v12587_v6 = vpop.eup %8454  ;;  %8474 = vpow2.f32 %v5675_v32  ;;  %v14064_v32 = vsub.f32 %v14062_v61, %v14063_v1  ;;  %v4822_v49 = vmul.f32 1.442695, %v14070_v12  ;;  %v14078_v43 = vld [vmem:[#allocation112_spill] sm:$0xff]  ;;  %v14083_v12 = vld [vmem:[#allocation113_spill] sm:$0xff] }
 0x416   :  { %v12592_v7 = vpop.eup %8456  ;;  %8476 = vpow2.f32 %v4812_v0  ;;  %v14066_v0 = vld [vmem:[#allocation103_spill] sm:$0xff]  ;;  %v4716_v1 = vld [vmem:[#allocation3 + $0x10] sm:$0xff] }
 0x417   :  { %v12598_v60 = vpop.eup %8458  ;;  %8478 = vpow2.f32 %v4814_v11  ;;  %v5683_v19 = vmul.f32 1.442695, %v14064_v32  ;;  %v14067_v24 = vsub.f32 %v14065_v46, %v14066_v0  ;;  %v5582_v32 = vld [vmem:[#allocation5 + $0x18] sm:$0xff]  ;;  %v14080_v0 = vld [vmem:[#allocation111_spill] sm:$0xff] }
 0x418   :  { %v12603_v50 = vpop.eup %8460  ;;  %8480 = vpow2.f32 %v5677_v5 }
 0x419   :  { %v12608_v9 = vpop.eup %8462  ;;  %8482 = vpow2.f32 %v5679_v47  ;;  %v4820_v57 = vmul.f32 1.442695, %v14067_v24  ;;  %v14072_v47 = vld [vmem:[#allocation107_spill] sm:$0xff]  ;;  %v14081_v24 = vld [vmem:[#allocation114_spill] sm:$0xff] }
 0x41a   :  { %v6093_v54 = vpop.xlane.xlu0 %6092  ;;  %v12613_v16 = vpop.eup %8464  ;;  %8484 = vpow2.f32 %v4816_v52  ;;  %v14073_v38 = vsub.f32 %v14071_v13, %v14072_v47 }
 0x41b   :  { %v6187_v41 = vadd.f32 %v6093_v54, %v5707_v36  ;;  %v12620_v11 = vpop.eup %8466  ;;  %8486 = vpow2.f32 %v4818_v62  ;;  %v14075_v36 = vld [vmem:[#allocation110_spill] sm:$0xff]  ;;  %v5709_v62 = vmul.f32 %v12326_v55, %v5581_v31  ;;  %v5580_v54 = vld [vmem:[#allocation5 + $0x8] sm:$0xff] }
 0x41c   :  { %v12625_v44 = vpop.eup %8468  ;;  %8488 = vpow2.f32 %v5681_v17  ;;  %v5685_v4 = vmul.f32 1.442695, %v14073_v38  ;;  %v14076_v21 = vsub.f32 %v14074_v34, %v14075_v36  ;;  %v14079_v17 = vsub.f32 %v14077_v8, %v14078_v43  ;;  %v5585_v8 = vld [vmem:[#allocation5 + $0x30] sm:$0xff] }
 0x41d   :  { %6219 = vst.msk [vmem:[#allocation5] sm:$0xff] %vm21_vm14, %v6187_v41  ;;  %v12630_v52 = vpop.eup %8470  ;;  %8490 = vpow2.f32 %v5683_v19  ;;  %v5583_v19 = vld [vmem:[#allocation5 + $0x20] sm:$0xff]  ;;  %v5708_v47 = vmul.f32 %v12321_v63, %v5580_v54  ;;  %v4843_v38 = vmul.f32 %v12324_v30, %v4715_v3  ;;  %v4844_v34 = vmul.f32 %v12329_v27, %v4716_v1  ;;  %v14086_v63 = vld [vmem:[#allocation115_spill] sm:$0xff]  ;;  %v5586_v1 = vld [vmem:[#allocation5 + $0x38] sm:$0xff] }
 0x41e   :  { %v5228_v5 = vpop.xlane.xlu0 %5227  ;;  %v5687_v14 = vmul.f32 1.442695, %v14076_v21  ;;  %v12635_v56 = vpop.eup %8472  ;;  %8492 = vpow2.f32 %v4820_v57  ;;  %v4824_v41 = vmul.f32 1.442695, %v14079_v17  ;;  %v14082_v57 = vsub.f32 %v14080_v0, %v14081_v24  ;;  %v14087_v30 = vld [vmem:[#allocation118_spill] sm:$0xff]  ;;  %v4719_v27 = vld [vmem:[#allocation3 + $0x28] sm:$0xff] }
 0x41f   :  { %v5322_v35 = vadd.f32 %v5228_v5, %v4842_v33  ;;  %v12639_v58 = vpop.eup %8474  ;;  %8494 = vpow2.f32 %v4822_v49  ;;  %v14084_v49 = vld [vmem:[#allocation116_spill] sm:$0xff]  ;;  %v5710_v21 = vmul.f32 %v12332_v22, %v5582_v32  ;;  %v14088_v54 = vsub.f32 %v14086_v63, %v14087_v30 }
 0x420   :  { %v12644_v46 = vpop.eup %8476  ;;  %8496 = vpow2.f32 %v5685_v4  ;;  %v4826_v55 = vmul.f32 1.442695, %v14082_v57  ;;  %v14085_v5 = vsub.f32 %v14083_v12, %v14084_v49  ;;  %v12670_v0 = vmul.f32 %v12338_v29, %v4717_v10  ;;  %v4720_v22 = vld [vmem:[#allocation3 + $0x30] sm:$0xff]  ;;  %v5587_v12 = vld [vmem:[#allocation5 + $0x40] sm:$0xff] }
 0x421   :  { %5355 = vst.msk [vmem:[#allocation3] sm:$0xff] %vm21_vm14, %v5322_v35  ;;  %v12649_v25 = vpop.eup %8478  ;;  %8498 = vpow2.f32 %v5687_v14  ;;  %v4718_v35 = vld [vmem:[#allocation3 + $0x20] sm:$0xff]  ;;  %v12662_v14 = vmul.f32 %v12335_v53, %v5583_v19  ;;  %v5691_v3 = vmul.f32 1.442695, %v14088_v54  ;;  %v14089_v53 = vld [vmem:[#allocation117_spill] sm:$0xff]  ;;  %v14090_v19 = vld [vmem:[#allocation119_spill] sm:$0xff]  ;;  %v12699_v63 = vmul.f32 %v12542_v45, %v5586_v1 }
 0x422   :  { %v6099_v61 = vpop.xlane.xlu0 %6098  ;;  %v5689_v31 = vmul.f32 1.442695, %v14085_v5  ;;  %v12656_v4 = vpop.eup %8480  ;;  %v14091_v24 = vsub.f32 %v14089_v53, %v14090_v19  ;;  %v14092_v29 = vld [vmem:[#allocation120_spill] sm:$0xff]  ;;  %v14093_v10 = vld [vmem:[#allocation122_spill] sm:$0xff]  ;;  %v12702_v30 = vmul.f32 %v12537_v48, %v4720_v22  ;;  %v14095_v54 = vld [vmem:[#allocation121_spill] sm:$0xff] }
 0x423   :  { %v6189_v33 = vadd.f32 %v6099_v61, %v5709_v62  ;;  %v5584_v62 = vld [vmem:[#allocation5 + $0x28] sm:$0xff]  ;;  %v12664_v43 = vpop.eup %8482  ;;  %v14094_v5 = vsub.f32 %v14092_v29, %v14093_v10  ;;  %v5589_v45 = vld [vmem:[#allocation5 + $0x50] sm:$0xff] }
 0x424   :  { %v6478_v13 = vld [vmem:[#allocation5] sm:$0xff]  ;;  %v12672_v32 = vpop.eup %8484  ;;  %v4828_v57 = vmul.f32 1.442695, %v14091_v24  ;;  %v4724_v1 = vld [vmem:[#allocation3 + $0x50] sm:$0xff] }
 0x425   :  { %8500 = vlog2.f32 %v6478_v13  ;;  %6221 = vst.msk [vmem:[#allocation5 + $0x10] sm:$0xff] %vm21_vm14, %v6189_v33  ;;  %v12678_v33 = vmul.f32 %v12341_v59, %v4718_v35  ;;  %v12680_v49 = vpop.eup %8486  ;;  %v4830_v13 = vmul.f32 1.442695, %v14094_v5  ;;  %v12696_v35 = vmul.f32 %v12532_v40, %v4719_v27  ;;  %v5590_v27 = vld [vmem:[#allocation5 + $0x58] sm:$0xff]  ;;  %v14098_v22 = vld [vmem:[#allocation124_spill] sm:$0xff] }
 0x426   :  { %8502 = vpow2.f32 %v4824_v41  ;;  %v5234_v17 = vpop.xlane.xlu0 %5233  ;;  %v12692_v59 = vpop.eup %8488  ;;  %v12710_v40 = vmul.f32 %v12547_v15, %v5587_v12 }
 0x427   :  { %8504 = vpow2.f32 %v4826_v55  ;;  %v5324_v41 = vadd.f32 %v5234_v17, %v4844_v34  ;;  %v12687_v55 = vmul.f32 %v12516_v2, %v5584_v62  ;;  %v4721_v34 = vld [vmem:[#allocation3 + $0x38] sm:$0xff]  ;;  %v5588_v2 = vld [vmem:[#allocation5 + $0x48] sm:$0xff]  ;;  %v4722_v62 = vld [vmem:[#allocation3 + $0x40] sm:$0xff] }
 0x428   :  { %v6096_v36 = vpop.xlane.xlu1 %6095  ;;  %8506 = vpow2.f32 %v5689_v31  ;;  %v14096_v17 = vld [vmem:[#allocation123_spill] sm:$0xff]  ;;  %v12718_v5 = vmul.f32 %v12552_v42, %v4721_v34  ;;  %v12739_v34 = vmul.f32 %v12582_v23, %v5590_v27  ;;  %v5593_v23 = vld [vmem:[#allocation5 + $0x70] sm:$0xff]  ;;  %v5594_v27 = vld [vmem:[#allocation5 + $0x78] sm:$0xff] }
 0x429   :  { %v6188_v61 = vadd.f32 %v6096_v36, %v5708_v47  ;;  %v6318_v47 = vld [vmem:[#allocation3] sm:$0xff]  ;;  %v12690_v36 = vmul.f32 %v12521_v51, %v5585_v8  ;;  %5357 = vst.msk [vmem:[#allocation3 + $0x10] sm:$0xff] %vm21_vm14, %v5324_v41  ;;  %v4723_v51 = vld [vmem:[#allocation3 + $0x48] sm:$0xff]  ;;  %v12704_v8 = vpop.eup %8490 }
 0x42a   :  { %8508 = vlog2.f32 %v6318_v47  ;;  %v6102_v19 = vpop.xlane.xlu0 %6101  ;;  %v12712_v48 = vpop.eup %8492  ;;  %v14099_v41 = vld [vmem:[#allocation126_spill] sm:$0xff]  ;;  %v12730_v12 = vmul.f32 %v12567_v18, %v4723_v51  ;;  %v4727_v18 = vld [vmem:[#allocation3 + $0x68] sm:$0xff]  ;;  %v14101_v51 = vld [vmem:[#allocation125_spill] sm:$0xff] }
 0x42b   :  { %6220 = vst.msk [vmem:[#allocation5 + $0x8] sm:$0xff] %vm21_vm14, %v6188_v61  ;;  %8510 = vpow2.f32 %v5691_v3  ;;  %v14097_v61 = vsub.f32 %v14095_v54, %v14096_v17  ;;  %v14100_v29 = vsub.f32 %v14098_v22, %v14099_v41  ;;  %v6190_v3 = vadd.f32 %v6102_v19, %v5710_v21  ;;  %v5591_v47 = vld [vmem:[#allocation5 + $0x60] sm:$0xff]  ;;  %v12720_v54 = vpop.eup %8494  ;;  %v4725_v21 = vld [vmem:[#allocation3 + $0x58] sm:$0xff]  ;;  %v14102_v17 = vld [vmem:[#allocation128_spill] sm:$0xff] }
 0x42c   :  { %v5231_v31 = vpop.xlane.xlu1 %5230  ;;  %8512 = vpow2.f32 %v4828_v57  ;;  %v6480_v15 = vld [vmem:[#allocation5 + $0x10] sm:$0xff]  ;;  %v12727_v57 = vmul.f32 %v12557_v39, %v4722_v62  ;;  %v5592_v39 = vld [vmem:[#allocation5 + $0x68] sm:$0xff]  ;;  %v14105_v41 = vld [vmem:[#allocation130_spill] sm:$0xff] }
 0x42d   :  { %v5693_v53 = vmul.f32 1.442695, %v14097_v61  ;;  %v5323_v24 = vadd.f32 %v5231_v31, %v4843_v38  ;;  %v5695_v10 = vmul.f32 1.442695, %v14100_v29  ;;  %8514 = vpow2.f32 %v4830_v13  ;;  %v12732_v31 = vpop.eup %8496  ;;  %6222 = vst.msk [vmem:[#allocation5 + $0x18] sm:$0xff] %vm21_vm14, %v6190_v3  ;;  %v14104_v22 = vld [vmem:[#allocation127_spill] sm:$0xff] }
 0x42e   :  { %v12724_v38 = vmul.f32 %v12562_v28, %v5588_v2  ;;  %8516 = vlog2.f32 %v6480_v15  ;;  %v12736_v13 = vmul.f32 %v12572_v26, %v5589_v45  ;;  %v12742_v28 = vmul.f32 %v12577_v37, %v4724_v1  ;;  %v4726_v2 = vld [vmem:[#allocation3 + $0x60] sm:$0xff]  ;;  %v12744_v62 = vpop.eup %8498  ;;  %v4728_v37 = vld [vmem:[#allocation3 + $0x70] sm:$0xff] }
 0x42f   :  { %5356 = vst.msk [vmem:[#allocation3 + $0x8] sm:$0xff] %vm21_vm14, %v5323_v24  ;;  %8518 = vpow2.f32 %v5693_v53  ;;  %v14103_v61 = vsub.f32 %v14101_v51, %v14102_v17  ;;  %v5237_v24 = vpop.xlane.xlu0 %5236  ;;  %v12751_v45 = vmul.f32 %v12587_v6, %v5591_v47  ;;  %v8501_v1 = vpop.eup %8500  ;;  %v14106_v29 = vsub.f32 %v14104_v22, %v14105_v41  ;;  %v4730_v17 = vld [vmem:[#allocation3 + $0x80] sm:$0xff]  ;;  %v5597_v41 = vld [vmem:[#allocation5 + $0x90] sm:$0xff] }
 0x430   :  { %v6105_v42 = vpop.xlane.xlu1 %6104  ;;  %8520 = vpow2.f32 %v5695_v10  ;;  %v5325_v15 = vadd.f32 %v5237_v24, %v12670_v0  ;;  %v12758_v51 = vmul.f32 %v12592_v7, %v4725_v21  ;;  %v6320_v6 = vld [vmem:[#allocation3 + $0x10] sm:$0xff]  ;;  %v12764_v47 = vmul.f32 %v12603_v50, %v5592_v39  ;;  %v4729_v0 = vld [vmem:[#allocation3 + $0x78] sm:$0xff]  ;;  %v5595_v39 = vld [vmem:[#allocation5 + $0x80] sm:$0xff] }
 0x431   :  { %v4832_v19 = vmul.f32 1.442695, %v14103_v61  ;;  %v6191_v26 = vadd.f32 %v6105_v42, %v12662_v14  ;;  %v4834_v3 = vmul.f32 1.442695, %v14106_v29  ;;  %v12760_v14 = vpop.eup %8502  ;;  %v12767_v10 = vmul.f32 %v12598_v60, %v4726_v2  ;;  %v4731_v60 = vld [vmem:[#allocation3 + $0x88] sm:$0xff] }
 0x432   :  { %v6479_v53 = vld [vmem:[#allocation5 + $0x8] sm:$0xff]  ;;  %v12770_v42 = vmul.f32 %v12608_v9, %v4727_v18  ;;  %v12772_v61 = vpop.eup %8504  ;;  %5358 = vst.msk [vmem:[#allocation3 + $0x18] sm:$0xff] %vm21_vm14, %v5325_v15  ;;  %v12776_v21 = vmul.f32 %v12613_v16, %v5593_v23  ;;  %v12779_v24 = vmul.f32 %v12625_v44, %v5594_v27  ;;  %v12782_v50 = vmul.f32 %v12620_v11, %v4728_v37  ;;  %v4732_v23 = vld [vmem:[#allocation3 + $0x90] sm:$0xff]  ;;  %v14107_v27 = vld [vmem:[#allocation129_spill] sm:$0xff] }
 0x433   :  { %8522 = vlog2.f32 %v6479_v53  ;;  %6223 = vst.msk [vmem:[#allocation5 + $0x20] sm:$0xff] %vm21_vm14, %v6191_v26  ;;  %v12784_v9 = vpop.eup %8506  ;;  %v6511_v2 = vmul.f32 0.6931472, %v8501_v1  ;;  %v6108_v18 = vpop.xlane.xlu0 %6107  ;;  %v12788_v22 = vmul.f32 %v12630_v52, %v4730_v17  ;;  %v5596_v16 = vld [vmem:[#allocation5 + $0x88] sm:$0xff]  ;;  %v14108_v11 = vld [vmem:[#allocation132_spill] sm:$0xff] }
 0x434   :  { %8524 = vlog2.f32 %v6320_v6  ;;  %v5240_v7 = vpop.xlane.xlu1 %5239  ;;  %v8509_v44 = vpop.eup %8508  ;;  %v14109_v37 = vsub.f32 %v14107_v27, %v14108_v11  ;;  %v6192_v15 = vadd.f32 %v6108_v18, %v12687_v55  ;;  %v6481_v17 = vld [vmem:[#allocation5 + $0x18] sm:$0xff]  ;;  %v12804_v6 = vmul.f32 %v12639_v58, %v5595_v39  ;;  %v6286_v55 = vld [vmem:[#allocation2] sm:$0xff] }
 0x435   :  { %8526 = vpow2.f32 %v4832_v19  ;;  %v5326_v26 = vadd.f32 %v5240_v7, %v12678_v33  ;;  %v12795_v19 = vmul.f32 %v12635_v56, %v4729_v0  ;;  %v12797_v1 = vpop.eup %8510  ;;  %v6446_v33 = vld [vmem:[#allocation4] sm:$0xff]  ;;  %v6351_v52 = vmul.f32 0.6931472, %v8509_v44  ;;  %v4733_v7 = vld [vmem:[#allocation3 + $0x98] sm:$0xff] }
 0x436   :  { %8528 = vpow2.f32 %v4834_v3  ;;  %v5697_v29 = vmul.f32 1.442695, %v14109_v37  ;;  %v6319_v53 = vld [vmem:[#allocation3 + $0x8] sm:$0xff]  ;;  %v12801_v3 = vmul.f32 %v12644_v46, %v4731_v60  ;;  %14111 = vst [vmem:[#allocation23_spill] sm:$0xff] %v12804_v6  ;;  %v12806_v27 = vpop.eup %8512  ;;  %6224 = vst.msk [vmem:[#allocation5 + $0x28] sm:$0xff] %vm21_vm14, %v6192_v15  ;;  %v12810_v0 = vmul.f32 %v12656_v4, %v5596_v16  ;;  %v5598_v60 = vld [vmem:[#allocation5 + $0x98] sm:$0xff] }
 0x437   :  { %8530 = vlog2.f32 %v6319_v53  ;;  %5359 = vst.msk [vmem:[#allocation3 + $0x20] sm:$0xff] %vm21_vm14, %v5326_v26  ;;  %v12813_v18 = vmul.f32 %v12649_v25, %v4732_v23  ;;  %v12816_v46 = vmul.f32 %v12664_v43, %v5597_v41  ;;  %v4734_v58 = vld [vmem:[#allocation3 + $0xa0] sm:$0xff]  ;;  %v12818_v39 = vpop.eup %8514  ;;  %v14115_v26 = vld [vmem:[#allocation131_spill] sm:$0xff]  ;;  %v6574_v53 = vadd.f32 %v6511_v2, %v6446_v33  ;;  %v4736_v25 = vld [vmem:[#allocation3 + $0xb0] sm:$0xff] }
 0x438   :  { %14110 = vst [vmem:[#allocation19_spill] sm:$0xff] %v12801_v3  ;;  %8532 = vlog2.f32 %v6481_v17  ;;  %v6111_v56 = vpop.xlane.xlu1 %6110  ;;  %14112 = vst [vmem:[#allocation24_spill] sm:$0xff] %v12810_v0  ;;  %v14116_v44 = vld [vmem:[#allocation134_spill] sm:$0xff]  ;;  %v6414_v15 = vadd.f32 %v6351_v52, %v6286_v55  ;;  %v5243_v17 = vpop.xlane.xlu0 %5242  ;;  %v4735_v16 = vld [vmem:[#allocation3 + $0xa8] sm:$0xff]  ;;  %v12840_v52 = vmul.f32 %v12680_v49, %v4734_v58 }
 0x439   :  { %14113 = vst [vmem:[#allocation6_spill] sm:$0xff] %v12813_v18  ;;  %14114 = vst [vmem:[#allocation22_spill] sm:$0xff] %v12816_v46  ;;  %v14117_v11 = vsub.f32 %v14115_v26, %v14116_v44  ;;  %v6193_v4 = vadd.f32 %v6111_v56, %v12690_v36  ;;  %v5599_v0 = vld [vmem:[#allocation5 + $0xa0] sm:$0xff]  ;;  %v8517_v23 = vpop.eup %8516  ;;  %8534 = vpow2.f32 %v5697_v29  ;;  %v14118_v43 = vld [vmem:[#allocation133_spill] sm:$0xff]  ;;  %v5327_v3 = vadd.f32 %v5243_v17, %v12696_v35 }
 0x43a   :  { %v14119_v41 = vld [vmem:[#allocation136_spill] sm:$0xff]  ;;  %v6482_v6 = vld [vmem:[#allocation5 + $0x20] sm:$0xff]  ;;  %v12829_v26 = vmul.f32 %v12672_v32, %v4733_v7  ;;  %v12831_v2 = vpop.eup %8518  ;;  %v12833_v33 = vadd.f32 %v6574_v53, %v6414_v15  ;;  %v6321_v36 = vld [vmem:[#allocation3 + $0x18] sm:$0xff]  ;;  %v12837_v29 = vmul.f32 %v12692_v59, %v5598_v60  ;;  %v12846_v35 = vmul.f32 %v12712_v48, %v4735_v16 }
 0x43b   :  { %v5699_v37 = vmul.f32 1.442695, %v14117_v11  ;;  %v14120_v46 = vsub.f32 %v14118_v43, %v14119_v41  ;;  %8536 = vlog2.f32 %v6482_v6  ;;  %6225 = vst.msk [vmem:[#allocation5 + $0x30] sm:$0xff] %vm21_vm14, %v6193_v4  ;;  %v5600_v55 = vld [vmem:[#allocation5 + $0xa8] sm:$0xff]  ;;  %v12842_v56 = vpop.eup %8520  ;;  %5360 = vst.msk [vmem:[#allocation3 + $0x28] sm:$0xff] %vm21_vm14, %v5327_v3  ;;  %v12849_v6 = vmul.f32 %v12704_v8, %v5599_v0  ;;  %v5601_v59 = vld [vmem:[#allocation5 + $0xb0] sm:$0xff] }
 0x43c   :  { %8538 = vlog2.f32 %v6321_v36  ;;  %v5246_v32 = vpop.xlane.xlu1 %5245  ;;  %v12852_v7 = vmul.f32 %v12720_v54, %v4736_v25  ;;  %v6670_v49 = vand.u32 2147483647, %v12833_v33  ;;  %v6515_v60 = vmul.f32 0.6931472, %v8517_v23  ;;  %v6114_v58 = vpop.xlane.xlu0 %6113  ;;  %v4737_v3 = vld [vmem:[#allocation3 + $0xb8] sm:$0xff]  ;;  %v4738_v11 = vld [vmem:[#allocation3 + $0xc0] sm:$0xff] }
 0x43d   :  { %v4836_v18 = vmul.f32 1.442695, %v14120_v46  ;;  %v8523_v46 = vpop.eup %8522  ;;  %8540 = vpow2.f32 %v5699_v37  ;;  %v5328_v44 = vadd.f32 %v5246_v32, %v12702_v30  ;;  %v14121_v48 = vld [vmem:[#allocation135_spill] sm:$0xff]  ;;  %v14122_v15 = vld [vmem:[#allocation137_spill] sm:$0xff]  ;;  %v6194_v54 = vadd.f32 %v6114_v58, %v12699_v63  ;;  %v6448_v16 = vld [vmem:[#allocation4 + $0x10] sm:$0xff] }
 0x43e   :  { %v8525_v53 = vpop.eup %8524  ;;  %v14123_v8 = vsub.f32 %v14121_v48, %v14122_v15  ;;  %v6322_v17 = vld [vmem:[#allocation3 + $0x20] sm:$0xff]  ;;  %v12861_v4 = vmul.f32 %v12732_v31, %v5600_v55  ;;  %v6702_v25 = vsub.f32 0.0, %v6670_v49  ;;  %v6483_v30 = vld [vmem:[#allocation5 + $0x28] sm:$0xff]  ;;  %v6288_v41 = vld [vmem:[#allocation2 + $0x10] sm:$0xff]  ;;  %v6513_v36 = vmul.f32 0.6931472, %v8523_v46 }
 0x43f   :  { %8542 = vpow2.f32 %v4836_v18  ;;  %v12863_v37 = vpop.eup %8526  ;;  %v6355_v23 = vmul.f32 0.6931472, %v8525_v53  ;;  %5361 = vst.msk [vmem:[#allocation3 + $0x30] sm:$0xff] %vm21_vm14, %v5328_v44  ;;  %v12867_v18 = vmul.f32 %v12744_v62, %v5601_v59  ;;  %6226 = vst.msk [vmem:[#allocation5 + $0x38] sm:$0xff] %vm21_vm14, %v6194_v54  ;;  %v12873_v31 = vmul.f32 %v12760_v14, %v4737_v3  ;;  %v5602_v55 = vld [vmem:[#allocation5 + $0xb8] sm:$0xff]  ;;  %v5603_v49 = vld [vmem:[#allocation5 + $0xc0] sm:$0xff] }
 0x440   :  { %v4838_v0 = vmul.f32 1.442695, %v14123_v8  ;;  %8544 = vlog2.f32 %v6322_v17  ;;  %v12869_v43 = vpop.eup %8528  ;;  %v6117_v63 = vpop.xlane.xlu1 %6116  ;;  %v12876_v32 = vmul.f32 %v12772_v61, %v4738_v11  ;;  %v6734_v44 = vmul.f32 1.442695, %v6702_v25  ;;  %v4739_v46 = vld [vmem:[#allocation3 + $0xc8] sm:$0xff]  ;;  %v14125_v8 = vld [vmem:[#allocation138_spill] sm:$0xff] }
 0x441   :  { %8546 = vlog2.f32 %v6483_v30  ;;  %v8531_v58 = vpop.eup %8530  ;;  %v6576_v62 = vadd.f32 %v6515_v60, %v6448_v16  ;;  %v6416_v59 = vadd.f32 %v6355_v23, %v6288_v41  ;;  %v5249_v53 = vpop.xlane.xlu0 %5248  ;;  %v6195_v48 = vadd.f32 %v6117_v63, %v12710_v40  ;;  %v14126_v17 = vld [vmem:[#allocation140_spill] sm:$0xff]  ;;  %v6447_v11 = vld [vmem:[#allocation4 + $0x8] sm:$0xff] }
 0x442   :  { %14124 = vst [vmem:[#allocation7_spill] sm:$0xff] %v12876_v32  ;;  %v8533_v15 = vpop.eup %8532  ;;  %8548 = vpow2.f32 %v4838_v0  ;;  %v14127_v54 = vsub.f32 %v14125_v8, %v14126_v17  ;;  %v6353_v3 = vmul.f32 0.6931472, %v8531_v58  ;;  %v6484_v30 = vld [vmem:[#allocation5 + $0x30] sm:$0xff]  ;;  %v5329_v61 = vadd.f32 %v5249_v53, %v12718_v5  ;;  %v6287_v32 = vld [vmem:[#allocation2 + $0x8] sm:$0xff] }
 0x443   :  { %8550 = vpow2.f32 %v6734_v44  ;;  %v12883_v25 = vadd.f32 %v6576_v62, %v6416_v59  ;;  %v6323_v60 = vld [vmem:[#allocation3 + $0x28] sm:$0xff]  ;;  %6227 = vst.msk [vmem:[#allocation5 + $0x40] sm:$0xff] %vm21_vm14, %v6195_v48  ;;  %v12887_v40 = vmul.f32 %v12784_v9, %v5602_v55  ;;  %v12890_v0 = vmul.f32 %v12797_v1, %v5603_v49  ;;  %v12892_v16 = vpop.eup %8534  ;;  %v4740_v44 = vld [vmem:[#allocation3 + $0xd0] sm:$0xff]  ;;  %v14129_v9 = vld [vmem:[#allocation141_spill] sm:$0xff] }
 0x444   :  { %v5701_v14 = vmul.f32 1.442695, %v14127_v54  ;;  %v6575_v23 = vadd.f32 %v6513_v36, %v6447_v11  ;;  %v6415_v41 = vadd.f32 %v6353_v3, %v6287_v32  ;;  %8552 = vlog2.f32 %v6323_v60  ;;  %5362 = vst.msk [vmem:[#allocation3 + $0x38] sm:$0xff] %vm21_vm14, %v5329_v61  ;;  %v5252_v5 = vpop.xlane.xlu1 %5251  ;;  %v5604_v58 = vld [vmem:[#allocation5 + $0xc8] sm:$0xff] }
 0x445   :  { %v12896_v63 = vmul.f32 %v12806_v27, %v4739_v46  ;;  %v8537_v62 = vpop.eup %8536  ;;  %v14128_v59 = vld [vmem:[#allocation139_spill] sm:$0xff]  ;;  %v6672_v1 = vand.u32 2147483647, %v12883_v25  ;;  %v6517_v49 = vmul.f32 0.6931472, %v8533_v15  ;;  %8554 = vlog2.f32 %v6484_v30  ;;  %v6120_v36 = vpop.xlane.xlu0 %6119  ;;  %v6449_v15 = vld [vmem:[#allocation4 + $0x18] sm:$0xff] }
 0x446   :  { %v14130_v55 = vsub.f32 %v14128_v59, %v14129_v9  ;;  %v8539_v32 = vpop.eup %8538  ;;  %8556 = vpow2.f32 %v5701_v14  ;;  %v12902_v48 = vadd.f32 %v6575_v23, %v6415_v41  ;;  %v6324_v8 = vld [vmem:[#allocation3 + $0x30] sm:$0xff]  ;;  %v6196_v27 = vadd.f32 %v6120_v36, %v12724_v38  ;;  %v6485_v11 = vld [vmem:[#allocation5 + $0x38] sm:$0xff] }
 0x447   :  { %v5330_v46 = vadd.f32 %v5252_v5, %v12727_v57  ;;  %v12906_v17 = vpop.eup %8540  ;;  %v6704_v54 = vsub.f32 0.0, %v6672_v1  ;;  %v6357_v3 = vmul.f32 0.6931472, %v8539_v32  ;;  %v6519_v61 = vmul.f32 0.6931472, %v8537_v62  ;;  %v6289_v30 = vld [vmem:[#allocation2 + $0x18] sm:$0xff] }
 0x448   :  { %v5703_v53 = vmul.f32 1.442695, %v14130_v55  ;;  %8558 = vlog2.f32 %v6324_v8  ;;  %v6671_v14 = vand.u32 2147483647, %v12902_v48  ;;  %6228 = vst.msk [vmem:[#allocation5 + $0x48] sm:$0xff] %vm21_vm14, %v6196_v27  ;;  %v6123_v38 = vpop.xlane.xlu1 %6122  ;;  %v12914_v57 = vmul.f32 %v12831_v2, %v5604_v58  ;;  %v6450_v5 = vld [vmem:[#allocation4 + $0x20] sm:$0xff] }
 0x449   :  { %v12908_v60 = vpop.eup %8542  ;;  %8560 = vlog2.f32 %v6485_v11  ;;  %5363 = vst.msk [vmem:[#allocation3 + $0x40] sm:$0xff] %vm21_vm14, %v5330_v46  ;;  %v12917_v23 = vmul.f32 %v12818_v39, %v4740_v44  ;;  %v6738_v62 = vmul.f32 1.442695, %v6704_v54  ;;  %v6577_v59 = vadd.f32 %v6517_v49, %v6449_v15  ;;  %v5255_v55 = vpop.xlane.xlu0 %5254  ;;  %v4741_v2 = vld [vmem:[#allocation3 + $0xd8] sm:$0xff]  ;;  %v5605_v58 = vld [vmem:[#allocation5 + $0xd0] sm:$0xff]  ;;  %v6290_v11 = vld [vmem:[#allocation2 + $0x20] sm:$0xff] }
 0x44a   :  { %14131 = vst [vmem:[#allocation25_spill] sm:$0xff] %v12914_v57  ;;  %v8545_v41 = vpop.eup %8544  ;;  %v6417_v9 = vadd.f32 %v6357_v3, %v6289_v30  ;;  %v6197_v1 = vadd.f32 %v6123_v38, %v12736_v13  ;;  %8562 = vpow2.f32 %v5703_v53  ;;  %v6703_v32 = vsub.f32 0.0, %v6671_v14  ;;  %v6486_v27 = vld [vmem:[#allocation5 + $0x40] sm:$0xff]  ;;  %v14134_v44 = vld [vmem:[#allocation143_spill] sm:$0xff] }
 0x44b   :  { %14132 = vst [vmem:[#allocation28_spill] sm:$0xff] %v12917_v23  ;;  %v8547_v36 = vpop.eup %8546  ;;  %v6359_v8 = vmul.f32 0.6931472, %v8545_v41  ;;  %v5331_v46 = vadd.f32 %v5255_v55, %v12730_v12  ;;  %v14133_v39 = vld [vmem:[#allocation142_spill] sm:$0xff]  ;;  %8564 = vpow2.f32 %v6738_v62  ;;  %v6578_v54 = vadd.f32 %v6519_v61, %v6450_v5  ;;  %v6325_v3 = vld [vmem:[#allocation3 + $0x38] sm:$0xff]  ;;  %v6451_v62 = vld [vmem:[#allocation4 + $0x28] sm:$0xff] }
 0x44c   :  { %v14135_v23 = vsub.f32 %v14133_v39, %v14134_v44  ;;  %v12924_v49 = vadd.f32 %v6577_v59, %v6417_v9  ;;  %6229 = vst.msk [vmem:[#allocation5 + $0x50] sm:$0xff] %vm21_vm14, %v6197_v1  ;;  %v12927_v13 = vpop.eup %8548  ;;  %v6736_v53 = vmul.f32 1.442695, %v6703_v32  ;;  %v6521_v15 = vmul.f32 0.6931472, %v8547_v36  ;;  %v5258_v12 = vpop.xlane.xlu1 %5257 }
 0x44d   :  { %v6418_v30 = vadd.f32 %v6359_v8, %v6290_v11  ;;  %8566 = vlog2.f32 %v6325_v3  ;;  %5364 = vst.msk [vmem:[#allocation3 + $0x48] sm:$0xff] %vm21_vm14, %v5331_v46  ;;  %v8551_v14 = vpop.eup %8550  ;;  %v12932_v41 = vmul.f32 %v12863_v37, %v4741_v2  ;;  %v12935_v61 = vmul.f32 %v12842_v56, %v5605_v58  ;;  %v4742_v46 = vld [vmem:[#allocation3 + $0xe0] sm:$0xff]  ;;  %v6291_v56 = vld [vmem:[#allocation2 + $0x28] sm:$0xff] }
 0x44e   :  { %v4840_v57 = vmul.f32 1.442695, %v14135_v23  ;;  %v6673_v38 = vand.u32 2147483647, %v12924_v49  ;;  %8568 = vlog2.f32 %v6486_v27  ;;  %v6126_v23 = vpop.xlane.xlu0 %6125  ;;  %v8553_v5 = vpop.eup %8552  ;;  %v6798_v59 = vadd.f32 1.0, %v8551_v14 }
 0x44f   :  { %8570 = vpow2.f32 %v6736_v53  ;;  %v12937_v9 = vadd.f32 %v6578_v54, %v6418_v30  ;;  %v6198_v55 = vadd.f32 %v6126_v23, %v12739_v34  ;;  %v8555_v1 = vpop.eup %8554  ;;  %v6361_v32 = vmul.f32 0.6931472, %v8553_v5  ;;  %v6487_v8 = vld [vmem:[#allocation5 + $0x48] sm:$0xff]  ;;  %v5606_v53 = vld [vmem:[#allocation5 + $0xd8] sm:$0xff]  ;;  %v5607_v5 = vld [vmem:[#allocation5 + $0xe0] sm:$0xff] }
 0x450   :  { %8572 = vpow2.f32 %v4840_v57  ;;  %v6705_v36 = vsub.f32 0.0, %v6673_v38  ;;  %v6326_v27 = vld [vmem:[#allocation3 + $0x40] sm:$0xff]  ;;  %v5332_v37 = vadd.f32 %v5258_v12, %v12742_v28  ;;  %v12941_v2 = vpop.eup %8556  ;;  %v6579_v58 = vadd.f32 %v6521_v15, %v6451_v62  ;;  %v6129_v34 = vpop.xlane.xlu1 %6128  ;;  %v6452_v12 = vld [vmem:[#allocation4 + $0x30] sm:$0xff] }
 0x451   :  { %8574 = vlog2.f32 %v6798_v59  ;;  %v6674_v11 = vand.u32 2147483647, %v12937_v9  ;;  %v6523_v39 = vmul.f32 0.6931472, %v8555_v1  ;;  %6230 = vst.msk [vmem:[#allocation5 + $0x58] sm:$0xff] %vm21_vm14, %v6198_v55  ;;  %v6419_v54 = vadd.f32 %v6361_v32, %v6291_v56  ;;  %v6292_v62 = vld [vmem:[#allocation2 + $0x30] sm:$0xff] }
 0x452   :  { %v8559_v44 = vpop.eup %8558  ;;  %v6740_v57 = vmul.f32 1.442695, %v6705_v36  ;;  %8576 = vlog2.f32 %v6487_v8  ;;  %5365 = vst.msk [vmem:[#allocation3 + $0x50] sm:$0xff] %vm21_vm14, %v5332_v37  ;;  %v5261_v3 = vpop.xlane.xlu0 %5260  ;;  %v6199_v28 = vadd.f32 %v6129_v34, %v12751_v45  ;;  %v12948_v23 = vmul.f32 %v12869_v43, %v4742_v46 }
 0x453   :  { %v8561_v30 = vpop.eup %8560  ;;  %v6706_v14 = vsub.f32 0.0, %v6674_v11  ;;  %v6363_v15 = vmul.f32 0.6931472, %v8559_v44  ;;  %8578 = vlog2.f32 %v6326_v27  ;;  %v6488_v38 = vld [vmem:[#allocation5 + $0x50] sm:$0xff]  ;;  %v12950_v59 = vadd.f32 %v6579_v58, %v6419_v54 }
 0x454   :  { %8580 = vpow2.f32 %v6740_v57  ;;  %v6580_v55 = vadd.f32 %v6523_v39, %v6452_v12  ;;  %v6327_v1 = vld [vmem:[#allocation3 + $0x48] sm:$0xff]  ;;  %v5333_v36 = vadd.f32 %v5261_v3, %v12758_v51  ;;  %6231 = vst.msk [vmem:[#allocation5 + $0x60] sm:$0xff] %vm21_vm14, %v6199_v28  ;;  %v12954_v45 = vpop.eup %8562  ;;  %v6525_v8 = vmul.f32 0.6931472, %v8561_v30  ;;  %v5264_v37 = vpop.xlane.xlu1 %5263  ;;  %v6453_v39 = vld [vmem:[#allocation4 + $0x38] sm:$0xff]  ;;  %v14136_v3 = vld [vmem:[#allocation144_spill] sm:$0xff] }
 0x455   :  { %v6742_v32 = vmul.f32 1.442695, %v6706_v14  ;;  %v6420_v27 = vadd.f32 %v6363_v15, %v6292_v62  ;;  %8582 = vlog2.f32 %v6327_v1  ;;  %v8565_v43 = vpop.eup %8564  ;;  %v6675_v46 = vand.u32 2147483647, %v12950_v59  ;;  %v6293_v15 = vld [vmem:[#allocation2 + $0x38] sm:$0xff] }
 0x456   :  { %8584 = vlog2.f32 %v6488_v38  ;;  %5366 = vst.msk [vmem:[#allocation3 + $0x58] sm:$0xff] %vm21_vm14, %v5333_v36  ;;  %v6132_v56 = vpop.xlane.xlu0 %6131  ;;  %v12959_v58 = vmul.f32 %v12892_v16, %v5606_v53  ;;  %v12962_v51 = vmul.f32 %v12906_v17, %v5607_v5  ;;  %v6800_v34 = vadd.f32 1.0, %v8565_v43 }
 0x457   :  { %v8567_v11 = vpop.eup %8566  ;;  %8586 = vpow2.f32 %v6742_v32  ;;  %v12964_v44 = vadd.f32 %v6580_v55, %v6420_v27  ;;  %v6200_v57 = vadd.f32 %v6132_v56, %v12764_v47  ;;  %v14137_v28 = vsub.f32 %v12267_v20, %v14136_v3  ;;  %v4743_v27 = vld [vmem:[#allocation3 + $0xe8] sm:$0xff] }
 0x458   :  { %v8569_v54 = vpop.eup %8568  ;;  %v6707_v12 = vsub.f32 0.0, %v6675_v46  ;;  %v6365_v14 = vmul.f32 0.6931472, %v8567_v11  ;;  %v6489_v16 = vld [vmem:[#allocation5 + $0x58] sm:$0xff]  ;;  %v5334_v53 = vadd.f32 %v5264_v37, %v12767_v10  ;;  %v6638_v38 = vmax.f32 %v12833_v33, 0.0  ;;  %v6135_v47 = vpop.xlane.xlu1 %6134 }
 0x459   :  { %v5705_v30 = vmul.f32 1.442695, %v14137_v28  ;;  %v8571_v17 = vpop.eup %8570  ;;  %8588 = vlog2.f32 %v6800_v34  ;;  %v6581_v5 = vadd.f32 %v6525_v8, %v6453_v39  ;;  %v6676_v62 = vand.u32 2147483647, %v12964_v44  ;;  %v6328_v55 = vld [vmem:[#allocation3 + $0x50] sm:$0xff]  ;;  %6232 = vst.msk [vmem:[#allocation5 + $0x68] sm:$0xff] %vm21_vm14, %v6200_v57 }
 0x45a   :  { %v12974_v1 = vpop.eup %8572  ;;  %v6799_v20 = vadd.f32 1.0, %v8571_v17  ;;  %v6744_v36 = vmul.f32 1.442695, %v6707_v12  ;;  %v6421_v32 = vadd.f32 %v6365_v14, %v6293_v15  ;;  %8590 = vlog2.f32 %v6489_v16  ;;  %5367 = vst.msk [vmem:[#allocation3 + $0x60] sm:$0xff] %vm21_vm14, %v5334_v53  ;;  %v5267_v10 = vpop.xlane.xlu0 %5266  ;;  %v4744_v15 = vld [vmem:[#allocation3 + $0xf0] sm:$0xff] }
 0x45b   :  { %v8575_v37 = vpop.eup %8574  ;;  %v6708_v33 = vsub.f32 0.0, %v6676_v62  ;;  %v6527_v43 = vmul.f32 0.6931472, %v8569_v54  ;;  %8592 = vlog2.f32 %v6328_v55  ;;  %v5335_v8 = vadd.f32 %v5267_v10, %v12770_v42  ;;  %v6454_v42 = vld [vmem:[#allocation4 + $0x40] sm:$0xff] }
 0x45c   :  { %v8577_v46 = vpop.eup %8576  ;;  %v6831_v56 = vmul.f32 0.6931472, %v8575_v37  ;;  %8594 = vlog2.f32 %v6799_v20  ;;  %v12978_v11 = vadd.f32 %v6581_v5, %v6421_v32  ;;  %v6201_v39 = vadd.f32 %v6135_v47, %v12776_v21  ;;  %v5270_v12 = vpop.xlane.xlu1 %5269  ;;  %v6294_v62 = vld [vmem:[#allocation2 + $0x40] sm:$0xff]  ;;  %v6295_v37 = vld [vmem:[#allocation2 + $0x48] sm:$0xff] }
 0x45d   :  { %v8579_v34 = vpop.eup %8578  ;;  %8596 = vpow2.f32 %v6744_v36  ;;  %v6746_v57 = vmul.f32 1.442695, %v6708_v33  ;;  %v6529_v3 = vmul.f32 0.6931472, %v8577_v46  ;;  %v6329_v28 = vld [vmem:[#allocation3 + $0x58] sm:$0xff]  ;;  %5368 = vst.msk [vmem:[#allocation3 + $0x68] sm:$0xff] %vm21_vm14, %v5335_v8  ;;  %v12983_v54 = vmul.f32 %v12908_v60, %v4743_v27 }
 0x45e   :  { %v8581_v14 = vpop.eup %8580  ;;  %8598 = vpow2.f32 %v5705_v30  ;;  %v6894_v16 = vadd.f32 %v6831_v56, %v6638_v38  ;;  %v6677_v53 = vand.u32 2147483647, %v12978_v11  ;;  %v6367_v17 = vmul.f32 0.6931472, %v8579_v34  ;;  %6233 = vst.msk [vmem:[#allocation5 + $0x70] sm:$0xff] %vm21_vm14, %v6201_v39  ;;  %v6138_v21 = vpop.xlane.xlu0 %6137  ;;  %v6455_v36 = vld [vmem:[#allocation4 + $0x48] sm:$0xff] }
 0x45f   :  { %v8583_v5 = vpop.eup %8582  ;;  %v6801_v55 = vadd.f32 1.0, %v8581_v14  ;;  %8600 = vpow2.f32 %v6746_v57  ;;  %v6582_v47 = vadd.f32 %v6527_v43, %v6454_v42  ;;  %v6202_v20 = vadd.f32 %v6138_v21, %v12779_v24  ;;  %v6490_v10 = vld [vmem:[#allocation5 + $0x60] sm:$0xff] }
 0x460   :  { %v8585_v60 = vpop.eup %8584  ;;  %6926 = vst.msk [vmem:[%s13311_s4] sm:$0xff] %vm21_vm14, %v6894_v16  ;;  %v6709_v30 = vsub.f32 0.0, %v6677_v53  ;;  %v6422_v38 = vadd.f32 %v6367_v17, %v6294_v62  ;;  %v6369_v32 = vmul.f32 0.6931472, %v8583_v5  ;;  %8602 = vlog2.f32 %v6329_v28  ;;  %v5276_v43 = vpop.xlane.xlu1 %5275  ;;  %v6491_v42 = vld [vmem:[#allocation5 + $0x68] sm:$0xff] }
 0x461   :  { %v8587_v27 = vpop.eup %8586  ;;  %8604 = vlog2.f32 %v6801_v55  ;;  %v6583_v33 = vadd.f32 %v6529_v3, %v6455_v36  ;;  %6234 = vst.msk [vmem:[#allocation5 + $0x78] sm:$0xff] %vm21_vm14, %v6202_v20  ;;  %v5336_v24 = vadd.f32 %v5270_v12, %v12782_v50  ;;  %v12995_v8 = vmul.f32 %v12927_v13, %v4744_v15  ;;  %v6330_v62 = vld [vmem:[#allocation3 + $0x60] sm:$0xff]  ;;  %v6296_v55 = vld [vmem:[#allocation2 + $0x50] sm:$0xff] }
 0x462   :  { %v6802_v46 = vadd.f32 1.0, %v8587_v27  ;;  %v6748_v56 = vmul.f32 1.442695, %v6709_v30  ;;  %v12997_v39 = vadd.f32 %v6582_v47, %v6422_v38  ;;  %v6423_v34 = vadd.f32 %v6369_v32, %v6295_v37  ;;  %v5273_v57 = vpop.xlane.xlu0 %5272 }
 0x463   :  { %v8589_v28 = vpop.eup %8588  ;;  %v6531_v14 = vmul.f32 0.6931472, %v8585_v60  ;;  %8606 = vlog2.f32 %v6490_v10  ;;  %5369 = vst.msk [vmem:[#allocation3 + $0x70] sm:$0xff] %vm21_vm14, %v5336_v24  ;;  %v5337_v3 = vadd.f32 %v5273_v57, %v12795_v19  ;;  %v5338_v50 = vadd.f32 %v5276_v43, %v12788_v22  ;;  %v14138_v57 = vld [vmem:[#allocation19_spill] sm:$0xff] }
 0x464   :  { %v8591_v12 = vpop.eup %8590  ;;  %v6640_v13 = vmax.f32 %v12883_v25, 0.0  ;;  %v6835_v16 = vmul.f32 0.6931472, %v8589_v28  ;;  %8608 = vlog2.f32 %v6802_v46  ;;  %v6678_v53 = vand.u32 2147483647, %v12997_v39  ;;  %v6141_v22 = vpop.xlane.xlu1 %6140  ;;  %v6456_v25 = vld [vmem:[#allocation4 + $0x50] sm:$0xff] }
 0x465   :  { %v8593_v17 = vpop.eup %8592  ;;  %v6639_v21 = vmax.f32 %v12902_v48, 0.0  ;;  %v6641_v15 = vmax.f32 %v12924_v49, 0.0  ;;  %8610 = vpow2.f32 %v6748_v56  ;;  %v13006_v5 = vadd.f32 %v6583_v33, %v6423_v34  ;;  %5370 = vst.msk [vmem:[#allocation3 + $0x78] sm:$0xff] %vm21_vm14, %v5337_v3  ;;  %5371 = vst.msk [vmem:[#allocation3 + $0x80] sm:$0xff] %vm21_vm14, %v5338_v50  ;;  %v6331_v36 = vld [vmem:[#allocation3 + $0x68] sm:$0xff]  ;;  %v6457_v3 = vld [vmem:[#allocation4 + $0x58] sm:$0xff] }
 0x466   :  { %v8595_v19 = vpop.eup %8594  ;;  %v6896_v47 = vadd.f32 %v6835_v16, %v6640_v13  ;;  %v6710_v20 = vsub.f32 0.0, %v6678_v53  ;;  %v6371_v60 = vmul.f32 0.6931472, %v8593_v17  ;;  %8612 = vlog2.f32 %v6491_v42  ;;  %v5279_v48 = vpop.xlane.xlu0 %5278  ;;  %v14139_v13 = vld [vmem:[#allocation23_spill] sm:$0xff] }
 0x467   :  { %v8597_v30 = vpop.eup %8596  ;;  %v6833_v38 = vmul.f32 0.6931472, %v8595_v19  ;;  %v6679_v32 = vand.u32 2147483647, %v13006_v5  ;;  %v6584_v10 = vadd.f32 %v6531_v14, %v6456_v25  ;;  %v6533_v27 = vmul.f32 0.6931472, %v8591_v12 }
 0x468   :  { %v13011_v37 = vpop.eup %8598  ;;  %6928 = vst.msk [vmem:[%s13311_s4 + $0x10] sm:$0xff] %vm21_vm14, %v6896_v47  ;;  %v6803_v33 = vadd.f32 1.0, %v8597_v30  ;;  %v6750_v24 = vmul.f32 1.442695, %v6710_v20  ;;  %v6424_v43 = vadd.f32 %v6371_v60, %v6296_v55  ;;  %8614 = vlog2.f32 %v6330_v62  ;;  %v5282_v42 = vpop.xlane.xlu1 %5281  ;;  %v6297_v19 = vld [vmem:[#allocation2 + $0x58] sm:$0xff]  ;;  %v6492_v25 = vld [vmem:[#allocation5 + $0x70] sm:$0xff] }
 0x469   :  { %v8601_v46 = vpop.eup %8600  ;;  %v6895_v56 = vadd.f32 %v6833_v38, %v6639_v21  ;;  %v6711_v34 = vsub.f32 0.0, %v6679_v32  ;;  %8616 = vlog2.f32 %v6331_v36  ;;  %v5339_v28 = vadd.f32 %v5279_v48, %v14138_v57  ;;  %v14140_v55 = vld [vmem:[#allocation24_spill] sm:$0xff]  ;;  %v6493_v36 = vld [vmem:[#allocation5 + $0x78] sm:$0xff] }
 0x46a   :  { %v8603_v14 = vpop.eup %8602  ;;  %8618 = vlog2.f32 %v6803_v33  ;;  %v6804_v50 = vadd.f32 1.0, %v8601_v46  ;;  %v13018_v12 = vadd.f32 %v6584_v10, %v6424_v43  ;;  %v6203_v16 = vadd.f32 %v6141_v22, %v14139_v13  ;;  %v6144_v53 = vpop.xlane.xlu0 %6143  ;;  %v6332_v32 = vld [vmem:[#allocation3 + $0x70] sm:$0xff]  ;;  %v14141_v10 = vld [vmem:[#allocation6_spill] sm:$0xff]  ;;  %v5608_v43 = vld [vmem:[#allocation5 + $0xe8] sm:$0xff] }
 0x46b   :  { %v8605_v17 = vpop.eup %8604  ;;  %6927 = vst.msk [vmem:[%s13311_s4 + $0x8] sm:$0xff] %vm21_vm14, %v6895_v56  ;;  %8620 = vpow2.f32 %v6750_v24  ;;  %v6752_v21 = vmul.f32 1.442695, %v6711_v34  ;;  %v6373_v62 = vmul.f32 0.6931472, %v8603_v14  ;;  %5372 = vst.msk [vmem:[#allocation3 + $0x88] sm:$0xff] %vm21_vm14, %v5339_v28  ;;  %v6204_v47 = vadd.f32 %v6144_v53, %v14140_v55 }
 0x46c   :  { %v6837_v20 = vmul.f32 0.6931472, %v8605_v17  ;;  %v6642_v60 = vmax.f32 %v12937_v9, 0.0  ;;  %8622 = vlog2.f32 %v6804_v50  ;;  %v6680_v22 = vand.u32 2147483647, %v13018_v12  ;;  %6235 = vst.msk [vmem:[#allocation5 + $0x80] sm:$0xff] %vm21_vm14, %v6203_v16  ;;  %v6147_v24 = vpop.xlane.xlu1 %6146 }
 0x46d   :  { %v8607_v48 = vpop.eup %8606  ;;  %8624 = vpow2.f32 %v6752_v21  ;;  %v6585_v30 = vadd.f32 %v6533_v27, %v6457_v3  ;;  %v6425_v38 = vadd.f32 %v6373_v62, %v6297_v19  ;;  %6236 = vst.msk [vmem:[#allocation5 + $0x88] sm:$0xff] %vm21_vm14, %v6204_v47  ;;  %v5340_v33 = vadd.f32 %v5282_v42, %v14141_v10  ;;  %v6333_v19 = vld [vmem:[#allocation3 + $0x78] sm:$0xff]  ;;  %v6458_v62 = vld [vmem:[#allocation4 + $0x60] sm:$0xff] }
 0x46e   :  { %v8609_v46 = vpop.eup %8608  ;;  %v6897_v9 = vadd.f32 %v6837_v20, %v6641_v15  ;;  %v6712_v56 = vsub.f32 0.0, %v6680_v22  ;;  %v6535_v34 = vmul.f32 0.6931472, %v8607_v48  ;;  %8626 = vlog2.f32 %v6492_v25  ;;  %v5285_v57 = vpop.xlane.xlu0 %5284  ;;  %v6334_v55 = vld [vmem:[#allocation3 + $0x80] sm:$0xff] }
 0x46f   :  { %v8611_v28 = vpop.eup %8610  ;;  %v6839_v14 = vmul.f32 0.6931472, %v8609_v46  ;;  %v13034_v50 = vadd.f32 %v6585_v30, %v6425_v38  ;;  %8628 = vlog2.f32 %v6493_v36  ;;  %5373 = vst.msk [vmem:[#allocation3 + $0x90] sm:$0xff] %vm21_vm14, %v5340_v33  ;;  %v5341_v27 = vadd.f32 %v5285_v57, %v12829_v26  ;;  %v14142_v47 = vld [vmem:[#allocation22_spill] sm:$0xff] }
 0x470   :  { %v8613_v42 = vpop.eup %8612  ;;  %6929 = vst.msk [vmem:[%s13311_s4 + $0x18] sm:$0xff] %vm21_vm14, %v6897_v9  ;;  %v6805_v49 = vadd.f32 1.0, %v8611_v28  ;;  %v6754_v15 = vmul.f32 1.442695, %v6712_v56  ;;  %8630 = vlog2.f32 %v6332_v32  ;;  %v13043_v3 = vmul.f32 %v12941_v2, %v5608_v43  ;;  %v5288_v26 = vpop.xlane.xlu1 %5287  ;;  %v6298_v32 = vld [vmem:[#allocation2 + $0x60] sm:$0xff]  ;;  %v6299_v43 = vld [vmem:[#allocation2 + $0x68] sm:$0xff] }
 0x471   :  { %v6898_v13 = vadd.f32 %v6839_v14, %v6642_v60  ;;  %v6643_v16 = vmax.f32 %v12950_v59, 0.0  ;;  %v6681_v53 = vand.u32 2147483647, %v13034_v50  ;;  %v6537_v17 = vmul.f32 0.6931472, %v8613_v42  ;;  %5374 = vst.msk [vmem:[#allocation3 + $0x98] sm:$0xff] %vm21_vm14, %v5341_v27 }
 0x472   :  { %v8615_v21 = vpop.eup %8614  ;;  %v6644_v25 = vmax.f32 %v12964_v44, 0.0  ;;  %8632 = vlog2.f32 %v6805_v49  ;;  %v6205_v20 = vadd.f32 %v6147_v24, %v14142_v47  ;;  %v6150_v2 = vpop.xlane.xlu0 %6149  ;;  %v5342_v60 = vadd.f32 %v5288_v26, %v12840_v52  ;;  %v6459_v59 = vld [vmem:[#allocation4 + $0x68] sm:$0xff]  ;;  %v5609_v49 = vld [vmem:[#allocation5 + $0xf0] sm:$0xff] }
 0x473   :  { %v8617_v22 = vpop.eup %8616  ;;  %6930 = vst.msk [vmem:[%s13311_s4 + $0x20] sm:$0xff] %vm21_vm14, %v6898_v13  ;;  %8634 = vpow2.f32 %v6754_v15  ;;  %v6713_v36 = vsub.f32 0.0, %v6681_v53  ;;  %v6586_v48 = vadd.f32 %v6535_v34, %v6458_v62  ;;  %v6375_v30 = vmul.f32 0.6931472, %v8615_v21  ;;  %v6335_v38 = vld [vmem:[#allocation3 + $0x88] sm:$0xff]  ;;  %v6494_v62 = vld [vmem:[#allocation5 + $0x80] sm:$0xff] }
 0x474   :  { %v8619_v44 = vpop.eup %8618  ;;  %v6587_v10 = vadd.f32 %v6537_v17, %v6459_v59  ;;  %v6377_v33 = vmul.f32 0.6931472, %v8617_v22  ;;  %8636 = vlog2.f32 %v6333_v19  ;;  %6237 = vst.msk [vmem:[#allocation5 + $0x90] sm:$0xff] %vm21_vm14, %v6205_v20  ;;  %v6206_v52 = vadd.f32 %v6150_v2, %v12837_v29  ;;  %5375 = vst.msk [vmem:[#allocation3 + $0xa0] sm:$0xff] %vm21_vm14, %v5342_v60  ;;  %v6153_v34 = vpop.xlane.xlu1 %6152  ;;  %v4745_v17 = vld [vmem:[#allocation3 + $0xf8] sm:$0xff]  ;;  %v6495_v2 = vld [vmem:[#allocation5 + $0x88] sm:$0xff] }
 0x475   :  { %v8621_v24 = vpop.eup %8620  ;;  %v6841_v46 = vmul.f32 0.6931472, %v8619_v44  ;;  %v6756_v9 = vmul.f32 1.442695, %v6713_v36  ;;  %v6426_v56 = vadd.f32 %v6375_v30, %v6298_v32  ;;  %8638 = vlog2.f32 %v6334_v55  ;;  %v6460_v36 = vld [vmem:[#allocation4 + $0x70] sm:$0xff] }
 0x476   :  { %v8623_v57 = vpop.eup %8622  ;;  %v6806_v28 = vadd.f32 1.0, %v8621_v24  ;;  %v6427_v14 = vadd.f32 %v6377_v33, %v6299_v43  ;;  %8640 = vlog2.f32 %v6335_v38  ;;  %6238 = vst.msk [vmem:[#allocation5 + $0x98] sm:$0xff] %vm21_vm14, %v6206_v52  ;;  %v5291_v27 = vpop.xlane.xlu0 %5290  ;;  %v6207_v42 = vadd.f32 %v6153_v34, %v12849_v6  ;;  %v6336_v30 = vld [vmem:[#allocation3 + $0x90] sm:$0xff] }
 0x477   :  { %v8625_v29 = vpop.eup %8624  ;;  %v6899_v15 = vadd.f32 %v6841_v46, %v6643_v16  ;;  %v6843_v13 = vmul.f32 0.6931472, %v8623_v57  ;;  %8642 = vpow2.f32 %v6756_v9  ;;  %v13060_v53 = vadd.f32 %v6586_v48, %v6426_v56  ;;  %v6300_v33 = vld [vmem:[#allocation2 + $0x70] sm:$0xff] }
 0x478   :  { %v8627_v19 = vpop.eup %8626  ;;  %8644 = vlog2.f32 %v6806_v28  ;;  %v6807_v26 = vadd.f32 1.0, %v8625_v29  ;;  %v13062_v21 = vadd.f32 %v6587_v10, %v6427_v14  ;;  %v5343_v55 = vadd.f32 %v5291_v27, %v12846_v35  ;;  %6239 = vst.msk [vmem:[#allocation5 + $0xa0] sm:$0xff] %vm21_vm14, %v6207_v42  ;;  %v5294_v60 = vpop.xlane.xlu1 %5293 }
 0x479   :  { %v8629_v47 = vpop.eup %8628  ;;  %6931 = vst.msk [vmem:[%s13311_s4 + $0x28] sm:$0xff] %vm21_vm14, %v6899_v15  ;;  %v6900_v6 = vadd.f32 %v6843_v13, %v6644_v25  ;;  %v6682_v16 = vand.u32 2147483647, %v13060_v53  ;;  %v6539_v20 = vmul.f32 0.6931472, %v8627_v19  ;;  %v13072_v22 = vmul.f32 %v12954_v45, %v5609_v49  ;;  %v6461_v19 = vld [vmem:[#allocation4 + $0x78] sm:$0xff] }
 0x47a   :  { %v8631_v59 = vpop.eup %8630  ;;  %v6645_v35 = vmax.f32 %v12978_v11, 0.0  ;;  %8646 = vlog2.f32 %v6807_v26  ;;  %v6683_v48 = vand.u32 2147483647, %v13062_v21  ;;  %5376 = vst.msk [vmem:[#allocation3 + $0xa8] sm:$0xff] %vm21_vm14, %v5343_v55  ;;  %v6156_v38 = vpop.xlane.xlu0 %6155  ;;  %v13078_v25 = vmul.f32 %v12974_v1, %v4745_v17  ;;  %v6337_v11 = vld [vmem:[#allocation3 + $0x98] sm:$0xff] }
 0x47b   :  { %6932 = vst.msk [vmem:[%s13311_s4 + $0x30] sm:$0xff] %vm21_vm14, %v6900_v6  ;;  %v6714_v45 = vsub.f32 0.0, %v6682_v16  ;;  %v6541_v44 = vmul.f32 0.6931472, %v8629_v47  ;;  %v6379_v32 = vmul.f32 0.6931472, %v8631_v59  ;;  %8648 = vlog2.f32 %v6494_v62 }
 0x47c   :  { %v8633_v10 = vpop.eup %8632  ;;  %v6715_v52 = vsub.f32 0.0, %v6683_v48  ;;  %v6588_v24 = vadd.f32 %v6539_v20, %v6460_v36  ;;  %8650 = vlog2.f32 %v6495_v2  ;;  %v6208_v43 = vadd.f32 %v6156_v38, %v12861_v4  ;;  %v6159_v34 = vpop.xlane.xlu1 %6158  ;;  %v6496_v13 = vld [vmem:[#allocation5 + $0x90] sm:$0xff]  ;;  %v6301_v26 = vld [vmem:[#allocation2 + $0x78] sm:$0xff]  ;;  %v6302_v48 = vld [vmem:[#allocation2 + $0x80] sm:$0xff] }
 0x47d   :  { %v8635_v46 = vpop.eup %8634  ;;  %v6845_v1 = vmul.f32 0.6931472, %v8633_v10  ;;  %v6758_v9 = vmul.f32 1.442695, %v6714_v45  ;;  %v6428_v56 = vadd.f32 %v6379_v32, %v6300_v33  ;;  %8652 = vlog2.f32 %v6336_v30  ;;  %v6497_v55 = vld [vmem:[#allocation5 + $0x98] sm:$0xff]  ;;  %v14143_v10 = vld [vmem:[#allocation7_spill] sm:$0xff] }
 0x47e   :  { %v8637_v57 = vpop.eup %8636  ;;  %v6808_v28 = vadd.f32 1.0, %v8635_v46  ;;  %v6760_v14 = vmul.f32 1.442695, %v6715_v52  ;;  %8654 = vlog2.f32 %v6337_v11  ;;  %6240 = vst.msk [vmem:[#allocation5 + $0xa8] sm:$0xff] %vm21_vm14, %v6208_v43  ;;  %v5344_v27 = vadd.f32 %v5294_v60, %v12852_v7  ;;  %v5297_v42 = vpop.xlane.xlu0 %5296 }
 0x47f   :  { %v8639_v49 = vpop.eup %8638  ;;  %v6901_v29 = vadd.f32 %v6845_v1, %v6645_v35  ;;  %8656 = vpow2.f32 %v6758_v9  ;;  %v13087_v15 = vadd.f32 %v6588_v24, %v6428_v56  ;;  %v6381_v4 = vmul.f32 0.6931472, %v8637_v57 }
 0x480   :  { %v8641_v17 = vpop.eup %8640  ;;  %8658 = vlog2.f32 %v6808_v28  ;;  %v6383_v62 = vmul.f32 0.6931472, %v8639_v49  ;;  %5377 = vst.msk [vmem:[#allocation3 + $0xb0] sm:$0xff] %vm21_vm14, %v5344_v27  ;;  %v5345_v47 = vadd.f32 %v5297_v42, %v12873_v31  ;;  %v6209_v7 = vadd.f32 %v6159_v34, %v12867_v18  ;;  %v5300_v60 = vpop.xlane.xlu1 %5299  ;;  %v6498_v28 = vld [vmem:[#allocation5 + $0xa0] sm:$0xff] }
 0x481   :  { %v8643_v6 = vpop.eup %8642  ;;  %6933 = vst.msk [vmem:[%s13311_s4 + $0x38] sm:$0xff] %vm21_vm14, %v6901_v29  ;;  %8660 = vpow2.f32 %v6760_v14  ;;  %v6589_v16 = vadd.f32 %v6541_v44, %v6461_v19  ;;  %v6684_v20 = vand.u32 2147483647, %v13087_v15  ;;  %v6429_v2 = vadd.f32 %v6381_v4, %v6301_v26  ;;  %v6338_v44 = vld [vmem:[#allocation3 + $0xa0] sm:$0xff]  ;;  %v6463_v19 = vld [vmem:[#allocation4 + $0x88] sm:$0xff] }
 0x482   :  { %v8645_v59 = vpop.eup %8644  ;;  %v6646_v36 = vmax.f32 %v12997_v39, 0.0  ;;  %v6647_v35 = vmax.f32 %v13006_v5, 0.0  ;;  %v6809_v31 = vadd.f32 1.0, %v8643_v6  ;;  %8662 = vlog2.f32 %v6496_v13  ;;  %5378 = vst.msk [vmem:[#allocation3 + $0xb8] sm:$0xff] %vm21_vm14, %v5345_v47  ;;  %6241 = vst.msk [vmem:[#allocation5 + $0xb0] sm:$0xff] %vm21_vm14, %v6209_v7  ;;  %v6162_v18 = vpop.xlane.xlu0 %6161  ;;  %v6339_v39 = vld [vmem:[#allocation3 + $0xa8] sm:$0xff] }
 0x483   :  { %v6847_v30 = vmul.f32 0.6931472, %v8645_v59  ;;  %v6716_v38 = vsub.f32 0.0, %v6684_v20  ;;  %v13101_v45 = vadd.f32 %v6589_v16, %v6429_v2  ;;  %8664 = vlog2.f32 %v6497_v55  ;;  %v6462_v42 = vld [vmem:[#allocation4 + $0x80] sm:$0xff] }
 0x484   :  { %v8647_v32 = vpop.eup %8646  ;;  %8666 = vlog2.f32 %v6809_v31  ;;  %v6430_v11 = vadd.f32 %v6383_v62, %v6302_v48  ;;  %v6210_v5 = vadd.f32 %v6162_v18, %v12887_v40  ;;  %v5346_v33 = vadd.f32 %v5300_v60, %v14143_v10  ;;  %v6165_v9 = vpop.xlane.xlu1 %6164  ;;  %v6304_v31 = vld [vmem:[#allocation2 + $0x90] sm:$0xff] }
 0x485   :  { %v8649_v52 = vpop.eup %8648  ;;  %v6902_v24 = vadd.f32 %v6847_v30, %v6646_v36  ;;  %v6849_v43 = vmul.f32 0.6931472, %v8647_v32  ;;  %v6762_v46 = vmul.f32 1.442695, %v6716_v38  ;;  %v6385_v1 = vmul.f32 0.6931472, %v8641_v17 }
 0x486   :  { %v8651_v56 = vpop.eup %8650  ;;  %v6685_v34 = vand.u32 2147483647, %v13101_v45  ;;  %v6543_v57 = vmul.f32 0.6931472, %v8649_v52  ;;  %8668 = vlog2.f32 %v6338_v44  ;;  %6242 = vst.msk [vmem:[#allocation5 + $0xb8] sm:$0xff] %vm21_vm14, %v6210_v5  ;;  %5379 = vst.msk [vmem:[#allocation3 + $0xc0] sm:$0xff] %vm21_vm14, %v5346_v33  ;;  %v5303_v14 = vpop.xlane.xlu0 %5302  ;;  %v6211_v40 = vadd.f32 %v6165_v9, %v12890_v0 }
 0x487   :  { %v8653_v27 = vpop.eup %8652  ;;  %6934 = vst.msk [vmem:[%s13311_s4 + $0x40] sm:$0xff] %vm21_vm14, %v6902_v24  ;;  %v6903_v49 = vadd.f32 %v6849_v43, %v6647_v35  ;;  %8670 = vpow2.f32 %v6762_v46  ;;  %v6545_v29 = vmul.f32 0.6931472, %v8651_v56  ;;  %v5347_v4 = vadd.f32 %v5303_v14, %v12896_v63  ;;  %v6303_v17 = vld [vmem:[#allocation2 + $0x88] sm:$0xff]  ;;  %v6305_v44 = vld [vmem:[#allocation2 + $0x98] sm:$0xff]  ;;  %v6340_v5 = vld [vmem:[#allocation3 + $0xb0] sm:$0xff] }
 0x488   :  { %v8655_v13 = vpop.eup %8654  ;;  %v6717_v26 = vsub.f32 0.0, %v6685_v34  ;;  %v6590_v62 = vadd.f32 %v6543_v57, %v6462_v42  ;;  %v6387_v55 = vmul.f32 0.6931472, %v8653_v27  ;;  %8672 = vlog2.f32 %v6339_v39  ;;  %v6499_v0 = vld [vmem:[#allocation5 + $0xa8] sm:$0xff]  ;;  %6243 = vst.msk [vmem:[#allocation5 + $0xc0] sm:$0xff] %vm21_vm14, %v6211_v40  ;;  %v5306_v43 = vpop.xlane.xlu1 %5305  ;;  %v6464_v57 = vld [vmem:[#allocation4 + $0x90] sm:$0xff] }
 0x489   :  { %v8657_v47 = vpop.eup %8656  ;;  %6935 = vst.msk [vmem:[%s13311_s4 + $0x48] sm:$0xff] %vm21_vm14, %v6903_v49  ;;  %v6431_v7 = vadd.f32 %v6385_v1, %v6303_v17  ;;  %v6591_v6 = vadd.f32 %v6545_v29, %v6463_v19  ;;  %v6389_v16 = vmul.f32 0.6931472, %v8655_v13  ;;  %8674 = vlog2.f32 %v6498_v28  ;;  %5380 = vst.msk [vmem:[#allocation3 + $0xc8] sm:$0xff] %vm21_vm14, %v5347_v4  ;;  %v6341_v24 = vld [vmem:[#allocation3 + $0xb8] sm:$0xff]  ;;  %v6500_v56 = vld [vmem:[#allocation5 + $0xb0] sm:$0xff] }
 0x48a   :  { %v8659_v63 = vpop.eup %8658  ;;  %v6648_v20 = vmax.f32 %v13018_v12, 0.0  ;;  %v6810_v2 = vadd.f32 1.0, %v8657_v47  ;;  %v6764_v60 = vmul.f32 1.442695, %v6717_v26  ;;  %v13121_v59 = vadd.f32 %v6590_v62, %v6430_v11  ;;  %v6168_v36 = vpop.xlane.xlu0 %6167  ;;  %v6465_v28 = vld [vmem:[#allocation4 + $0x98] sm:$0xff] }
 0x48b   :  { %v8661_v35 = vpop.eup %8660  ;;  %v6851_v18 = vmul.f32 0.6931472, %v8659_v63  ;;  %v6649_v48 = vmax.f32 %v13034_v50, 0.0  ;;  %v13124_v30 = vadd.f32 %v6591_v6, %v6431_v7  ;;  %8676 = vlog2.f32 %v6499_v0  ;;  %v14144_v27 = vld [vmem:[#allocation25_spill] sm:$0xff]  ;;  %v6306_v63 = vld [vmem:[#allocation2 + $0xa0] sm:$0xff] }
 0x48c   :  { %v8663_v38 = vpop.eup %8662  ;;  %8678 = vlog2.f32 %v6810_v2  ;;  %v6811_v32 = vadd.f32 1.0, %v8661_v35  ;;  %v6686_v39 = vand.u32 2147483647, %v13121_v59  ;;  %v6432_v12 = vadd.f32 %v6387_v55, %v6304_v31  ;;  %v6171_v31 = vpop.xlane.xlu1 %6170 }
 0x48d   :  { %v8665_v10 = vpop.eup %8664  ;;  %v6904_v11 = vadd.f32 %v6851_v18, %v6648_v20  ;;  %8680 = vpow2.f32 %v6764_v60  ;;  %v6687_v33 = vand.u32 2147483647, %v13124_v30  ;;  %v6433_v52 = vadd.f32 %v6389_v16, %v6305_v44  ;;  %v6501_v6 = vld [vmem:[#allocation5 + $0xb8] sm:$0xff]  ;;  %v6342_v60 = vld [vmem:[#allocation3 + $0xc0] sm:$0xff] }
 0x48e   :  { %v8667_v50 = vpop.eup %8666  ;;  %8682 = vlog2.f32 %v6811_v32  ;;  %v6718_v46 = vsub.f32 0.0, %v6686_v39  ;;  %v6547_v1 = vmul.f32 0.6931472, %v8663_v38  ;;  %v6549_v9 = vmul.f32 0.6931472, %v8665_v10  ;;  %v5309_v34 = vpop.xlane.xlu0 %5308 }
 0x48f   :  { %6936 = vst.msk [vmem:[%s13311_s4 + $0x50] sm:$0xff] %vm21_vm14, %v6904_v11  ;;  %v6853_v14 = vmul.f32 0.6931472, %v8667_v50  ;;  %v6719_v40 = vsub.f32 0.0, %v6687_v33  ;;  %8684 = vlog2.f32 %v6340_v5  ;;  %v6212_v42 = vadd.f32 %v6168_v36, %v14144_v27  ;;  %v14145_v36 = vld [vmem:[#allocation28_spill] sm:$0xff]  ;;  %v6502_v11 = vld [vmem:[#allocation5 + $0xc0] sm:$0xff] }
 0x490   :  { %v8669_v49 = vpop.eup %8668  ;;  %v6766_v29 = vmul.f32 1.442695, %v6718_v46  ;;  %v6592_v4 = vadd.f32 %v6547_v1, %v6464_v57  ;;  %v6593_v13 = vadd.f32 %v6549_v9, %v6465_v28  ;;  %8686 = vlog2.f32 %v6341_v24  ;;  %v6343_v39 = vld [vmem:[#allocation3 + $0xc8] sm:$0xff]  ;;  %v5610_v57 = vld [vmem:[#allocation5 + $0xf8] sm:$0xff] }
 0x491   :  { %v8671_v17 = vpop.eup %8670  ;;  %v6905_v19 = vadd.f32 %v6853_v14, %v6649_v48  ;;  %v6768_v26 = vmul.f32 1.442695, %v6719_v40  ;;  %v6391_v62 = vmul.f32 0.6931472, %v8669_v49  ;;  %8688 = vlog2.f32 %v6500_v56  ;;  %6244 = vst.msk [vmem:[#allocation5 + $0xc8] sm:$0xff] %vm21_vm14, %v6212_v42  ;;  %v6307_v48 = vld [vmem:[#allocation2 + $0xa8] sm:$0xff] }
 0x492   :  { %v8673_v55 = vpop.eup %8672  ;;  %v6812_v0 = vadd.f32 1.0, %v8671_v17  ;;  %8690 = vpow2.f32 %v6766_v29  ;;  %v13134_v47 = vadd.f32 %v6592_v4, %v6432_v12  ;;  %v13136_v7 = vadd.f32 %v6593_v13, %v6433_v52  ;;  %v13144_v18 = vpop.xlane.xlu0 %6173  ;;  %v6466_v52 = vld [vmem:[#allocation4 + $0xa0] sm:$0xff]  ;;  %v6467_v46 = vld [vmem:[#allocation4 + $0xa8] sm:$0xff] }
 0x493   :  { %v8675_v16 = vpop.eup %8674  ;;  %6937 = vst.msk [vmem:[%s13311_s4 + $0x58] sm:$0xff] %vm21_vm14, %v6905_v19  ;;  %v6650_v20 = vmax.f32 %v13060_v53, 0.0  ;;  %8692 = vpow2.f32 %v6768_v26  ;;  %v6393_v2 = vmul.f32 0.6931472, %v8673_v55  ;;  %v5348_v35 = vadd.f32 %v5306_v43, %v14145_v36 }
 0x494   :  { %v6651_v38 = vmax.f32 %v13062_v21, 0.0  ;;  %8694 = vlog2.f32 %v6812_v0  ;;  %v6688_v44 = vand.u32 2147483647, %v13134_v47  ;;  %v6434_v32 = vadd.f32 %v6391_v62, %v6306_v63 }
 0x495   :  { %v8677_v12 = vpop.eup %8676  ;;  %v6689_v5 = vand.u32 2147483647, %v13136_v7  ;;  %v6435_v53 = vadd.f32 %v6393_v2, %v6307_v48  ;;  %v6551_v10 = vmul.f32 0.6931472, %v8675_v16  ;;  %8696 = vlog2.f32 %v6501_v6  ;;  %5381 = vst.msk [vmem:[#allocation3 + $0xd0] sm:$0xff] %vm21_vm14, %v5348_v35 }
 0x496   :  { %v8679_v33 = vpop.eup %8678  ;;  %v6720_v24 = vsub.f32 0.0, %v6688_v44  ;;  %v6553_v43 = vmul.f32 0.6931472, %v8677_v12  ;;  %8698 = vlog2.f32 %v6342_v60  ;;  %v5349_v21 = vadd.f32 %v5309_v34, %v12932_v41  ;;  %v5312_v41 = vpop.xlane.xlu1 %5311  ;;  %v6308_v44 = vld [vmem:[#allocation2 + $0xb0] sm:$0xff] }
 0x497   :  { %v8681_v50 = vpop.eup %8680  ;;  %v6855_v1 = vmul.f32 0.6931472, %v8679_v33  ;;  %v6721_v9 = vsub.f32 0.0, %v6689_v5  ;;  %v6594_v56 = vadd.f32 %v6551_v10, %v6466_v52  ;;  %8700 = vlog2.f32 %v6343_v39  ;;  %v13154_v34 = vpop.xlane.xlu0 %5314  ;;  %v6468_v5 = vld [vmem:[#allocation4 + $0xb0] sm:$0xff] }
 0x498   :  { %v8683_v28 = vpop.eup %8682  ;;  %v6813_v14 = vadd.f32 1.0, %v8681_v50  ;;  %v6770_v40 = vmul.f32 1.442695, %v6720_v24  ;;  %v6595_v27 = vadd.f32 %v6553_v43, %v6467_v46  ;;  %8702 = vlog2.f32 %v6502_v11  ;;  %5382 = vst.msk [vmem:[#allocation3 + $0xd8] sm:$0xff] %vm21_vm14, %v5349_v21  ;;  %v6503_v63 = vld [vmem:[#allocation5 + $0xc8] sm:$0xff] }
 0x499   :  { %v8685_v42 = vpop.eup %8684  ;;  %v6906_v49 = vadd.f32 %v6855_v1, %v6650_v20  ;;  %v6857_v29 = vmul.f32 0.6931472, %v8683_v28  ;;  %v6772_v4 = vmul.f32 1.442695, %v6721_v9  ;;  %v13152_v13 = vadd.f32 %v6594_v56, %v6434_v32  ;;  %v6309_v9 = vld [vmem:[#allocation2 + $0xb8] sm:$0xff] }
 0x49a   :  { %v8687_v17 = vpop.eup %8686  ;;  %8704 = vlog2.f32 %v6813_v14  ;;  %v13156_v19 = vadd.f32 %v6595_v27, %v6435_v53  ;;  %v6213_v26 = vadd.f32 %v6171_v31, %v12935_v61  ;;  %v13160_v62 = vmul.f32 %v13011_v37, %v5610_v57  ;;  %v6177_v33 = vpop.xlane.xlu1 %6176  ;;  %v6469_v56 = vld [vmem:[#allocation4 + $0xb8] sm:$0xff] }
 0x49b   :  { %v8689_v55 = vpop.eup %8688  ;;  %6938 = vst.msk [vmem:[%s13311_s4 + $0x60] sm:$0xff] %vm21_vm14, %v6906_v49  ;;  %v6907_v0 = vadd.f32 %v6857_v29, %v6651_v38  ;;  %8706 = vpow2.f32 %v6770_v40  ;;  %v6690_v6 = vand.u32 2147483647, %v13152_v13  ;;  %v6395_v16 = vmul.f32 0.6931472, %v8685_v42  ;;  %v6180_v52 = vpop.xlane.xlu0 %6179  ;;  %v6310_v42 = vld [vmem:[#allocation2 + $0xc0] sm:$0xff] }
 0x49c   :  { %v8691_v20 = vpop.eup %8690  ;;  %v6652_v2 = vmax.f32 %v13087_v15, 0.0  ;;  %v6653_v61 = vmax.f32 %v13101_v45, 0.0  ;;  %8708 = vpow2.f32 %v6772_v4  ;;  %v6691_v37 = vand.u32 2147483647, %v13156_v19  ;;  %6245 = vst.msk [vmem:[#allocation5 + $0xd0] sm:$0xff] %vm21_vm14, %v6213_v26  ;;  %v6344_v46 = vld [vmem:[#allocation3 + $0xd0] sm:$0xff] }
 0x49d   :  { %v8693_v60 = vpop.eup %8692  ;;  %6939 = vst.msk [vmem:[%s13311_s4 + $0x68] sm:$0xff] %vm21_vm14, %v6907_v0  ;;  %v6814_v36 = vadd.f32 1.0, %v8691_v20  ;;  %v6722_v35 = vsub.f32 0.0, %v6690_v6  ;;  %v6397_v31 = vmul.f32 0.6931472, %v8687_v17  ;;  %8710 = vlog2.f32 %v6503_v63  ;;  %v6470_v49 = vld [vmem:[#allocation4 + $0xc0] sm:$0xff] }
 0x49e   :  { %v6555_v48 = vmul.f32 0.6931472, %v8689_v55  ;;  %v8695_v38 = vpop.eup %8694  ;;  %v6815_v15 = vadd.f32 1.0, %v8693_v60  ;;  %v6723_v32 = vsub.f32 0.0, %v6691_v37  ;;  %v6214_v39 = vadd.f32 %v13144_v18, %v12959_v58  ;;  %v5318_v60 = vpop.xlane.xlu1 %5317 }
 0x49f   :  { %v8697_v12 = vpop.eup %8696  ;;  %v6859_v53 = vmul.f32 0.6931472, %v8695_v38  ;;  %8712 = vlog2.f32 %v6814_v36  ;;  %v6774_v10 = vmul.f32 1.442695, %v6722_v35  ;;  %v6436_v11 = vadd.f32 %v6395_v16, %v6308_v44  ;;  %v6345_v17 = vld [vmem:[#allocation3 + $0xd8] sm:$0xff]  ;;  %v5321_v36 = vpop.xlane.xlu0 %5320 }
 0x4a0   :  { %v8699_v24 = vpop.eup %8698  ;;  %8714 = vlog2.f32 %v6815_v15  ;;  %v6776_v43 = vmul.f32 1.442695, %v6723_v32  ;;  %v6596_v21 = vadd.f32 %v6555_v48, %v6468_v5  ;;  %v6557_v50 = vmul.f32 0.6931472, %v8697_v12  ;;  %6246 = vst.msk [vmem:[#allocation5 + $0xd8] sm:$0xff] %vm21_vm14, %v6214_v39  ;;  %v6311_v15 = vld [vmem:[#allocation2 + $0xc8] sm:$0xff] }
 0x4a1   :  { %v8701_v1 = vpop.eup %8700  ;;  %v6908_v58 = vadd.f32 %v6859_v53, %v6652_v2  ;;  %8716 = vpow2.f32 %v6774_v10  ;;  %v6399_v18 = vmul.f32 0.6931472, %v8699_v24  ;;  %v5350_v57 = vadd.f32 %v5312_v41, %v12948_v23 }
 0x4a2   :  { %v8703_v28 = vpop.eup %8702  ;;  %8718 = vpow2.f32 %v6776_v43  ;;  %v6437_v14 = vadd.f32 %v6397_v31, %v6309_v9  ;;  %v13179_v40 = vadd.f32 %v6596_v21, %v6436_v11  ;;  %v6597_v27 = vadd.f32 %v6557_v50, %v6469_v56  ;;  %v6471_v11 = vld [vmem:[#allocation4 + $0xc8] sm:$0xff] }
 0x4a3   :  { %6940 = vst.msk [vmem:[%s13311_s4 + $0x70] sm:$0xff] %vm21_vm14, %v6908_v58  ;;  %v6654_v29 = vmax.f32 %v13121_v59, 0.0  ;;  %v6559_v4 = vmul.f32 0.6931472, %v8703_v28  ;;  %8720 = vlog2.f32 %v6344_v46  ;;  %5383 = vst.msk [vmem:[#allocation3 + $0xe0] sm:$0xff] %vm21_vm14, %v5350_v57  ;;  %v5351_v23 = vadd.f32 %v13154_v34, %v12983_v54  ;;  %v6504_v16 = vld [vmem:[#allocation5 + $0xd0] sm:$0xff]  ;;  %v6183_v46 = vpop.xlane.xlu1 %6182 }
 0x4a4   :  { %v8705_v41 = vpop.eup %8704  ;;  %v6655_v26 = vmax.f32 %v13124_v30, 0.0  ;;  %v6692_v55 = vand.u32 2147483647, %v13179_v40  ;;  %v13191_v0 = vadd.f32 %v6597_v27, %v6437_v14  ;;  %v6401_v6 = vmul.f32 0.6931472, %v8701_v1  ;;  %v6186_v1 = vpop.xlane.xlu0 %6185 }
 0x4a5   :  { %v8707_v63 = vpop.eup %8706  ;;  %v6861_v20 = vmul.f32 0.6931472, %v8705_v41  ;;  %v6438_v59 = vadd.f32 %v6399_v18, %v6310_v42  ;;  %v6598_v2 = vadd.f32 %v6559_v4, %v6470_v49  ;;  %5384 = vst.msk [vmem:[#allocation3 + $0xe8] sm:$0xff] %vm21_vm14, %v5351_v23  ;;  %v6215_v37 = vadd.f32 %v6177_v33, %v12962_v51 }
 0x4a6   :  { %v8709_v54 = vpop.eup %8708  ;;  %v6816_v34 = vadd.f32 1.0, %v8707_v63  ;;  %v6724_v35 = vsub.f32 0.0, %v6692_v55  ;;  %v6693_v30 = vand.u32 2147483647, %v13191_v0  ;;  %8722 = vlog2.f32 %v6345_v17 }
 0x4a7   :  { %v6909_v31 = vadd.f32 %v6861_v20, %v6653_v61  ;;  %v6817_v48 = vadd.f32 1.0, %v8709_v54  ;;  %v13198_v38 = vadd.f32 %v6598_v2, %v6438_v59  ;;  %8724 = vlog2.f32 %v6504_v16  ;;  %6247 = vst.msk [vmem:[#allocation5 + $0xe0] sm:$0xff] %vm21_vm14, %v6215_v37  ;;  %v8711_v44 = vpop.eup %8710  ;;  %v6505_v39 = vld [vmem:[#allocation5 + $0xd8] sm:$0xff]  ;;  %v6472_v2 = vld [vmem:[#allocation4 + $0xd0] sm:$0xff] }
 0x4a8   :  { %8726 = vlog2.f32 %v6816_v34  ;;  %v6778_v51 = vmul.f32 1.442695, %v6724_v35  ;;  %v6725_v32 = vsub.f32 0.0, %v6693_v30  ;;  %v6216_v12 = vadd.f32 %v6180_v52, %v13043_v3 }
 0x4a9   :  { %v8713_v5 = vpop.eup %8712  ;;  %6941 = vst.msk [vmem:[%s13311_s4 + $0x78] sm:$0xff] %vm21_vm14, %v6909_v31  ;;  %8728 = vlog2.f32 %v6817_v48  ;;  %v6439_v45 = vadd.f32 %v6401_v6, %v6311_v15  ;;  %v6694_v61 = vand.u32 2147483647, %v13198_v38  ;;  %v6561_v53 = vmul.f32 0.6931472, %v8711_v44  ;;  %v6312_v6 = vld [vmem:[#allocation2 + $0xd0] sm:$0xff] }
 0x4aa   :  { %v8715_v10 = vpop.eup %8714  ;;  %v6863_v33 = vmul.f32 0.6931472, %v8713_v5  ;;  %8730 = vpow2.f32 %v6778_v51  ;;  %v6780_v24 = vmul.f32 1.442695, %v6725_v32  ;;  %6248 = vst.msk [vmem:[#allocation5 + $0xe8] sm:$0xff] %vm21_vm14, %v6216_v12  ;;  %v5352_v3 = vadd.f32 %v5318_v60, %v12995_v8  ;;  %v6346_v42 = vld [vmem:[#allocation3 + $0xe0] sm:$0xff] }
 0x4ab   :  { %v8717_v52 = vpop.eup %8716  ;;  %v6865_v43 = vmul.f32 0.6931472, %v8715_v10  ;;  %v6726_v21 = vsub.f32 0.0, %v6694_v61  ;;  %v6599_v50 = vadd.f32 %v6561_v53, %v6471_v11  ;;  %8732 = vlog2.f32 %v6505_v39  ;;  %v6313_v12 = vld [vmem:[#allocation2 + $0xd8] sm:$0xff] }
 0x4ac   :  { %v8719_v9 = vpop.eup %8718  ;;  %v6910_v56 = vadd.f32 %v6863_v33, %v6654_v29  ;;  %v6818_v58 = vadd.f32 1.0, %v8717_v52  ;;  %8734 = vpow2.f32 %v6780_v24  ;;  %5385 = vst.msk [vmem:[#allocation3 + $0xf0] sm:$0xff] %vm21_vm14, %v5352_v3  ;;  %v5353_v18 = vadd.f32 %v5321_v36, %v13078_v25  ;;  %v6347_v17 = vld [vmem:[#allocation3 + $0xe8] sm:$0xff]  ;;  %v6473_v5 = vld [vmem:[#allocation4 + $0xd8] sm:$0xff] }
 0x4ad   :  { %v8721_v57 = vpop.eup %8720  ;;  %v6911_v28 = vadd.f32 %v6865_v43, %v6655_v26  ;;  %v6819_v14 = vadd.f32 1.0, %v8719_v9  ;;  %v6782_v27 = vmul.f32 1.442695, %v6726_v21  ;;  %v13211_v8 = vadd.f32 %v6599_v50, %v6439_v45 }
 0x4ae   :  { %6942 = vst.msk [vmem:[%s13311_s4 + $0x80] sm:$0xff] %vm21_vm14, %v6910_v56  ;;  %8736 = vlog2.f32 %v6818_v58  ;;  %5386 = vst.msk [vmem:[#allocation3 + $0xf8] sm:$0xff] %vm21_vm14, %v5353_v18  ;;  %v6217_v49 = vadd.f32 %v6183_v46, %v13072_v22  ;;  %v6218_v29 = vadd.f32 %v6186_v1, %v13160_v62  ;;  %v6403_v4 = vmul.f32 0.6931472, %v8721_v57  ;;  %v6506_v41 = vld [vmem:[#allocation5 + $0xe0] sm:$0xff] }
 0x4af   :  { %6943 = vst.msk [vmem:[%s13311_s4 + $0x88] sm:$0xff] %vm21_vm14, %v6911_v28  ;;  %8738 = vlog2.f32 %v6819_v14  ;;  %v6695_v25 = vand.u32 2147483647, %v13211_v8  ;;  %v6656_v16 = vmax.f32 %v13134_v47, 0.0  ;;  %v6657_v63 = vmax.f32 %v13136_v7, 0.0 }
 0x4b0   :  { %v8723_v23 = vpop.eup %8722  ;;  %8740 = vpow2.f32 %v6782_v27  ;;  %6249 = vst.msk [vmem:[#allocation5 + $0xf0] sm:$0xff] %vm21_vm14, %v6217_v49  ;;  %6250 = vst.msk [vmem:[#allocation5 + $0xf8] sm:$0xff] %vm21_vm14, %v6218_v29  ;;  %v6440_v36 = vadd.f32 %v6403_v4, %v6312_v6  ;;  %v6658_v52 = vmax.f32 %v13152_v13, 0.0  ;;  %v6659_v21 = vmax.f32 %v13156_v19, 0.0 }
 0x4b1   :  { %v8725_v22 = vpop.eup %8724  ;;  %v6727_v26 = vsub.f32 0.0, %v6695_v25  ;;  %8742 = vlog2.f32 %v6346_v42  ;;  %v6507_v62 = vld [vmem:[#allocation5 + $0xe8] sm:$0xff]  ;;  %v6405_v30 = vmul.f32 0.6931472, %v8723_v23  ;;  %v6474_v23 = vld [vmem:[#allocation4 + $0xe0] sm:$0xff] }
 0x4b2   :  { %v8727_v55 = vpop.eup %8726  ;;  %v6563_v20 = vmul.f32 0.6931472, %v8725_v22  ;;  %8744 = vlog2.f32 %v6347_v17  ;;  %v6314_v17 = vld [vmem:[#allocation2 + $0xe0] sm:$0xff] }
 0x4b3   :  { %v8729_v59 = vpop.eup %8728  ;;  %v6867_v37 = vmul.f32 0.6931472, %v8727_v55  ;;  %v6784_v60 = vmul.f32 1.442695, %v6727_v26  ;;  %8746 = vlog2.f32 %v6506_v41  ;;  %v6348_v54 = vld [vmem:[#allocation3 + $0xf0] sm:$0xff]  ;;  %v6441_v10 = vadd.f32 %v6405_v30, %v6313_v12  ;;  %v6315_v26 = vld [vmem:[#allocation2 + $0xe8] sm:$0xff] }
 0x4b4   :  { %v8731_v34 = vpop.eup %8730  ;;  %v6869_v35 = vmul.f32 0.6931472, %v8729_v59  ;;  %v6600_v31 = vadd.f32 %v6563_v20, %v6472_v2  ;;  %8748 = vlog2.f32 %v6507_v62  ;;  %v6475_v62 = vld [vmem:[#allocation4 + $0xe8] sm:$0xff]  ;;  %v6316_v12 = vld [vmem:[#allocation2 + $0xf0] sm:$0xff] }
 0x4b5   :  { %v8733_v48 = vpop.eup %8732  ;;  %v6912_v44 = vadd.f32 %v6867_v37, %v6656_v16  ;;  %v6820_v15 = vadd.f32 1.0, %v8731_v34  ;;  %8750 = vpow2.f32 %v6784_v60  ;;  %v6349_v47 = vld [vmem:[#allocation3 + $0xf8] sm:$0xff]  ;;  %v6660_v60 = vmax.f32 %v13179_v40, 0.0 }
 0x4b6   :  { %v8735_v7 = vpop.eup %8734  ;;  %v6913_v51 = vadd.f32 %v6869_v35, %v6657_v63  ;;  %v13229_v32 = vadd.f32 %v6600_v31, %v6440_v36  ;;  %v6565_v39 = vmul.f32 0.6931472, %v8733_v48  ;;  %8752 = vlog2.f32 %v6348_v54 }
 0x4b7   :  { %6944 = vst.msk [vmem:[%s13311_s4 + $0x90] sm:$0xff] %vm21_vm14, %v6912_v44  ;;  %8754 = vlog2.f32 %v6820_v15  ;;  %v6821_v45 = vadd.f32 1.0, %v8735_v7  ;;  %v6508_v61 = vld [vmem:[#allocation5 + $0xf0] sm:$0xff]  ;;  %v6509_v24 = vld [vmem:[#allocation5 + $0xf8] sm:$0xff]  ;;  %v6661_v35 = vmax.f32 %v13191_v0, 0.0 }
 0x4b8   :  { %v8737_v53 = vpop.eup %8736  ;;  %6945 = vst.msk [vmem:[%s13311_s4 + $0x98] sm:$0xff] %vm21_vm14, %v6913_v51  ;;  %v6696_v11 = vand.u32 2147483647, %v13229_v32  ;;  %v6601_v33 = vadd.f32 %v6565_v39, %v6473_v5  ;;  %8756 = vlog2.f32 %v6349_v47  ;;  %v6476_v5 = vld [vmem:[#allocation4 + $0xf0] sm:$0xff] }
 0x4b9   :  { %v8739_v3 = vpop.eup %8738  ;;  %v6871_v43 = vmul.f32 0.6931472, %v8737_v53  ;;  %8758 = vlog2.f32 %v6821_v45 }
 0x4ba   :  { %v8741_v50 = vpop.eup %8740  ;;  %v6873_v46 = vmul.f32 0.6931472, %v8739_v3  ;;  %v6728_v1 = vsub.f32 0.0, %v6696_v11  ;;  %v13242_v9 = vadd.f32 %v6601_v33, %v6441_v10  ;;  %8760 = vlog2.f32 %v6508_v61  ;;  %v6317_v10 = vld [vmem:[#allocation2 + $0xf8] sm:$0xff] }
 0x4bb   :  { %v8743_v56 = vpop.eup %8742  ;;  %v6914_v58 = vadd.f32 %v6871_v43, %v6658_v52  ;;  %v6822_v18 = vadd.f32 1.0, %v8741_v50  ;;  %8762 = vlog2.f32 %v6509_v24  ;;  %v6477_v11 = vld [vmem:[#allocation4 + $0xf8] sm:$0xff]  ;;  %v6662_v33 = vmax.f32 %v13198_v38, 0.0 }
 0x4bc   :  { %v8745_v57 = vpop.eup %8744  ;;  %v6915_v28 = vadd.f32 %v6873_v46, %v6659_v21  ;;  %v6786_v14 = vmul.f32 1.442695, %v6728_v1  ;;  %v6697_v27 = vand.u32 2147483647, %v13242_v9  ;;  %v6407_v19 = vmul.f32 0.6931472, %v8743_v56 }
 0x4bd   :  { %v8747_v13 = vpop.eup %8746  ;;  %6946 = vst.msk [vmem:[%s13311_s4 + $0xa0] sm:$0xff] %vm21_vm14, %v6914_v58  ;;  %8764 = vlog2.f32 %v6822_v18  ;;  %v6409_v42 = vmul.f32 0.6931472, %v8745_v57 }
 0x4be   :  { %v8749_v49 = vpop.eup %8748  ;;  %6947 = vst.msk [vmem:[%s13311_s4 + $0xa8] sm:$0xff] %vm21_vm14, %v6915_v28  ;;  %8766 = vpow2.f32 %v6786_v14  ;;  %v6729_v29 = vsub.f32 0.0, %v6697_v27  ;;  %v6567_v25 = vmul.f32 0.6931472, %v8747_v13  ;;  %v6442_v16 = vadd.f32 %v6407_v19, %v6314_v17 }
 0x4bf   :  { %v8751_v4 = vpop.eup %8750  ;;  %v6569_v41 = vmul.f32 0.6931472, %v8749_v49  ;;  %v6443_v59 = vadd.f32 %v6409_v42, %v6315_v26  ;;  %v6663_v19 = vmax.f32 %v13211_v8, 0.0  ;;  %v6664_v8 = vmax.f32 %v13229_v32, 0.0 }
 0x4c0   :  { %v8753_v22 = vpop.eup %8752  ;;  %v6823_v55 = vadd.f32 1.0, %v8751_v4  ;;  %v6788_v6 = vmul.f32 1.442695, %v6729_v29  ;;  %v6602_v63 = vadd.f32 %v6567_v25, %v6474_v23 }
 0x4c1   :  { %v8755_v20 = vpop.eup %8754  ;;  %v6603_v2 = vadd.f32 %v6569_v41, %v6475_v62  ;;  %v6411_v31 = vmul.f32 0.6931472, %v8753_v22 }
 0x4c2   :  { %v8757_v37 = vpop.eup %8756  ;;  %v6875_v36 = vmul.f32 0.6931472, %v8755_v20  ;;  %8768 = vlog2.f32 %v6823_v55  ;;  %v13254_v54 = vadd.f32 %v6602_v63, %v6442_v16 }
 0x4c3   :  { %v8759_v34 = vpop.eup %8758  ;;  %8770 = vpow2.f32 %v6788_v6  ;;  %v13257_v30 = vadd.f32 %v6603_v2, %v6443_v59  ;;  %v6413_v7 = vmul.f32 0.6931472, %v8757_v37  ;;  %v6444_v3 = vadd.f32 %v6411_v31, %v6316_v12 }
 0x4c4   :  { %v8761_v48 = vpop.eup %8760  ;;  %v6916_v44 = vadd.f32 %v6875_v36, %v6660_v60  ;;  %v6877_v15 = vmul.f32 0.6931472, %v8759_v34  ;;  %v6698_v47 = vand.u32 2147483647, %v13254_v54  ;;  %v6665_v59 = vmax.f32 %v13242_v9, 0.0 }
 0x4c5   :  { %v8763_v51 = vpop.eup %8762  ;;  %v6699_v40 = vand.u32 2147483647, %v13257_v30  ;;  %v6571_v39 = vmul.f32 0.6931472, %v8761_v48  ;;  %v6445_v46 = vadd.f32 %v6413_v7, %v6317_v10  ;;  %v6667_v9 = vmax.f32 %v13257_v30, 0.0 }
 0x4c6   :  { %6948 = vst.msk [vmem:[%s13311_s4 + $0xb0] sm:$0xff] %vm21_vm14, %v6916_v44  ;;  %v6917_v0 = vadd.f32 %v6877_v15, %v6661_v35  ;;  %v6730_v45 = vsub.f32 0.0, %v6698_v47  ;;  %v6573_v61 = vmul.f32 0.6931472, %v8763_v51  ;;  %v6666_v35 = vmax.f32 %v13254_v54, 0.0 }
 0x4c7   :  { %v8765_v53 = vpop.eup %8764  ;;  %v6731_v24 = vsub.f32 0.0, %v6699_v40  ;;  %v6604_v52 = vadd.f32 %v6571_v39, %v6476_v5 }
 0x4c8   :  { %v8767_v43 = vpop.eup %8766  ;;  %6949 = vst.msk [vmem:[%s13311_s4 + $0xb8] sm:$0xff] %vm21_vm14, %v6917_v0  ;;  %v6879_v21 = vmul.f32 0.6931472, %v8765_v53  ;;  %v6790_v50 = vmul.f32 1.442695, %v6730_v45  ;;  %v6605_v1 = vadd.f32 %v6573_v61, %v6477_v11 }
 0x4c9   :  { %v6824_v56 = vadd.f32 1.0, %v8767_v43  ;;  %v6792_v58 = vmul.f32 1.442695, %v6731_v24  ;;  %v6636_v18 = vadd.f32 %v6604_v52, %v6444_v3 }
 0x4ca   :  { %v6918_v57 = vadd.f32 %v6879_v21, %v6662_v33  ;;  %8772 = vpow2.f32 %v6790_v50  ;;  %v6637_v28 = vadd.f32 %v6605_v1, %v6445_v46 }
 0x4cb   :  { %8774 = vlog2.f32 %v6824_v56  ;;  %v6700_v38 = vand.u32 2147483647, %v6636_v18  ;;  %v6668_v54 = vmax.f32 %v6636_v18, 0.0 }
 0x4cc   :  { %v8769_v14 = vpop.eup %8768  ;;  %6950 = vst.msk [vmem:[%s13311_s4 + $0xc0] sm:$0xff] %vm21_vm14, %v6918_v57  ;;  %8776 = vpow2.f32 %v6792_v58  ;;  %v6701_v27 = vand.u32 2147483647, %v6637_v28  ;;  %v6669_v39 = vmax.f32 %v6637_v28, 0.0 }
 0x4cd   :  { %v8771_v13 = vpop.eup %8770  ;;  %v6881_v42 = vmul.f32 0.6931472, %v8769_v14  ;;  %v6732_v49 = vsub.f32 0.0, %v6700_v38 }
 0x4ce   :  { %v6825_v29 = vadd.f32 1.0, %v8771_v13  ;;  %v6733_v25 = vsub.f32 0.0, %v6701_v27 }
 0x4cf   :  { %v6919_v4 = vadd.f32 %v6881_v42, %v6663_v19  ;;  %v6794_v17 = vmul.f32 1.442695, %v6732_v49 }
 0x4d0   :  { %8778 = vlog2.f32 %v6825_v29  ;;  %v6796_v23 = vmul.f32 1.442695, %v6733_v25 }
 0x4d1   :  { %6951 = vst.msk [vmem:[%s13311_s4 + $0xc8] sm:$0xff] %vm21_vm14, %v6919_v4  ;;  %8780 = vpow2.f32 %v6794_v17 }
 0x4d2   :  { %8782 = vpow2.f32 %v6796_v23 }
 0x4d4   :  { %v8773_v41 = vpop.eup %8772 }
 0x4d5   :  { %v8775_v22 = vpop.eup %8774  ;;  %v6826_v26 = vadd.f32 1.0, %v8773_v41 }
 0x4d6   :  { %v8777_v62 = vpop.eup %8776  ;;  %v6883_v55 = vmul.f32 0.6931472, %v8775_v22 }
 0x4d7   :  { %8784 = vlog2.f32 %v6826_v26  ;;  %v6827_v6 = vadd.f32 1.0, %v8777_v62 }
 0x4d8   :  { %v6920_v16 = vadd.f32 %v6883_v55, %v6664_v8 }
 0x4d9   :  { %8786 = vlog2.f32 %v6827_v6 }
 0x4da   :  { %v8779_v63 = vpop.eup %8778  ;;  %6952 = vst.msk [vmem:[%s13311_s4 + $0xd0] sm:$0xff] %vm21_vm14, %v6920_v16 }
 0x4db   :  { %v8781_v20 = vpop.eup %8780  ;;  %v6885_v2 = vmul.f32 0.6931472, %v8779_v63 }
 0x4dc   :  { %v8783_v37 = vpop.eup %8782  ;;  %v6828_v60 = vadd.f32 1.0, %v8781_v20 }
 0x4dd   :  { %v6921_v36 = vadd.f32 %v6885_v2, %v6665_v59  ;;  %v6829_v34 = vadd.f32 1.0, %v8783_v37 }
 0x4de   :  { %8788 = vlog2.f32 %v6828_v60 }
 0x4df   :  { %6953 = vst.msk [vmem:[%s13311_s4 + $0xd8] sm:$0xff] %vm21_vm14, %v6921_v36  ;;  %8790 = vlog2.f32 %v6829_v34 }
 0x4e1   :  { %v8785_v32 = vpop.eup %8784 }
 0x4e2   :  { %v6887_v31 = vmul.f32 0.6931472, %v8785_v32 }
 0x4e3   :  { %v8787_v48 = vpop.eup %8786 }
 0x4e4   :  { %v6922_v44 = vadd.f32 %v6887_v31, %v6666_v35  ;;  %v6889_v15 = vmul.f32 0.6931472, %v8787_v48 }
 0x4e6   :  { %6954 = vst.msk [vmem:[%s13311_s4 + $0xe0] sm:$0xff] %vm21_vm14, %v6922_v44  ;;  %v6923_v47 = vadd.f32 %v6889_v15, %v6667_v9 }
 0x4e8   :  { %v8789_v7 = vpop.eup %8788  ;;  %6955 = vst.msk [vmem:[%s13311_s4 + $0xe8] sm:$0xff] %vm21_vm14, %v6923_v47 }
 0x4e9   :  { %v8791_v51 = vpop.eup %8790  ;;  %v6891_v40 = vmul.f32 0.6931472, %v8789_v7 }
 0x4ea   :  { %v6893_v12 = vmul.f32 0.6931472, %v8791_v51 }
 0x4eb   :  { %v6924_v5 = vadd.f32 %v6891_v40, %v6668_v54 }
 0x4ec   :  { %v6925_v30 = vadd.f32 %v6893_v12, %v6669_v39 }
 0x4ed   :  { %6956 = vst.msk [vmem:[%s13311_s4 + $0xf0] sm:$0xff] %vm21_vm14, %v6924_v5 }
 0x4ee   :  { %6957 = vst.msk [vmem:[%s13311_s4 + $0xf8] sm:$0xff] %vm21_vm14, %v6925_v30 }

</bundles_post_ra>
